<compile_context>
chip_gen: v6e
topology: v6e:2x2x1
jax: 0.10.0
libtpu: 0.0.40
codegen_flags: <defaults>
</compile_context>

<pallas_src>
import functools
import math

import jax
import jax.numpy as jnp
from jax.experimental import pallas as pl
from jax.experimental.pallas import tpu as pltpu


def _fused_kernel(heads, dim_head,
                  x_ref,
                  ln1_g_ref, ln1_b_ref,
                  wqkv_ref, bqkv_ref,
                  wo_ref, bo_ref,
                  ln2_g_ref, ln2_b_ref,
                  w1_ref, b1_ref, w2_ref, b2_ref,
                  xo_ref, attn_ref):
    """One (batch-block, layer) grid step: full transformer block on resident x."""
    layer = pl.program_id(1)
    n_layers = pl.num_programs(1)
    last = layer == n_layers - 1
    eps = 1e-5
    f32 = jnp.float32
    bf16 = jnp.bfloat16

    # First layer for this batch block: seed the resident residual stream.
    @pl.when(layer == 0)
    def _():
        xo_ref[...] = x_ref[...]

    x = xo_ref[...]                                   # (Bt, N, dim) f32 residual
    Bt, N, dim = x.shape
    inner = heads * dim_head

    def layernorm(z, g, b):
        mu = jnp.mean(z, axis=-1, keepdims=True)
        var = jnp.mean((z - mu) ** 2, axis=-1, keepdims=True)
        return (z - mu) * jax.lax.rsqrt(var + eps) * g + b

    # ---------------- PreNorm + c_Attention ----------------
    y = layernorm(x, ln1_g_ref[layer], ln1_b_ref[layer])        # (Bt, N, dim) f32
    y2d = y.reshape(Bt * N, dim).astype(bf16)                    # merged M dim

    # Single dense QKV projection (1/sqrt(dim_head) folded into Wq/bq).
    qkv = jnp.dot(y2d, wqkv_ref[layer], preferred_element_type=f32)
    qkv = qkv + bqkv_ref[layer]                                  # (Bt*N, 3*inner) f32
    qkv = qkv.reshape(Bt, N, 3 * inner)

    out_heads = []
    for h in range(heads):
        lo = h * dim_head
        q_h = qkv[:, :, lo:lo + dim_head]                        # (Bt, N, dh) lane slice
        k_h = qkv[:, :, inner + lo:inner + lo + dim_head]
        v_h = qkv[:, :, 2 * inner + lo:2 * inner + lo + dim_head]

        dots = jnp.einsum('bne,bme->bnm', q_h.astype(bf16), k_h.astype(bf16),
                          preferred_element_type=f32)            # (Bt, N, N) f32
        m = jnp.max(dots, axis=-1, keepdims=True)
        p = jnp.exp(dots - m)                                    # unnormalized, f32
        s = jnp.sum(p, axis=-1, keepdims=True)
        inv = pl.reciprocal(s, approx=True)                      # EUP; ~1e-3 rel err, OK

        # P@V in bf16, scale by the per-row reciprocal afterwards (keeps the
        # (N,N) f32 normalized attn off the hot path).
        ov = jnp.einsum('bnm,bme->bne', p.astype(bf16), v_h.astype(bf16),
                        preferred_element_type=f32) * inv        # (Bt, N, dh) f32
        out_heads.append(ov.astype(bf16))

        # Only the last layer's attention is consumed -> only build/store it then.
        @pl.when(last)
        def _():
            attn_ref[:, h, :, :] = p * inv

    # to_out: lane-concat heads -> one full-depth matmul against natural Wo.
    out = jnp.concatenate(out_heads, axis=-1)                    # (Bt, N, inner) bf16
    proj = jnp.dot(out.reshape(Bt * N, inner), wo_ref[layer],
                   preferred_element_type=f32) + bo_ref[layer]   # (Bt*N, dim) f32
    x = x + proj.reshape(Bt, N, dim)                             # residual

    # ---------------- PreNorm + FeedForward ----------------
    y2 = layernorm(x, ln2_g_ref[layer], ln2_b_ref[layer])
    h1 = jnp.dot(y2.reshape(Bt * N, dim).astype(bf16), w1_ref[layer],
                 preferred_element_type=f32) + b1_ref[layer]     # (Bt*N, mlp) f32
    h1 = jax.nn.gelu(h1, approximate=True)                       # tanh GELU -> EUP
    z = jnp.dot(h1.astype(bf16), w2_ref[layer],
                preferred_element_type=f32) + b2_ref[layer]      # (Bt*N, dim) f32
    xo_ref[...] = x + z.reshape(Bt, N, dim)                      # residual


def c_transformer_forward(x, stacked_params, heads, dim_head, batch_block=2):
    """Full c_Transformer.forward in one pallas_call. x: (B, N, dim) f32."""
    B, N, dim = x.shape
    params = list(stacked_params)
    depth = params[0].shape[0]

    Bt = batch_block if (batch_block > 0 and B % batch_block == 0) else 1

    # Weights/biases: full stacked (depth, ...) array resident in VMEM with a
    # constant block index -> single HBM fetch per launch.
    def resident_spec(p):
        nd = p.ndim
        return pl.BlockSpec(p.shape, lambda b, l, _nd=nd: (0,) * _nd)

    in_specs = [pl.BlockSpec((Bt, N, dim), lambda b, l: (b, 0, 0))] + \
               [resident_spec(p) for p in params]
    out_specs = [pl.BlockSpec((Bt, N, dim), lambda b, l: (b, 0, 0)),
                 pl.BlockSpec((Bt, heads, N, N), lambda b, l: (b, 0, 0, 0))]
    out_shape = (jax.ShapeDtypeStruct((B, N, dim), jnp.float32),
                 jax.ShapeDtypeStruct((B, heads, N, N), jnp.float32))

    # VMEM budget from actual block sizes (+ headroom for temporaries) instead
    # of a blanket 48 MiB (important on v7x's 64 MiB / 32 MiB-scoped VMEM).
    weight_bytes = sum(int(p.size) * p.dtype.itemsize for p in params)
    vmem_bytes = (2 * weight_bytes                       # (possibly) double-buffered weights
                  + 4 * Bt * N * dim * 4                 # x in/out blocks
                  + 2 * Bt * heads * N * N * 4           # attn out block
                  + 8 * 1024 * 1024)                     # matmul/softmax temporaries
    vmem_bytes = min(max(vmem_bytes, 16 * 1024 * 1024), 100 * 1024 * 1024)

    kernel = functools.partial(_fused_kernel, heads, dim_head)
    return pl.pallas_call(
        kernel,
        grid=(B // Bt, depth),                 # depth MUST stay inner + arbitrary
        in_specs=in_specs,
        out_specs=out_specs,
        out_shape=out_shape,
        compiler_params=pltpu.CompilerParams(
            dimension_semantics=("parallel", "arbitrary"),
            vmem_limit_bytes=vmem_bytes),
    )(x, *params)


# ---------------- parameter init (deterministic, in-script) ----------------
def init_layer_params(key, dim, heads, dim_head, mlp_dim):
    """Per-layer params in natural (in, out) layout, f32 (mirrors the torch module)."""
    inner = heads * dim_head
    ks = jax.random.split(key, 8)
    s = 0.02

    def lin(k, fin, fout):
        return (jax.random.normal(k, (fin, fout), jnp.float32) * s,
                jnp.zeros((1, fout), jnp.float32))

    wq, bq = lin(ks[0], dim, inner)
    wk, bk = lin(ks[1], dim, inner)
    wv, bv = lin(ks[2], dim, inner)
    wo, bo = lin(ks[3], inner, dim)
    w1, b1 = lin(ks[4], dim, mlp_dim)
    w2, b2 = lin(ks[5], mlp_dim, dim)
    ln1_g = jnp.ones((1, dim), jnp.float32)
    ln1_b = jnp.zeros((1, dim), jnp.float32)
    ln2_g = jnp.ones((1, dim), jnp.float32)
    ln2_b = jnp.zeros((1, dim), jnp.float32)
    return (ln1_g, ln1_b, wq, bq, wk, bk, wv, bv, wo, bo,
            ln2_g, ln2_b, w1, b1, w2, b2)


def prepare_stacked_params(layers_params, heads, dim_head):
    """Stack over depth, fuse Wq/Wk/Wv into one (dim, 3*inner) weight (with the
    1/sqrt(dim_head) scale folded into the q part), keep Wo/W1/W2 in natural
    layout, cast matmul weights to bf16 (biases / LN params stay f32)."""
    scale = 1.0 / math.sqrt(dim_head)
    bf16 = jnp.bfloat16

    def stack(i):
        return jnp.stack([p[i] for p in layers_params], axis=0)

    ln1_g, ln1_b = stack(0), stack(1)                 # (depth, 1, dim)
    wq, bq = stack(2), stack(3)                       # (depth, dim, inner), (depth, 1, inner)
    wk, bk = stack(4), stack(5)
    wv, bv = stack(6), stack(7)
    wo, bo = stack(8), stack(9)                       # (depth, inner, dim), (depth, 1, dim)
    ln2_g, ln2_b = stack(10), stack(11)
    w1, b1 = stack(12), stack(13)                     # (depth, dim, mlp_dim)
    w2, b2 = stack(14), stack(15)                     # (depth, mlp_dim, dim)

    wqkv = jnp.concatenate([wq * scale, wk, wv], axis=-1).astype(bf16)  # (depth, dim, 3*inner)
    bqkv = jnp.concatenate([bq * scale, bk, bv], axis=-1)               # (depth, 1, 3*inner) f32

    return (ln1_g, ln1_b,
            wqkv, bqkv,
            wo.astype(bf16), bo,
            ln2_g, ln2_b,
            w1.astype(bf16), b1, w2.astype(bf16), b2)


# ---------------- pure-JAX f32 reference for verification ----------------
def reference_layer(x, p, heads, dim_head):
    (ln1_g, ln1_b, wq, bq, wk, bk, wv, bv, wo, bo,
     ln2_g, ln2_b, w1, b1, w2, b2) = p

    def ln(z, g, b):
        mu = jnp.mean(z, -1, keepdims=True)
        var = jnp.mean((z - mu) ** 2, -1, keepdims=True)
        return (z - mu) / jnp.sqrt(var + 1e-5) * g[0] + b[0]

    B, N, dim = x.shape
    y = ln(x, ln1_g, ln1_b)
    q = (y @ wq + bq[0]).reshape(B, N, heads, dim_head).transpose(0, 2, 1, 3)
    k = (y @ wk + bk[0]).reshape(B, N, heads, dim_head).transpose(0, 2, 1, 3)
    v = (y @ wv + bv[0]).reshape(B, N, heads, dim_head).transpose(0, 2, 1, 3)
    dots = jnp.einsum('bhid,bhjd->bhij', q, k) / math.sqrt(dim_head)
    attn = jax.nn.softmax(dots, -1)
    out = jnp.einsum('bhij,bhjd->bhid', attn, v).transpose(0, 2, 1, 3).reshape(B, N, -1)
    x = x + (out @ wo + bo[0])
    y2 = ln(x, ln2_g, ln2_b)
    hdn = jax.nn.gelu(y2 @ w1 + b1[0], approximate=False)   # exact erf (torch nn.GELU)
    x = x + (hdn @ w2 + b2[0])
    return x, attn


if __name__ == "__main__":
    # Small but TPU-friendly (lane-dense) shapes.
    B, N = 4, 128
    dim, depth, heads, dim_head, mlp_dim = 128, 2, 4, 64, 256

    key = jax.random.PRNGKey(0)
    kx, kp = jax.random.split(key)
    x = jax.random.normal(kx, (B, N, dim), jnp.float32)

    layer_keys = jax.random.split(kp, depth)
    layers_params = [init_layer_params(k, dim, heads, dim_head, mlp_dim)
                     for k in layer_keys]
    stacked = prepare_stacked_params(layers_params, heads, dim_head)

    out_x, out_attn = c_transformer_forward(x, stacked, heads, dim_head, batch_block=2)
    out_x = jax.block_until_ready(out_x)
    out_attn = jax.block_until_ready(out_attn)

    # Verify against the pure-JAX f32 reference (bf16 MXU inputs, tanh GELU,
    # approx reciprocal -> loosened tolerance).
    xr = x
    attn_r = None
    for p in layers_params:
        xr, attn_r = reference_layer(xr, p, heads, dim_head)
    assert jnp.allclose(out_x, xr, atol=2e-2, rtol=2e-2), "x mismatch"
    assert jnp.allclose(out_attn, attn_r, atol=2e-2, rtol=2e-2), "attn mismatch"

    print("KERNEL_OK")
</pallas_src>

<mosaic_0001>
module attributes {stable_mosaic.version = 11 : i64} {
  func.func @_fused_kernel(%arg0: i32, %arg1: i32, %arg2: memref<2x128x128xf32, #tpu.memory_space<vmem>>, %arg3: memref<2x1x128xf32, #tpu.memory_space<vmem>>, %arg4: memref<2x1x128xf32, #tpu.memory_space<vmem>>, %arg5: memref<2x128x768xbf16, #tpu.memory_space<vmem>>, %arg6: memref<2x1x768xf32, #tpu.memory_space<vmem>>, %arg7: memref<2x256x128xbf16, #tpu.memory_space<vmem>>, %arg8: memref<2x1x128xf32, #tpu.memory_space<vmem>>, %arg9: memref<2x1x128xf32, #tpu.memory_space<vmem>>, %arg10: memref<2x1x128xf32, #tpu.memory_space<vmem>>, %arg11: memref<2x128x256xbf16, #tpu.memory_space<vmem>>, %arg12: memref<2x1x256xf32, #tpu.memory_space<vmem>>, %arg13: memref<2x256x128xbf16, #tpu.memory_space<vmem>>, %arg14: memref<2x1x128xf32, #tpu.memory_space<vmem>>, %arg15: memref<2x128x128xf32, #tpu.memory_space<vmem>>, %arg16: memref<2x4x128x128xf32, #tpu.memory_space<vmem>>) attributes {dimension_semantics = [#tpu.dimension_semantics<parallel>, #tpu.dimension_semantics<arbitrary>], iteration_bounds = array<i64: 2, 2>, scalar_prefetch = 0 : i64, scratch_operands = 0 : i64, tpu.core_type = #tpu.core_type<tc>, window_params = [{transform_indices = @transform_0, window_bounds = array<i64: 2, 128, 128>}, {pipeline_mode = #tpu.pipeline_mode<synchronous>, transform_indices = @transform_1, window_bounds = array<i64: 2, 1, 128>}, {pipeline_mode = #tpu.pipeline_mode<synchronous>, transform_indices = @transform_2, window_bounds = array<i64: 2, 1, 128>}, {pipeline_mode = #tpu.pipeline_mode<synchronous>, transform_indices = @transform_3, window_bounds = array<i64: 2, 128, 768>}, {pipeline_mode = #tpu.pipeline_mode<synchronous>, transform_indices = @transform_4, window_bounds = array<i64: 2, 1, 768>}, {pipeline_mode = #tpu.pipeline_mode<synchronous>, transform_indices = @transform_5, window_bounds = array<i64: 2, 256, 128>}, {pipeline_mode = #tpu.pipeline_mode<synchronous>, transform_indices = @transform_6, window_bounds = array<i64: 2, 1, 128>}, {pipeline_mode = #tpu.pipeline_mode<synchronous>, transform_indices = @transform_7, window_bounds = array<i64: 2, 1, 128>}, {pipeline_mode = #tpu.pipeline_mode<synchronous>, transform_indices = @transform_8, window_bounds = array<i64: 2, 1, 128>}, {pipeline_mode = #tpu.pipeline_mode<synchronous>, transform_indices = @transform_9, window_bounds = array<i64: 2, 128, 256>}, {pipeline_mode = #tpu.pipeline_mode<synchronous>, transform_indices = @transform_10, window_bounds = array<i64: 2, 1, 256>}, {pipeline_mode = #tpu.pipeline_mode<synchronous>, transform_indices = @transform_11, window_bounds = array<i64: 2, 256, 128>}, {pipeline_mode = #tpu.pipeline_mode<synchronous>, transform_indices = @transform_12, window_bounds = array<i64: 2, 1, 128>}, {transform_indices = @transform_13, window_bounds = array<i64: 2, 128, 128>}, {transform_indices = @transform_14, window_bounds = array<i64: 2, 4, 128, 128>}]} {
    %c1_i32 = arith.constant 1 : i32
    %0 = arith.cmpi eq, %arg1, %c1_i32 : i32
    %c0_i32 = arith.constant 0 : i32
    %1 = arith.cmpi eq, %arg1, %c0_i32 : i32
    %2 = arith.extui %1 : i1 to i32
    %c0_i32_0 = arith.constant 0 : i32
    %3 = arith.cmpi ne, %2, %c0_i32_0 : i32
    scf.if %3 {
      %c0_67 = arith.constant 0 : index
      %c0_68 = arith.constant 0 : index
      %c0_69 = arith.constant 0 : index
      %215 = vector.load %arg2[%c0_67, %c0_68, %c0_69] : memref<2x128x128xf32, #tpu.memory_space<vmem>>, vector<2x128x128xf32>
      %c0_70 = arith.constant 0 : index
      %c0_71 = arith.constant 0 : index
      %c0_72 = arith.constant 0 : index
      %216 = vector.load %arg15[%c0_70, %c0_71, %c0_72] : memref<2x128x128xf32, #tpu.memory_space<vmem>>, vector<2x128x128xf32>
      tpu.vector_store %arg15[%c0_70, %c0_71, %c0_72], %215 {strides = array<i32>} : memref<2x128x128xf32, #tpu.memory_space<vmem>>, vector<2x128x128xf32>,
    } else {
    }
    %c0 = arith.constant 0 : index
    %c0_1 = arith.constant 0 : index
    %c0_2 = arith.constant 0 : index
    %4 = vector.load %arg15[%c0, %c0_1, %c0_2] : memref<2x128x128xf32, #tpu.memory_space<vmem>>, vector<2x128x128xf32>
    %5 = arith.index_cast %arg1 : i32 to index
    %c0_3 = arith.constant 0 : index
    %c0_4 = arith.constant 0 : index
    %6 = vector.load %arg3[%5, %c0_3, %c0_4] : memref<2x1x128xf32, #tpu.memory_space<vmem>>, vector<1x1x128xf32>
    %7 = vector.shape_cast %6 : vector<1x1x128xf32> to vector<1x128xf32>
    %8 = arith.index_cast %arg1 : i32 to index
    %c0_5 = arith.constant 0 : index
    %c0_6 = arith.constant 0 : index
    %9 = vector.load %arg4[%8, %c0_5, %c0_6] : memref<2x1x128xf32, #tpu.memory_space<vmem>>, vector<1x1x128xf32>
    %10 = vector.shape_cast %9 : vector<1x1x128xf32> to vector<1x128xf32>
    %cst = arith.constant dense<0.000000e+00> : vector<2x128xf32>
    %11 = vector.multi_reduction <add>, %4, %cst [2] : vector<2x128x128xf32> to vector<2x128xf32>
    %12 = vector.shape_cast %11 : vector<2x128xf32> to vector<2x128x1xf32>
    %cst_7 = arith.constant 1.280000e+02 : f32
    %13 = vector.broadcast %cst_7 : f32 to vector<2x128x1xf32>
    %14 = arith.divf %12, %13 : vector<2x128x1xf32>
    %15 = vector.broadcast %14 : vector<2x128x1xf32> to vector<2x128x128xf32>
    %16 = arith.subf %4, %15 : vector<2x128x128xf32>
    %17 = arith.mulf %16, %16 : vector<2x128x128xf32>
    %cst_8 = arith.constant dense<0.000000e+00> : vector<2x128xf32>
    %18 = vector.multi_reduction <add>, %17, %cst_8 [2] : vector<2x128x128xf32> to vector<2x128xf32>
    %19 = vector.shape_cast %18 : vector<2x128xf32> to vector<2x128x1xf32>
    %cst_9 = arith.constant 1.280000e+02 : f32
    %20 = vector.broadcast %cst_9 : f32 to vector<2x128x1xf32>
    %21 = arith.divf %19, %20 : vector<2x128x1xf32>
    %22 = vector.broadcast %14 : vector<2x128x1xf32> to vector<2x128x128xf32>
    %23 = arith.subf %4, %22 : vector<2x128x128xf32>
    %cst_10 = arith.constant 9.99999974E-6 : f32
    %24 = vector.broadcast %cst_10 : f32 to vector<2x128x1xf32>
    %25 = arith.addf %21, %24 : vector<2x128x1xf32>
    %26 = math.rsqrt %25 : vector<2x128x1xf32>
    %27 = vector.broadcast %26 : vector<2x128x1xf32> to vector<2x128x128xf32>
    %28 = arith.mulf %23, %27 : vector<2x128x128xf32>
    %29 = vector.shape_cast %7 : vector<1x128xf32> to vector<1x1x128xf32>
    %30 = vector.broadcast %29 : vector<1x1x128xf32> to vector<2x128x128xf32>
    %31 = arith.mulf %28, %30 : vector<2x128x128xf32>
    %32 = vector.shape_cast %10 : vector<1x128xf32> to vector<1x1x128xf32>
    %33 = vector.broadcast %32 : vector<1x1x128xf32> to vector<2x128x128xf32>
    %34 = arith.addf %31, %33 : vector<2x128x128xf32>
    %35 = vector.shape_cast %34 : vector<2x128x128xf32> to vector<256x128xf32>
    %36 = arith.truncf %35 : vector<256x128xf32> to vector<256x128xbf16>
    %37 = arith.index_cast %arg1 : i32 to index
    %c0_11 = arith.constant 0 : index
    %c0_12 = arith.constant 0 : index
    %38 = vector.load %arg5[%37, %c0_11, %c0_12] : memref<2x128x768xbf16, #tpu.memory_space<vmem>>, vector<1x128x768xbf16>
    %39 = vector.shape_cast %38 : vector<1x128x768xbf16> to vector<128x768xbf16>
    %cst_13 = arith.constant dense<0.000000e+00> : vector<256x768xf32>
    %40 = tpu.matmul %36, %39, %cst_13 {dimension_numbers = #tpu.dot_dimension_numbers<[1], [0], [0], [1], [0, 0, 1, 1], [], []>} : vector<256x128xbf16>, vector<128x768xbf16>, vector<256x768xf32> -> vector<256x768xf32>
    %41 = arith.index_cast %arg1 : i32 to index
    %c0_14 = arith.constant 0 : index
    %c0_15 = arith.constant 0 : index
    %42 = vector.load %arg6[%41, %c0_14, %c0_15] : memref<2x1x768xf32, #tpu.memory_space<vmem>>, vector<1x1x768xf32>
    %43 = vector.shape_cast %42 : vector<1x1x768xf32> to vector<1x768xf32>
    %44 = vector.broadcast %43 : vector<1x768xf32> to vector<256x768xf32>
    %45 = arith.addf %40, %44 : vector<256x768xf32>
    %46 = vector.shape_cast %45 : vector<256x768xf32> to vector<2x128x768xf32>
    %47 = vector.extract_strided_slice %46 {offsets = [0, 0, 0], sizes = [2, 128, 64], strides = [1, 1, 1]} : vector<2x128x768xf32> to vector<2x128x64xf32>
    %48 = vector.extract_strided_slice %46 {offsets = [0, 0, 256], sizes = [2, 128, 64], strides = [1, 1, 1]} : vector<2x128x768xf32> to vector<2x128x64xf32>
    %49 = vector.extract_strided_slice %46 {offsets = [0, 0, 512], sizes = [2, 128, 64], strides = [1, 1, 1]} : vector<2x128x768xf32> to vector<2x128x64xf32>
    %50 = arith.truncf %47 : vector<2x128x64xf32> to vector<2x128x64xbf16>
    %51 = arith.truncf %48 : vector<2x128x64xf32> to vector<2x128x64xbf16>
    "tpu.trace_start"() <{level = 10 : i32, message = "bne,bme->bnm"}> : () -> ()
    %cst_16 = arith.constant dense<0.000000e+00> : vector<2x128x128xf32>
    %52 = tpu.matmul %50, %51, %cst_16 {dimension_numbers = #tpu.dot_dimension_numbers<[2], [2], [1], [1], [0, 0, 0, 1, 1, 1], [0], [0]>} : vector<2x128x64xbf16>, vector<2x128x64xbf16>, vector<2x128x128xf32> -> vector<2x128x128xf32>
    "tpu.trace_stop"() : () -> ()
    %cst_17 = arith.constant dense<0xFF800000> : vector<2x128xf32>
    %53 = vector.multi_reduction <maximumf>, %52, %cst_17 [2] : vector<2x128x128xf32> to vector<2x128xf32>
    %54 = vector.shape_cast %53 : vector<2x128xf32> to vector<2x128x1xf32>
    %55 = vector.broadcast %54 : vector<2x128x1xf32> to vector<2x128x128xf32>
    %56 = arith.subf %52, %55 : vector<2x128x128xf32>
    %57 = math.exp %56 : vector<2x128x128xf32>
    %cst_18 = arith.constant dense<0.000000e+00> : vector<2x128xf32>
    %58 = vector.multi_reduction <add>, %57, %cst_18 [2] : vector<2x128x128xf32> to vector<2x128xf32>
    %59 = vector.shape_cast %58 : vector<2x128xf32> to vector<2x128x1xf32>
    %60 = tpu.reciprocal %59 {approx = true} : vector<2x128x1xf32> -> vector<2x128x1xf32>
    %61 = arith.truncf %57 : vector<2x128x128xf32> to vector<2x128x128xbf16>
    %62 = arith.truncf %49 : vector<2x128x64xf32> to vector<2x128x64xbf16>
    "tpu.trace_start"() <{level = 10 : i32, message = "bnm,bme->bne"}> : () -> ()
    %cst_19 = arith.constant dense<0.000000e+00> : vector<2x128x64xf32>
    %63 = tpu.matmul %61, %62, %cst_19 {dimension_numbers = #tpu.dot_dimension_numbers<[2], [1], [1], [2], [0, 0, 0, 1, 1, 2], [0], [0]>} : vector<2x128x128xbf16>, vector<2x128x64xbf16>, vector<2x128x64xf32> -> vector<2x128x64xf32>
    "tpu.trace_stop"() : () -> ()
    %64 = vector.broadcast %60 : vector<2x128x1xf32> to vector<2x128x64xf32>
    %65 = arith.mulf %63, %64 : vector<2x128x64xf32>
    %66 = arith.truncf %65 : vector<2x128x64xf32> to vector<2x128x64xbf16>
    %67 = arith.extui %0 : i1 to i32
    %c0_i32_20 = arith.constant 0 : i32
    %68 = arith.cmpi ne, %67, %c0_i32_20 : i32
    scf.if %68 {
      %215 = vector.broadcast %60 : vector<2x128x1xf32> to vector<2x128x128xf32>
      %216 = arith.mulf %57, %215 : vector<2x128x128xf32>
      %c0_67 = arith.constant 0 : index
      %c0_68 = arith.constant 0 : index
      %c0_69 = arith.constant 0 : index
      %c0_70 = arith.constant 0 : index
      %217 = vector.load %arg16[%c0_67, %c0_68, %c0_69, %c0_70] : memref<2x4x128x128xf32, #tpu.memory_space<vmem>>, vector<2x1x128x128xf32>
      %218 = vector.shape_cast %217 : vector<2x1x128x128xf32> to vector<2x128x128xf32>
      %219 = vector.shape_cast %216 : vector<2x128x128xf32> to vector<2x1x128x128xf32>
      tpu.vector_store %arg16[%c0_67, %c0_68, %c0_69, %c0_70], %219 {strides = array<i32>} : memref<2x4x128x128xf32, #tpu.memory_space<vmem>>, vector<2x1x128x128xf32>,
    } else {
    }
    %69 = vector.extract_strided_slice %46 {offsets = [0, 0, 64], sizes = [2, 128, 64], strides = [1, 1, 1]} : vector<2x128x768xf32> to vector<2x128x64xf32>
    %70 = vector.extract_strided_slice %46 {offsets = [0, 0, 320], sizes = [2, 128, 64], strides = [1, 1, 1]} : vector<2x128x768xf32> to vector<2x128x64xf32>
    %71 = vector.extract_strided_slice %46 {offsets = [0, 0, 576], sizes = [2, 128, 64], strides = [1, 1, 1]} : vector<2x128x768xf32> to vector<2x128x64xf32>
    %72 = arith.truncf %69 : vector<2x128x64xf32> to vector<2x128x64xbf16>
    %73 = arith.truncf %70 : vector<2x128x64xf32> to vector<2x128x64xbf16>
    "tpu.trace_start"() <{level = 10 : i32, message = "bne,bme->bnm"}> : () -> ()
    %cst_21 = arith.constant dense<0.000000e+00> : vector<2x128x128xf32>
    %74 = tpu.matmul %72, %73, %cst_21 {dimension_numbers = #tpu.dot_dimension_numbers<[2], [2], [1], [1], [0, 0, 0, 1, 1, 1], [0], [0]>} : vector<2x128x64xbf16>, vector<2x128x64xbf16>, vector<2x128x128xf32> -> vector<2x128x128xf32>
    "tpu.trace_stop"() : () -> ()
    %cst_22 = arith.constant dense<0xFF800000> : vector<2x128xf32>
    %75 = vector.multi_reduction <maximumf>, %74, %cst_22 [2] : vector<2x128x128xf32> to vector<2x128xf32>
    %76 = vector.shape_cast %75 : vector<2x128xf32> to vector<2x128x1xf32>
    %77 = vector.broadcast %76 : vector<2x128x1xf32> to vector<2x128x128xf32>
    %78 = arith.subf %74, %77 : vector<2x128x128xf32>
    %79 = math.exp %78 : vector<2x128x128xf32>
    %cst_23 = arith.constant dense<0.000000e+00> : vector<2x128xf32>
    %80 = vector.multi_reduction <add>, %79, %cst_23 [2] : vector<2x128x128xf32> to vector<2x128xf32>
    %81 = vector.shape_cast %80 : vector<2x128xf32> to vector<2x128x1xf32>
    %82 = tpu.reciprocal %81 {approx = true} : vector<2x128x1xf32> -> vector<2x128x1xf32>
    %83 = arith.truncf %79 : vector<2x128x128xf32> to vector<2x128x128xbf16>
    %84 = arith.truncf %71 : vector<2x128x64xf32> to vector<2x128x64xbf16>
    "tpu.trace_start"() <{level = 10 : i32, message = "bnm,bme->bne"}> : () -> ()
    %cst_24 = arith.constant dense<0.000000e+00> : vector<2x128x64xf32>
    %85 = tpu.matmul %83, %84, %cst_24 {dimension_numbers = #tpu.dot_dimension_numbers<[2], [1], [1], [2], [0, 0, 0, 1, 1, 2], [0], [0]>} : vector<2x128x128xbf16>, vector<2x128x64xbf16>, vector<2x128x64xf32> -> vector<2x128x64xf32>
    "tpu.trace_stop"() : () -> ()
    %86 = vector.broadcast %82 : vector<2x128x1xf32> to vector<2x128x64xf32>
    %87 = arith.mulf %85, %86 : vector<2x128x64xf32>
    %88 = arith.truncf %87 : vector<2x128x64xf32> to vector<2x128x64xbf16>
    %89 = arith.extui %0 : i1 to i32
    %c0_i32_25 = arith.constant 0 : i32
    %90 = arith.cmpi ne, %89, %c0_i32_25 : i32
    scf.if %90 {
      %215 = vector.broadcast %82 : vector<2x128x1xf32> to vector<2x128x128xf32>
      %216 = arith.mulf %79, %215 : vector<2x128x128xf32>
      %c0_67 = arith.constant 0 : index
      %c1 = arith.constant 1 : index
      %c0_68 = arith.constant 0 : index
      %c0_69 = arith.constant 0 : index
      %217 = vector.load %arg16[%c0_67, %c1, %c0_68, %c0_69] : memref<2x4x128x128xf32, #tpu.memory_space<vmem>>, vector<2x1x128x128xf32>
      %218 = vector.shape_cast %217 : vector<2x1x128x128xf32> to vector<2x128x128xf32>
      %219 = vector.shape_cast %216 : vector<2x128x128xf32> to vector<2x1x128x128xf32>
      tpu.vector_store %arg16[%c0_67, %c1, %c0_68, %c0_69], %219 {strides = array<i32>} : memref<2x4x128x128xf32, #tpu.memory_space<vmem>>, vector<2x1x128x128xf32>,
    } else {
    }
    %91 = vector.extract_strided_slice %46 {offsets = [0, 0, 128], sizes = [2, 128, 64], strides = [1, 1, 1]} : vector<2x128x768xf32> to vector<2x128x64xf32>
    %92 = vector.extract_strided_slice %46 {offsets = [0, 0, 384], sizes = [2, 128, 64], strides = [1, 1, 1]} : vector<2x128x768xf32> to vector<2x128x64xf32>
    %93 = vector.extract_strided_slice %46 {offsets = [0, 0, 640], sizes = [2, 128, 64], strides = [1, 1, 1]} : vector<2x128x768xf32> to vector<2x128x64xf32>
    %94 = arith.truncf %91 : vector<2x128x64xf32> to vector<2x128x64xbf16>
    %95 = arith.truncf %92 : vector<2x128x64xf32> to vector<2x128x64xbf16>
    "tpu.trace_start"() <{level = 10 : i32, message = "bne,bme->bnm"}> : () -> ()
    %cst_26 = arith.constant dense<0.000000e+00> : vector<2x128x128xf32>
    %96 = tpu.matmul %94, %95, %cst_26 {dimension_numbers = #tpu.dot_dimension_numbers<[2], [2], [1], [1], [0, 0, 0, 1, 1, 1], [0], [0]>} : vector<2x128x64xbf16>, vector<2x128x64xbf16>, vector<2x128x128xf32> -> vector<2x128x128xf32>
    "tpu.trace_stop"() : () -> ()
    %cst_27 = arith.constant dense<0xFF800000> : vector<2x128xf32>
    %97 = vector.multi_reduction <maximumf>, %96, %cst_27 [2] : vector<2x128x128xf32> to vector<2x128xf32>
    %98 = vector.shape_cast %97 : vector<2x128xf32> to vector<2x128x1xf32>
    %99 = vector.broadcast %98 : vector<2x128x1xf32> to vector<2x128x128xf32>
    %100 = arith.subf %96, %99 : vector<2x128x128xf32>
    %101 = math.exp %100 : vector<2x128x128xf32>
    %cst_28 = arith.constant dense<0.000000e+00> : vector<2x128xf32>
    %102 = vector.multi_reduction <add>, %101, %cst_28 [2] : vector<2x128x128xf32> to vector<2x128xf32>
    %103 = vector.shape_cast %102 : vector<2x128xf32> to vector<2x128x1xf32>
    %104 = tpu.reciprocal %103 {approx = true} : vector<2x128x1xf32> -> vector<2x128x1xf32>
    %105 = arith.truncf %101 : vector<2x128x128xf32> to vector<2x128x128xbf16>
    %106 = arith.truncf %93 : vector<2x128x64xf32> to vector<2x128x64xbf16>
    "tpu.trace_start"() <{level = 10 : i32, message = "bnm,bme->bne"}> : () -> ()
    %cst_29 = arith.constant dense<0.000000e+00> : vector<2x128x64xf32>
    %107 = tpu.matmul %105, %106, %cst_29 {dimension_numbers = #tpu.dot_dimension_numbers<[2], [1], [1], [2], [0, 0, 0, 1, 1, 2], [0], [0]>} : vector<2x128x128xbf16>, vector<2x128x64xbf16>, vector<2x128x64xf32> -> vector<2x128x64xf32>
    "tpu.trace_stop"() : () -> ()
    %108 = vector.broadcast %104 : vector<2x128x1xf32> to vector<2x128x64xf32>
    %109 = arith.mulf %107, %108 : vector<2x128x64xf32>
    %110 = arith.truncf %109 : vector<2x128x64xf32> to vector<2x128x64xbf16>
    %111 = arith.extui %0 : i1 to i32
    %c0_i32_30 = arith.constant 0 : i32
    %112 = arith.cmpi ne, %111, %c0_i32_30 : i32
    scf.if %112 {
      %215 = vector.broadcast %104 : vector<2x128x1xf32> to vector<2x128x128xf32>
      %216 = arith.mulf %101, %215 : vector<2x128x128xf32>
      %c0_67 = arith.constant 0 : index
      %c2 = arith.constant 2 : index
      %c0_68 = arith.constant 0 : index
      %c0_69 = arith.constant 0 : index
      %217 = vector.load %arg16[%c0_67, %c2, %c0_68, %c0_69] : memref<2x4x128x128xf32, #tpu.memory_space<vmem>>, vector<2x1x128x128xf32>
      %218 = vector.shape_cast %217 : vector<2x1x128x128xf32> to vector<2x128x128xf32>
      %219 = vector.shape_cast %216 : vector<2x128x128xf32> to vector<2x1x128x128xf32>
      tpu.vector_store %arg16[%c0_67, %c2, %c0_68, %c0_69], %219 {strides = array<i32>} : memref<2x4x128x128xf32, #tpu.memory_space<vmem>>, vector<2x1x128x128xf32>,
    } else {
    }
    %113 = vector.extract_strided_slice %46 {offsets = [0, 0, 192], sizes = [2, 128, 64], strides = [1, 1, 1]} : vector<2x128x768xf32> to vector<2x128x64xf32>
    %114 = vector.extract_strided_slice %46 {offsets = [0, 0, 448], sizes = [2, 128, 64], strides = [1, 1, 1]} : vector<2x128x768xf32> to vector<2x128x64xf32>
    %115 = vector.extract_strided_slice %46 {offsets = [0, 0, 704], sizes = [2, 128, 64], strides = [1, 1, 1]} : vector<2x128x768xf32> to vector<2x128x64xf32>
    %116 = arith.truncf %113 : vector<2x128x64xf32> to vector<2x128x64xbf16>
    %117 = arith.truncf %114 : vector<2x128x64xf32> to vector<2x128x64xbf16>
    "tpu.trace_start"() <{level = 10 : i32, message = "bne,bme->bnm"}> : () -> ()
    %cst_31 = arith.constant dense<0.000000e+00> : vector<2x128x128xf32>
    %118 = tpu.matmul %116, %117, %cst_31 {dimension_numbers = #tpu.dot_dimension_numbers<[2], [2], [1], [1], [0, 0, 0, 1, 1, 1], [0], [0]>} : vector<2x128x64xbf16>, vector<2x128x64xbf16>, vector<2x128x128xf32> -> vector<2x128x128xf32>
    "tpu.trace_stop"() : () -> ()
    %cst_32 = arith.constant dense<0xFF800000> : vector<2x128xf32>
    %119 = vector.multi_reduction <maximumf>, %118, %cst_32 [2] : vector<2x128x128xf32> to vector<2x128xf32>
    %120 = vector.shape_cast %119 : vector<2x128xf32> to vector<2x128x1xf32>
    %121 = vector.broadcast %120 : vector<2x128x1xf32> to vector<2x128x128xf32>
    %122 = arith.subf %118, %121 : vector<2x128x128xf32>
    %123 = math.exp %122 : vector<2x128x128xf32>
    %cst_33 = arith.constant dense<0.000000e+00> : vector<2x128xf32>
    %124 = vector.multi_reduction <add>, %123, %cst_33 [2] : vector<2x128x128xf32> to vector<2x128xf32>
    %125 = vector.shape_cast %124 : vector<2x128xf32> to vector<2x128x1xf32>
    %126 = tpu.reciprocal %125 {approx = true} : vector<2x128x1xf32> -> vector<2x128x1xf32>
    %127 = arith.truncf %123 : vector<2x128x128xf32> to vector<2x128x128xbf16>
    %128 = arith.truncf %115 : vector<2x128x64xf32> to vector<2x128x64xbf16>
    "tpu.trace_start"() <{level = 10 : i32, message = "bnm,bme->bne"}> : () -> ()
    %cst_34 = arith.constant dense<0.000000e+00> : vector<2x128x64xf32>
    %129 = tpu.matmul %127, %128, %cst_34 {dimension_numbers = #tpu.dot_dimension_numbers<[2], [1], [1], [2], [0, 0, 0, 1, 1, 2], [0], [0]>} : vector<2x128x128xbf16>, vector<2x128x64xbf16>, vector<2x128x64xf32> -> vector<2x128x64xf32>
    "tpu.trace_stop"() : () -> ()
    %130 = vector.broadcast %126 : vector<2x128x1xf32> to vector<2x128x64xf32>
    %131 = arith.mulf %129, %130 : vector<2x128x64xf32>
    %132 = arith.truncf %131 : vector<2x128x64xf32> to vector<2x128x64xbf16>
    %133 = arith.extui %0 : i1 to i32
    %c0_i32_35 = arith.constant 0 : i32
    %134 = arith.cmpi ne, %133, %c0_i32_35 : i32
    scf.if %134 {
      %215 = vector.broadcast %126 : vector<2x128x1xf32> to vector<2x128x128xf32>
      %216 = arith.mulf %123, %215 : vector<2x128x128xf32>
      %c0_67 = arith.constant 0 : index
      %c3 = arith.constant 3 : index
      %c0_68 = arith.constant 0 : index
      %c0_69 = arith.constant 0 : index
      %217 = vector.load %arg16[%c0_67, %c3, %c0_68, %c0_69] : memref<2x4x128x128xf32, #tpu.memory_space<vmem>>, vector<2x1x128x128xf32>
      %218 = vector.shape_cast %217 : vector<2x1x128x128xf32> to vector<2x128x128xf32>
      %219 = vector.shape_cast %216 : vector<2x128x128xf32> to vector<2x1x128x128xf32>
      tpu.vector_store %arg16[%c0_67, %c3, %c0_68, %c0_69], %219 {strides = array<i32>} : memref<2x4x128x128xf32, #tpu.memory_space<vmem>>, vector<2x1x128x128xf32>,
    } else {
    }
    %135 = tpu.concatenate %66, %88, %110, %132 in 2 : vector<2x128x64xbf16>, vector<2x128x64xbf16>, vector<2x128x64xbf16>, vector<2x128x64xbf16> -> vector<2x128x256xbf16>
    %136 = vector.shape_cast %135 : vector<2x128x256xbf16> to vector<256x256xbf16>
    %137 = arith.index_cast %arg1 : i32 to index
    %c0_36 = arith.constant 0 : index
    %c0_37 = arith.constant 0 : index
    %138 = vector.load %arg7[%137, %c0_36, %c0_37] : memref<2x256x128xbf16, #tpu.memory_space<vmem>>, vector<1x256x128xbf16>
    %139 = vector.shape_cast %138 : vector<1x256x128xbf16> to vector<256x128xbf16>
    %cst_38 = arith.constant dense<0.000000e+00> : vector<256x128xf32>
    %140 = tpu.matmul %136, %139, %cst_38 {dimension_numbers = #tpu.dot_dimension_numbers<[1], [0], [0], [1], [0, 0, 1, 1], [], []>} : vector<256x256xbf16>, vector<256x128xbf16>, vector<256x128xf32> -> vector<256x128xf32>
    %141 = arith.index_cast %arg1 : i32 to index
    %c0_39 = arith.constant 0 : index
    %c0_40 = arith.constant 0 : index
    %142 = vector.load %arg8[%141, %c0_39, %c0_40] : memref<2x1x128xf32, #tpu.memory_space<vmem>>, vector<1x1x128xf32>
    %143 = vector.shape_cast %142 : vector<1x1x128xf32> to vector<1x128xf32>
    %144 = vector.broadcast %143 : vector<1x128xf32> to vector<256x128xf32>
    %145 = arith.addf %140, %144 : vector<256x128xf32>
    %146 = vector.shape_cast %145 : vector<256x128xf32> to vector<2x128x128xf32>
    %147 = arith.addf %4, %146 : vector<2x128x128xf32>
    %148 = arith.index_cast %arg1 : i32 to index
    %c0_41 = arith.constant 0 : index
    %c0_42 = arith.constant 0 : index
    %149 = vector.load %arg9[%148, %c0_41, %c0_42] : memref<2x1x128xf32, #tpu.memory_space<vmem>>, vector<1x1x128xf32>
    %150 = vector.shape_cast %149 : vector<1x1x128xf32> to vector<1x128xf32>
    %151 = arith.index_cast %arg1 : i32 to index
    %c0_43 = arith.constant 0 : index
    %c0_44 = arith.constant 0 : index
    %152 = vector.load %arg10[%151, %c0_43, %c0_44] : memref<2x1x128xf32, #tpu.memory_space<vmem>>, vector<1x1x128xf32>
    %153 = vector.shape_cast %152 : vector<1x1x128xf32> to vector<1x128xf32>
    %cst_45 = arith.constant dense<0.000000e+00> : vector<2x128xf32>
    %154 = vector.multi_reduction <add>, %147, %cst_45 [2] : vector<2x128x128xf32> to vector<2x128xf32>
    %155 = vector.shape_cast %154 : vector<2x128xf32> to vector<2x128x1xf32>
    %cst_46 = arith.constant 1.280000e+02 : f32
    %156 = vector.broadcast %cst_46 : f32 to vector<2x128x1xf32>
    %157 = arith.divf %155, %156 : vector<2x128x1xf32>
    %158 = vector.broadcast %157 : vector<2x128x1xf32> to vector<2x128x128xf32>
    %159 = arith.subf %147, %158 : vector<2x128x128xf32>
    %160 = arith.mulf %159, %159 : vector<2x128x128xf32>
    %cst_47 = arith.constant dense<0.000000e+00> : vector<2x128xf32>
    %161 = vector.multi_reduction <add>, %160, %cst_47 [2] : vector<2x128x128xf32> to vector<2x128xf32>
    %162 = vector.shape_cast %161 : vector<2x128xf32> to vector<2x128x1xf32>
    %cst_48 = arith.constant 1.280000e+02 : f32
    %163 = vector.broadcast %cst_48 : f32 to vector<2x128x1xf32>
    %164 = arith.divf %162, %163 : vector<2x128x1xf32>
    %165 = vector.broadcast %157 : vector<2x128x1xf32> to vector<2x128x128xf32>
    %166 = arith.subf %147, %165 : vector<2x128x128xf32>
    %cst_49 = arith.constant 9.99999974E-6 : f32
    %167 = vector.broadcast %cst_49 : f32 to vector<2x128x1xf32>
    %168 = arith.addf %164, %167 : vector<2x128x1xf32>
    %169 = math.rsqrt %168 : vector<2x128x1xf32>
    %170 = vector.broadcast %169 : vector<2x128x1xf32> to vector<2x128x128xf32>
    %171 = arith.mulf %166, %170 : vector<2x128x128xf32>
    %172 = vector.shape_cast %150 : vector<1x128xf32> to vector<1x1x128xf32>
    %173 = vector.broadcast %172 : vector<1x1x128xf32> to vector<2x128x128xf32>
    %174 = arith.mulf %171, %173 : vector<2x128x128xf32>
    %175 = vector.shape_cast %153 : vector<1x128xf32> to vector<1x1x128xf32>
    %176 = vector.broadcast %175 : vector<1x1x128xf32> to vector<2x128x128xf32>
    %177 = arith.addf %174, %176 : vector<2x128x128xf32>
    %178 = vector.shape_cast %177 : vector<2x128x128xf32> to vector<256x128xf32>
    %179 = arith.truncf %178 : vector<256x128xf32> to vector<256x128xbf16>
    %180 = arith.index_cast %arg1 : i32 to index
    %c0_50 = arith.constant 0 : index
    %c0_51 = arith.constant 0 : index
    %181 = vector.load %arg11[%180, %c0_50, %c0_51] : memref<2x128x256xbf16, #tpu.memory_space<vmem>>, vector<1x128x256xbf16>
    %182 = vector.shape_cast %181 : vector<1x128x256xbf16> to vector<128x256xbf16>
    %cst_52 = arith.constant dense<0.000000e+00> : vector<256x256xf32>
    %183 = tpu.matmul %179, %182, %cst_52 {dimension_numbers = #tpu.dot_dimension_numbers<[1], [0], [0], [1], [0, 0, 1, 1], [], []>} : vector<256x128xbf16>, vector<128x256xbf16>, vector<256x256xf32> -> vector<256x256xf32>
    %184 = arith.index_cast %arg1 : i32 to index
    %c0_53 = arith.constant 0 : index
    %c0_54 = arith.constant 0 : index
    %185 = vector.load %arg12[%184, %c0_53, %c0_54] : memref<2x1x256xf32, #tpu.memory_space<vmem>>, vector<1x1x256xf32>
    %186 = vector.shape_cast %185 : vector<1x1x256xf32> to vector<1x256xf32>
    %187 = vector.broadcast %186 : vector<1x256xf32> to vector<256x256xf32>
    %188 = arith.addf %183, %187 : vector<256x256xf32>
    %189 = arith.mulf %188, %188 : vector<256x256xf32>
    %190 = arith.mulf %188, %189 : vector<256x256xf32>
    %cst_55 = arith.constant 4.471500e-02 : f32
    %191 = vector.broadcast %cst_55 : f32 to vector<256x256xf32>
    %192 = arith.mulf %191, %190 : vector<256x256xf32>
    %193 = arith.addf %188, %192 : vector<256x256xf32>
    %cst_56 = arith.constant 0.797884583 : f32
    %194 = vector.broadcast %cst_56 : f32 to vector<256x256xf32>
    %195 = arith.mulf %194, %193 : vector<256x256xf32>
    %196 = math.tanh %195 : vector<256x256xf32>
    %cst_57 = arith.constant 1.000000e+00 : f32
    %197 = vector.broadcast %cst_57 : f32 to vector<256x256xf32>
    %198 = arith.addf %197, %196 : vector<256x256xf32>
    %cst_58 = arith.constant 5.000000e-01 : f32
    %199 = vector.broadcast %cst_58 : f32 to vector<256x256xf32>
    %200 = arith.mulf %199, %198 : vector<256x256xf32>
    %201 = arith.mulf %188, %200 : vector<256x256xf32>
    %202 = arith.truncf %201 : vector<256x256xf32> to vector<256x256xbf16>
    %203 = arith.index_cast %arg1 : i32 to index
    %c0_59 = arith.constant 0 : index
    %c0_60 = arith.constant 0 : index
    %204 = vector.load %arg13[%203, %c0_59, %c0_60] : memref<2x256x128xbf16, #tpu.memory_space<vmem>>, vector<1x256x128xbf16>
    %205 = vector.shape_cast %204 : vector<1x256x128xbf16> to vector<256x128xbf16>
    %cst_61 = arith.constant dense<0.000000e+00> : vector<256x128xf32>
    %206 = tpu.matmul %202, %205, %cst_61 {dimension_numbers = #tpu.dot_dimension_numbers<[1], [0], [0], [1], [0, 0, 1, 1], [], []>} : vector<256x256xbf16>, vector<256x128xbf16>, vector<256x128xf32> -> vector<256x128xf32>
    %207 = arith.index_cast %arg1 : i32 to index
    %c0_62 = arith.constant 0 : index
    %c0_63 = arith.constant 0 : index
    %208 = vector.load %arg14[%207, %c0_62, %c0_63] : memref<2x1x128xf32, #tpu.memory_space<vmem>>, vector<1x1x128xf32>
    %209 = vector.shape_cast %208 : vector<1x1x128xf32> to vector<1x128xf32>
    %210 = vector.broadcast %209 : vector<1x128xf32> to vector<256x128xf32>
    %211 = arith.addf %206, %210 : vector<256x128xf32>
    %212 = vector.shape_cast %211 : vector<256x128xf32> to vector<2x128x128xf32>
    %213 = arith.addf %147, %212 : vector<2x128x128xf32>
    %c0_64 = arith.constant 0 : index
    %c0_65 = arith.constant 0 : index
    %c0_66 = arith.constant 0 : index
    %214 = vector.load %arg15[%c0_64, %c0_65, %c0_66] : memref<2x128x128xf32, #tpu.memory_space<vmem>>, vector<2x128x128xf32>
    tpu.vector_store %arg15[%c0_64, %c0_65, %c0_66], %213 {strides = array<i32>} : memref<2x128x128xf32, #tpu.memory_space<vmem>>, vector<2x128x128xf32>,
    return
  }
  func.func @transform_0(%arg0: i32, %arg1: i32) -> (i32, i32, i32) {
    %c0_i32 = arith.constant 0 : i32
    %c0_i32_0 = arith.constant 0 : i32
    %c0_i32_1 = arith.constant 0 : i32
    return %arg0, %c0_i32, %c0_i32_0 : i32, i32, i32
  }
  func.func @transform_1(%arg0: i32, %arg1: i32) -> (i32, i32, i32) {
    %c0_i32 = arith.constant 0 : i32
    %c0_i32_0 = arith.constant 0 : i32
    %c0_i32_1 = arith.constant 0 : i32
    %c0_i32_2 = arith.constant 0 : i32
    return %c0_i32, %c0_i32_0, %c0_i32_1 : i32, i32, i32
  }
  func.func @transform_2(%arg0: i32, %arg1: i32) -> (i32, i32, i32) {
    %c0_i32 = arith.constant 0 : i32
    %c0_i32_0 = arith.constant 0 : i32
    %c0_i32_1 = arith.constant 0 : i32
    %c0_i32_2 = arith.constant 0 : i32
    return %c0_i32, %c0_i32_0, %c0_i32_1 : i32, i32, i32
  }
  func.func @transform_3(%arg0: i32, %arg1: i32) -> (i32, i32, i32) {
    %c0_i32 = arith.constant 0 : i32
    %c0_i32_0 = arith.constant 0 : i32
    %c0_i32_1 = arith.constant 0 : i32
    %c0_i32_2 = arith.constant 0 : i32
    return %c0_i32, %c0_i32_0, %c0_i32_1 : i32, i32, i32
  }
  func.func @transform_4(%arg0: i32, %arg1: i32) -> (i32, i32, i32) {
    %c0_i32 = arith.constant 0 : i32
    %c0_i32_0 = arith.constant 0 : i32
    %c0_i32_1 = arith.constant 0 : i32
    %c0_i32_2 = arith.constant 0 : i32
    return %c0_i32, %c0_i32_0, %c0_i32_1 : i32, i32, i32
  }
  func.func @transform_5(%arg0: i32, %arg1: i32) -> (i32, i32, i32) {
    %c0_i32 = arith.constant 0 : i32
    %c0_i32_0 = arith.constant 0 : i32
    %c0_i32_1 = arith.constant 0 : i32
    %c0_i32_2 = arith.constant 0 : i32
    return %c0_i32, %c0_i32_0, %c0_i32_1 : i32, i32, i32
  }
  func.func @transform_6(%arg0: i32, %arg1: i32) -> (i32, i32, i32) {
    %c0_i32 = arith.constant 0 : i32
    %c0_i32_0 = arith.constant 0 : i32
    %c0_i32_1 = arith.constant 0 : i32
    %c0_i32_2 = arith.constant 0 : i32
    return %c0_i32, %c0_i32_0, %c0_i32_1 : i32, i32, i32
  }
  func.func @transform_7(%arg0: i32, %arg1: i32) -> (i32, i32, i32) {
    %c0_i32 = arith.constant 0 : i32
    %c0_i32_0 = arith.constant 0 : i32
    %c0_i32_1 = arith.constant 0 : i32
    %c0_i32_2 = arith.constant 0 : i32
    return %c0_i32, %c0_i32_0, %c0_i32_1 : i32, i32, i32
  }
  func.func @transform_8(%arg0: i32, %arg1: i32) -> (i32, i32, i32) {
    %c0_i32 = arith.constant 0 : i32
    %c0_i32_0 = arith.constant 0 : i32
    %c0_i32_1 = arith.constant 0 : i32
    %c0_i32_2 = arith.constant 0 : i32
    return %c0_i32, %c0_i32_0, %c0_i32_1 : i32, i32, i32
  }
  func.func @transform_9(%arg0: i32, %arg1: i32) -> (i32, i32, i32) {
    %c0_i32 = arith.constant 0 : i32
    %c0_i32_0 = arith.constant 0 : i32
    %c0_i32_1 = arith.constant 0 : i32
    %c0_i32_2 = arith.constant 0 : i32
    return %c0_i32, %c0_i32_0, %c0_i32_1 : i32, i32, i32
  }
  func.func @transform_10(%arg0: i32, %arg1: i32) -> (i32, i32, i32) {
    %c0_i32 = arith.constant 0 : i32
    %c0_i32_0 = arith.constant 0 : i32
    %c0_i32_1 = arith.constant 0 : i32
    %c0_i32_2 = arith.constant 0 : i32
    return %c0_i32, %c0_i32_0, %c0_i32_1 : i32, i32, i32
  }
  func.func @transform_11(%arg0: i32, %arg1: i32) -> (i32, i32, i32) {
    %c0_i32 = arith.constant 0 : i32
    %c0_i32_0 = arith.constant 0 : i32
    %c0_i32_1 = arith.constant 0 : i32
    %c0_i32_2 = arith.constant 0 : i32
    return %c0_i32, %c0_i32_0, %c0_i32_1 : i32, i32, i32
  }
  func.func @transform_12(%arg0: i32, %arg1: i32) -> (i32, i32, i32) {
    %c0_i32 = arith.constant 0 : i32
    %c0_i32_0 = arith.constant 0 : i32
    %c0_i32_1 = arith.constant 0 : i32
    %c0_i32_2 = arith.constant 0 : i32
    return %c0_i32, %c0_i32_0, %c0_i32_1 : i32, i32, i32
  }
  func.func @transform_13(%arg0: i32, %arg1: i32) -> (i32, i32, i32) {
    %c0_i32 = arith.constant 0 : i32
    %c0_i32_0 = arith.constant 0 : i32
    %c0_i32_1 = arith.constant 0 : i32
    return %arg0, %c0_i32, %c0_i32_0 : i32, i32, i32
  }
  func.func @transform_14(%arg0: i32, %arg1: i32) -> (i32, i32, i32, i32) {
    %c0_i32 = arith.constant 0 : i32
    %c0_i32_0 = arith.constant 0 : i32
    %c0_i32_1 = arith.constant 0 : i32
    %c0_i32_2 = arith.constant 0 : i32
    return %arg0, %c0_i32, %c0_i32_0, %c0_i32_1 : i32, i32, i32, i32
  }
}

</mosaic_0001>

<bundles_post_ra>
// kernel: tpu_custom_call.1
= control target key start
LH: loop header
LB: loop body
LE: loop exit
PB: predicated region body
PF: predicated region fallthrough
CT: control target
= control target key end

     0   :  { %s17242_s0 = inlined_call_operand.hbm [shape: f32[4,128,128], index: 0, kind: input, shape index: {}]   ;;  %s17243_s1 = inlined_call_operand.hbm [shape: f32[2,1,128], index: 1, kind: input, shape index: {}]   ;;  %s17244_s2 = inlined_call_operand.vmem [shape: f32[2,1,128], index: 2, kind: input, shape index: {}]   ;;  %s17245_s3 = inlined_call_operand.hbm [shape: bf16[2,128,768], index: 3, kind: input, shape index: {}]   ;;  %s17246_s4 = inlined_call_operand.hbm [shape: f32[2,1,768], index: 4, kind: input, shape index: {}]   ;;  %s17247_s5 = inlined_call_operand.hbm [shape: bf16[2,256,128], index: 5, kind: input, shape index: {}]   ;;  %s17248_s6 = inlined_call_operand.vmem [shape: f32[2,1,128], index: 6, kind: input, shape index: {}]   ;;  %s17249_s7 = inlined_call_operand.vmem [shape: f32[2,1,128], index: 7, kind: input, shape index: {}]   ;;  %s17250_s8 = inlined_call_operand.vmem [shape: f32[2,1,128], index: 8, kind: input, shape index: {}]   ;;  %s17251_s9 = inlined_call_operand.hbm [shape: bf16[2,128,256], index: 9, kind: input, shape index: {}]   ;;  %s17252_s10 = inlined_call_operand.vmem [shape: f32[2,1,256], index: 10, kind: input, shape index: {}]   ;;  %s17253_s11 = inlined_call_operand.hbm [shape: bf16[2,256,128], index: 11, kind: input, shape index: {}]   ;;  %s17254_s12 = inlined_call_operand.vmem [shape: f32[2,1,128], index: 12, kind: input, shape index: {}]   ;;  %s17255_s13 = inlined_call_operand.hbm [shape: f32[4,128,128], index: 13, kind: output, shape index: {0}]   ;;  %s17256_s14 = inlined_call_operand.hbm [shape: f32[4,4,128,128], index: 14, kind: output, shape index: {1}]  }
   0x1   :  { %17594 = sst [smem:[#allocation247_spill]] %s17243_s1 }
   0x2   :  { %17595 = sst [smem:[#allocation248_spill]] %s17245_s3 }
   0x3   :  { %17596 = sst [smem:[#allocation249_spill]] %s17246_s4 }
   0x4   :  { %17597 = sst [smem:[#allocation250_spill]] %s17247_s5 }
   0x5   :  { %17598 = sst [smem:[#allocation251_spill]] %s17249_s7 }
   0x6   :  { %17599 = sst [smem:[#allocation252_spill]] %s17250_s8 }
   0x7   :  { %17600 = sst [smem:[#allocation253_spill]] %s17251_s9 }
   0x8   :  { %17601 = sst [smem:[#allocation254_spill]] %s17252_s10 }
   0x9   :  { %17602 = sst [smem:[#allocation255_spill]] %s17253_s11 }
   0xa   :  { %17603 = sst [smem:[#allocation256_spill]] %s17254_s12 }
   0xb   :  { %17604 = sst [smem:[#allocation257_spill]] %s17255_s13 }
   0xc   :  { %17605 = sst [smem:[#allocation258_spill]] %s17256_s14 }
   0xd   :  { %20 = vsyncpa [#allocation3], 0 }
   0xe   :  { %22 = vsyncpa [#allocation3 + $0x1], 0 }
   0xf   :  { %23 = vsyncpa [#allocation6], 0 }
  0x10   :  { %24 = vsyncpa [#allocation9], 0 }
  0x11   :  { %25 = vsyncpa [#allocation12], 0 }
  0x12   :  { %26 = vsyncpa [#allocation4], 0 }
  0x13   :  { %28 = vsyncpa [#allocation4 + $0x1], 0 }
  0x14   :  { %29 = vsyncpa [#allocation16], 0 }
  0x15   :  { %31 = vsyncpa [#allocation16 + $0x1], 0  ;;  %s11316_s29 = smov 0   ;;  %s11318_s30 = smov 0  }
  0x16   :  { %s11320_s15 = smov 0   ;;  %s11322_s16 = smov 0  }
  0x17   :  { %s11324_s17 = smov 0   ;;  %s11326_s18 = smov 0  }
  0x18   :  { %s11328_s19 = smov 0   ;;  %s11330_s20 = smov 0  }
  0x19 LB: > { %17606 = sst [smem:[#allocation23_spill]] %s11204_s17  ;;  %s17257_s21 = sadd.s32 4294967295, %s11216_s20   ;;  %s11216_s20 = sphi %s11330_s20, %s37_s20   ;;  %s11212_s19 = sphi %s11328_s19, %s18547_s19   ;;  %s11208_s18 = sphi %s11326_s18, %s18546_s18   ;;  %s11204_s17 = sphi %s11324_s17, %s18545_s17   ;;  %s11200_s16 = sphi %s11322_s16, %s18544_s16   ;;  %s11196_s15 = sphi %s11320_s15, %s18543_s15   ;;  %s11192_s30 = sphi %s11318_s30, %s18542_s30   ;;  %s11188_s29 = sphi %s11316_s29, %s18541_s29  }
  0x1a   : > { %p8469_p0 = scmp.ge.s32.totalorder %s11216_s20, 1  ;;  %p11360_p1 = scmp.eq.s32.totalorder %s17257_s21, 0 }
  0x1b   : > { %p384_p2 = scmp.lt.s32.totalorder %s11216_s20, 5  ;;  %s11218_s24 = smov [#allocation5]  }
  0x1c   : > { %s396_s25 = sshll.u32 %s11218_s24, 4  ;;  %s11219_s27 = smov [#allocation8]   ;;  %s397_s25 = int_to_ptr.vmem [resolvable:$true] %s396_s25 }
  0x1d   : > { %p11365_p3 = pnand %p8469_p0, %p384_p2  ;;  %s425_s28 = sshll.u32 %s11219_s27, 4  ;;  %s426_s28 = int_to_ptr.vmem [resolvable:$true] %s425_s28 }
  0x1e   : > { %s10905_s13 = scalar_lea.vmem %s397_s25, 32  ;;  %p10913_p10 = scmp.lt.s32.totalorder %s397_s25, %s397_s25 }
  0x1f   : > { %s17608_s23 = scalar_select %p11365_p3, 1, 0 }
  0x20   : > { %p9870_p4 = pneg %p11365_p3  ;;  %p10906_p7 = scmp.ne.s32.totalorder %s397_s25, %s10905_s13 }
  0x21   : > { %p10914_p11 = scmp.lt.s32.totalorder %s10905_s13, %s10905_s13 }
  0x22   : > { %p11373_p5 = pnand %p9870_p4, %p11360_p1 }
  0x23   : > { %p10915_p12 = por %p10914_p11, %p10913_p10 }
  0x24   : > { %p11379_p6 = pneg %p11373_p5 }
  0x26   : > { %p10908_p8 = pnand %p10906_p7, %p11379_p6 }
  0x28   : > { %p10909_p9 = pneg %p10908_p8 }
  0x2a   : > { %p10916_p13 = pnand %p10915_p12, %p10909_p9 }
  0x2c   : > { %10919 = shalt.err (!%p10916_p13)
}
  0x2d   : > { %s11220_s24 = smov 16   ;;  %s11221_s27 = smov 1  }
  0x2e   : > { %s17611_s1 = sld [smem:[#allocation247_spill]]  ;;  %s10931_s12 = scalar_lea.vmem %s426_s28, 192 }
  0x2f   : > { %p10932_p0 = scmp.ne.s32.totalorder %s426_s28, %s10931_s12  ;;  %p10939_p7 = scmp.lt.s32.totalorder %s426_s28, %s426_s28 }
  0x30   : > { %p10940_p8 = scmp.lt.s32.totalorder %s10931_s12, %s10931_s12 }
  0x31   : > { %p10934_p2 = pnand %p10932_p0, %p11379_p6 }
  0x32   : > { %p10941_p3 = por %p10940_p8, %p10939_p7 }
  0x33   : > { %p10935_p4 = pneg %p10934_p2 }
  0x34   : > { %9873 = dma.hbm_to_vmem [thread:$0]  (!%p11373_p5), %s17611_s1, 32, %s397_s25, [#allocation6], %s11220_s24, %s11220_s24, %s11221_s27  }
  0x35   : > { %p10942_p10 = pnand %p10941_p3, %p10935_p4 }
  0x37   : > { %10945 = shalt.err (!%p10942_p10)
}
  0x38   : > { %s11222_s13 = smov 96   ;;  %s11223_s10 = smov 6  }
  0x39   : > { %s17612_s4 = sld [smem:[#allocation249_spill]]  ;;  %s11224_s14 = smov [#allocation11]  }
  0x3a   : > { %s460_s17 = sshll.u32 %s11224_s14, 4  ;;  %s461_s17 = int_to_ptr.vmem [resolvable:$true] %s460_s17 }
  0x3b   : > { %s10957_s25 = scalar_lea.vmem %s461_s17, 4096  ;;  %p10965_p13 = scmp.lt.s32.totalorder %s461_s17, %s461_s17 }
  0x3c   : > { %p10958_p9 = scmp.ne.s32.totalorder %s461_s17, %s10957_s25  ;;  %p10966_p3 = scmp.lt.s32.totalorder %s10957_s25, %s10957_s25 }
  0x3e   : > { %p10960_p11 = pnand %p10958_p9, %p11379_p6  ;;  %p10967_p0 = por %p10966_p3, %p10965_p13 }
  0x3f   : > { %9879 = dma.hbm_to_vmem [thread:$0]  (!%p11373_p5), %s17612_s4, 192, %s426_s28, [#allocation9], %s11222_s13, %s11222_s13, %s11223_s10  }
  0x40   : > { %p10961_p12 = pneg %p10960_p11 }
  0x42   : > { %p10968_p2 = pnand %p10967_p0, %p10961_p12 }
  0x44   : > { %10971 = shalt.err (!%p10968_p2)
}
  0x45   : > { %s17262_s12 = smov 128   ;;  %s17263_s24 = smov 8  }
  0x46   : > { %s17613_s9 = sld [smem:[#allocation253_spill]]  ;;  %s11227_s10 = smov [#allocation7]  }
  0x47   : > { %s412_s28 = sshll.u32 %s11227_s10, 4  ;;  %s413_s28 = int_to_ptr.vmem [resolvable:$true] %s412_s28 }
  0x48   : > { %s10983_s27 = scalar_lea.vmem %s413_s28, 12288  ;;  %p10991_p10 = scmp.lt.s32.totalorder %s413_s28, %s413_s28 }
  0x49   : > { %p10984_p4 = scmp.ne.s32.totalorder %s413_s28, %s10983_s27  ;;  %p10992_p9 = scmp.lt.s32.totalorder %s10983_s27, %s10983_s27 }
  0x4b   : > { %p10986_p7 = pnand %p10984_p4, %p11379_p6  ;;  %p10993_p11 = por %p10992_p9, %p10991_p10 }
  0x4c   : > { %9885 = dma.hbm_to_vmem [thread:$0]  (!%p11373_p5), %s17613_s9, 4096, %s461_s17, [#allocation12], %s17262_s12, %s17262_s12, %s17263_s24  }
  0x4d   : > { %p10987_p8 = pneg %p10986_p7 }
  0x4f   : > { %p10994_p12 = pnand %p10993_p11, %p10987_p8 }
  0x51   : > { %10997 = shalt.err (!%p10994_p12)
}
  0x52   : > { %s11228_s13 = smov 384   ;;  %s11229_s14 = smov 24  }
  0x53   : > { %s17614_s3 = sld [smem:[#allocation248_spill]]  ;;  %s11230_s7 = smov [#allocation10]  }
  0x54   : > { %s438_s8 = sshll.u32 %s11230_s7, 4  ;;  %s439_s8 = int_to_ptr.vmem [resolvable:$true] %s438_s8 }
  0x55   : > { %s11009_s10 = scalar_lea.vmem %s439_s8, 4096  ;;  %p11017_p2 = scmp.lt.s32.totalorder %s439_s8, %s439_s8 }
  0x56   : > { %p11010_p13 = scmp.ne.s32.totalorder %s439_s8, %s11009_s10  ;;  %p11018_p4 = scmp.lt.s32.totalorder %s11009_s10, %s11009_s10 }
  0x58   : > { %p11012_p3 = pnand %p11010_p13, %p11379_p6  ;;  %p11019_p7 = por %p11018_p4, %p11017_p2 }
  0x59   : > { %9876 = dma.hbm_to_vmem [thread:$0]  (!%p11373_p5), %s17614_s3, 12288, %s413_s28, [#allocation6], %s11228_s13, %s11228_s13, %s11229_s14  }
  0x5a   : > { %p11013_p0 = pneg %p11012_p3 }
  0x5c   : > { %p11020_p8 = pnand %p11019_p7, %p11013_p0 }
  0x5e   : > { %11023 = shalt.err (!%p11020_p8)
}
  0x5f   : > { %s11231_s27 = smov 64   ;;  %s11232_s12 = smov 4  }
  0x60   : > { %s17615_s5 = sld [smem:[#allocation250_spill]]  ;;  %s11233_s13 = smov [#allocation13]  }
  0x61   : > { %s476_s14 = sshll.u32 %s11233_s13, 4  ;;  %s477_s14 = int_to_ptr.vmem [resolvable:$true] %s476_s14 }
  0x62   : > { %s11035_s17 = scalar_lea.vmem %s477_s14, 4096  ;;  %p11043_p12 = scmp.lt.s32.totalorder %s477_s14, %s477_s14 }
  0x63   : > { %p11036_p10 = scmp.ne.s32.totalorder %s477_s14, %s11035_s17  ;;  %p11044_p13 = scmp.lt.s32.totalorder %s11035_s17, %s11035_s17 }
  0x65   : > { %p11038_p9 = pnand %p11036_p10, %p11379_p6  ;;  %p11045_p3 = por %p11044_p13, %p11043_p12 }
  0x66   : > { %9882 = dma.hbm_to_vmem [thread:$0]  (!%p11373_p5), %s17615_s5, 4096, %s439_s8, [#allocation9], %s11231_s27, %s11231_s27, %s11232_s12  }
  0x67   : > { %p11039_p11 = pneg %p11038_p9 }
  0x69   : > { %p11046_p0 = pnand %p11045_p3, %p11039_p11 }
  0x6b   : > { %11049 = shalt.err (!%p11046_p0)
}
  0x6c   : > { %s17616_s11 = sld [smem:[#allocation255_spill]]  ;;  %s8468_s21 = sadd.s32 4294967294, %s11216_s20  }
  0x6d   : > { %s46_s8 = sadd.s32 1, %s11208_s18  ;;  %s49_s26 = sadd.s32 1, %s11212_s19 }
  0x6e   : > { %p47_p6 = scmp.ge.s32.totalorder %s46_s8, 2  ;;  %s56_s25 = sadd.s32 1, %s11196_s15 }
  0x6f   : > { %p63_p2 = scmp.ne.s32.totalorder %s11196_s15, %s11192_s30  ;;  %p64_p4 = scmp.eq.s32.totalorder %s11216_s20, 0 }
  0x70   : > { %s18549_s8 = smov (%p47_p6, %s46_s8), 0  ;;  %s18551_s26 = smov (!%p47_p6, %s49_s26), %s11212_s19 }
  0x71   : > { %p69_p7 = scmp.ne.s32.totalorder %s11192_s30, %s11188_s29  ;;  %p51_p8 = scmp.ge.s32.totalorder %s18551_s26, 2 }
  0x72   : > { %9888 = dma.hbm_to_vmem [thread:$0]  (!%p11373_p5), %s17616_s11, 4096, %s477_s14, [#allocation12], %s11231_s27, %s11231_s27, %s11232_s12  }
  0x73   : > { %s17617_s28 = sadd.s32 4294967295, %s11216_s20   ;;  %p11442_p5 = por %p64_p4, %p63_p2 }
  0x74   : > { %p345_p10 = scmp.eq.s32.totalorder %s17617_s28, 3  ;;  %p11448_p9 = por %p11360_p1, %p69_p7 }
  0x75   : > { %s18553_s26 = smov (%p51_p8, %s18551_s26), 0  ;;  %p351_p12 = scmp.eq.s32.totalorder %s8468_s21, 3 }
  0x76   : > { %17620 = sst [smem:[#allocation24_spill]] %s18553_s26  ;;  %p11454_p11 = por %p345_p10, %p63_p2 }
  0x77   : > { %s53_s14 = ssub.s32 %s11212_s19, %s18553_s26  ;;  %p9906_p13 = scmp.lt.s32.totalorder %s11216_s20, 4 }
  0x78   : > { %p54_p3 = scmp.eq.s32.totalorder %s53_s14, 0  ;;  %p11461_p0 = por %p351_p12, %p69_p7 }
  0x79   : > { %s493_s7 = sand.u32 1, %s11196_s15   ;;  %s8775_s10 = sshll.u32 %s11212_s19, 12 }
  0x7a   : > { %s11468_s28 = scalar_select %p54_p3, %s11196_s15, %s56_s25  }
  0x7b   : > { %s8477_s24 = sshll.u32 %s493_s7, 8  ;;  %s504_s4 = scalar_lea.hbm %s17242_s0, %s8775_s10 }
  0x7c   : > { %s497_s5 = scalar_lea.vmem [#allocation2], %s8477_s24  ;;  %p11475_p6 = pnand %p9906_p13, %p11442_p5 }
  0x7d   : > { %s505_s9 = sshll.u32 %s497_s5, 4  ;;  %s494_s14 = scalar_lea.sflag [#allocation3], %s493_s7  ;;  %s506_s9 = int_to_ptr.vmem [resolvable:$true] %s505_s9 }
  0x7e   : > { %p11052_p2 = pneg %p11475_p6  ;;  %s11063_s11 = scalar_lea.vmem %s506_s9, 4096 }
  0x7f   : > { %p11064_p4 = scmp.ne.s32.totalorder %s506_s9, %s11063_s11  ;;  %s11234_s25 = smov [#allocation2]  }
  0x80   : > { %s11068_s26 = sshll.u32 %s11234_s25, 4  ;;  %s11069_s26 = int_to_ptr.vmem [resolvable:$false] %s11068_s26 }
  0x81   : > { %p11066_p7 = pnand %p11064_p4, %p11052_p2  ;;  %s11070_s1 = scalar_lea.vmem %s11069_s26, 8192 }
  0x82   : > { %p11071_p10 = scmp.lt.s32.totalorder %s506_s9, %s11069_s26  ;;  %p11072_p12 = scmp.lt.s32.totalorder %s11070_s1, %s11063_s11 }
  0x83   : > { %p11067_p8 = pneg %p11066_p7 }
  0x84   : > { %p11073_p3 = por %p11072_p12, %p11071_p10 }
  0x86   : > { %p11074_p5 = pnand %p11073_p3, %p11067_p8 }
  0x88   : > { %11077 = shalt.err (!%p11074_p5)
}
  0x89   : > { %s17624_s3 = smov 8   ;;  %s17625_s5 = smov 128  }
  0x8a   : > { %9892 = dma.hbm_to_vmem [thread:$0]  (!%p11475_p6), %s504_s4, 4096, %s506_s9, %s494_s14, %s17625_s5, %s17625_s5, %s17624_s3  }
  0x8b   : > { %p17626_p13 = scmp.ne.s32.totalorder %s17608_s23, 0 }
  0x8d   : > { %517 = sbr.rel (%p17626_p13) target bundleno = 5233 (0x1471), region = 72 }
  0x92   : > { %s11489_s24 = sand.u32 1, %s11192_s30  }
  0x93   : > { %s8482_s26 = sshll.u32 %s11489_s24, 8  ;;  %s520_s11 = scalar_lea.sflag [#allocation3], %s11489_s24 }
  0x94   : > { %s11493_s12 = scalar_lea.vmem [#allocation2], %s8482_s26 }
  0x95   : > { %11163 = dma.done.wait (%p11448_p9), %s520_s11, 4096  }
  0x96   : > { %11165 = vsyncadd (%p11448_p9), %s520_s11, 4294963200 }
  0x97   : > { %11167 = dma.done.wait (%p11360_p1), [#allocation6], 12320  }
  0x98   : > { %11169 = vsyncadd (%p11360_p1), [#allocation6], 4294954976 }
  0x99   : > { %11171 = dma.done.wait (%p11360_p1), [#allocation9], 4288  }
  0x9a   : > { %11173 = vsyncadd (%p11360_p1), [#allocation9], 4294963008 }
  0x9b   : > { %11175 = dma.done.wait (%p11360_p1), [#allocation12], 8192  }
  0x9c   : > { %11177 = vsyncadd (%p11360_p1), [#allocation12], 4294959104  ;;  %s8490_s4 = sshll.u32 %s11489_s24, 10  ;;  %s11512_s9 = scalar_lea.vmem [#allocation14], %s8482_s26 }
  0x9d   : > { %s11514_s23 = scalar_lea.vmem [#allocation15], %s8490_s4  ;;  %p8491_p9 = scmp.ne.s32.totalorder %s11200_s16, 0 }
  0x9f   : > { %605 = sbr.rel (%p8491_p9) target bundleno = 181 (0xb5), region = 104 }
  0xa4   : > { %v606_v0 = vld [vmem:[%s11493_s12] sm:$0xff]  ;;  %v607_v1 = vld [vmem:[%s11493_s12 + $0x8] sm:$0xff]  ;;  %v608_v2 = vld [vmem:[%s11493_s12 + $0x10] sm:$0xff] }
  0xa5   : > { %638 = vst [vmem:[%s11512_s9] sm:$0xff] %v606_v0  ;;  %639 = vst [vmem:[%s11512_s9 + $0x8] sm:$0xff] %v607_v1  ;;  %v609_v3 = vld [vmem:[%s11493_s12 + $0x18] sm:$0xff]  ;;  %v610_v4 = vld [vmem:[%s11493_s12 + $0x20] sm:$0xff] }
  0xa6   : > { %640 = vst [vmem:[%s11512_s9 + $0x10] sm:$0xff] %v608_v2  ;;  %v611_v5 = vld [vmem:[%s11493_s12 + $0x28] sm:$0xff]  ;;  %641 = vst [vmem:[%s11512_s9 + $0x18] sm:$0xff] %v609_v3  ;;  %v612_v6 = vld [vmem:[%s11493_s12 + $0x30] sm:$0xff] }
  0xa7   : > { %642 = vst [vmem:[%s11512_s9 + $0x20] sm:$0xff] %v610_v4  ;;  %643 = vst [vmem:[%s11512_s9 + $0x28] sm:$0xff] %v611_v5  ;;  %v613_v7 = vld [vmem:[%s11493_s12 + $0x38] sm:$0xff]  ;;  %v614_v8 = vld [vmem:[%s11493_s12 + $0x40] sm:$0xff] }
  0xa8   : > { %644 = vst [vmem:[%s11512_s9 + $0x30] sm:$0xff] %v612_v6  ;;  %645 = vst [vmem:[%s11512_s9 + $0x38] sm:$0xff] %v613_v7  ;;  %v615_v9 = vld [vmem:[%s11493_s12 + $0x48] sm:$0xff]  ;;  %v616_v10 = vld [vmem:[%s11493_s12 + $0x50] sm:$0xff] }
  0xa9   : > { %646 = vst [vmem:[%s11512_s9 + $0x40] sm:$0xff] %v614_v8  ;;  %v617_v11 = vld [vmem:[%s11493_s12 + $0x58] sm:$0xff]  ;;  %647 = vst [vmem:[%s11512_s9 + $0x48] sm:$0xff] %v615_v9  ;;  %v618_v12 = vld [vmem:[%s11493_s12 + $0x60] sm:$0xff] }
  0xaa   : > { %648 = vst [vmem:[%s11512_s9 + $0x50] sm:$0xff] %v616_v10  ;;  %649 = vst [vmem:[%s11512_s9 + $0x58] sm:$0xff] %v617_v11  ;;  %v619_v13 = vld [vmem:[%s11493_s12 + $0x68] sm:$0xff]  ;;  %v620_v14 = vld [vmem:[%s11493_s12 + $0x70] sm:$0xff] }
  0xab   : > { %650 = vst [vmem:[%s11512_s9 + $0x60] sm:$0xff] %v618_v12  ;;  %651 = vst [vmem:[%s11512_s9 + $0x68] sm:$0xff] %v619_v13  ;;  %v621_v15 = vld [vmem:[%s11493_s12 + $0x78] sm:$0xff]  ;;  %v622_v16 = vld [vmem:[%s11493_s12 + $0x80] sm:$0xff] }
  0xac   : > { %652 = vst [vmem:[%s11512_s9 + $0x70] sm:$0xff] %v620_v14  ;;  %v623_v17 = vld [vmem:[%s11493_s12 + $0x88] sm:$0xff]  ;;  %653 = vst [vmem:[%s11512_s9 + $0x78] sm:$0xff] %v621_v15  ;;  %v624_v18 = vld [vmem:[%s11493_s12 + $0x90] sm:$0xff] }
  0xad   : > { %654 = vst [vmem:[%s11512_s9 + $0x80] sm:$0xff] %v622_v16  ;;  %655 = vst [vmem:[%s11512_s9 + $0x88] sm:$0xff] %v623_v17  ;;  %v625_v19 = vld [vmem:[%s11493_s12 + $0x98] sm:$0xff]  ;;  %v626_v20 = vld [vmem:[%s11493_s12 + $0xa0] sm:$0xff] }
  0xae   : > { %656 = vst [vmem:[%s11512_s9 + $0x90] sm:$0xff] %v624_v18  ;;  %657 = vst [vmem:[%s11512_s9 + $0x98] sm:$0xff] %v625_v19  ;;  %v627_v21 = vld [vmem:[%s11493_s12 + $0xa8] sm:$0xff]  ;;  %v628_v22 = vld [vmem:[%s11493_s12 + $0xb0] sm:$0xff] }
  0xaf   : > { %658 = vst [vmem:[%s11512_s9 + $0xa0] sm:$0xff] %v626_v20  ;;  %v629_v23 = vld [vmem:[%s11493_s12 + $0xb8] sm:$0xff]  ;;  %659 = vst [vmem:[%s11512_s9 + $0xa8] sm:$0xff] %v627_v21  ;;  %v630_v24 = vld [vmem:[%s11493_s12 + $0xc0] sm:$0xff] }
  0xb0   : > { %660 = vst [vmem:[%s11512_s9 + $0xb0] sm:$0xff] %v628_v22  ;;  %661 = vst [vmem:[%s11512_s9 + $0xb8] sm:$0xff] %v629_v23  ;;  %v631_v25 = vld [vmem:[%s11493_s12 + $0xc8] sm:$0xff]  ;;  %v632_v26 = vld [vmem:[%s11493_s12 + $0xd0] sm:$0xff] }
  0xb1   : > { %662 = vst [vmem:[%s11512_s9 + $0xc0] sm:$0xff] %v630_v24  ;;  %663 = vst [vmem:[%s11512_s9 + $0xc8] sm:$0xff] %v631_v25  ;;  %v633_v27 = vld [vmem:[%s11493_s12 + $0xd8] sm:$0xff]  ;;  %v634_v28 = vld [vmem:[%s11493_s12 + $0xe0] sm:$0xff] }
  0xb2   : > { %664 = vst [vmem:[%s11512_s9 + $0xd0] sm:$0xff] %v632_v26  ;;  %v635_v29 = vld [vmem:[%s11493_s12 + $0xe8] sm:$0xff]  ;;  %665 = vst [vmem:[%s11512_s9 + $0xd8] sm:$0xff] %v633_v27  ;;  %v636_v30 = vld [vmem:[%s11493_s12 + $0xf0] sm:$0xff] }
  0xb3   : > { %666 = vst [vmem:[%s11512_s9 + $0xe0] sm:$0xff] %v634_v28  ;;  %667 = vst [vmem:[%s11512_s9 + $0xe8] sm:$0xff] %v635_v29  ;;  %v637_v31 = vld [vmem:[%s11493_s12 + $0xf8] sm:$0xff] }
  0xb4   : > { %668 = vst [vmem:[%s11512_s9 + $0xf0] sm:$0xff] %v636_v30  ;;  %669 = vst [vmem:[%s11512_s9 + $0xf8] sm:$0xff] %v637_v31 }
  0xb5 PF: > { %v11582_v32 = vld [vmem:[%s11512_s9] sm:$0xff]  ;;  %v11585_v33 = vld [vmem:[%s11512_s9 + $0x10] sm:$0xff]  ;;  %v11590_v34 = vld [vmem:[%s11512_s9 + $0x8] sm:$0xff]  ;;  %s8776_s22 = smul.u32 384, %s11200_s16  ;;  %s702_s7 = scalar_lea.vmem [#allocation5], %s11200_s16  ;;  %vm2087_vm0 = vcmask 523264  }
  0xb6   : > { %17627 = vst [vmem:[#allocation25_spill] sm:$0xff] %v11582_v32  ;;  %17628 = vst [vmem:[#allocation26_spill] sm:$0xff] %v11585_v33  ;;  %706 = vadd.xlane.f32.xlu0 %v11582_v32  ;;  %710 = vadd.xlane.f32.xlu1 %v11585_v33  ;;  %v11593_v35 = vld [vmem:[%s11512_s9 + $0x18] sm:$0xff]  ;;  %v11598_v36 = vld [vmem:[%s11512_s9 + $0x20] sm:$0xff]  ;;  %s704_s14 = scalar_lea.vmem %s17244_s2, %s11200_s16  ;;  %s1202_s25 = smul.u32 6, %s11200_s16 }
  0xb7   : > { %17629 = vst [vmem:[#allocation27_spill] sm:$0xff] %v11590_v34  ;;  %17630 = vst [vmem:[#allocation28_spill] sm:$0xff] %v11593_v35  ;;  %v11601_v37 = vld [vmem:[%s11512_s9 + $0x28] sm:$0xff]  ;;  %v11606_v38 = vld [vmem:[%s11512_s9 + $0x30] sm:$0xff]  ;;  %s11662_s27 = scalar_lea.vmem [#allocation7], %s8776_s22  ;;  %p8559_p1 = scmp.ne.s32.totalorder %s11200_s16, 1 }
  0xb8   : > { %17631 = vst [vmem:[#allocation29_spill] sm:$0xff] %v11598_v36  ;;  %17632 = vst [vmem:[#allocation30_spill] sm:$0xff] %v11601_v37  ;;  %v11609_v39 = vld [vmem:[%s11512_s9 + $0x38] sm:$0xff]  ;;  %v11614_v40 = vld [vmem:[%s11512_s9 + $0x40] sm:$0xff]  ;;  %s1203_s1 = scalar_lea.vmem [#allocation8], %s1202_s25 }
  0xb9   : > { %17633 = vst [vmem:[#allocation31_spill] sm:$0xff] %v11606_v38  ;;  %17634 = vst [vmem:[#allocation32_spill] sm:$0xff] %v11609_v39  ;;  %v11617_v41 = vld [vmem:[%s11512_s9 + $0x48] sm:$0xff]  ;;  %v11622_v42 = vld [vmem:[%s11512_s9 + $0x50] sm:$0xff] }
  0xba   : > { %708 = vadd.xlane.f32.xlu0 %v11590_v34  ;;  %712 = vadd.xlane.f32.xlu1 %v11593_v35  ;;  %17635 = vst [vmem:[#allocation33_spill] sm:$0xff] %v11614_v40  ;;  %17636 = vst [vmem:[#allocation34_spill] sm:$0xff] %v11617_v41  ;;  %v11625_v43 = vld [vmem:[%s11512_s9 + $0x58] sm:$0xff]  ;;  %v11630_v44 = vld [vmem:[%s11512_s9 + $0x60] sm:$0xff] }
  0xbb   : > { %17637 = vst [vmem:[#allocation35_spill] sm:$0xff] %v11622_v42  ;;  %17638 = vst [vmem:[#allocation36_spill] sm:$0xff] %v11625_v43  ;;  %v11633_v45 = vld [vmem:[%s11512_s9 + $0x68] sm:$0xff]  ;;  %v11638_v46 = vld [vmem:[%s11512_s9 + $0x70] sm:$0xff] }
  0xbc   : > { %17639 = vst [vmem:[#allocation37_spill] sm:$0xff] %v11630_v44  ;;  %17640 = vst [vmem:[#allocation38_spill] sm:$0xff] %v11633_v45  ;;  %v11641_v47 = vld [vmem:[%s11512_s9 + $0x78] sm:$0xff]  ;;  %v11646_v48 = vld [vmem:[%s11512_s9 + $0x80] sm:$0xff] }
  0xbd   : > { %17641 = vst [vmem:[#allocation39_spill] sm:$0xff] %v11638_v46  ;;  %17642 = vst [vmem:[#allocation40_spill] sm:$0xff] %v11641_v47  ;;  %v11649_v49 = vld [vmem:[%s11512_s9 + $0x88] sm:$0xff]  ;;  %v11654_v50 = vld [vmem:[%s11512_s9 + $0x90] sm:$0xff] }
  0xbe   : > { %714 = vadd.xlane.f32.xlu0 %v11598_v36  ;;  %716 = vadd.xlane.f32.xlu1 %v11601_v37  ;;  %17643 = vst [vmem:[#allocation41_spill] sm:$0xff] %v11646_v48  ;;  %17644 = vst [vmem:[#allocation42_spill] sm:$0xff] %v11649_v49  ;;  %v11657_v51 = vld [vmem:[%s11512_s9 + $0x98] sm:$0xff]  ;;  %v10000_v53 = vld [vmem:[%s11662_s27 + $0x15c] ss:$24 sps:$4 sm:$0xff]  }
  0xbf   : > { %17645 = vst [vmem:[#allocation43_spill] sm:$0xff] %v11654_v50  ;;  %17646 = vst [vmem:[#allocation44_spill] sm:$0xff] %v11657_v51  ;;  %v9998_v52 = vld [vmem:[%s11662_s27 + $0x154] ss:$24 sps:$4 sm:$0xff]   ;;  %v10002_v54 = vld [vmem:[%s11662_s27 + $0x150] ss:$24 sps:$4 sm:$0xff]   ;;  %1669 = vmatprep.subr.bf16.mxu1 %v10000_v53 }
  0xc0   : > { %1476 = vmatprep.subr.bf16.mxu0 %v9998_v52  ;;  %v10003_v55 = vld [vmem:[%s11662_s27 + $0x158] ss:$24 sps:$4 sm:$0xff]   ;;  %v11700_v15 = vld [vmem:[%s11512_s9 + $0xb0] sm:$0xff]  ;;  %v11713_v24 = vld [vmem:[%s11512_s9 + $0xb8] sm:$0xff] }
  0xc1   : > { %1477 = vmatpush1.bf16.msra.mxu0 %v10002_v54  ;;  %1670 = vmatpush1.bf16.msra.mxu1 %v10003_v55  ;;  %v11680_v4 = vld [vmem:[%s11512_s9 + $0xa0] sm:$0xff]  ;;  %v11691_v10 = vld [vmem:[%s11512_s9 + $0xa8] sm:$0xff]  ;;  %17649 = vst [vmem:[#allocation47_spill] sm:$0xff] %v11700_v15  ;;  %v10009_v20 = vld [vmem:[%s11662_s27 + $0x128] ss:$24 sps:$4 sm:$0xff]  }
  0xc2   : > { %718 = vadd.xlane.f32.xlu0 %v11606_v38  ;;  %720 = vadd.xlane.f32.xlu1 %v11609_v39  ;;  %17647 = vst [vmem:[#allocation45_spill] sm:$0xff] %v11680_v4  ;;  %17648 = vst [vmem:[#allocation46_spill] sm:$0xff] %v11691_v10  ;;  %v10004_v17 = vld [vmem:[%s11662_s27 + $0x124] ss:$24 sps:$4 sm:$0xff]   ;;  %v10008_v19 = vld [vmem:[%s11662_s27 + $0x120] ss:$24 sps:$4 sm:$0xff]  }
  0xc3   : > { %v10006_v18 = vld [vmem:[%s11662_s27 + $0x12c] ss:$24 sps:$4 sm:$0xff]   ;;  %17650 = vst [vmem:[#allocation48_spill] sm:$0xff] %v11713_v24  ;;  %1478 = vmatprep.subr.bf16.mxu0 %v10004_v17  ;;  %v10012_v27 = vld [vmem:[%s11662_s27 + $0xfc] ss:$24 sps:$4 sm:$0xff]  }
  0xc4   : > { %1671 = vmatprep.subr.bf16.mxu1 %v10006_v18  ;;  %v10010_v26 = vld [vmem:[%s11662_s27 + $0xf4] ss:$24 sps:$4 sm:$0xff]   ;;  %v10014_v28 = vld [vmem:[%s11662_s27 + $0xf0] ss:$24 sps:$4 sm:$0xff]   ;;  %v10016_v55 = vld [vmem:[%s11662_s27 + $0xc4] ss:$24 sps:$4 sm:$0xff]  }
  0xc5   : > { %1479 = vmatpush1.bf16.msra.mxu0 %v10008_v19  ;;  %1672 = vmatpush1.bf16.msra.mxu1 %v10009_v20  ;;  %v10015_v29 = vld [vmem:[%s11662_s27 + $0xf8] ss:$24 sps:$4 sm:$0xff]   ;;  %v10028_v17 = vld [vmem:[%s11662_s27 + $0x64] ss:$24 sps:$4 sm:$0xff]  }
  0xc6   : > { %722 = vadd.xlane.f32.xlu0 %v11614_v40  ;;  %724 = vadd.xlane.f32.xlu1 %v11617_v41  ;;  %v11726_v53 = vld [vmem:[%s11512_s9 + $0xc0] sm:$0xff] }
  0xc7   : > { %17651 = vst [vmem:[#allocation49_spill] sm:$0xff] %v11726_v53  ;;  %1480 = vmatprep.subr.bf16.mxu0 %v10010_v26  ;;  %1673 = vmatprep.subr.bf16.mxu1 %v10012_v27  ;;  %v10030_v18 = vld [vmem:[%s11662_s27 + $0x6c] ss:$24 sps:$4 sm:$0xff]  }
  0xc9   : > { %1481 = vmatpush1.bf16.msra.mxu0 %v10014_v28  ;;  %1674 = vmatpush1.bf16.msra.mxu1 %v10015_v29  ;;  %v11765_v28 = vld [vmem:[%s11512_s9 + $0xd8] sm:$0xff] }
  0xca   : > { %726 = vadd.xlane.f32.xlu0 %v11622_v42  ;;  %728 = vadd.xlane.f32.xlu1 %v11625_v43  ;;  %17654 = vst [vmem:[#allocation52_spill] sm:$0xff] %v11765_v28  ;;  %v10034_v29 = vld [vmem:[%s11662_s27 + $0x34] ss:$24 sps:$4 sm:$0xff]  }
  0xcb   : > { %1482 = vmatprep.subr.bf16.mxu0 %v10016_v55  ;;  %v10039_v55 = vld [vmem:[%s11662_s27 + $0x38] ss:$24 sps:$4 sm:$0xff]  }
  0xce   : > { %730 = vadd.xlane.f32.xlu0 %v11630_v44  ;;  %732 = vadd.xlane.f32.xlu1 %v11633_v45 }
  0xd2   : > { %734 = vadd.xlane.f32.xlu0 %v11638_v46  ;;  %736 = vadd.xlane.f32.xlu1 %v11641_v47 }
  0xd6   : > { %738 = vadd.xlane.f32.xlu0 %v11646_v48  ;;  %740 = vadd.xlane.f32.xlu1 %v11649_v49 }
  0xda   : > { %742 = vadd.xlane.f32.xlu0 %v11654_v50  ;;  %744 = vadd.xlane.f32.xlu1 %v11657_v51 }
 0x13f   : > { %v707_v56 = vpop.xlane.xlu0 %706  ;;  %v711_v57 = vpop.xlane.xlu1 %710 }
 0x140   : > { %v771_v58 = vmul.f32 0.0078125, %v707_v56  ;;  %v773_v60 = vmul.f32 0.0078125, %v711_v57  ;;  %v10018_v56 = vld [vmem:[%s11662_s27 + $0xcc] ss:$24 sps:$4 sm:$0xff]   ;;  %v10020_v57 = vld [vmem:[%s11662_s27 + $0xc0] ss:$24 sps:$4 sm:$0xff]  }
 0x141   : > { %1675 = vmatprep.subr.bf16.mxu1 %v10018_v56  ;;  %1483 = vmatpush1.bf16.msra.mxu0 %v10020_v57 }
 0x142   : > { %v11669_v59 = vsub.f32 %v11582_v32, %v771_v58  ;;  %v11677_v3 = vsub.f32 %v11585_v33, %v773_v60  ;;  %v10021_v58 = vld [vmem:[%s11662_s27 + $0xc8] ss:$24 sps:$4 sm:$0xff]  }
 0x143   : > { %v709_v61 = vpop.xlane.xlu0 %708  ;;  %v713_v62 = vpop.xlane.xlu1 %712  ;;  %1676 = vmatpush1.bf16.msra.mxu1 %v10021_v58 }
 0x144   : > { %v772_v63 = vmul.f32 0.0078125, %v709_v61  ;;  %v835_v0 = vmul.f32 %v11669_v59, %v11669_v59  ;;  %v774_v2 = vmul.f32 0.0078125, %v713_v62  ;;  %v837_v7 = vmul.f32 %v11677_v3, %v11677_v3 }
 0x146   : > { %867 = vadd.xlane.f32.xlu0 %v835_v0  ;;  %v11674_v1 = vsub.f32 %v11590_v34, %v772_v63  ;;  %v11688_v9 = vsub.f32 %v11593_v35, %v774_v2  ;;  %v11739_v63 = vld [vmem:[%s11512_s9 + $0xc8] sm:$0xff] }
 0x147   : > { %v715_v5 = vpop.xlane.xlu0 %714  ;;  %v717_v11 = vpop.xlane.xlu1 %716  ;;  %17652 = vst [vmem:[#allocation50_spill] sm:$0xff] %v11739_v63  ;;  %v10022_v2 = vld [vmem:[%s11662_s27 + $0x94] ss:$24 sps:$4 sm:$0xff]  }
 0x148   : > { %v836_v6 = vmul.f32 %v11674_v1, %v11674_v1  ;;  %v775_v8 = vmul.f32 0.0078125, %v715_v5  ;;  %v838_v12 = vmul.f32 %v11688_v9, %v11688_v9  ;;  %v776_v13 = vmul.f32 0.0078125, %v717_v11  ;;  %v10024_v5 = vld [vmem:[%s11662_s27 + $0x9c] ss:$24 sps:$4 sm:$0xff]   ;;  %1484 = vmatprep.subr.bf16.mxu0 %v10022_v2  ;;  %v10042_v2 = vld [vmem:[%s11662_s27 + $0xc] ss:$24 sps:$4 sm:$0xff]  }
 0x149   : > { %1677 = vmatprep.subr.bf16.mxu1 %v10024_v5  ;;  %v10044_v5 = vld [vmem:[%s11662_s27] ss:$24 sps:$4 sm:$0xff]  }
 0x14a   : > { %746 = vadd.xlane.f32.xlu0 %v11680_v4  ;;  %869 = vadd.xlane.f32.xlu1 %v836_v6  ;;  %v11697_v14 = vsub.f32 %v11598_v36, %v775_v8  ;;  %v11710_v23 = vsub.f32 %v11601_v37, %v776_v13  ;;  %v10027_v8 = vld [vmem:[%s11662_s27 + $0x98] ss:$24 sps:$4 sm:$0xff]  }
 0x14b   : > { %v719_v16 = vpop.xlane.xlu0 %718  ;;  %v721_v25 = vpop.xlane.xlu1 %720  ;;  %1678 = vmatpush1.bf16.msra.mxu1 %v10027_v8 }
 0x14c   : > { %v839_v21 = vmul.f32 %v11697_v14, %v11697_v14  ;;  %v777_v22 = vmul.f32 0.0078125, %v719_v16  ;;  %v840_v30 = vmul.f32 %v11710_v23, %v11710_v23  ;;  %v778_v31 = vmul.f32 0.0078125, %v721_v25  ;;  %v11752_v16 = vld [vmem:[%s11512_s9 + $0xd0] sm:$0xff]  ;;  %1679 = vmatprep.subr.bf16.mxu1 %v10030_v18 }
 0x14d   : > { %17653 = vst [vmem:[#allocation51_spill] sm:$0xff] %v11752_v16 }
 0x14e   : > { %871 = vadd.xlane.f32.xlu0 %v837_v7  ;;  %748 = vadd.xlane.f32.xlu1 %v11691_v10  ;;  %v11723_v52 = vsub.f32 %v11606_v38, %v777_v22  ;;  %v11736_v62 = vsub.f32 %v11609_v39, %v778_v31  ;;  %v10026_v7 = vld [vmem:[%s11662_s27 + $0x90] ss:$24 sps:$4 sm:$0xff]  }
 0x14f   : > { %v723_v54 = vpop.xlane.xlu0 %722  ;;  %v725_v0 = vpop.xlane.xlu1 %724  ;;  %1485 = vmatpush1.bf16.msra.mxu0 %v10026_v7  ;;  %v10033_v22 = vld [vmem:[%s11662_s27 + $0x68] ss:$24 sps:$4 sm:$0xff]  }
 0x150   : > { %v841_v60 = vmul.f32 %v11723_v52, %v11723_v52  ;;  %v779_v61 = vmul.f32 0.0078125, %v723_v54  ;;  %v842_v11 = vmul.f32 %v11736_v62, %v11736_v62  ;;  %1486 = vmatprep.subr.bf16.mxu0 %v10028_v17  ;;  %1680 = vmatpush1.bf16.msra.mxu1 %v10033_v22  ;;  %v10038_v54 = vld [vmem:[%s11662_s27 + $0x30] ss:$24 sps:$4 sm:$0xff]  }
 0x152   : > { %750 = vadd.xlane.f32.xlu0 %v11700_v15  ;;  %873 = vadd.xlane.f32.xlu1 %v838_v12  ;;  %v780_v12 = vmul.f32 0.0078125, %v725_v0  ;;  %v11749_v13 = vsub.f32 %v11614_v40, %v779_v61  ;;  %v10040_v0 = vld [vmem:[%s11662_s27 + $0x4] ss:$24 sps:$4 sm:$0xff]  }
 0x153   : > { %v727_v6 = vpop.xlane.xlu0 %726  ;;  %v729_v19 = vpop.xlane.xlu1 %728 }
 0x154   : > { %v843_v25 = vmul.f32 %v11749_v13, %v11749_v13  ;;  %v781_v26 = vmul.f32 0.0078125, %v727_v6  ;;  %v11762_v27 = vsub.f32 %v11617_v41, %v780_v12  ;;  %v782_v57 = vmul.f32 0.0078125, %v729_v19  ;;  %v10045_v6 = vld [vmem:[%s11662_s27 + $0x8] ss:$24 sps:$4 sm:$0xff]   ;;  %v11791_v12 = vld [vmem:[%s11512_s9 + $0xe8] sm:$0xff] }
 0x155   : > { %17656 = vst [vmem:[#allocation54_spill] sm:$0xff] %v11791_v12 }
 0x156   : > { %752 = vadd.xlane.f32.xlu1 %v11713_v24  ;;  %875 = vadd.xlane.f32.xlu0 %v839_v21  ;;  %v10032_v21 = vld [vmem:[%s11662_s27 + $0x60] ss:$24 sps:$4 sm:$0xff]   ;;  %v844_v56 = vmul.f32 %v11762_v27, %v11762_v27  ;;  %v11775_v58 = vsub.f32 %v11622_v42, %v781_v26 }
 0x157   : > { %v731_v20 = vpop.xlane.xlu0 %730  ;;  %1487 = vmatpush1.bf16.msra.mxu0 %v10032_v21  ;;  %v733_v31 = vpop.xlane.xlu1 %732  ;;  %v17265_v21 = vmov 0   ;;  %v11802_v26 = vld [vmem:[%s11512_s9 + $0xf0] sm:$0xff] }
 0x158   : > { %1488 = vmatprep.subr.bf16.mxu0 %v10034_v29  ;;  %v845_v7 = vmul.f32 %v11775_v58, %v11775_v58  ;;  %v783_v8 = vmul.f32 0.0078125, %v731_v20  ;;  %v784_v18 = vmul.f32 0.0078125, %v733_v31  ;;  %1508 = vmatprep.mubr.bf16.mxu0 %v17265_v21  ;;  %17657 = vst [vmem:[#allocation55_spill] sm:$0xff] %v11802_v26 }
 0x159   : > { %1701 = vmatprep.mubr.bf16.mxu1 %v17265_v21 }
 0x15a   : > { %877 = vadd.xlane.f32.xlu1 %v840_v30  ;;  %754 = vadd.xlane.f32.xlu0 %v11726_v53  ;;  %v10036_v30 = vld [vmem:[%s11662_s27 + $0x3c] ss:$24 sps:$4 sm:$0xff]  }
 0x15b   : > { %v735_v61 = vpop.xlane.xlu0 %734  ;;  %1681 = vmatprep.subr.bf16.mxu1 %v10036_v30  ;;  %1489 = vmatpush1.bf16.msra.mxu0 %v10038_v54  ;;  %v737_v17 = vpop.xlane.xlu1 %736  ;;  %v11805_v30 = vsub.f32 %v11633_v45, %v784_v18 }
 0x15c   : > { %1682 = vmatpush1.bf16.msra.mxu1 %v10039_v55  ;;  %1490 = vmatprep.subr.bf16.mxu0 %v10040_v0  ;;  %v785_v22 = vmul.f32 0.0078125, %v735_v61  ;;  %v786_v29 = vmul.f32 0.0078125, %v737_v17 }
 0x15d   : > { %1683 = vmatprep.subr.bf16.mxu1 %v10042_v2  ;;  %v848_v0 = vmul.f32 %v11805_v30, %v11805_v30 }
 0x15e   : > { %756 = vadd.xlane.f32.xlu1 %v11739_v63  ;;  %879 = vadd.xlane.f32.xlu0 %v841_v60  ;;  %v11778_v60 = vld [vmem:[%s11512_s9 + $0xe0] sm:$0xff]  ;;  %v11819_v2 = vsub.f32 %v11641_v47, %v786_v29 }
 0x15f   : > { %17655 = vst [vmem:[#allocation53_spill] sm:$0xff] %v11778_v60  ;;  %1491 = vmatpush1.bf16.msra.mxu0 %v10044_v5  ;;  %v739_v19 = vpop.xlane.xlu0 %738  ;;  %v741_v31 = vpop.xlane.xlu1 %740 }
 0x160   : > { %1684 = vmatpush1.bf16.msra.mxu1 %v10045_v6  ;;  %v787_v55 = vmul.f32 0.0078125, %v739_v19  ;;  %v788_v6 = vmul.f32 0.0078125, %v741_v31  ;;  %v850_v18 = vmul.f32 %v11819_v2, %v11819_v2 }
 0x162   : > { %881 = vadd.xlane.f32.xlu1 %v842_v11  ;;  %758 = vadd.xlane.f32.xlu0 %v11752_v16  ;;  %v11788_v11 = vsub.f32 %v11625_v43, %v782_v57  ;;  %v11814_v57 = vld [vmem:[%s11512_s9 + $0xf8] sm:$0xff] }
 0x163   : > { %17658 = vst [vmem:[#allocation56_spill] sm:$0xff] %v11814_v57  ;;  %v743_v61 = vpop.xlane.xlu0 %742  ;;  %v745_v17 = vpop.xlane.xlu1 %744 }
 0x164   : > { %v846_v20 = vmul.f32 %v11788_v11, %v11788_v11 }
 0x166   : > { %760 = vadd.xlane.f32.xlu1 %v11765_v28  ;;  %883 = vadd.xlane.f32.xlu0 %v843_v25  ;;  %v11799_v25 = vsub.f32 %v11630_v44, %v783_v8  ;;  %v11825_v8 = vsub.f32 %v11646_v48, %v787_v55 }
 0x168   : > { %v847_v54 = vmul.f32 %v11799_v25, %v11799_v25  ;;  %v851_v19 = vmul.f32 %v11825_v8, %v11825_v8 }
 0x16a   : > { %885 = vadd.xlane.f32.xlu1 %v844_v56  ;;  %762 = vadd.xlane.f32.xlu0 %v11778_v60  ;;  %v11811_v56 = vsub.f32 %v11638_v46, %v785_v22  ;;  %v11832_v22 = vsub.f32 %v11649_v49, %v788_v6 }
 0x16c   : > { %v849_v5 = vmul.f32 %v11811_v56, %v11811_v56  ;;  %v852_v31 = vmul.f32 %v11832_v22, %v11832_v22 }
 0x16e   : > { %764 = vadd.xlane.f32.xlu1 %v11791_v12  ;;  %887 = vadd.xlane.f32.xlu0 %v845_v7  ;;  %v789_v7 = vmul.f32 0.0078125, %v743_v61 }
 0x170   : > { %v11835_v29 = vsub.f32 %v11654_v50, %v789_v7 }
 0x172   : > { %889 = vadd.xlane.f32.xlu1 %v846_v20  ;;  %766 = vadd.xlane.f32.xlu0 %v11802_v26  ;;  %v790_v20 = vmul.f32 0.0078125, %v745_v17 }
 0x174   : > { %v11842_v55 = vsub.f32 %v11657_v51, %v790_v20 }
 0x176   : > { %768 = vadd.xlane.f32.xlu1 %v11814_v57  ;;  %891 = vadd.xlane.f32.xlu0 %v847_v54  ;;  %v853_v54 = vmul.f32 %v11835_v29, %v11835_v29  ;;  %v854_v61 = vmul.f32 %v11842_v55, %v11842_v55 }
 0x17a   : > { %893 = vadd.xlane.f32.xlu1 %v848_v0  ;;  %895 = vadd.xlane.f32.xlu0 %v849_v5 }
 0x17e   : > { %897 = vadd.xlane.f32.xlu1 %v850_v18  ;;  %899 = vadd.xlane.f32.xlu0 %v851_v19 }
 0x182   : > { %901 = vadd.xlane.f32.xlu1 %v852_v31  ;;  %903 = vadd.xlane.f32.xlu0 %v853_v54 }
 0x186   : > { %905 = vadd.xlane.f32.xlu1 %v854_v61 }
 0x1cf   : > { %v868_v0 = vpop.xlane.xlu0 %867 }
 0x1d0   : > { %v931_v5 = vmul.f32 0.0078125, %v868_v0 }
 0x1d2   : > { %v963_v6 = vadd.f32 1e-05, %v931_v5 }
 0x1d3   : > { %v870_v7 = vpop.xlane.xlu1 %869  ;;  %v747_v17 = vpop.xlane.xlu0 %746 }
 0x1d4   : > { %10070 = vrsqrt.f32 %v963_v6  ;;  %v932_v18 = vmul.f32 0.0078125, %v870_v7  ;;  %v791_v19 = vmul.f32 0.0078125, %v747_v17 }
 0x1d6   : > { %v964_v21 = vadd.f32 1e-05, %v932_v18  ;;  %v11847_v50 = vsub.f32 %v11680_v4, %v791_v19  ;;  %v11881_v4 = vld [vmem:[%s704_s14] ss:$0 sm:$0xff] }
 0x1d7   : > { %v749_v20 = vpop.xlane.xlu1 %748  ;;  %v872_v51 = vpop.xlane.xlu0 %871 }
 0x1d8   : > { %10072 = vrsqrt.f32 %v964_v21  ;;  %v792_v31 = vmul.f32 0.0078125, %v749_v20  ;;  %v933_v54 = vmul.f32 0.0078125, %v872_v51  ;;  %v855_v61 = vmul.f32 %v11847_v50, %v11847_v50 }
 0x1da   : > { %v965_v49 = vadd.f32 1e-05, %v933_v54  ;;  %907 = vadd.xlane.f32.xlu0 %v855_v61  ;;  %v11852_v0 = vsub.f32 %v11691_v10, %v792_v31 }
 0x1db   : > { %v874_v5 = vpop.xlane.xlu1 %873  ;;  %v751_v6 = vpop.xlane.xlu0 %750 }
 0x1dc   : > { %10074 = vrsqrt.f32 %v965_v49  ;;  %v934_v7 = vmul.f32 0.0078125, %v874_v5  ;;  %v793_v17 = vmul.f32 0.0078125, %v751_v6  ;;  %v856_v18 = vmul.f32 %v11852_v0, %v11852_v0 }
 0x1de   : > { %v966_v19 = vadd.f32 1e-05, %v934_v7  ;;  %909 = vadd.xlane.f32.xlu1 %v856_v18  ;;  %v11857_v51 = vsub.f32 %v11700_v15, %v793_v17 }
 0x1df   : > { %v753_v21 = vpop.xlane.xlu1 %752  ;;  %v876_v20 = vpop.xlane.xlu0 %875 }
 0x1e0   : > { %10076 = vrsqrt.f32 %v966_v19  ;;  %v794_v54 = vmul.f32 0.0078125, %v753_v21  ;;  %v935_v31 = vmul.f32 0.0078125, %v876_v20  ;;  %v857_v49 = vmul.f32 %v11857_v51, %v11857_v51  ;;  %v11868_v21 = vld [vmem:[%s702_s7] ss:$0 sm:$0xff] }
 0x1e1   : > { %v10071_v61 = vpop.eup %10070 }
 0x1e2   : > { %v967_v5 = vadd.f32 1e-05, %v935_v31  ;;  %911 = vadd.xlane.f32.xlu0 %v857_v49  ;;  %v11862_v6 = vsub.f32 %v11713_v24, %v794_v54  ;;  %v1027_v17 = vmul.f32 %v10071_v61, %v11669_v59 }
 0x1e3   : > { %v878_v7 = vpop.xlane.xlu1 %877  ;;  %v755_v18 = vpop.xlane.xlu0 %754 }
 0x1e4   : > { %10078 = vrsqrt.f32 %v967_v5  ;;  %v936_v15 = vmul.f32 0.0078125, %v878_v7  ;;  %v795_v10 = vmul.f32 0.0078125, %v755_v18  ;;  %v858_v19 = vmul.f32 %v11862_v6, %v11862_v6 }
 0x1e5   : > { %v10073_v20 = vpop.eup %10072  ;;  %v1065_v5 = vmul.f32 %v11868_v21, %v1027_v17 }
 0x1e6   : > { %v968_v54 = vadd.f32 1e-05, %v936_v15  ;;  %v11875_v31 = vsub.f32 %v11726_v53, %v795_v10  ;;  %913 = vadd.xlane.f32.xlu1 %v858_v19  ;;  %v1028_v59 = vmul.f32 %v10073_v20, %v11674_v1 }
 0x1e7   : > { %v757_v49 = vpop.xlane.xlu1 %756  ;;  %v880_v61 = vpop.xlane.xlu0 %879  ;;  %v1103_v17 = vadd.f32 %v11881_v4, %v1065_v5 }
 0x1e8   : > { %10080 = vrsqrt.f32 %v968_v54  ;;  %v796_v7 = vmul.f32 0.0078125, %v757_v49  ;;  %v937_v18 = vmul.f32 0.0078125, %v880_v61  ;;  %v859_v24 = vmul.f32 %v11875_v31, %v11875_v31 }
 0x1e9   : > { %v10075_v48 = vpop.eup %10074  ;;  %v1066_v15 = vmul.f32 %v11868_v21, %v1028_v59 }
 0x1ea   : > { %v11885_v10 = vsub.f32 %v11739_v63, %v796_v7  ;;  %v969_v19 = vadd.f32 1e-05, %v937_v18  ;;  %915 = vadd.xlane.f32.xlu0 %v859_v24  ;;  %v1029_v49 = vmul.f32 %v10075_v48, %v11677_v3 }
 0x1eb   : > { %v882_v1 = vpop.xlane.xlu1 %881  ;;  %v759_v20 = vpop.xlane.xlu0 %758  ;;  %v1104_v54 = vadd.f32 %v11881_v4, %v1066_v15 }
 0x1ec   : > { %10082 = vrsqrt.f32 %v969_v19  ;;  %v938_v61 = vmul.f32 0.0078125, %v882_v1  ;;  %v797_v53 = vmul.f32 0.0078125, %v759_v20  ;;  %v860_v47 = vmul.f32 %v11885_v10, %v11885_v10 }
 0x1ed   : > { %v10077_v59 = vpop.eup %10076  ;;  %v11892_v46 = vpack.c.bf16 %v1104_v54, %v1103_v17  ;;  %v1067_v18 = vmul.f32 %v11868_v21, %v1029_v49  ;;  %v17659_v20 = vmov 0  }
 0x1ee   : > { %v970_v7 = vadd.f32 1e-05, %v938_v61  ;;  %v11895_v24 = vsub.f32 %v11752_v16, %v797_v53  ;;  %917 = vadd.xlane.f32.xlu1 %v860_v47  ;;  %v1030_v5 = vmul.f32 %v10077_v59, %v11688_v9 }
 0x1ef   : > { %1509 = vmatmul.mubr.bf16.vlgmr.msra.gmra.mxu0 %v11892_v46  ;;  %1702 = vmatmul.mubr.bf16.vlgmr.msra.gmra.mxu1 %v11892_v46  ;;  %v761_v48 = vpop.xlane.xlu1 %760  ;;  %v884_v3 = vpop.xlane.xlu0 %883  ;;  %v1105_v61 = vadd.f32 %v11881_v4, %v1067_v18 }
 0x1f0   : > { %10084 = vrsqrt.f32 %v970_v7  ;;  %v798_v15 = vmul.f32 0.0078125, %v761_v48  ;;  %v939_v19 = vmul.f32 0.0078125, %v884_v3  ;;  %v861_v1 = vmul.f32 %v11895_v24, %v11895_v24  ;;  %1518 = vmatprep.mubr.bf16.mxu0 %v17659_v20  ;;  %1711 = vmatprep.mubr.bf16.mxu1 %v17659_v20 }
 0x1f1   : > { %v10079_v47 = vpop.eup %10078  ;;  %v1068_v9 = vmul.f32 %v11868_v21, %v1030_v5 }
 0x1f2   : > { %v11907_v53 = vsub.f32 %v11765_v28, %v798_v15  ;;  %v971_v17 = vadd.f32 1e-05, %v939_v19  ;;  %919 = vadd.xlane.f32.xlu0 %v861_v1  ;;  %v1031_v7 = vmul.f32 %v10079_v47, %v11697_v14 }
 0x1f3   : > { %v886_v54 = vpop.xlane.xlu1 %885  ;;  %v763_v49 = vpop.xlane.xlu0 %762  ;;  %v1106_v59 = vadd.f32 %v11881_v4, %v1068_v9 }
 0x1f4   : > { %10086 = vrsqrt.f32 %v971_v17  ;;  %v940_v48 = vmul.f32 0.0078125, %v886_v54  ;;  %v799_v3 = vmul.f32 0.0078125, %v763_v49  ;;  %v862_v16 = vmul.f32 %v11907_v53, %v11907_v53 }
 0x1f5   : > { %v10081_v5 = vpop.eup %10080  ;;  %v11914_v63 = vpack.c.bf16 %v1106_v59, %v1105_v61  ;;  %v1069_v47 = vmul.f32 %v11868_v21, %v1031_v7 }
 0x1f6   : > { %v972_v15 = vadd.f32 1e-05, %v940_v48  ;;  %v11917_v19 = vsub.f32 %v11778_v60, %v799_v3  ;;  %921 = vadd.xlane.f32.xlu1 %v862_v16  ;;  %v1032_v18 = vmul.f32 %v10081_v5, %v11710_v23 }
 0x1f7   : > { %1519 = vmatmul.mubr.bf16.gmra.mxu0 %v11914_v63  ;;  %1712 = vmatmul.mubr.bf16.gmra.mxu1 %v11914_v63  ;;  %v765_v14 = vpop.xlane.xlu1 %764  ;;  %v888_v1 = vpop.xlane.xlu0 %887  ;;  %v1107_v48 = vadd.f32 %v11881_v4, %v1069_v47 }
 0x1f8   : > { %10088 = vrsqrt.f32 %v972_v15  ;;  %v800_v9 = vmul.f32 0.0078125, %v765_v14  ;;  %v941_v17 = vmul.f32 0.0078125, %v888_v1  ;;  %v863_v54 = vmul.f32 %v11917_v19, %v11917_v19  ;;  %1528 = vmatprep.mubr.bf16.mxu0 %v17659_v20  ;;  %1721 = vmatprep.mubr.bf16.mxu1 %v17659_v20 }
 0x1f9   : > { %v10083_v16 = vpop.eup %10082  ;;  %v1070_v23 = vmul.f32 %v11868_v21, %v1032_v18 }
 0x1fa   : > { %v11929_v49 = vsub.f32 %v11791_v12, %v800_v9  ;;  %v973_v61 = vadd.f32 1e-05, %v941_v17  ;;  %923 = vadd.xlane.f32.xlu0 %v863_v54  ;;  %v1033_v5 = vmul.f32 %v10083_v16, %v11723_v52 }
 0x1fb   : > { %v890_v59 = vpop.xlane.xlu1 %889  ;;  %v767_v7 = vpop.xlane.xlu0 %766  ;;  %v1108_v3 = vadd.f32 %v11881_v4, %v1070_v23 }
 0x1fc   : > { %10090 = vrsqrt.f32 %v973_v61  ;;  %v942_v15 = vmul.f32 0.0078125, %v890_v59  ;;  %v801_v14 = vmul.f32 0.0078125, %v767_v7  ;;  %v864_v1 = vmul.f32 %v11929_v49, %v11929_v49 }
 0x1fd   : > { %v10085_v18 = vpop.eup %10084  ;;  %v11936_v60 = vpack.c.bf16 %v1108_v3, %v1107_v48  ;;  %v1071_v16 = vmul.f32 %v11868_v21, %v1033_v5 }
 0x1fe   : > { %v974_v9 = vadd.f32 1e-05, %v942_v15  ;;  %v11939_v17 = vsub.f32 %v11802_v26, %v801_v14  ;;  %925 = vadd.xlane.f32.xlu1 %v864_v1  ;;  %v1034_v47 = vmul.f32 %v10085_v18, %v11736_v62 }
 0x1ff   : > { %1529 = vmatmul.mubr.bf16.gmra.mxu0 %v11936_v60  ;;  %1722 = vmatmul.mubr.bf16.gmra.mxu1 %v11936_v60  ;;  %v769_v52 = vpop.xlane.xlu1 %768  ;;  %v892_v54 = vpop.xlane.xlu0 %891  ;;  %v1109_v1 = vadd.f32 %v11881_v4, %v1071_v16 }
 0x200   : > { %10092 = vrsqrt.f32 %v974_v9  ;;  %v802_v23 = vmul.f32 0.0078125, %v769_v52  ;;  %v943_v61 = vmul.f32 0.0078125, %v892_v54  ;;  %v865_v59 = vmul.f32 %v11939_v17, %v11939_v17  ;;  %1538 = vmatprep.mubr.bf16.mxu0 %v17659_v20  ;;  %1731 = vmatprep.mubr.bf16.mxu1 %v17659_v20 }
 0x201   : > { %v10087_v7 = vpop.eup %10086  ;;  %v1072_v62 = vmul.f32 %v11868_v21, %v1034_v47 }
 0x202   : > { %v11951_v48 = vsub.f32 %v11814_v57, %v802_v23  ;;  %v975_v3 = vadd.f32 1e-05, %v943_v61  ;;  %927 = vadd.xlane.f32.xlu0 %v865_v59  ;;  %v1035_v5 = vmul.f32 %v10087_v7, %v11749_v13 }
 0x203   : > { %v894_v15 = vpop.xlane.xlu1 %893  ;;  %v896_v14 = vpop.xlane.xlu0 %895  ;;  %v1110_v18 = vadd.f32 %v11881_v4, %v1072_v62 }
 0x204   : > { %10094 = vrsqrt.f32 %v975_v3  ;;  %v944_v9 = vmul.f32 0.0078125, %v894_v15  ;;  %v945_v52 = vmul.f32 0.0078125, %v896_v14  ;;  %v866_v54 = vmul.f32 %v11951_v48, %v11951_v48 }
 0x205   : > { %v10089_v47 = vpop.eup %10088  ;;  %v11958_v26 = vpack.c.bf16 %v1110_v18, %v1109_v1  ;;  %v1073_v13 = vmul.f32 %v11868_v21, %v1035_v5 }
 0x206   : > { %v976_v23 = vadd.f32 1e-05, %v944_v9  ;;  %929 = vadd.xlane.f32.xlu1 %v866_v54  ;;  %v1036_v61 = vmul.f32 %v10089_v47, %v11762_v27  ;;  %v977_v59 = vadd.f32 1e-05, %v945_v52 }
 0x207   : > { %1539 = vmatmul.mubr.bf16.gmra.mxu0 %v11958_v26  ;;  %1732 = vmatmul.mubr.bf16.gmra.mxu1 %v11958_v26  ;;  %v898_v16 = vpop.xlane.xlu1 %897  ;;  %v900_v62 = vpop.xlane.xlu0 %899  ;;  %v1111_v27 = vadd.f32 %v11881_v4, %v1073_v13 }
 0x208   : > { %10096 = vrsqrt.f32 %v976_v23  ;;  %v946_v7 = vmul.f32 0.0078125, %v898_v16  ;;  %1548 = vmatprep.mubr.bf16.mxu0 %v17659_v20  ;;  %1741 = vmatprep.mubr.bf16.mxu1 %v17659_v20  ;;  %v1074_v3 = vmul.f32 %v11868_v21, %v1036_v61  ;;  %v947_v18 = vmul.f32 0.0078125, %v900_v62 }
 0x209   : > { %v10091_v15 = vpop.eup %10090  ;;  %10098 = vrsqrt.f32 %v977_v59 }
 0x20a   : > { %v978_v14 = vadd.f32 1e-05, %v946_v7  ;;  %v1112_v5 = vadd.f32 %v11881_v4, %v1074_v3  ;;  %v1037_v1 = vmul.f32 %v10091_v15, %v11775_v58  ;;  %v979_v13 = vadd.f32 1e-05, %v947_v18  ;;  %v10048_v3 = vld [vmem:[%s11662_s27 + $0x164] ss:$24 sps:$4 sm:$0xff]  }
 0x20b   : > { %v902_v9 = vpop.xlane.xlu1 %901  ;;  %v904_v59 = vpop.xlane.xlu0 %903  ;;  %1862 = vmatprep.subr.bf16.mxu0 %v10048_v3  ;;  %v10052_v3 = vld [vmem:[%s11662_s27 + $0x100] ss:$24 sps:$4 sm:$0xff]  }
 0x20c   : > { %10100 = vrsqrt.f32 %v978_v14  ;;  %v948_v52 = vmul.f32 0.0078125, %v902_v9  ;;  %v11970_v54 = vpack.c.bf16 %v1112_v5, %v1111_v27  ;;  %v1075_v16 = vmul.f32 %v11868_v21, %v1037_v1  ;;  %v10046_v5 = vld [vmem:[%s11662_s27 + $0x160] ss:$24 sps:$4 sm:$0xff]   ;;  %v10051_v9 = vld [vmem:[%s11662_s27 + $0x134] ss:$24 sps:$4 sm:$0xff]  }
 0x20d   : > { %v10093_v47 = vpop.eup %10092  ;;  %v949_v1 = vmul.f32 0.0078125, %v904_v59  ;;  %1863 = vmatpush1.bf16.msra.mxu0 %v10046_v5 }
 0x20e   : > { %v980_v23 = vadd.f32 1e-05, %v948_v52  ;;  %v1038_v61 = vmul.f32 %v10093_v47, %v11788_v11  ;;  %v1113_v15 = vadd.f32 %v11881_v4, %v1075_v16  ;;  %1864 = vmatprep.subr.bf16.mxu0 %v10051_v9 }
 0x20f   : > { %1549 = vmatmul.mubr.bf16.gmra.mxu0 %v11970_v54  ;;  %1742 = vmatmul.mubr.bf16.gmra.mxu1 %v11970_v54  ;;  %v906_v58 = vpop.xlane.xlu1 %905 }
 0x210   : > { %1558 = vmatprep.mubr.bf16.mxu0 %v17659_v20  ;;  %1751 = vmatprep.mubr.bf16.mxu1 %v17659_v20  ;;  %v1076_v7 = vmul.f32 %v11868_v21, %v1038_v61  ;;  %10102 = vrsqrt.f32 %v980_v23  ;;  %v950_v11 = vmul.f32 0.0078125, %v906_v58  ;;  %v10049_v23 = vld [vmem:[%s11662_s27 + $0x130] ss:$24 sps:$4 sm:$0xff]  }
 0x211   : > { %v10095_v62 = vpop.eup %10094  ;;  %10104 = vrsqrt.f32 %v979_v13  ;;  %1865 = vmatpush1.bf16.msra.mxu0 %v10049_v23  ;;  %v10060_v23 = vld [vmem:[%s11662_s27 + $0xa4] ss:$24 sps:$4 sm:$0xff]  }
 0x212   : > { %v1114_v14 = vadd.f32 %v11881_v4, %v1076_v7  ;;  %v1039_v27 = vmul.f32 %v10095_v62, %v11799_v25  ;;  %v982_v47 = vadd.f32 1e-05, %v950_v11  ;;  %v981_v25 = vadd.f32 1e-05, %v949_v1  ;;  %v10055_v1 = vld [vmem:[%s11662_s27 + $0xd0] ss:$24 sps:$4 sm:$0xff]  }
 0x214   : > { %v11984_v18 = vpack.c.bf16 %v1114_v14, %v1113_v15  ;;  %v1077_v16 = vmul.f32 %v11868_v21, %v1039_v27  ;;  %10106 = vrsqrt.f32 %v982_v47  ;;  %v10057_v15 = vld [vmem:[%s11662_s27 + $0xd4] ss:$24 sps:$4 sm:$0xff]  }
 0x215   : > { %v10097_v52 = vpop.eup %10096  ;;  %10108 = vrsqrt.f32 %v981_v25 }
 0x216   : > { %v1040_v61 = vmul.f32 %v10097_v52, %v11805_v30  ;;  %v10099_v13 = vpop.eup %10098  ;;  %v10054_v30 = vld [vmem:[%s11662_s27 + $0x104] ss:$24 sps:$4 sm:$0xff]   ;;  %v1115_v7 = vadd.f32 %v11881_v4, %v1077_v16  ;;  %v10063_v16 = vld [vmem:[%s11662_s27 + $0x74] ss:$24 sps:$4 sm:$0xff]  }
 0x217   : > { %1559 = vmatmul.mubr.bf16.gmra.mxu0 %v11984_v18  ;;  %1752 = vmatmul.mubr.bf16.gmra.mxu1 %v11984_v18  ;;  %v1041_v14 = vmul.f32 %v10099_v13, %v11811_v56 }
 0x218   : > { %1568 = vmatprep.mubr.bf16.mxu0 %v17659_v20  ;;  %1761 = vmatprep.mubr.bf16.mxu1 %v17659_v20  ;;  %v1078_v58 = vmul.f32 %v11868_v21, %v1040_v61  ;;  %v10058_v61 = vld [vmem:[%s11662_s27 + $0xa0] ss:$24 sps:$4 sm:$0xff]  }
 0x219   : > { %v10101_v59 = vpop.eup %10100  ;;  %1866 = vmatprep.subr.bf16.mxu0 %v10054_v30  ;;  %v10061_v30 = vld [vmem:[%s11662_s27 + $0x70] ss:$24 sps:$4 sm:$0xff]  }
 0x21a   : > { %v1116_v62 = vadd.f32 %v11881_v4, %v1078_v58  ;;  %v1042_v11 = vmul.f32 %v10101_v59, %v11819_v2  ;;  %1867 = vmatpush1.bf16.msra.mxu0 %v10052_v3  ;;  %v1079_v2 = vmul.f32 %v11868_v21, %v1041_v14  ;;  %v10066_v3 = vld [vmem:[%s11662_s27 + $0x44] ss:$24 sps:$4 sm:$0xff]  }
 0x21b   : > { %1868 = vmatprep.subr.bf16.mxu0 %v10057_v15  ;;  %v10064_v15 = vld [vmem:[%s11662_s27 + $0x40] ss:$24 sps:$4 sm:$0xff]  }
 0x21c   : > { %v12002_v27 = vpack.c.bf16 %v1116_v62, %v1115_v7  ;;  %v1080_v5 = vmul.f32 %v11868_v21, %v1042_v11  ;;  %v1117_v25 = vadd.f32 %v11881_v4, %v1079_v2  ;;  %v10069_v2 = vld [vmem:[%s11662_s27 + $0x14] ss:$24 sps:$4 sm:$0xff]  }
 0x21d   : > { %v10103_v9 = vpop.eup %10102 }
 0x21e   : > { %v10105_v56 = vpop.eup %10104  ;;  %v1118_v52 = vadd.f32 %v11881_v4, %v1080_v5  ;;  %v1044_v47 = vmul.f32 %v10103_v9, %v11832_v22  ;;  %1869 = vmatpush1.bf16.msra.mxu0 %v10055_v1 }
 0x21f   : > { %1569 = vmatmul.mubr.bf16.gmra.mxu0 %v12002_v27  ;;  %1762 = vmatmul.mubr.bf16.gmra.mxu1 %v12002_v27  ;;  %v1043_v13 = vmul.f32 %v10105_v56, %v11825_v8  ;;  %v10067_v56 = vld [vmem:[%s11662_s27 + $0x10] ss:$24 sps:$4 sm:$0xff]  }
 0x220   : > { %1578 = vmatprep.mubr.bf16.mxu0 %v17659_v20  ;;  %1771 = vmatprep.mubr.bf16.mxu1 %v17659_v20  ;;  %v12018_v58 = vpack.c.bf16 %v1118_v52, %v1117_v25  ;;  %v1082_v59 = vmul.f32 %v11868_v21, %v1044_v47 }
 0x221   : > { %1870 = vmatprep.subr.bf16.mxu0 %v10060_v23  ;;  %v10107_v7 = vpop.eup %10106  ;;  %v1081_v22 = vmul.f32 %v11868_v21, %v1043_v13 }
 0x222   : > { %1871 = vmatpush1.bf16.msra.mxu0 %v10058_v61  ;;  %v10109_v8 = vpop.eup %10108  ;;  %v1120_v62 = vadd.f32 %v11881_v4, %v1082_v59  ;;  %v1046_v11 = vmul.f32 %v10107_v7, %v11842_v55 }
 0x223   : > { %1872 = vmatprep.subr.bf16.mxu0 %v10063_v16  ;;  %v1119_v14 = vadd.f32 %v11881_v4, %v1081_v22  ;;  %v1045_v5 = vmul.f32 %v10109_v8, %v11835_v29 }
 0x224   : > { %v1084_v9 = vmul.f32 %v11868_v21, %v1046_v11 }
 0x225   : > { %v12033_v1 = vpack.c.bf16 %v1120_v62, %v1119_v14  ;;  %v1083_v55 = vmul.f32 %v11868_v21, %v1045_v5 }
 0x226   : > { %1873 = vmatpush1.bf16.msra.mxu0 %v10061_v30  ;;  %v1122_v29 = vadd.f32 %v11881_v4, %v1084_v9 }
 0x227   : > { %1579 = vmatmul.mubr.bf16.gmra.mxu0 %v12018_v58  ;;  %1772 = vmatmul.mubr.bf16.gmra.mxu1 %v12018_v58  ;;  %v1121_v52 = vadd.f32 %v11881_v4, %v1083_v55 }
 0x228   : > { %1588 = vmatprep.mubr.bf16.mxu0 %v17659_v20  ;;  %1781 = vmatprep.mubr.bf16.mxu1 %v17659_v20 }
 0x229   : > { %1874 = vmatprep.subr.bf16.mxu0 %v10066_v3  ;;  %v12045_v47 = vpack.c.bf16 %v1122_v29, %v1121_v52 }
 0x22a   : > { %1875 = vmatpush1.bf16.msra.mxu0 %v10064_v15 }
 0x22b   : > { %1876 = vmatprep.subr.bf16.mxu0 %v10069_v2 }
 0x22e   : > { %1877 = vmatpush1.bf16.msra.mxu0 %v10067_v56 }
 0x22f   : > { %1589 = vmatmul.mubr.bf16.gmra.mxu0 %v12033_v1  ;;  %1782 = vmatmul.mubr.bf16.gmra.mxu1 %v12033_v1 }
 0x230   : > { %1598 = vmatprep.mubr.bf16.mxu0 %v17659_v20  ;;  %1791 = vmatprep.mubr.bf16.mxu1 %v17659_v20 }
 0x237   : > { %1599 = vmatmul.mubr.bf16.gmra.mxu0 %v12045_v47  ;;  %1792 = vmatmul.mubr.bf16.gmra.mxu1 %v12045_v47 }
 0x238   : > { %1608 = vmatprep.mubr.bf16.mxu0 %v17659_v20  ;;  %1801 = vmatprep.mubr.bf16.mxu1 %v17659_v20 }
 0x263   : > { %v908_v23 = vpop.xlane.xlu0 %907 }
 0x264   : > { %v951_v61 = vmul.f32 0.0078125, %v908_v23 }
 0x266   : > { %v983_v16 = vadd.f32 1e-05, %v951_v61 }
 0x267   : > { %v910_v25 = vpop.xlane.xlu1 %909 }
 0x268   : > { %10110 = vrsqrt.f32 %v983_v16  ;;  %v952_v13 = vmul.f32 0.0078125, %v910_v25 }
 0x26a   : > { %v984_v59 = vadd.f32 1e-05, %v952_v13 }
 0x26b   : > { %v912_v30 = vpop.xlane.xlu0 %911 }
 0x26c   : > { %10112 = vrsqrt.f32 %v984_v59  ;;  %v953_v7 = vmul.f32 0.0078125, %v912_v30 }
 0x26e   : > { %v985_v22 = vadd.f32 1e-05, %v953_v7 }
 0x26f   : > { %v914_v8 = vpop.xlane.xlu1 %913 }
 0x270   : > { %10114 = vrsqrt.f32 %v985_v22  ;;  %v954_v62 = vmul.f32 0.0078125, %v914_v8 }
 0x272   : > { %v986_v11 = vadd.f32 1e-05, %v954_v62 }
 0x273   : > { %v916_v3 = vpop.xlane.xlu0 %915 }
 0x274   : > { %10116 = vrsqrt.f32 %v986_v11  ;;  %v955_v15 = vmul.f32 0.0078125, %v916_v3 }
 0x275   : > { %v10111_v14 = vpop.eup %10110 }
 0x276   : > { %v987_v5 = vadd.f32 1e-05, %v955_v15  ;;  %v1047_v9 = vmul.f32 %v10111_v14, %v11847_v50 }
 0x277   : > { %v918_v2 = vpop.xlane.xlu1 %917 }
 0x278   : > { %10118 = vrsqrt.f32 %v987_v5  ;;  %v956_v56 = vmul.f32 0.0078125, %v918_v2  ;;  %v1085_v23 = vmul.f32 %v11868_v21, %v1047_v9 }
 0x279   : > { %v10113_v55 = vpop.eup %10112 }
 0x27a   : > { %v988_v29 = vadd.f32 1e-05, %v956_v56  ;;  %v1048_v52 = vmul.f32 %v10113_v55, %v11852_v0  ;;  %v1123_v30 = vadd.f32 %v11881_v4, %v1085_v23 }
 0x27b   : > { %v920_v61 = vpop.xlane.xlu0 %919 }
 0x27c   : > { %10120 = vrsqrt.f32 %v988_v29  ;;  %v957_v16 = vmul.f32 0.0078125, %v920_v61  ;;  %v1086_v25 = vmul.f32 %v11868_v21, %v1048_v52 }
 0x27d   : > { %v10115_v13 = vpop.eup %10114 }
 0x27e   : > { %v989_v59 = vadd.f32 1e-05, %v957_v16  ;;  %v1124_v50 = vadd.f32 %v11881_v4, %v1086_v25  ;;  %v1049_v7 = vmul.f32 %v10115_v13, %v11857_v51 }
 0x27f   : > { %v922_v22 = vpop.xlane.xlu1 %921 }
 0x280   : > { %10122 = vrsqrt.f32 %v989_v59  ;;  %v958_v8 = vmul.f32 0.0078125, %v922_v22  ;;  %v12058_v62 = vpack.c.bf16 %v1124_v50, %v1123_v30  ;;  %v1087_v15 = vmul.f32 %v11868_v21, %v1049_v7 }
 0x281   : > { %v10117_v0 = vpop.eup %10116 }
 0x282   : > { %v990_v11 = vadd.f32 1e-05, %v958_v8  ;;  %1609 = vmatmul.mubr.bf16.gmra.mxu0 %v12058_v62  ;;  %1802 = vmatmul.mubr.bf16.gmra.mxu1 %v12058_v62  ;;  %v1050_v3 = vmul.f32 %v10117_v0, %v11862_v6  ;;  %v1125_v56 = vadd.f32 %v11881_v4, %v1087_v15 }
 0x283   : > { %v924_v14 = vpop.xlane.xlu0 %923  ;;  %1618 = vmatprep.mubr.bf16.mxu0 %v17659_v20  ;;  %1811 = vmatprep.mubr.bf16.mxu1 %v17659_v20 }
 0x284   : > { %10124 = vrsqrt.f32 %v990_v11  ;;  %v959_v51 = vmul.f32 0.0078125, %v924_v14  ;;  %v1088_v5 = vmul.f32 %v11868_v21, %v1050_v3 }
 0x285   : > { %v10119_v9 = vpop.eup %10118 }
 0x286   : > { %v991_v2 = vadd.f32 1e-05, %v959_v51  ;;  %v1126_v55 = vadd.f32 %v11881_v4, %v1088_v5  ;;  %v1051_v29 = vmul.f32 %v10119_v9, %v11875_v31 }
 0x287   : > { %v926_v6 = vpop.xlane.xlu1 %925 }
 0x288   : > { %10126 = vrsqrt.f32 %v991_v2  ;;  %v960_v52 = vmul.f32 0.0078125, %v926_v6  ;;  %v12070_v23 = vpack.c.bf16 %v1126_v55, %v1125_v56  ;;  %v1089_v13 = vmul.f32 %v11868_v21, %v1051_v29 }
 0x289   : > { %v10121_v61 = vpop.eup %10120 }
 0x28a   : > { %v992_v16 = vadd.f32 1e-05, %v960_v52  ;;  %1619 = vmatmul.mubr.bf16.gmra.mxu0 %v12070_v23  ;;  %1812 = vmatmul.mubr.bf16.gmra.mxu1 %v12070_v23  ;;  %v1052_v25 = vmul.f32 %v10121_v61, %v11885_v10  ;;  %v1127_v22 = vadd.f32 %v11881_v4, %v1089_v13 }
 0x28b   : > { %v928_v59 = vpop.xlane.xlu0 %927  ;;  %1628 = vmatprep.mubr.bf16.mxu0 %v17659_v20  ;;  %1821 = vmatprep.mubr.bf16.mxu1 %v17659_v20 }
 0x28c   : > { %10128 = vrsqrt.f32 %v992_v16  ;;  %v961_v31 = vmul.f32 0.0078125, %v928_v59  ;;  %v1090_v30 = vmul.f32 %v11868_v21, %v1052_v25 }
 0x28d   : > { %v10123_v50 = vpop.eup %10122 }
 0x28e   : > { %v993_v7 = vadd.f32 1e-05, %v961_v31  ;;  %v1128_v8 = vadd.f32 %v11881_v4, %v1090_v30  ;;  %v1053_v0 = vmul.f32 %v10123_v50, %v11895_v24 }
 0x28f   : > { %v930_v10 = vpop.xlane.xlu1 %929 }
 0x290   : > { %10130 = vrsqrt.f32 %v993_v7  ;;  %v962_v11 = vmul.f32 0.0078125, %v930_v10  ;;  %v12082_v3 = vpack.c.bf16 %v1128_v8, %v1127_v22  ;;  %v1091_v5 = vmul.f32 %v11868_v21, %v1053_v0 }
 0x291   : > { %v10125_v15 = vpop.eup %10124  ;;  %v1206_v7 = vlaneseq }
 0x292   : > { %v994_v14 = vadd.f32 1e-05, %v962_v11  ;;  %1629 = vmatmul.mubr.bf16.gmra.mxu0 %v12082_v3  ;;  %1822 = vmatmul.mubr.bf16.gmra.mxu1 %v12082_v3  ;;  %v1054_v51 = vmul.f32 %v10125_v15, %v11907_v53  ;;  %v1129_v2 = vadd.f32 %v11881_v4, %v1091_v5 }
 0x293   : > { %1638 = vmatprep.mubr.bf16.mxu0 %v17659_v20  ;;  %1831 = vmatprep.mubr.bf16.mxu1 %v17659_v20  ;;  %v12120_v0 = vshrl.u32 %v1206_v7, 7 }
 0x294   : > { %10132 = vrsqrt.f32 %v994_v14  ;;  %v1092_v24 = vmul.f32 %v11868_v21, %v1054_v51 }
 0x295   : > { %v10127_v9 = vpop.eup %10126  ;;  %17660 = vst [vmem:[#allocation57_spill] sm:$0xff] %v12120_v0  ;;  %v1220_v10 = vsub.s32 3, %v12120_v0  ;;  %v1216_v11 = vsub.s32 2, %v12120_v0 }
 0x296   : > { %v1130_v56 = vadd.f32 %v11881_v4, %v1092_v24  ;;  %v1055_v55 = vmul.f32 %v10127_v9, %v11917_v19 }
 0x298   : > { %v12094_v29 = vpack.c.bf16 %v1130_v56, %v1129_v2  ;;  %v1093_v52 = vmul.f32 %v11868_v21, %v1055_v55 }
 0x299   : > { %v10129_v6 = vpop.eup %10128 }
 0x29a   : > { %1639 = vmatmul.mubr.bf16.gmra.mxu0 %v12094_v29  ;;  %1832 = vmatmul.mubr.bf16.gmra.mxu1 %v12094_v29  ;;  %v1056_v53 = vmul.f32 %v10129_v6, %v11929_v49  ;;  %v1131_v19 = vadd.f32 %v11881_v4, %v1093_v52 }
 0x29b   : > { %1648 = vmatprep.mubr.bf16.mxu0 %v17659_v20  ;;  %1841 = vmatprep.mubr.bf16.mxu1 %v17659_v20 }
 0x29c   : > { %v1094_v61 = vmul.f32 %v11868_v21, %v1056_v53 }
 0x29d   : > { %v10131_v16 = vpop.eup %10130 }
 0x29e   : > { %v1132_v25 = vadd.f32 %v11881_v4, %v1094_v61  ;;  %v1057_v13 = vmul.f32 %v10131_v16, %v11939_v17 }
 0x2a0   : > { %v12106_v59 = vpack.c.bf16 %v1132_v25, %v1131_v19  ;;  %v1095_v30 = vmul.f32 %v11868_v21, %v1057_v13 }
 0x2a1   : > { %v10133_v31 = vpop.eup %10132 }
 0x2a2   : > { %1649 = vmatmul.mubr.bf16.gmra.mxu0 %v12106_v59  ;;  %1842 = vmatmul.mubr.bf16.gmra.mxu1 %v12106_v59  ;;  %v1058_v49 = vmul.f32 %v10133_v31, %v11951_v48  ;;  %v1133_v17 = vadd.f32 %v11881_v4, %v1095_v30  ;;  %v17283_v48 = vsub.s32 1, %v12120_v0 }
 0x2a3   : > { %1658 = vmatprep.mubr.bf16.mxu0 %v17659_v20  ;;  %1851 = vmatprep.mubr.bf16.mxu1 %v17659_v20 }
 0x2a4   : > { %v1096_v50 = vmul.f32 %v11868_v21, %v1058_v49  ;;  %v17284_v21 = vsub.s32 0, %v12120_v0 }
 0x2a6   : > { %v1134_v22 = vadd.f32 %v11881_v4, %v1096_v50  ;;  %v12129_v4 = vld [vmem:[%s1203_s1] sm:$0x3f] }
 0x2a7   : > { %v12134_v15 = vrot.slane %v12129_v4, %v17283_v48  ;;  %v12137_v14 = vrot.slane %v12129_v4, %v1220_v10  ;;  %v12142_v24 = vrot.slane %v12129_v4, %v17284_v21  ;;  %v12145_v9 = vrot.slane %v12129_v4, %v1216_v11 }
 0x2a8   : > { %v12118_v8 = vpack.c.bf16 %v1134_v22, %v1133_v17 }
 0x2aa   : > { %1659 = vmatmul.mubr.bf16.gmra.mxu0 %v12118_v8  ;;  %1852 = vmatmul.mubr.bf16.gmra.mxu1 %v12118_v8 }
 0x2ab   : > { %1894 = vmatprep.mubr.bf16.mxu0 %v17659_v20 }
 0x2af   : > { %v1510_v51 = vpop.f32.mrf.mxu0  ;;  %v1703_v5 = vpop.f32.mrf.mxu1 }
 0x2b0   : > { %v1511_v61 = vadd.f32 %v1510_v51, %v12142_v24  ;;  %v1704_v16 = vadd.f32 %v1703_v5, %v12145_v9 }
 0x2b1   : > { %v1512_v2 = vpop.f32.mrf.mxu0  ;;  %v1705_v56 = vpop.f32.mrf.mxu1 }
 0x2b2   : > { %v12148_v55 = vadd.f32 %v1512_v2, %v12134_v15  ;;  %v12151_v6 = vadd.f32 %v1705_v56, %v12137_v14  ;;  %1895 = vmatmul.mubr.bf16.vlgmr.msra.gmra.mxu0 %v11892_v46 }
 0x2b3   : > { %v1514_v53 = vpop.f32.mrf.mxu0  ;;  %v1707_v52 = vpop.f32.mrf.mxu1  ;;  %1904 = vmatprep.mubr.bf16.mxu0 %v17659_v20 }
 0x2b4   : > { %17661 = vst [vmem:[#allocation58_spill] sm:$0xff] %v12148_v55  ;;  %17662 = vst [vmem:[#allocation59_spill] sm:$0xff] %v12151_v6  ;;  %v1515_v19 = vadd.f32 %v1514_v53, %v12142_v24  ;;  %v1708_v25 = vadd.f32 %v1707_v52, %v12145_v9 }
 0x2b5   : > { %v1516_v13 = vpop.f32.mrf.mxu0  ;;  %v1709_v31 = vpop.f32.mrf.mxu1 }
 0x2b6   : > { %v12159_v49 = vpack.c.bf16 %v1515_v19, %v1511_v61  ;;  %v12161_v30 = vpack.c.bf16 %v1708_v25, %v1704_v16  ;;  %v12164_v46 = vadd.f32 %v1516_v13, %v12134_v15  ;;  %v12167_v50 = vadd.f32 %v1709_v31, %v12137_v14 }
 0x2b7   : > { %v1520_v7 = vpop.f32.mrf.mxu0  ;;  %v1713_v17 = vpop.f32.mrf.mxu1 }
 0x2b8   : > { %17663 = vst [vmem:[#allocation60_spill] sm:$0xff] %v12159_v49  ;;  %17664 = vst [vmem:[#allocation61_spill] sm:$0xff] %v12161_v30  ;;  %v1521_v56 = vadd.f32 %v1520_v7, %v12142_v24  ;;  %v1714_v53 = vadd.f32 %v1713_v17, %v12145_v9 }
 0x2b9   : > { %17665 = vst [vmem:[#allocation62_spill] sm:$0xff] %v12164_v46  ;;  %17666 = vst [vmem:[#allocation63_spill] sm:$0xff] %v12167_v50  ;;  %v1522_v22 = vpop.f32.mrf.mxu0  ;;  %v1715_v10 = vpop.f32.mrf.mxu1 }
 0x2ba   : > { %v12170_v11 = vadd.f32 %v1522_v22, %v12134_v15  ;;  %v12173_v51 = vadd.f32 %v1715_v10, %v12137_v14  ;;  %1905 = vmatmul.mubr.bf16.gmra.mxu0 %v11914_v63 }
 0x2bb   : > { %v1524_v5 = vpop.f32.mrf.mxu0  ;;  %v1717_v2 = vpop.f32.mrf.mxu1  ;;  %1914 = vmatprep.mubr.bf16.mxu0 %v17659_v20 }
 0x2bc   : > { %17667 = vst [vmem:[#allocation64_spill] sm:$0xff] %v12170_v11  ;;  %17668 = vst [vmem:[#allocation65_spill] sm:$0xff] %v12173_v51  ;;  %v1525_v52 = vadd.f32 %v1524_v5, %v12142_v24  ;;  %v1718_v61 = vadd.f32 %v1717_v2, %v12145_v9 }
 0x2bd   : > { %v1526_v16 = vpop.f32.mrf.mxu0  ;;  %v1719_v19 = vpop.f32.mrf.mxu1 }
 0x2be   : > { %v12181_v25 = vpack.c.bf16 %v1525_v52, %v1521_v56  ;;  %v12183_v13 = vpack.c.bf16 %v1718_v61, %v1714_v53  ;;  %v12186_v63 = vadd.f32 %v1526_v16, %v12134_v15  ;;  %v12189_v31 = vadd.f32 %v1719_v19, %v12137_v14 }
 0x2bf   : > { %v1530_v22 = vpop.f32.mrf.mxu0  ;;  %v1723_v7 = vpop.f32.mrf.mxu1 }
 0x2c0   : > { %17669 = vst [vmem:[#allocation66_spill] sm:$0xff] %v12181_v25  ;;  %17670 = vst [vmem:[#allocation67_spill] sm:$0xff] %v12183_v13  ;;  %v1531_v52 = vadd.f32 %v1530_v22, %v12142_v24  ;;  %v1724_v61 = vadd.f32 %v1723_v7, %v12145_v9 }
 0x2c1   : > { %17671 = vst [vmem:[#allocation68_spill] sm:$0xff] %v12186_v63  ;;  %17672 = vst [vmem:[#allocation69_spill] sm:$0xff] %v12189_v31  ;;  %v1532_v10 = vpop.f32.mrf.mxu0  ;;  %v1725_v17 = vpop.f32.mrf.mxu1 }
 0x2c2   : > { %v12192_v5 = vadd.f32 %v1532_v10, %v12134_v15  ;;  %v12195_v2 = vadd.f32 %v1725_v17, %v12137_v14  ;;  %1915 = vmatmul.mubr.bf16.gmra.mxu0 %v11936_v60 }
 0x2c3   : > { %v1534_v56 = vpop.f32.mrf.mxu0  ;;  %v1727_v53 = vpop.f32.mrf.mxu1  ;;  %1924 = vmatprep.mubr.bf16.mxu0 %v17659_v20 }
 0x2c4   : > { %17673 = vst [vmem:[#allocation70_spill] sm:$0xff] %v12192_v5  ;;  %17674 = vst [vmem:[#allocation71_spill] sm:$0xff] %v12195_v2  ;;  %v1535_v16 = vadd.f32 %v1534_v56, %v12142_v24  ;;  %v1728_v19 = vadd.f32 %v1727_v53, %v12145_v9 }
 0x2c5   : > { %v1536_v48 = vpop.f32.mrf.mxu0  ;;  %v1729_v10 = vpop.f32.mrf.mxu1 }
 0x2c6   : > { %v12203_v21 = vpack.c.bf16 %v1535_v16, %v1531_v52  ;;  %v12205_v17 = vpack.c.bf16 %v1728_v19, %v1724_v61  ;;  %v12208_v60 = vadd.f32 %v1536_v48, %v12134_v15  ;;  %v12211_v57 = vadd.f32 %v1729_v10, %v12137_v14 }
 0x2c7   : > { %v1540_v12 = vpop.f32.mrf.mxu0  ;;  %v12213_v22 = vpop.f32.mrf.mxu1 }
 0x2c8   : > { %17675 = vst [vmem:[#allocation72_spill] sm:$0xff] %v12203_v21  ;;  %17676 = vst [vmem:[#allocation73_spill] sm:$0xff] %v12205_v17  ;;  %v1541_v48 = vadd.f32 %v1540_v12, %v12142_v24 }
 0x2c9   : > { %17677 = vst [vmem:[#allocation74_spill] sm:$0xff] %v12208_v60  ;;  %17678 = vst [vmem:[#allocation75_spill] sm:$0xff] %v12211_v57  ;;  %v1542_v7 = vpop.f32.mrf.mxu0  ;;  %v1735_v28 = vpop.f32.mrf.mxu1 }
 0x2ca   : > { %v12216_v56 = vadd.f32 %v1542_v7, %v12134_v15  ;;  %v12219_v53 = vadd.f32 %v1735_v28, %v12137_v14  ;;  %1925 = vmatmul.mubr.bf16.gmra.mxu0 %v11958_v26 }
 0x2cb   : > { %v1544_v52 = vpop.f32.mrf.mxu0  ;;  %v12222_v61 = vpop.f32.mrf.mxu1  ;;  %1934 = vmatprep.mubr.bf16.mxu0 %v17659_v20 }
 0x2cc   : > { %17679 = vst [vmem:[#allocation76_spill] sm:$0xff] %v12216_v56  ;;  %17680 = vst [vmem:[#allocation77_spill] sm:$0xff] %v12219_v53  ;;  %v1545_v16 = vadd.f32 %v1544_v52, %v12142_v24 }
 0x2cd   : > { %v1546_v19 = vpop.f32.mrf.mxu0  ;;  %v1739_v10 = vpop.f32.mrf.mxu1 }
 0x2ce   : > { %v12227_v45 = vpack.c.bf16 %v1545_v16, %v1541_v48  ;;  %v12230_v7 = vadd.f32 %v1546_v19, %v12134_v15  ;;  %v12233_v28 = vadd.f32 %v1739_v10, %v12137_v14 }
 0x2cf   : > { %v1550_v26 = vpop.f32.mrf.mxu0  ;;  %v12235_v44 = vpop.f32.mrf.mxu1 }
 0x2d0   : > { %17681 = vst [vmem:[#allocation78_spill] sm:$0xff] %v12227_v45  ;;  %17682 = vst [vmem:[#allocation79_spill] sm:$0xff] %v12230_v7  ;;  %v1551_v16 = vadd.f32 %v1550_v26, %v12142_v24 }
 0x2d1   : > { %17683 = vst [vmem:[#allocation80_spill] sm:$0xff] %v12233_v28  ;;  %v1552_v43 = vpop.f32.mrf.mxu0  ;;  %v1745_v42 = vpop.f32.mrf.mxu1 }
 0x2d2   : > { %v12238_v41 = vadd.f32 %v1552_v43, %v12134_v15  ;;  %v12241_v12 = vadd.f32 %v1745_v42, %v12137_v14  ;;  %1935 = vmatmul.mubr.bf16.gmra.mxu0 %v11970_v54 }
 0x2d3   : > { %v1554_v52 = vpop.f32.mrf.mxu0  ;;  %v12244_v48 = vpop.f32.mrf.mxu1  ;;  %1944 = vmatprep.mubr.bf16.mxu0 %v17659_v20 }
 0x2d4   : > { %17684 = vst [vmem:[#allocation81_spill] sm:$0xff] %v12238_v41  ;;  %17685 = vst [vmem:[#allocation82_spill] sm:$0xff] %v12241_v12  ;;  %v1555_v19 = vadd.f32 %v1554_v52, %v12142_v24 }
 0x2d5   : > { %v1556_v10 = vpop.f32.mrf.mxu0  ;;  %v1749_v40 = vpop.f32.mrf.mxu1 }
 0x2d6   : > { %v12249_v39 = vpack.c.bf16 %v1555_v19, %v1551_v16  ;;  %v12252_v43 = vadd.f32 %v1556_v10, %v12134_v15  ;;  %v12255_v42 = vadd.f32 %v1749_v40, %v12137_v14 }
 0x2d7   : > { %v1560_v54 = vpop.f32.mrf.mxu0  ;;  %v12257_v38 = vpop.f32.mrf.mxu1 }
 0x2d8   : > { %17686 = vst [vmem:[#allocation83_spill] sm:$0xff] %v12249_v39  ;;  %17687 = vst [vmem:[#allocation84_spill] sm:$0xff] %v12252_v43  ;;  %v1561_v40 = vadd.f32 %v1560_v54, %v12142_v24 }
 0x2d9   : > { %17688 = vst [vmem:[#allocation85_spill] sm:$0xff] %v12255_v42  ;;  %v1562_v37 = vpop.f32.mrf.mxu0  ;;  %v1755_v36 = vpop.f32.mrf.mxu1 }
 0x2da   : > { %v12260_v35 = vadd.f32 %v1562_v37, %v12134_v15  ;;  %v12263_v26 = vadd.f32 %v1755_v36, %v12137_v14  ;;  %1945 = vmatmul.mubr.bf16.gmra.mxu0 %v11984_v18 }
 0x2db   : > { %v1564_v52 = vpop.f32.mrf.mxu0  ;;  %v1757_v16 = vpop.f32.mrf.mxu1  ;;  %1954 = vmatprep.mubr.bf16.mxu0 %v17659_v20 }
 0x2dc   : > { %17689 = vst [vmem:[#allocation86_spill] sm:$0xff] %v12260_v35  ;;  %17690 = vst [vmem:[#allocation87_spill] sm:$0xff] %v12263_v26  ;;  %v1565_v19 = vadd.f32 %v1564_v52, %v12142_v24 }
 0x2dd   : > { %v1566_v10 = vpop.f32.mrf.mxu0  ;;  %v1759_v33 = vpop.f32.mrf.mxu1 }
 0x2de   : > { %v12269_v34 = vpack.c.bf16 %v1565_v19, %v1561_v40  ;;  %v12272_v37 = vadd.f32 %v1566_v10, %v12134_v15  ;;  %v12275_v36 = vadd.f32 %v1759_v33, %v12137_v14 }
 0x2df   : > { %v1570_v32 = vpop.f32.mrf.mxu0  ;;  %v1763_v18 = vpop.f32.mrf.mxu1 }
 0x2e0   : > { %17691 = vst [vmem:[#allocation88_spill] sm:$0xff] %v12269_v34  ;;  %17692 = vst [vmem:[#allocation89_spill] sm:$0xff] %v12272_v37  ;;  %v1571_v19 = vadd.f32 %v1570_v32, %v12142_v24 }
 0x2e1   : > { %17693 = vst [vmem:[#allocation90_spill] sm:$0xff] %v12275_v36  ;;  %v1572_v35 = vpop.f32.mrf.mxu0  ;;  %v1765_v43 = vpop.f32.mrf.mxu1 }
 0x2e2   : > { %v12278_v41 = vadd.f32 %v1572_v35, %v12134_v15  ;;  %v12281_v54 = vadd.f32 %v1765_v43, %v12137_v14  ;;  %1955 = vmatmul.mubr.bf16.gmra.mxu0 %v12002_v27 }
 0x2e3   : > { %v1574_v52 = vpop.f32.mrf.mxu0  ;;  %v1767_v40 = vpop.f32.mrf.mxu1  ;;  %1964 = vmatprep.mubr.bf16.mxu0 %v17659_v20 }
 0x2e4   : > { %17694 = vst [vmem:[#allocation91_spill] sm:$0xff] %v12278_v41  ;;  %17695 = vst [vmem:[#allocation92_spill] sm:$0xff] %v12281_v54  ;;  %v1575_v33 = vadd.f32 %v1574_v52, %v12142_v24  ;;  %v1768_v52 = vadd.f32 %v1767_v40, %v12145_v9 }
 0x2e5   : > { %v1576_v10 = vpop.f32.mrf.mxu0  ;;  %v1769_v37 = vpop.f32.mrf.mxu1 }
 0x2e6   : > { %v12287_v7 = vpack.c.bf16 %v1575_v33, %v1571_v19  ;;  %v12290_v35 = vadd.f32 %v1576_v10, %v12134_v15  ;;  %v12293_v43 = vadd.f32 %v1769_v37, %v12137_v14 }
 0x2e7   : > { %v1580_v41 = vpop.f32.mrf.mxu0  ;;  %v1773_v27 = vpop.f32.mrf.mxu1 }
 0x2e8   : > { %17696 = vst [vmem:[#allocation93_spill] sm:$0xff] %v12287_v7  ;;  %17697 = vst [vmem:[#allocation94_spill] sm:$0xff] %v12290_v35  ;;  %v1581_v37 = vadd.f32 %v1580_v41, %v12142_v24  ;;  %v1774_v10 = vadd.f32 %v1773_v27, %v12145_v9 }
 0x2e9   : > { %17698 = vst [vmem:[#allocation95_spill] sm:$0xff] %v12293_v43  ;;  %v1582_v56 = vpop.f32.mrf.mxu0  ;;  %v1775_v60 = vpop.f32.mrf.mxu1 }
 0x2ea   : > { %v12296_v5 = vadd.f32 %v1582_v56, %v12134_v15  ;;  %v12299_v32 = vadd.f32 %v1775_v60, %v12137_v14  ;;  %1965 = vmatmul.mubr.bf16.gmra.mxu0 %v12018_v58 }
 0x2eb   : > { %v1584_v19 = vpop.f32.mrf.mxu0  ;;  %v1777_v33 = vpop.f32.mrf.mxu1  ;;  %1974 = vmatprep.mubr.bf16.mxu0 %v17659_v20 }
 0x2ec   : > { %17699 = vst [vmem:[#allocation96_spill] sm:$0xff] %v12296_v5  ;;  %17700 = vst [vmem:[#allocation97_spill] sm:$0xff] %v12299_v32  ;;  %v1585_v35 = vadd.f32 %v1584_v19, %v12142_v24  ;;  %v1778_v56 = vadd.f32 %v1777_v33, %v12145_v9  ;;  %v1764_v5 = vadd.f32 %v1763_v18, %v12145_v9 }
 0x2ed   : > { %v1586_v60 = vpop.f32.mrf.mxu0  ;;  %v1779_v63 = vpop.f32.mrf.mxu1 }
 0x2ee   : > { %v12309_v11 = vpack.c.bf16 %v1585_v35, %v1581_v37  ;;  %v12311_v58 = vpack.c.bf16 %v1778_v56, %v1774_v10  ;;  %v12314_v40 = vadd.f32 %v1586_v60, %v12134_v15  ;;  %v12317_v50 = vadd.f32 %v1779_v63, %v12137_v14 }
 0x2ef   : > { %v1590_v41 = vpop.f32.mrf.mxu0  ;;  %v1783_v27 = vpop.f32.mrf.mxu1  ;;  %v12319_v19 = vpack.c.bf16 %v1768_v52, %v1764_v5  ;;  %v1758_v5 = vadd.f32 %v1757_v16, %v12145_v9 }
 0x2f0   : > { %17701 = vst [vmem:[#allocation98_spill] sm:$0xff] %v12309_v11  ;;  %17702 = vst [vmem:[#allocation99_spill] sm:$0xff] %v12311_v58  ;;  %9776 = vmatprep.subr.msk.bf16.mxu0 %vm2087_vm0, %v12311_v58  ;;  %v2134_v18 = vsel %vm2087_vm0, %v12311_v58, 0  ;;  %v1591_v56 = vadd.f32 %v1590_v41, %v12142_v24  ;;  %v1784_v60 = vadd.f32 %v1783_v27, %v12145_v9 }
 0x2f1   : > { %17703 = vst [vmem:[#allocation100_spill] sm:$0xff] %v12314_v40  ;;  %17704 = vst [vmem:[#allocation101_spill] sm:$0xff] %v12317_v50  ;;  %v1592_v35 = vpop.f32.mrf.mxu0  ;;  %v1785_v33 = vpop.f32.mrf.mxu1  ;;  %9265 = vmatpush3.bf16.xpose.msra.mxu0 %v2134_v18 }
 0x2f2   : > { %17705 = vst [vmem:[#allocation102_spill] sm:$0xff] %v12319_v19  ;;  %v12326_v37 = vadd.f32 %v1592_v35, %v12134_v15  ;;  %v12329_v63 = vadd.f32 %v1785_v33, %v12137_v14  ;;  %9777 = vmatprep.subr.msk.bf16.mxu0 %vm2087_vm0, %v12319_v19  ;;  %1975 = vmatmul.mubr.bf16.gmra.mxu0 %v12033_v1 }
 0x2f3   : > { %v1594_v52 = vpop.f32.mrf.mxu0  ;;  %v1787_v10 = vpop.f32.mrf.mxu1  ;;  %1984 = vmatprep.mubr.bf16.mxu0 %v17659_v20  ;;  %v1754_v33 = vadd.f32 %v12257_v38, %v12145_v9  ;;  %v2131_v38 = vsel %vm2087_vm0, %v12319_v19, 0 }
 0x2f4   : > { %17706 = vst [vmem:[#allocation103_spill] sm:$0xff] %v12326_v37  ;;  %17707 = vst [vmem:[#allocation104_spill] sm:$0xff] %v12329_v63  ;;  %v1595_v18 = vadd.f32 %v1594_v52, %v12142_v24  ;;  %v1788_v35 = vadd.f32 %v1787_v10, %v12145_v9  ;;  %v1228_v37 = vsub.s32 5, %v12120_v0 }
 0x2f5   : > { %v1596_v40 = vpop.f32.mrf.mxu0  ;;  %v1789_v63 = vpop.f32.mrf.mxu1  ;;  %v12352_v52 = vpack.c.bf16 %v1758_v5, %v1754_v33 }
 0x2f6   : > { %v12342_v1 = vpack.c.bf16 %v1595_v18, %v1591_v56  ;;  %v12344_v16 = vpack.c.bf16 %v1788_v35, %v1784_v60  ;;  %v12347_v6 = vadd.f32 %v1596_v40, %v12134_v15  ;;  %v12350_v41 = vadd.f32 %v1789_v63, %v12137_v14 }
 0x2f7   : > { %v1600_v27 = vpop.f32.mrf.mxu0  ;;  %v1793_v31 = vpop.f32.mrf.mxu1  ;;  %17712 = vst [vmem:[#allocation109_spill] sm:$0xff] %v12352_v52  ;;  %v1748_v63 = vadd.f32 %v12244_v48, %v12145_v9 }
 0x2f8   : > { %17708 = vst [vmem:[#allocation105_spill] sm:$0xff] %v12342_v1  ;;  %17709 = vst [vmem:[#allocation106_spill] sm:$0xff] %v12344_v16  ;;  %9312 = vmatprep.mubr.msk.bf16.mxu1 %vm2087_vm0, %v12342_v1  ;;  %v1601_v35 = vadd.f32 %v1600_v27, %v12142_v24  ;;  %v1794_v33 = vadd.f32 %v1793_v31, %v12145_v9 }
 0x2f9   : > { %17710 = vst [vmem:[#allocation107_spill] sm:$0xff] %v12347_v6  ;;  %17711 = vst [vmem:[#allocation108_spill] sm:$0xff] %v12350_v41  ;;  %v1602_v10 = vpop.f32.mrf.mxu0  ;;  %v1795_v56 = vpop.f32.mrf.mxu1  ;;  %9267 = vmatpush3.bf16.xpose.msra.mxu0 %v2131_v38 }
 0x2fa   : > { %v12359_v60 = vadd.f32 %v1602_v10, %v12134_v15  ;;  %v12362_v40 = vadd.f32 %v1795_v56, %v12137_v14  ;;  %9778 = vmatprep.subr.msk.bf16.mxu0 %vm2087_vm0, %v12352_v52  ;;  %1985 = vmatmul.mubr.bf16.gmra.mxu0 %v12045_v47  ;;  %v1744_v56 = vadd.f32 %v12235_v44, %v12145_v9 }
 0x2fb   : > { %v1604_v5 = vpop.f32.mrf.mxu0  ;;  %v1797_v18 = vpop.f32.mrf.mxu1  ;;  %1994 = vmatprep.mubr.bf16.mxu0 %v17659_v20  ;;  %v1738_v44 = vadd.f32 %v12222_v61, %v12145_v9 }
 0x2fc   : > { %17713 = vst [vmem:[#allocation110_spill] sm:$0xff] %v12359_v60  ;;  %17714 = vst [vmem:[#allocation111_spill] sm:$0xff] %v12362_v40  ;;  %v1605_v38 = vadd.f32 %v1604_v5, %v12142_v24  ;;  %v1798_v10 = vadd.f32 %v1797_v18, %v12145_v9  ;;  %v12386_v31 = vpack.c.bf16 %v1748_v63, %v1744_v56  ;;  %v2128_v5 = vsel %vm2087_vm0, %v12352_v52, 0 }
 0x2fd   : > { %v1606_v60 = vpop.f32.mrf.mxu0  ;;  %v1799_v47 = vpop.f32.mrf.mxu1 }
 0x2fe   : > { %v12376_v41 = vpack.c.bf16 %v1605_v38, %v1601_v35  ;;  %v12378_v48 = vpack.c.bf16 %v1798_v10, %v1794_v33  ;;  %v12381_v40 = vadd.f32 %v1606_v60, %v12134_v15  ;;  %v12384_v27 = vadd.f32 %v1799_v47, %v12137_v14  ;;  %17719 = vst [vmem:[#allocation116_spill] sm:$0xff] %v12386_v31 }
 0x2ff   : > { %v1734_v60 = vadd.f32 %v12213_v22, %v12145_v9  ;;  %v2125_v63 = vsel %vm2087_vm0, %v12386_v31, 0  ;;  %v2119_v22 = vsel %vm2087_vm0, %v12205_v17, 0 }
 0x300   : > { %17715 = vst [vmem:[#allocation112_spill] sm:$0xff] %v12376_v41  ;;  %17716 = vst [vmem:[#allocation113_spill] sm:$0xff] %v12378_v48 }
 0x301   : > { %17717 = vst [vmem:[#allocation114_spill] sm:$0xff] %v12381_v40  ;;  %17718 = vst [vmem:[#allocation115_spill] sm:$0xff] %v12384_v27  ;;  %9269 = vmatpush3.bf16.xpose.msra.mxu0 %v2128_v5  ;;  %v12398_v18 = vpack.c.bf16 %v1738_v44, %v1734_v60 }
 0x302   : > { %9779 = vmatprep.subr.msk.bf16.mxu0 %vm2087_vm0, %v12386_v31  ;;  %1995 = vmatmul.mubr.bf16.gmra.mxu0 %v12058_v62 }
 0x303   : > { %2004 = vmatprep.mubr.bf16.mxu0 %v17659_v20  ;;  %17720 = vst [vmem:[#allocation117_spill] sm:$0xff] %v12398_v18  ;;  %v2122_v62 = vsel %vm2087_vm0, %v12398_v18, 0 }
 0x309   : > { %9271 = vmatpush3.bf16.xpose.msra.mxu0 %v2125_v63 }
 0x30a   : > { %9780 = vmatprep.subr.msk.bf16.mxu0 %vm2087_vm0, %v12398_v18  ;;  %2005 = vmatmul.mubr.bf16.gmra.mxu0 %v12070_v23  ;;  %v2116_v23 = vsel %vm2087_vm0, %v12183_v13, 0 }
 0x30b   : > { %2014 = vmatprep.mubr.bf16.mxu0 %v17659_v20 }
 0x311   : > { %9273 = vmatpush3.bf16.xpose.msra.mxu0 %v2122_v62 }
 0x312   : > { %9781 = vmatprep.subr.msk.bf16.mxu0 %vm2087_vm0, %v12205_v17  ;;  %2015 = vmatmul.mubr.bf16.gmra.mxu0 %v12082_v3  ;;  %v2113_v3 = vsel %vm2087_vm0, %v12161_v30, 0 }
 0x313   : > { %2024 = vmatprep.mubr.bf16.mxu0 %v17659_v20 }
 0x319   : > { %9275 = vmatpush3.bf16.xpose.msra.mxu0 %v2119_v22 }
 0x31a   : > { %9782 = vmatprep.subr.msk.bf16.mxu0 %vm2087_vm0, %v12183_v13  ;;  %2025 = vmatmul.mubr.bf16.gmra.mxu0 %v12094_v29 }
 0x31b   : > { %2034 = vmatprep.mubr.bf16.mxu0 %v17659_v20 }
 0x321   : > { %9277 = vmatpush3.bf16.xpose.msra.mxu0 %v2116_v23 }
 0x322   : > { %9783 = vmatprep.subr.msk.bf16.mxu0 %vm2087_vm0, %v12161_v30  ;;  %2035 = vmatmul.mubr.bf16.gmra.mxu0 %v12106_v59 }
 0x323   : > { %2044 = vmatprep.mubr.bf16.mxu0 %v17659_v20 }
 0x329   : > { %9279 = vmatpush3.bf16.xpose.msra.mxu0 %v2113_v3 }
 0x32a   : > { %2045 = vmatmul.mubr.bf16.gmra.mxu0 %v12118_v8 }
 0x32b   : > { %9280 = vmatprep.mubr.msk.bf16.mxu0 %vm2087_vm0, %v12159_v49 }
 0x332   : > { %9281 = vmatmul.mubr.msk.bf16.vlgmr.msra.gmra.mxu0 %vm2087_vm0, %v12181_v25 }
 0x333   : > { %9284 = vmatprep.mubr.msk.bf16.mxu0 %vm2087_vm0, %v12203_v21 }
 0x33a   : > { %9285 = vmatmul.mubr.msk.bf16.gmra.mxu0 %vm2087_vm0, %v12227_v45 }
 0x33b   : > { %9288 = vmatprep.mubr.msk.bf16.mxu0 %vm2087_vm0, %v12249_v39 }
 0x342   : > { %v1610_v20 = vpop.f32.mrf.mxu0  ;;  %v1803_v29 = vpop.f32.mrf.mxu1  ;;  %9289 = vmatmul.mubr.msk.bf16.gmra.mxu0 %vm2087_vm0, %v12269_v34 }
 0x343   : > { %9292 = vmatprep.mubr.msk.bf16.mxu0 %vm2087_vm0, %v12287_v7  ;;  %v1611_v10 = vadd.f32 %v1610_v20, %v12142_v24  ;;  %v1804_v56 = vadd.f32 %v1803_v29, %v12145_v9 }
 0x344   : > { %v1612_v59 = vpop.f32.mrf.mxu0  ;;  %v1805_v8 = vpop.f32.mrf.mxu1 }
 0x345   : > { %v12442_v61 = vadd.f32 %v1612_v59, %v12134_v15  ;;  %v12445_v35 = vadd.f32 %v1805_v8, %v12137_v14 }
 0x346   : > { %v1614_v33 = vpop.f32.mrf.mxu0  ;;  %v1807_v38 = vpop.f32.mrf.mxu1 }
 0x347   : > { %17721 = vst [vmem:[#allocation118_spill] sm:$0xff] %v12442_v61  ;;  %17722 = vst [vmem:[#allocation119_spill] sm:$0xff] %v12445_v35  ;;  %v1615_v47 = vadd.f32 %v1614_v33, %v12142_v24  ;;  %v1808_v5 = vadd.f32 %v1807_v38, %v12145_v9 }
 0x348   : > { %v1616_v44 = vpop.f32.mrf.mxu0  ;;  %v1809_v60 = vpop.f32.mrf.mxu1 }
 0x349   : > { %v12451_v63 = vpack.c.bf16 %v1615_v47, %v1611_v10  ;;  %v12453_v62 = vpack.c.bf16 %v1808_v5, %v1804_v56  ;;  %v12456_v22 = vadd.f32 %v1616_v44, %v12134_v15  ;;  %v12459_v23 = vadd.f32 %v1809_v60, %v12137_v14 }
 0x34a   : > { %v1620_v3 = vpop.f32.mrf.mxu0  ;;  %v12461_v20 = vpop.f32.mrf.mxu1  ;;  %9293 = vmatmul.mubr.msk.bf16.gmra.mxu0 %vm2087_vm0, %v12309_v11 }
 0x34b   : > { %17723 = vst [vmem:[#allocation120_spill] sm:$0xff] %v12451_v63  ;;  %17724 = vst [vmem:[#allocation121_spill] sm:$0xff] %v12453_v62  ;;  %v1621_v56 = vadd.f32 %v1620_v3, %v12142_v24 }
 0x34c   : > { %17725 = vst [vmem:[#allocation122_spill] sm:$0xff] %v12456_v22  ;;  %17726 = vst [vmem:[#allocation123_spill] sm:$0xff] %v12459_v23  ;;  %v1622_v29 = vpop.f32.mrf.mxu0  ;;  %v1815_v59 = vpop.f32.mrf.mxu1 }
 0x34d   : > { %v12466_v8 = vadd.f32 %v1622_v29, %v12134_v15  ;;  %v12469_v33 = vadd.f32 %v1815_v59, %v12137_v14 }
 0x34e   : > { %v1624_v38 = vpop.f32.mrf.mxu0  ;;  %v12471_v10 = vpop.f32.mrf.mxu1 }
 0x34f   : > { %17727 = vst [vmem:[#allocation124_spill] sm:$0xff] %v12466_v8  ;;  %17728 = vst [vmem:[#allocation125_spill] sm:$0xff] %v12469_v33  ;;  %v1625_v47 = vadd.f32 %v1624_v38, %v12142_v24 }
 0x350   : > { %v1626_v5 = vpop.f32.mrf.mxu0  ;;  %v1819_v44 = vpop.f32.mrf.mxu1 }
 0x351   : > { %v12475_v60 = vpack.c.bf16 %v1625_v47, %v1621_v56  ;;  %v12478_v22 = vadd.f32 %v1626_v5, %v12134_v15  ;;  %v12481_v29 = vadd.f32 %v1819_v44, %v12137_v14 }
 0x352   : > { %v1630_v8 = vpop.f32.mrf.mxu0  ;;  %v12483_v59 = vpop.f32.mrf.mxu1 }
 0x353   : > { %17729 = vst [vmem:[#allocation126_spill] sm:$0xff] %v12475_v60  ;;  %17730 = vst [vmem:[#allocation127_spill] sm:$0xff] %v12478_v22  ;;  %v1631_v47 = vadd.f32 %v1630_v8, %v12142_v24 }
 0x354   : > { %17731 = vst [vmem:[#allocation128_spill] sm:$0xff] %v12481_v29  ;;  %v1632_v61 = vpop.f32.mrf.mxu0  ;;  %v1825_v40 = vpop.f32.mrf.mxu1 }
 0x355   : > { %v12486_v27 = vadd.f32 %v1632_v61, %v12134_v15  ;;  %v12489_v3 = vadd.f32 %v1825_v40, %v12137_v14 }
 0x356   : > { %v1634_v38 = vpop.f32.mrf.mxu0  ;;  %v12491_v56 = vpop.f32.mrf.mxu1 }
 0x357   : > { %17732 = vst [vmem:[#allocation129_spill] sm:$0xff] %v12486_v27  ;;  %17733 = vst [vmem:[#allocation130_spill] sm:$0xff] %v12489_v3  ;;  %v1635_v5 = vadd.f32 %v1634_v38, %v12142_v24 }
 0x358   : > { %v1636_v44 = vpop.f32.mrf.mxu0  ;;  %v1829_v22 = vpop.f32.mrf.mxu1 }
 0x359   : > { %v12495_v51 = vpack.c.bf16 %v1635_v5, %v1631_v47  ;;  %v12498_v23 = vadd.f32 %v1636_v44, %v12134_v15  ;;  %v12501_v61 = vadd.f32 %v1829_v22, %v12137_v14 }
 0x35a   : > { %v1640_v27 = vpop.f32.mrf.mxu0  ;;  %v12503_v40 = vpop.f32.mrf.mxu1 }
 0x35b   : > { %17734 = vst [vmem:[#allocation131_spill] sm:$0xff] %v12495_v51  ;;  %17735 = vst [vmem:[#allocation132_spill] sm:$0xff] %v12498_v23  ;;  %v1641_v5 = vadd.f32 %v1640_v27, %v12142_v24 }
 0x35c   : > { %17736 = vst [vmem:[#allocation133_spill] sm:$0xff] %v12501_v61  ;;  %v1642_v35 = vpop.f32.mrf.mxu0  ;;  %v1835_v57 = vpop.f32.mrf.mxu1 }
 0x35d   : > { %v12506_v2 = vadd.f32 %v1642_v35, %v12134_v15  ;;  %v12509_v8 = vadd.f32 %v1835_v57, %v12137_v14 }
 0x35e   : > { %v1644_v38 = vpop.f32.mrf.mxu0  ;;  %v1837_v47 = vpop.f32.mrf.mxu1 }
 0x35f   : > { %17737 = vst [vmem:[#allocation134_spill] sm:$0xff] %v12506_v2  ;;  %17738 = vst [vmem:[#allocation135_spill] sm:$0xff] %v12509_v8  ;;  %v1645_v44 = vadd.f32 %v1644_v38, %v12142_v24 }
 0x360   : > { %v1646_v23 = vpop.f32.mrf.mxu0  ;;  %v1839_v22 = vpop.f32.mrf.mxu1 }
 0x361   : > { %v12513_v29 = vpack.c.bf16 %v1645_v44, %v1641_v5  ;;  %v12516_v33 = vadd.f32 %v1646_v23, %v12134_v15  ;;  %v12519_v28 = vadd.f32 %v1839_v22, %v12137_v14 }
 0x362   : > { %v1650_v35 = vpop.f32.mrf.mxu0  ;;  %v1843_v2 = vpop.f32.mrf.mxu1 }
 0x363   : > { %17739 = vst [vmem:[#allocation136_spill] sm:$0xff] %v12513_v29  ;;  %17740 = vst [vmem:[#allocation137_spill] sm:$0xff] %v12516_v33  ;;  %v1651_v5 = vadd.f32 %v1650_v35, %v12142_v24 }
 0x364   : > { %17741 = vst [vmem:[#allocation138_spill] sm:$0xff] %v12519_v28  ;;  %v1652_v57 = vpop.f32.mrf.mxu0  ;;  %v1845_v53 = vpop.f32.mrf.mxu1 }
 0x365   : > { %v12522_v61 = vadd.f32 %v1652_v57, %v12134_v15  ;;  %v12525_v27 = vadd.f32 %v1845_v53, %v12137_v14 }
 0x366   : > { %v1654_v38 = vpop.f32.mrf.mxu0  ;;  %v1847_v3 = vpop.f32.mrf.mxu1 }
 0x367   : > { %17742 = vst [vmem:[#allocation139_spill] sm:$0xff] %v12522_v61  ;;  %17743 = vst [vmem:[#allocation140_spill] sm:$0xff] %v12525_v27  ;;  %v1655_v23 = vadd.f32 %v1654_v38, %v12142_v24 }
 0x368   : > { %v1656_v44 = vpop.f32.mrf.mxu0  ;;  %v1849_v33 = vpop.f32.mrf.mxu1 }
 0x369   : > { %v12529_v22 = vpack.c.bf16 %v1655_v23, %v1651_v5  ;;  %v12532_v42 = vadd.f32 %v1656_v44, %v12134_v15  ;;  %v12535_v12 = vadd.f32 %v1849_v33, %v12137_v14  ;;  %v1848_v5 = vadd.f32 %v1847_v3, %v12145_v9 }
 0x36a   : > { %v1660_v57 = vpop.f32.mrf.mxu0  ;;  %v1853_v61 = vpop.f32.mrf.mxu1 }
 0x36b   : > { %17744 = vst [vmem:[#allocation141_spill] sm:$0xff] %v12529_v22  ;;  %17745 = vst [vmem:[#allocation142_spill] sm:$0xff] %v12532_v42  ;;  %v1224_v42 = vsub.s32 4, %v12120_v0  ;;  %v1661_v33 = vadd.f32 %v1660_v57, %v12142_v24  ;;  %v1854_v46 = vadd.f32 %v1853_v61, %v12145_v9 }
 0x36c   : > { %17746 = vst [vmem:[#allocation143_spill] sm:$0xff] %v12535_v12  ;;  %v1662_v53 = vpop.f32.mrf.mxu0  ;;  %v1855_v6 = vpop.f32.mrf.mxu1 }
 0x36d   : > { %v12539_v35 = vadd.f32 %v1662_v53, %v12134_v15  ;;  %v12542_v38 = vadd.f32 %v1855_v6, %v12137_v14  ;;  %v1844_v53 = vadd.f32 %v1843_v2, %v12145_v9  ;;  %v12552_v6 = vrot.slane %v12129_v4, %v1228_v37 }
 0x36e   : > { %v1664_v23 = vpop.f32.mrf.mxu0  ;;  %v1857_v44 = vpop.f32.mrf.mxu1  ;;  %v12567_v2 = vrot.slane %v12129_v4, %v1224_v42 }
 0x36f   : > { %17747 = vst [vmem:[#allocation144_spill] sm:$0xff] %v12539_v35  ;;  %17748 = vst [vmem:[#allocation145_spill] sm:$0xff] %v12542_v38  ;;  %v1665_v55 = vadd.f32 %v1664_v23, %v12142_v24  ;;  %v1858_v28 = vadd.f32 %v1857_v44, %v12145_v9  ;;  %v12564_v57 = vpack.c.bf16 %v1848_v5, %v1844_v53 }
 0x370   : > { %v1666_v35 = vpop.f32.mrf.mxu0  ;;  %v1859_v8 = vpop.f32.mrf.mxu1 }
 0x371   : > { %v12554_v3 = vpack.c.bf16 %v1665_v55, %v1661_v33  ;;  %v12556_v36 = vpack.c.bf16 %v1858_v28, %v1854_v46  ;;  %v12559_v0 = vadd.f32 %v1666_v35, %v12134_v15  ;;  %v12562_v61 = vadd.f32 %v1859_v8, %v12137_v14  ;;  %17753 = vst [vmem:[#allocation150_spill] sm:$0xff] %v12564_v57 }
 0x372   : > { %v1896_v24 = vpop.f32.mrf.mxu0  ;;  %v1838_v28 = vadd.f32 %v1837_v47, %v12145_v9  ;;  %v1834_v8 = vadd.f32 %v12503_v40, %v12145_v9  ;;  %v2276_v33 = vsel %vm2087_vm0, %v12564_v57, 0 }
 0x373   : > { %17749 = vst [vmem:[#allocation146_spill] sm:$0xff] %v12554_v3  ;;  %17750 = vst [vmem:[#allocation147_spill] sm:$0xff] %v12556_v36  ;;  %9784 = vmatprep.subr.msk.bf16.mxu1 %vm2087_vm0, %v12556_v36  ;;  %v2279_v55 = vsel %vm2087_vm0, %v12556_v36, 0  ;;  %v1897_v4 = vadd.f32 %v1896_v24, %v12567_v2  ;;  %v1828_v24 = vadd.f32 %v12491_v56, %v12145_v9 }
 0x374   : > { %17751 = vst [vmem:[#allocation148_spill] sm:$0xff] %v12559_v0  ;;  %17752 = vst [vmem:[#allocation149_spill] sm:$0xff] %v12562_v61  ;;  %v1898_v46 = vpop.f32.mrf.mxu0  ;;  %9297 = vmatpush3.bf16.xpose.msra.mxu1 %v2279_v55  ;;  %v12588_v44 = vpack.c.bf16 %v1838_v28, %v1834_v8  ;;  %v1824_v28 = vadd.f32 %v12483_v59, %v12145_v9 }
 0x375   : > { %v12574_v15 = vadd.f32 %v1898_v46, %v12552_v6  ;;  %9785 = vmatprep.subr.msk.bf16.mxu1 %vm2087_vm0, %v12564_v57 }
 0x376   : > { %v1900_v14 = vpop.f32.mrf.mxu0  ;;  %17757 = vst [vmem:[#allocation154_spill] sm:$0xff] %v12588_v44  ;;  %v12610_v8 = vpack.c.bf16 %v1828_v24, %v1824_v28  ;;  %v2273_v56 = vsel %vm2087_vm0, %v12588_v44, 0  ;;  %v1814_v24 = vadd.f32 %v12461_v20, %v12145_v9 }
 0x377   : > { %17754 = vst [vmem:[#allocation151_spill] sm:$0xff] %v12574_v15  ;;  %v1901_v42 = vadd.f32 %v1900_v14, %v12567_v2 }
 0x378   : > { %v1902_v37 = vpop.f32.mrf.mxu0  ;;  %17761 = vst [vmem:[#allocation158_spill] sm:$0xff] %v12610_v8  ;;  %v2270_v28 = vsel %vm2087_vm0, %v12610_v8, 0 }
 0x379   : > { %v12583_v35 = vpack.c.bf16 %v1901_v42, %v1897_v4  ;;  %v12586_v5 = vadd.f32 %v1902_v37, %v12552_v6 }
 0x37a   : > { %v1906_v23 = vpop.f32.mrf.mxu0 }
 0x37b   : > { %17755 = vst [vmem:[#allocation152_spill] sm:$0xff] %v12583_v35  ;;  %17756 = vst [vmem:[#allocation153_spill] sm:$0xff] %v12586_v5  ;;  %v1907_v55 = vadd.f32 %v1906_v23, %v12567_v2 }
 0x37c   : > { %v1908_v47 = vpop.f32.mrf.mxu0  ;;  %9299 = vmatpush3.bf16.xpose.msra.mxu1 %v2276_v33 }
 0x37d   : > { %v12593_v53 = vadd.f32 %v1908_v47, %v12552_v6  ;;  %9786 = vmatprep.subr.msk.bf16.mxu1 %vm2087_vm0, %v12588_v44  ;;  %v1818_v47 = vadd.f32 %v12471_v10, %v12145_v9 }
 0x37e   : > { %v1910_v40 = vpop.f32.mrf.mxu0 }
 0x37f   : > { %17758 = vst [vmem:[#allocation155_spill] sm:$0xff] %v12593_v53  ;;  %v1911_v46 = vadd.f32 %v1910_v40, %v12567_v2 }
 0x380   : > { %v1912_v14 = vpop.f32.mrf.mxu0 }
 0x381   : > { %v12603_v4 = vpack.c.bf16 %v1911_v46, %v1907_v55  ;;  %v12606_v42 = vadd.f32 %v1912_v14, %v12552_v6  ;;  %v12630_v14 = vpack.c.bf16 %v1818_v47, %v1814_v24 }
 0x382   : > { %v12608_v37 = vpop.f32.mrf.mxu0 }
 0x383   : > { %17759 = vst [vmem:[#allocation156_spill] sm:$0xff] %v12603_v4  ;;  %17760 = vst [vmem:[#allocation157_spill] sm:$0xff] %v12606_v42  ;;  %v2267_v47 = vsel %vm2087_vm0, %v12630_v14, 0 }
 0x384   : > { %v1918_v33 = vpop.f32.mrf.mxu0  ;;  %9301 = vmatpush3.bf16.xpose.msra.mxu1 %v2273_v56  ;;  %17764 = vst [vmem:[#allocation161_spill] sm:$0xff] %v12630_v14 }
 0x385   : > { %v12615_v23 = vadd.f32 %v1918_v33, %v12552_v6  ;;  %9787 = vmatprep.subr.msk.bf16.mxu1 %vm2087_vm0, %v12610_v8 }
 0x386   : > { %v12619_v59 = vpop.f32.mrf.mxu0 }
 0x387   : > { %17762 = vst [vmem:[#allocation159_spill] sm:$0xff] %v12615_v23 }
 0x388   : > { %v1922_v40 = vpop.f32.mrf.mxu0 }
 0x389   : > { %v12626_v55 = vadd.f32 %v1922_v40, %v12552_v6 }
 0x38a   : > { %v12628_v46 = vpop.f32.mrf.mxu0 }
 0x38b   : > { %17763 = vst [vmem:[#allocation160_spill] sm:$0xff] %v12626_v55 }
 0x38c   : > { %v1928_v56 = vpop.f32.mrf.mxu0  ;;  %9303 = vmatpush3.bf16.xpose.msra.mxu1 %v2270_v28 }
 0x38d   : > { %v12635_v33 = vadd.f32 %v1928_v56, %v12552_v6  ;;  %9788 = vmatprep.subr.msk.bf16.mxu1 %vm2087_vm0, %v12630_v14 }
 0x38e   : > { %v12639_v10 = vpop.f32.mrf.mxu0 }
 0x38f   : > { %17765 = vst [vmem:[#allocation162_spill] sm:$0xff] %v12635_v33 }
 0x390   : > { %v1932_v9 = vpop.f32.mrf.mxu0 }
 0x391   : > { %v12642_v20 = vadd.f32 %v1932_v9, %v12552_v6  ;;  %v2264_v9 = vsel %vm2087_vm0, %v12453_v62, 0 }
 0x392   : > { %v1936_v40 = vpop.f32.mrf.mxu0 }
 0x393   : > { %17766 = vst [vmem:[#allocation163_spill] sm:$0xff] %v12642_v20 }
 0x394   : > { %v1938_v24 = vpop.f32.mrf.mxu0  ;;  %9305 = vmatpush3.bf16.xpose.msra.mxu1 %v2267_v47 }
 0x395   : > { %v12647_v28 = vadd.f32 %v1938_v24, %v12552_v6  ;;  %9789 = vmatprep.subr.msk.bf16.mxu1 %vm2087_vm0, %v12453_v62 }
 0x396   : > { %v1940_v56 = vpop.f32.mrf.mxu0 }
 0x397   : > { %17767 = vst [vmem:[#allocation164_spill] sm:$0xff] %v12647_v28 }
 0x398   : > { %v1942_v5 = vpop.f32.mrf.mxu0 }
 0x399   : > { %v12652_v15 = vadd.f32 %v1942_v5, %v12552_v6  ;;  %v2261_v5 = vsel %vm2087_vm0, %v12378_v48, 0 }
 0x39a   : > { %v1946_v42 = vpop.f32.mrf.mxu0 }
 0x39b   : > { %17768 = vst [vmem:[#allocation165_spill] sm:$0xff] %v12652_v15 }
 0x39c   : > { %v1948_v53 = vpop.f32.mrf.mxu0  ;;  %9307 = vmatpush3.bf16.xpose.msra.mxu1 %v2264_v9 }
 0x39d   : > { %v12657_v55 = vadd.f32 %v1948_v53, %v12552_v6  ;;  %9790 = vmatprep.subr.msk.bf16.mxu1 %vm2087_vm0, %v12378_v48 }
 0x39e   : > { %v1950_v47 = vpop.f32.mrf.mxu0 }
 0x39f   : > { %17769 = vst [vmem:[#allocation166_spill] sm:$0xff] %v12657_v55 }
 0x3a0   : > { %v1952_v24 = vpop.f32.mrf.mxu0 }
 0x3a1   : > { %v12662_v23 = vadd.f32 %v1952_v24, %v12552_v6  ;;  %v2258_v24 = vsel %vm2087_vm0, %v12344_v16, 0 }
 0x3a2   : > { %v1956_v20 = vpop.f32.mrf.mxu0 }
 0x3a3   : > { %17770 = vst [vmem:[#allocation167_spill] sm:$0xff] %v12662_v23 }
 0x3a4   : > { %v1958_v33 = vpop.f32.mrf.mxu0  ;;  %9309 = vmatpush3.bf16.xpose.msra.mxu1 %v2261_v5 }
 0x3a5   : > { %v12667_v15 = vadd.f32 %v1958_v33, %v12552_v6  ;;  %9791 = vmatprep.subr.msk.bf16.mxu1 %vm2087_vm0, %v12344_v16 }
 0x3a6   : > { %v1960_v53 = vpop.f32.mrf.mxu0 }
 0x3a7   : > { %17771 = vst [vmem:[#allocation168_spill] sm:$0xff] %v12667_v15  ;;  %v1961_v33 = vadd.f32 %v1960_v53, %v12567_v2 }
 0x3a8   : > { %v1962_v9 = vpop.f32.mrf.mxu0 }
 0x3a9   : > { %v12672_v28 = vadd.f32 %v1962_v9, %v12552_v6  ;;  %v1957_v9 = vadd.f32 %v1956_v20, %v12567_v2  ;;  %v1941_v20 = vadd.f32 %v1940_v56, %v12567_v2  ;;  %v1931_v56 = vadd.f32 %v12639_v10, %v12567_v2 }
 0x3aa   : > { %v1966_v55 = vpop.f32.mrf.mxu0 }
 0x3ab   : > { %17772 = vst [vmem:[#allocation169_spill] sm:$0xff] %v12672_v28  ;;  %v1967_v15 = vadd.f32 %v1966_v55, %v12567_v2 }
 0x3ac   : > { %v1968_v23 = vpop.f32.mrf.mxu0  ;;  %9311 = vmatpush3.bf16.xpose.msra.mxu1 %v2258_v24  ;;  %v1951_v24 = vadd.f32 %v1950_v47, %v12567_v2 }
 0x3ad   : > { %v12677_v0 = vadd.f32 %v1968_v23, %v12552_v6  ;;  %v12689_v23 = vpack.c.bf16 %v1961_v33, %v1957_v9  ;;  %v1937_v9 = vadd.f32 %v1936_v40, %v12567_v2  ;;  %v1927_v40 = vadd.f32 %v12628_v46, %v12567_v2 }
 0x3ae   : > { %v1970_v5 = vpop.f32.mrf.mxu0  ;;  %v1917_v46 = vadd.f32 %v12608_v37, %v12567_v2 }
 0x3af   : > { %17773 = vst [vmem:[#allocation170_spill] sm:$0xff] %v12677_v0  ;;  %v1971_v26 = vadd.f32 %v1970_v5, %v12567_v2  ;;  %17776 = vst [vmem:[#allocation173_spill] sm:$0xff] %v12689_v23 }
 0x3b0   : > { %v1972_v12 = vpop.f32.mrf.mxu0 }
 0x3b1   : > { %v12683_v28 = vpack.c.bf16 %v1971_v26, %v1967_v15  ;;  %v12686_v27 = vadd.f32 %v1972_v12, %v12552_v6  ;;  %v1947_v26 = vadd.f32 %v1946_v42, %v12567_v2 }
 0x3b2   : > { %v1976_v43 = vpop.f32.mrf.mxu0 }
 0x3b3   : > { %17774 = vst [vmem:[#allocation171_spill] sm:$0xff] %v12683_v28  ;;  %17775 = vst [vmem:[#allocation172_spill] sm:$0xff] %v12686_v27  ;;  %9313 = vmatmul.mubr.msk.bf16.vlgmr.msra.gmra.mxu1 %vm2087_vm0, %v12376_v41  ;;  %9328 = vmatprep.subr.bf16.mxu1 %v12683_v28  ;;  %v12703_v47 = vpack.c.bf16 %v1951_v24, %v1947_v26  ;;  %v1977_v53 = vadd.f32 %v1976_v43, %v12567_v2 }
 0x3b4   : > { %v1978_v55 = vpop.f32.mrf.mxu0  ;;  %9316 = vmatprep.mubr.msk.bf16.mxu1 %vm2087_vm0, %v12451_v63  ;;  %9329 = vmatpush3.bf16.msra.mxu1 %v12683_v28  ;;  %v12717_v24 = vpack.c.bf16 %v1941_v20, %v1937_v9  ;;  %v12732_v20 = vpack.c.bf16 %v1931_v56, %v1927_v40 }
 0x3b5   : > { %v12699_v12 = vadd.f32 %v1978_v55, %v12552_v6  ;;  %9330 = vmatprep.subr.bf16.mxu1 %v12689_v23  ;;  %17778 = vst [vmem:[#allocation175_spill] sm:$0xff] %v12703_v47 }
 0x3b6   : > { %v1980_v15 = vpop.f32.mrf.mxu0  ;;  %17781 = vst [vmem:[#allocation178_spill] sm:$0xff] %v12717_v24  ;;  %17783 = vst [vmem:[#allocation180_spill] sm:$0xff] %v12732_v20 }
 0x3b7   : > { %17777 = vst [vmem:[#allocation174_spill] sm:$0xff] %v12699_v12  ;;  %v1981_v5 = vadd.f32 %v1980_v15, %v12567_v2  ;;  %v1921_v15 = vadd.f32 %v12619_v59, %v12567_v2 }
 0x3b8   : > { %v1982_v33 = vpop.f32.mrf.mxu0  ;;  %9331 = vmatpush3.bf16.msra.mxu1 %v12689_v23 }
 0x3b9   : > { %v12709_v42 = vpack.c.bf16 %v1981_v5, %v1977_v53  ;;  %v12712_v55 = vadd.f32 %v1982_v33, %v12552_v6  ;;  %9332 = vmatprep.subr.bf16.mxu1 %v12703_v47  ;;  %v12747_v56 = vpack.c.bf16 %v1921_v15, %v1917_v46 }
 0x3ba   : > { %v1986_v12 = vpop.f32.mrf.mxu0 }
 0x3bb   : > { %17779 = vst [vmem:[#allocation176_spill] sm:$0xff] %v12709_v42  ;;  %17780 = vst [vmem:[#allocation177_spill] sm:$0xff] %v12712_v55  ;;  %9317 = vmatmul.mubr.msk.bf16.gmra.mxu1 %vm2087_vm0, %v12475_v60  ;;  %v1987_v53 = vadd.f32 %v1986_v12, %v12567_v2 }
 0x3bc   : > { %v1988_v43 = vpop.f32.mrf.mxu0  ;;  %9320 = vmatprep.mubr.msk.bf16.mxu1 %vm2087_vm0, %v12495_v51  ;;  %9333 = vmatpush3.bf16.msra.mxu1 %v12703_v47  ;;  %17786 = vst [vmem:[#allocation183_spill] sm:$0xff] %v12747_v56 }
 0x3bd   : > { %v12727_v26 = vadd.f32 %v1988_v43, %v12552_v6  ;;  %9334 = vmatprep.subr.bf16.mxu1 %v12717_v24 }
 0x3be   : > { %v1990_v10 = vpop.f32.mrf.mxu0 }
 0x3bf   : > { %17782 = vst [vmem:[#allocation179_spill] sm:$0xff] %v12727_v26  ;;  %v1991_v5 = vadd.f32 %v1990_v10, %v12567_v2 }
 0x3c0   : > { %v1992_v33 = vpop.f32.mrf.mxu0  ;;  %9335 = vmatpush3.bf16.msra.mxu1 %v12717_v24 }
 0x3c1   : > { %v12739_v9 = vpack.c.bf16 %v1991_v5, %v1987_v53  ;;  %v12742_v43 = vadd.f32 %v1992_v33, %v12552_v6  ;;  %9336 = vmatprep.subr.bf16.mxu1 %v12732_v20 }
 0x3c2   : > { %v12745_v59 = vpop.f32.mrf.mxu0 }
 0x3c3   : > { %17784 = vst [vmem:[#allocation181_spill] sm:$0xff] %v12739_v9  ;;  %17785 = vst [vmem:[#allocation182_spill] sm:$0xff] %v12742_v43  ;;  %9321 = vmatmul.mubr.msk.bf16.gmra.mxu1 %vm2087_vm0, %v12513_v29 }
 0x3c4   : > { %v1998_v12 = vpop.f32.mrf.mxu0  ;;  %9324 = vmatprep.mubr.msk.bf16.mxu1 %vm2087_vm0, %v12529_v22  ;;  %9337 = vmatpush3.bf16.msra.mxu1 %v12732_v20 }
 0x3c5   : > { %v12755_v37 = vadd.f32 %v1998_v12, %v12552_v6  ;;  %9338 = vmatprep.subr.bf16.mxu1 %v12747_v56 }
 0x3c6   : > { %v12758_v40 = vpop.f32.mrf.mxu0 }
 0x3c7   : > { %17787 = vst [vmem:[#allocation184_spill] sm:$0xff] %v12755_v37 }
 0x3c8   : > { %v2002_v10 = vpop.f32.mrf.mxu0  ;;  %9339 = vmatpush3.bf16.msra.mxu1 %v12747_v56 }
 0x3c9   : > { %v12762_v15 = vadd.f32 %v2002_v10, %v12552_v6  ;;  %9340 = vmatprep.subr.bf16.mxu1 %v12603_v4 }
 0x3ca   : > { %v12765_v53 = vpop.f32.mrf.mxu0 }
 0x3cb   : > { %17788 = vst [vmem:[#allocation185_spill] sm:$0xff] %v12762_v15  ;;  %9325 = vmatmul.mubr.msk.bf16.gmra.mxu1 %vm2087_vm0, %v12554_v3 }
 0x3cc   : > { %v2008_v5 = vpop.f32.mrf.mxu0  ;;  %9341 = vmatpush3.bf16.msra.mxu1 %v12603_v4 }
 0x3cd   : > { %v12771_v33 = vadd.f32 %v2008_v5, %v12552_v6  ;;  %9342 = vmatprep.subr.bf16.mxu1 %v12583_v35 }
 0x3ce   : > { %v2010_v46 = vpop.f32.mrf.mxu0 }
 0x3cf   : > { %17789 = vst [vmem:[#allocation186_spill] sm:$0xff] %v12771_v33 }
 0x3d0   : > { %v2012_v12 = vpop.f32.mrf.mxu0  ;;  %9343 = vmatpush3.bf16.msra.mxu1 %v12583_v35 }
 0x3d1   : > { %v12776_v10 = vadd.f32 %v2012_v12, %v12552_v6 }
 0x3d2   : > { %v2016_v55 = vpop.f32.mrf.mxu0 }
 0x3d3   : > { %17790 = vst [vmem:[#allocation187_spill] sm:$0xff] %v12776_v10 }
 0x3d4   : > { %v2018_v43 = vpop.f32.mrf.mxu0 }
 0x3d5   : > { %v12779_v26 = vadd.f32 %v2018_v43, %v12552_v6 }
 0x3d6   : > { %v2020_v15 = vpop.f32.mrf.mxu0 }
 0x3d7   : > { %17791 = vst [vmem:[#allocation188_spill] sm:$0xff] %v12779_v26 }
 0x3d8   : > { %v2022_v37 = vpop.f32.mrf.mxu0 }
 0x3d9   : > { %v12782_v27 = vadd.f32 %v2022_v37, %v12552_v6 }
 0x3da   : > { %v2026_v5 = vpop.f32.mrf.mxu0 }
 0x3db   : > { %17792 = vst [vmem:[#allocation189_spill] sm:$0xff] %v12782_v27 }
 0x3dc   : > { %v2028_v33 = vpop.f32.mrf.mxu0 }
 0x3dd   : > { %v12785_v0 = vadd.f32 %v2028_v33, %v12552_v6 }
 0x3de   : > { %v2030_v54 = vpop.f32.mrf.mxu0 }
 0x3df   : > { %17793 = vst [vmem:[#allocation190_spill] sm:$0xff] %v12785_v0 }
 0x3e0   : > { %v2032_v61 = vpop.f32.mrf.mxu0 }
 0x3e1   : > { %v12788_v12 = vadd.f32 %v2032_v61, %v12552_v6 }
 0x3e2   : > { %v2036_v10 = vpop.f32.mrf.mxu0 }
 0x3e3   : > { %17794 = vst [vmem:[#allocation191_spill] sm:$0xff] %v12788_v12 }
 0x3e4   : > { %v2038_v38 = vpop.f32.mrf.mxu0 }
 0x3e5   : > { %v12791_v43 = vadd.f32 %v2038_v38, %v12552_v6  ;;  %v2037_v38 = vadd.f32 %v2036_v10, %v12567_v2 }
 0x3e6   : > { %v2040_v26 = vpop.f32.mrf.mxu0 }
 0x3e7   : > { %17795 = vst [vmem:[#allocation192_spill] sm:$0xff] %v12791_v43  ;;  %v2041_v35 = vadd.f32 %v2040_v26, %v12567_v2 }
 0x3e8   : > { %v2042_v50 = vpop.f32.mrf.mxu0 }
 0x3e9   : > { %v12794_v37 = vadd.f32 %v2042_v50, %v12552_v6 }
 0x3ea   : > { %v2046_v27 = vpop.f32.mrf.mxu0 }
 0x3eb   : > { %17796 = vst [vmem:[#allocation193_spill] sm:$0xff] %v12794_v37  ;;  %v2047_v61 = vadd.f32 %v2046_v27, %v12567_v2 }
 0x3ec   : > { %v2048_v32 = vpop.f32.mrf.mxu0 }
 0x3ed   : > { %v12797_v33 = vadd.f32 %v2048_v32, %v12552_v6  ;;  %v2031_v32 = vadd.f32 %v2030_v54, %v12567_v2 }
 0x3ee   : > { %v2050_v0 = vpop.f32.mrf.mxu0 }
 0x3ef   : > { %17797 = vst [vmem:[#allocation194_spill] sm:$0xff] %v12797_v33  ;;  %v2051_v12 = vadd.f32 %v2050_v0, %v12567_v2  ;;  %v12811_v33 = vpack.c.bf16 %v2041_v35, %v2037_v38  ;;  %v2027_v0 = vadd.f32 %v2026_v5, %v12567_v2  ;;  %v2017_v35 = vadd.f32 %v2016_v55, %v12567_v2 }
 0x3f0   : > { %v2052_v4 = vpop.f32.mrf.mxu0  ;;  %v2011_v5 = vadd.f32 %v2010_v46, %v12567_v2  ;;  %v2001_v46 = vadd.f32 %v12758_v40, %v12567_v2 }
 0x3f1   : > { %v12803_v43 = vpack.c.bf16 %v2051_v12, %v2047_v61  ;;  %v12806_v50 = vadd.f32 %v2052_v4, %v12552_v6  ;;  %17800 = vst [vmem:[#allocation197_spill] sm:$0xff] %v12811_v33  ;;  %v2021_v4 = vadd.f32 %v2020_v15, %v12567_v2  ;;  %v12823_v26 = vpack.c.bf16 %v2031_v32, %v2027_v0 }
 0x3f2   : > { %v12808_v37 = vpop.f32.mrf.mxu0  ;;  %v2007_v61 = vadd.f32 %v12765_v53, %v12567_v2  ;;  %v1997_v53 = vadd.f32 %v12745_v59, %v12567_v2 }
 0x3f3   : > { %17798 = vst [vmem:[#allocation195_spill] sm:$0xff] %v12803_v43  ;;  %17799 = vst [vmem:[#allocation196_spill] sm:$0xff] %v12806_v50  ;;  %2382 = vmax.xlane.f32.xlu0 %v12808_v37  ;;  %9360 = vmatprep.subr.bf16.mxu0 %v12803_v43  ;;  %v12835_v12 = vpack.c.bf16 %v2021_v4, %v2017_v35 }
 0x3f4   : > { %v12815_v27 = vpop.f32.mrf.mxu0  ;;  %9361 = vmatpush3.bf16.msra.mxu0 %v12803_v43  ;;  %17801 = vst [vmem:[#allocation198_spill] sm:$0xff] %v12823_v26  ;;  %v12849_v38 = vpack.c.bf16 %v2011_v5, %v2007_v61  ;;  %v12861_v4 = vpack.c.bf16 %v2001_v46, %v1997_v53 }
 0x3f5   : > { %9362 = vmatprep.subr.bf16.mxu0 %v12811_v33  ;;  %17802 = vst [vmem:[#allocation199_spill] sm:$0xff] %v12835_v12 }
 0x3f6   : > { %v12820_v6 = vpop.f32.mrf.mxu0  ;;  %17803 = vst [vmem:[#allocation200_spill] sm:$0xff] %v12849_v38  ;;  %17804 = vst [vmem:[#allocation201_spill] sm:$0xff] %v12861_v4 }
 0x3f7   : > { %2378 = vmax.xlane.f32.xlu0 %v12815_v27  ;;  %2384 = vmax.xlane.f32.xlu1 %v12820_v6 }
 0x3f8   : > { %v12827_v54 = vpop.f32.mrf.mxu0  ;;  %9363 = vmatpush3.bf16.msra.mxu0 %v12811_v33 }
 0x3f9   : > { %9364 = vmatprep.subr.bf16.mxu0 %v12823_v26 }
 0x3fa   : > { %v12832_v10 = vpop.f32.mrf.mxu0 }
 0x3fb   : > { %2380 = vmax.xlane.f32.xlu1 %v12827_v54  ;;  %2390 = vmax.xlane.f32.xlu0 %v12832_v10 }
 0x3fc   : > { %v12839_v15 = vpop.f32.mrf.mxu0  ;;  %9365 = vmatpush3.bf16.msra.mxu0 %v12823_v26 }
 0x3fd   : > { %9366 = vmatprep.subr.bf16.mxu0 %v12835_v12 }
 0x3fe   : > { %v12845_v55 = vpop.f32.mrf.mxu0 }
 0x3ff   : > { %2386 = vmax.xlane.f32.xlu0 %v12839_v15  ;;  %2392 = vmax.xlane.f32.xlu1 %v12845_v55 }
 0x400   : > { %v12853_v32 = vpop.f32.mrf.mxu0  ;;  %9367 = vmatpush3.bf16.msra.mxu0 %v12835_v12 }
 0x401   : > { %9368 = vmatprep.subr.bf16.mxu0 %v12849_v38 }
 0x402   : > { %v12859_v0 = vpop.f32.mrf.mxu0 }
 0x403   : > { %2388 = vmax.xlane.f32.xlu1 %v12853_v32  ;;  %2398 = vmax.xlane.f32.xlu0 %v12859_v0 }
 0x404   : > { %v12865_v40 = vpop.f32.mrf.mxu0  ;;  %9369 = vmatpush3.bf16.msra.mxu0 %v12849_v38 }
 0x405   : > { %9370 = vmatprep.subr.bf16.mxu0 %v12861_v4 }
 0x406   : > { %v12869_v35 = vpop.f32.mrf.mxu0 }
 0x407   : > { %2394 = vmax.xlane.f32.xlu0 %v12865_v40  ;;  %2400 = vmax.xlane.f32.xlu1 %v12869_v35 }
 0x408   : > { %v12873_v2 = vpop.f32.mrf.mxu0  ;;  %9371 = vmatpush3.bf16.msra.mxu0 %v12861_v4 }
 0x409   : > { %9372 = vmatprep.subr.bf16.mxu0 %v12739_v9 }
 0x40a   : > { %v12877_v59 = vpop.f32.mrf.mxu0 }
 0x40b   : > { %2396 = vmax.xlane.f32.xlu1 %v12873_v2 }
 0x40c   : > { %v12880_v5 = vpop.f32.mrf.mxu0  ;;  %9373 = vmatpush3.bf16.msra.mxu0 %v12739_v9 }
 0x40d   : > { %2402 = vmax.xlane.f32.xlu0 %v12880_v5  ;;  %9374 = vmatprep.subr.bf16.mxu0 %v12709_v42 }
 0x40e   : > { %v12885_v61 = vpop.f32.mrf.mxu0 }
 0x410   : > { %v12887_v46 = vpop.f32.mrf.mxu0  ;;  %9375 = vmatpush3.bf16.msra.mxu0 %v12709_v42 }
 0x411   : > { %2404 = vmax.xlane.f32.xlu1 %v12887_v46 }
 0x473   : > { %v12891_v53 = vpop.f32.mrf.mxu1 }
 0x474   : > { %2414 = vmax.xlane.f32.xlu0 %v12891_v53 }
 0x475   : > { %v12894_v50 = vpop.f32.mrf.mxu1 }
 0x477   : > { %v12896_v4 = vpop.f32.mrf.mxu1 }
 0x478   : > { %2410 = vmax.xlane.f32.xlu0 %v12894_v50  ;;  %2416 = vmax.xlane.f32.xlu1 %v12896_v4 }
 0x479   : > { %v12900_v9 = vpop.f32.mrf.mxu1 }
 0x47b   : > { %v12902_v56 = vpop.f32.mrf.mxu1 }
 0x47c   : > { %v2383_v20 = vpop.xlane.xlu0 %2382  ;;  %2422 = vmax.xlane.f32.xlu0 %v12902_v56  ;;  %2412 = vmax.xlane.f32.xlu1 %v12900_v9 }
 0x47d   : > { %v12906_v42 = vpop.f32.mrf.mxu1  ;;  %v2444_v23 = vsub.f32 %v12808_v37, %v2383_v20 }
 0x47f   : > { %v12908_v12 = vpop.f32.mrf.mxu1 }
 0x480   : > { %v2379_v24 = vpop.xlane.xlu0 %2378  ;;  %v2385_v47 = vpop.xlane.xlu1 %2384  ;;  %2418 = vmax.xlane.f32.xlu0 %v12906_v42  ;;  %2424 = vmax.xlane.f32.xlu1 %v12908_v12 }
 0x481   : > { %v2442_v38 = vsub.f32 %v12815_v27, %v2379_v24  ;;  %v2445_v33 = vsub.f32 %v12820_v6, %v2385_v47  ;;  %v12914_v26 = vpop.f32.mrf.mxu1  ;;  %v2478_v24 = vmul.f32 1.442695, %v2444_v23 }
 0x483   : > { %v2474_v43 = vmul.f32 1.442695, %v2442_v38  ;;  %v12917_v28 = vpop.f32.mrf.mxu1  ;;  %v2480_v3 = vmul.f32 1.442695, %v2445_v33 }
 0x484   : > { %v2381_v11 = vpop.xlane.xlu1 %2380  ;;  %v2391_v22 = vpop.xlane.xlu0 %2390  ;;  %2430 = vmax.xlane.f32.xlu0 %v12917_v28  ;;  %2420 = vmax.xlane.f32.xlu1 %v12914_v26 }
 0x485   : > { %v2443_v7 = vsub.f32 %v12827_v54, %v2381_v11  ;;  %v12922_v29 = vpop.f32.mrf.mxu1  ;;  %10134 = vpow2.f32 %v2474_v43  ;;  %v2448_v23 = vsub.f32 %v12832_v10, %v2391_v22 }
 0x486   : > { %10136 = vpow2.f32 %v2480_v3 }
 0x487   : > { %v2476_v47 = vmul.f32 1.442695, %v2443_v7  ;;  %v12924_v27 = vpop.f32.mrf.mxu1 }
 0x488   : > { %v2387_v20 = vpop.xlane.xlu0 %2386  ;;  %v2393_v37 = vpop.xlane.xlu1 %2392  ;;  %2426 = vmax.xlane.f32.xlu0 %v12922_v29  ;;  %2432 = vmax.xlane.f32.xlu1 %v12924_v27 }
 0x489   : > { %10138 = vpow2.f32 %v2476_v47  ;;  %v2446_v33 = vsub.f32 %v12839_v15, %v2387_v20  ;;  %v2449_v6 = vsub.f32 %v12845_v55, %v2393_v37  ;;  %v12930_v11 = vpop.f32.mrf.mxu1  ;;  %v2486_v55 = vmul.f32 1.442695, %v2448_v23 }
 0x48a   : > { %10140 = vpow2.f32 %v2478_v24 }
 0x48b   : > { %v2482_v7 = vmul.f32 1.442695, %v2446_v33  ;;  %v12933_v43 = vpop.f32.mrf.mxu1  ;;  %v2488_v3 = vmul.f32 1.442695, %v2449_v6 }
 0x48c   : > { %v2389_v54 = vpop.xlane.xlu1 %2388  ;;  %v2399_v38 = vpop.xlane.xlu0 %2398  ;;  %2406 = vmax.xlane.f32.xlu0 %v12877_v59  ;;  %2428 = vmax.xlane.f32.xlu1 %v12930_v11 }
 0x48d   : > { %v2447_v47 = vsub.f32 %v12853_v32, %v2389_v54  ;;  %v12938_v15 = vpop.f32.mrf.mxu1  ;;  %10142 = vpow2.f32 %v2482_v7  ;;  %v2452_v32 = vsub.f32 %v12859_v0, %v2399_v38 }
 0x48e   : > { %10144 = vpow2.f32 %v2488_v3 }
 0x48f   : > { %v2484_v20 = vmul.f32 1.442695, %v2447_v47  ;;  %v12940_v24 = vpop.f32.mrf.mxu1 }
 0x490   : > { %v2395_v22 = vpop.xlane.xlu0 %2394  ;;  %v2401_v10 = vpop.xlane.xlu1 %2400  ;;  %2408 = vmax.xlane.f32.xlu1 %v12885_v61  ;;  %2434 = vmax.xlane.f32.xlu0 %v12938_v15 }
 0x491   : > { %10146 = vpow2.f32 %v2484_v20  ;;  %v2450_v37 = vsub.f32 %v12865_v40, %v2395_v22  ;;  %v2453_v33 = vsub.f32 %v12869_v35, %v2401_v10  ;;  %v12947_v23 = vpop.f32.mrf.mxu1  ;;  %v2494_v35 = vmul.f32 1.442695, %v2452_v32 }
 0x492   : > { %10148 = vpow2.f32 %v2486_v55  ;;  %v12949_v7 = vpop.eup %10134 }
 0x493   : > { %v2490_v6 = vmul.f32 1.442695, %v2450_v37  ;;  %v2496_v3 = vmul.f32 1.442695, %v2453_v33  ;;  %v12953_v47 = vpop.eup %10136 }
 0x494   : > { %v2397_v54 = vpop.xlane.xlu1 %2396  ;;  %2438 = vmax.xlane.f32.xlu0 %v12933_v43  ;;  %2436 = vmax.xlane.f32.xlu1 %v12947_v23 }
 0x495   : > { %v2451_v40 = vsub.f32 %v12873_v2, %v2397_v54  ;;  %10150 = vpow2.f32 %v2490_v6 }
 0x496   : > { %v12956_v20 = vpop.eup %10138  ;;  %v2403_v55 = vpop.xlane.xlu0 %2402  ;;  %10152 = vpow2.f32 %v2496_v3 }
 0x497   : > { %v12958_v0 = vpop.eup %10140  ;;  %v2492_v38 = vmul.f32 1.442695, %v2451_v40  ;;  %v2454_v22 = vsub.f32 %v12880_v5, %v2403_v55  ;;  %v2634_v10 = vpack.c.bf16 %v12956_v20, %v12949_v7 }
 0x498   : > { %2542 = vadd.xlane.f32.xlu0 %v12958_v0  ;;  %2440 = vmax.xlane.f32.xlu1 %v12940_v24  ;;  %v2635_v2 = vpack.c.bf16 %v12953_v47, %v12958_v0 }
 0x499   : > { %10154 = vpow2.f32 %v2492_v38  ;;  %9344 = vmatprep.mubr.bf16.mxu1 %v2634_v10  ;;  %v2498_v37 = vmul.f32 1.442695, %v2454_v22 }
 0x49a   : > { %10156 = vpow2.f32 %v2494_v35  ;;  %v2405_v33 = vpop.xlane.xlu1 %2404  ;;  %9345 = vmatmul.mubr.bf16.vlgmr.msra.gmra.mxu1 %v2635_v2  ;;  %v12968_v5 = vpop.eup %10142 }
 0x49b   : > { %v2455_v32 = vsub.f32 %v12887_v46, %v2405_v33  ;;  %v12972_v6 = vpop.eup %10144  ;;  %10158 = vpow2.f32 %v2498_v37 }
 0x49c   : > { %2538 = vadd.xlane.f32.xlu0 %v12949_v7  ;;  %2544 = vadd.xlane.f32.xlu1 %v12953_v47 }
 0x49d   : > { %v2500_v3 = vmul.f32 1.442695, %v2455_v32 }
 0x49e   : > { %v12974_v54 = vpop.eup %10146 }
 0x49f   : > { %v12976_v40 = vpop.eup %10148  ;;  %10160 = vpow2.f32 %v2500_v3  ;;  %v2636_v35 = vpack.c.bf16 %v12974_v54, %v12968_v5 }
 0x4a0   : > { %2550 = vadd.xlane.f32.xlu0 %v12976_v40  ;;  %2540 = vadd.xlane.f32.xlu1 %v12956_v20  ;;  %v2637_v46 = vpack.c.bf16 %v12972_v6, %v12976_v40 }
 0x4a1   : > { %9348 = vmatprep.mubr.bf16.mxu1 %v2636_v35 }
 0x4a2   : > { %9349 = vmatmul.mubr.bf16.gmra.mxu1 %v2637_v46  ;;  %v12984_v55 = vpop.eup %10150 }
 0x4a3   : > { %v12988_v38 = vpop.eup %10152 }
 0x4a4   : > { %2546 = vadd.xlane.f32.xlu0 %v12968_v5  ;;  %2552 = vadd.xlane.f32.xlu1 %v12972_v6 }
 0x4a6   : > { %v12990_v22 = vpop.eup %10154 }
 0x4a7   : > { %v12992_v10 = vpop.eup %10156  ;;  %v2638_v2 = vpack.c.bf16 %v12990_v22, %v12984_v55 }
 0x4a8   : > { %2558 = vadd.xlane.f32.xlu0 %v12992_v10  ;;  %2548 = vadd.xlane.f32.xlu1 %v12974_v54  ;;  %v2639_v37 = vpack.c.bf16 %v12988_v38, %v12992_v10  ;;  %v13000_v33 = vpop.eup %10158 }
 0x4a9   : > { %9352 = vmatprep.mubr.bf16.mxu1 %v2638_v2 }
 0x4aa   : > { %9353 = vmatmul.mubr.bf16.gmra.mxu1 %v2639_v37 }
 0x4ac   : > { %v13002_v32 = vpop.eup %10160  ;;  %2554 = vadd.xlane.f32.xlu0 %v12984_v55  ;;  %2560 = vadd.xlane.f32.xlu1 %v12988_v38 }
 0x4ad   : > { %v2640_v3 = vpack.c.bf16 %v13002_v32, %v13000_v33 }
 0x4af   : > { %9356 = vmatprep.mubr.bf16.mxu1 %v2640_v3 }
 0x4b0   : > { %2556 = vadd.xlane.f32.xlu1 %v12990_v22 }
 0x4fd   : > { %v2415_v35 = vpop.xlane.xlu0 %2414 }
 0x4fe   : > { %v2460_v51 = vsub.f32 %v12891_v53, %v2415_v35 }
 0x500   : > { %v2510_v41 = vmul.f32 1.442695, %v2460_v51 }
 0x501   : > { %v2411_v46 = vpop.xlane.xlu0 %2410  ;;  %v2417_v34 = vpop.xlane.xlu1 %2416 }
 0x502   : > { %v2458_v2 = vsub.f32 %v12894_v50, %v2411_v46  ;;  %v2461_v37 = vsub.f32 %v12896_v4, %v2417_v34 }
 0x504   : > { %v2506_v39 = vmul.f32 1.442695, %v2458_v2  ;;  %v2512_v63 = vmul.f32 1.442695, %v2461_v37 }
 0x505   : > { %v2423_v60 = vpop.xlane.xlu0 %2422  ;;  %v2413_v45 = vpop.xlane.xlu1 %2412 }
 0x506   : > { %v2459_v21 = vsub.f32 %v12900_v9, %v2413_v45  ;;  %10162 = vpow2.f32 %v2506_v39  ;;  %v2464_v34 = vsub.f32 %v12902_v56, %v2423_v60 }
 0x507   : > { %10164 = vpow2.f32 %v2512_v63 }
 0x508   : > { %v2508_v25 = vmul.f32 1.442695, %v2459_v21  ;;  %v2518_v51 = vmul.f32 1.442695, %v2464_v34 }
 0x509   : > { %v2419_v3 = vpop.xlane.xlu0 %2418  ;;  %v2425_v1 = vpop.xlane.xlu1 %2424 }
 0x50a   : > { %v2462_v49 = vsub.f32 %v12906_v42, %v2419_v3  ;;  %v2465_v50 = vsub.f32 %v12908_v12, %v2425_v1  ;;  %10166 = vpow2.f32 %v2508_v25 }
 0x50b   : > { %10168 = vpow2.f32 %v2510_v41 }
 0x50c   : > { %v2514_v4 = vmul.f32 1.442695, %v2462_v49  ;;  %v2520_v46 = vmul.f32 1.442695, %v2465_v50 }
 0x50d   : > { %v2431_v53 = vpop.xlane.xlu0 %2430  ;;  %v2421_v35 = vpop.xlane.xlu1 %2420 }
 0x50e   : > { %v2463_v45 = vsub.f32 %v12914_v26, %v2421_v35  ;;  %10170 = vpow2.f32 %v2514_v4  ;;  %v2468_v25 = vsub.f32 %v12917_v28, %v2431_v53 }
 0x50f   : > { %10172 = vpow2.f32 %v2520_v46 }
 0x510   : > { %v2516_v21 = vmul.f32 1.442695, %v2463_v45 }
 0x511   : > { %v2427_v39 = vpop.xlane.xlu0 %2426  ;;  %v2433_v9 = vpop.xlane.xlu1 %2432 }
 0x512   : > { %v2466_v63 = vsub.f32 %v12922_v29, %v2427_v39  ;;  %v2469_v1 = vsub.f32 %v12924_v27, %v2433_v9  ;;  %10174 = vpow2.f32 %v2516_v21  ;;  %v2526_v29 = vmul.f32 1.442695, %v2468_v25 }
 0x513   : > { %10176 = vpow2.f32 %v2518_v51  ;;  %v13020_v56 = vpop.eup %10162 }
 0x514   : > { %v2522_v49 = vmul.f32 1.442695, %v2466_v63  ;;  %v2528_v41 = vmul.f32 1.442695, %v2469_v1  ;;  %v13024_v2 = vpop.eup %10164 }
 0x515   : > { %v2407_v60 = vpop.xlane.xlu0 %2406  ;;  %v2429_v42 = vpop.xlane.xlu1 %2428 }
 0x516   : > { %v2456_v26 = vsub.f32 %v12877_v59, %v2407_v60  ;;  %v2467_v12 = vsub.f32 %v12930_v11, %v2429_v42  ;;  %10178 = vpow2.f32 %v2522_v49 }
 0x517   : > { %v13026_v37 = vpop.eup %10166  ;;  %10180 = vpow2.f32 %v2528_v41 }
 0x518   : > { %v2502_v27 = vmul.f32 1.442695, %v2456_v26  ;;  %v2524_v3 = vmul.f32 1.442695, %v2467_v12  ;;  %v13028_v50 = vpop.eup %10168  ;;  %v2642_v4 = vpack.c.bf16 %v13026_v37, %v13020_v56 }
 0x519   : > { %v2409_v28 = vpop.xlane.xlu1 %2408  ;;  %v2435_v34 = vpop.xlane.xlu0 %2434  ;;  %v2643_v59 = vpack.c.bf16 %v13024_v2, %v13028_v50 }
 0x51a   : > { %10182 = vpow2.f32 %v2502_v27  ;;  %v2457_v11 = vsub.f32 %v12885_v61, %v2409_v28  ;;  %v2470_v53 = vsub.f32 %v12938_v15, %v2435_v34  ;;  %9376 = vmatprep.mubr.bf16.mxu0 %v2642_v4 }
 0x51b   : > { %10184 = vpow2.f32 %v2524_v3  ;;  %9377 = vmatmul.mubr.bf16.vlgmr.msra.gmra.mxu0 %v2643_v59  ;;  %v13036_v51 = vpop.eup %10170 }
 0x51c   : > { %10186 = vpow2.f32 %v2526_v29  ;;  %v2504_v35 = vmul.f32 1.442695, %v2457_v11  ;;  %v2530_v21 = vmul.f32 1.442695, %v2470_v53  ;;  %v13040_v63 = vpop.eup %10172 }
 0x51d   : > { %v2439_v46 = vpop.xlane.xlu0 %2438  ;;  %v2437_v45 = vpop.xlane.xlu1 %2436 }
 0x51e   : > { %10188 = vpow2.f32 %v2504_v35  ;;  %v2472_v39 = vsub.f32 %v12933_v43, %v2439_v46  ;;  %v2471_v9 = vsub.f32 %v12947_v23, %v2437_v45 }
 0x51f   : > { %v13042_v61 = vpop.eup %10174  ;;  %10190 = vpow2.f32 %v2530_v21 }
 0x520   : > { %v2532_v15 = vmul.f32 1.442695, %v2471_v9  ;;  %v13044_v1 = vpop.eup %10176  ;;  %v2534_v25 = vmul.f32 1.442695, %v2472_v39  ;;  %v2644_v41 = vpack.c.bf16 %v13042_v61, %v13036_v51 }
 0x521   : > { %v2441_v49 = vpop.xlane.xlu1 %2440  ;;  %v2645_v43 = vpack.c.bf16 %v13040_v63, %v13044_v1  ;;  %v2543_v45 = vpop.xlane.xlu0 %2542 }
 0x522   : > { %v2473_v60 = vsub.f32 %v12940_v24, %v2441_v49  ;;  %10192 = vpow2.f32 %v2532_v15  ;;  %9380 = vmatprep.mubr.bf16.mxu0 %v2644_v41 }
 0x523   : > { %9381 = vmatmul.mubr.bf16.gmra.mxu0 %v2645_v43  ;;  %v13051_v42 = vpop.eup %10178  ;;  %10194 = vpow2.f32 %v2534_v25 }
 0x524   : > { %v2536_v23 = vmul.f32 1.442695, %v2473_v60  ;;  %17805 = vst [vmem:[#allocation202_spill] sm:$0xff] %v13051_v42  ;;  %v13053_v26 = vpop.eup %10180 }
 0x525   : > { %17806 = vst [vmem:[#allocation203_spill] sm:$0xff] %v13053_v26  ;;  %v2545_v21 = vpop.xlane.xlu1 %2544  ;;  %v2539_v39 = vpop.xlane.xlu0 %2538 }
 0x526   : > { %10196 = vpow2.f32 %v2536_v23 }
 0x527   : > { %v13055_v12 = vpop.eup %10182  ;;  %10198 = vrcp.f32 %v2543_v45 }
 0x528   : > { %v13057_v29 = vpop.eup %10184  ;;  %2566 = vadd.xlane.f32.xlu0 %v13055_v12  ;;  %10200 = vrcp.f32 %v2545_v21 }
 0x529   : > { %17807 = vst [vmem:[#allocation204_spill] sm:$0xff] %v13057_v29  ;;  %v13060_v24 = vpop.eup %10186  ;;  %v2646_v27 = vpack.c.bf16 %v13057_v29, %v13051_v42  ;;  %v2541_v9 = vpop.xlane.xlu1 %2540  ;;  %10202 = vrcp.f32 %v2539_v39 }
 0x52a   : > { %17808 = vst [vmem:[#allocation205_spill] sm:$0xff] %v13060_v24  ;;  %v2647_v3 = vpack.c.bf16 %v13053_v26, %v13060_v24  ;;  %v2551_v15 = vpop.xlane.xlu0 %2550  ;;  %10204 = vrcp.f32 %v2541_v9 }
 0x52b   : > { %v13066_v28 = vpop.eup %10188  ;;  %9384 = vmatprep.mubr.bf16.mxu0 %v2646_v27  ;;  %10206 = vrcp.f32 %v2551_v15 }
 0x52c   : > { %9385 = vmatmul.mubr.bf16.gmra.mxu0 %v2647_v3  ;;  %2562 = vadd.xlane.f32.xlu0 %v13000_v33  ;;  %v2641_v34 = vpack.c.bf16 %v13066_v28, %v13055_v12  ;;  %v13072_v4 = vpop.eup %10190 }
 0x52d   : > { %2568 = vadd.xlane.f32.xlu1 %v13066_v28  ;;  %17809 = vst [vmem:[#allocation206_spill] sm:$0xff] %v13072_v4  ;;  %v2553_v25 = vpop.xlane.xlu1 %2552 }
 0x52e   : > { %9357 = vmatmul.mubr.bf16.gmra.mxu1 %v2641_v34  ;;  %v2547_v49 = vpop.xlane.xlu0 %2546  ;;  %10208 = vrcp.f32 %v2553_v25 }
 0x52f   : > { %v13074_v59 = vpop.eup %10192  ;;  %10210 = vrcp.f32 %v2547_v49 }
 0x530   : > { %17810 = vst [vmem:[#allocation207_spill] sm:$0xff] %v13074_v59  ;;  %2574 = vadd.xlane.f32.xlu0 %v13028_v50  ;;  %v2648_v11 = vpack.c.bf16 %v13074_v59, %v13072_v4  ;;  %v13080_v53 = vpop.eup %10194 }
 0x531   : > { %2564 = vadd.xlane.f32.xlu1 %v13002_v32  ;;  %17811 = vst [vmem:[#allocation208_spill] sm:$0xff] %v13080_v53  ;;  %v2549_v41 = vpop.xlane.xlu1 %2548 }
 0x532   : > { %9388 = vmatprep.mubr.bf16.mxu0 %v2648_v11  ;;  %v2559_v60 = vpop.xlane.xlu0 %2558  ;;  %10212 = vrcp.f32 %v2549_v41 }
 0x533   : > { %v13082_v35 = vpop.eup %10196  ;;  %10214 = vrcp.f32 %v2559_v60 }
 0x534   : > { %17812 = vst [vmem:[#allocation209_spill] sm:$0xff] %v13082_v35  ;;  %2570 = vadd.xlane.f32.xlu0 %v13020_v56  ;;  %v2649_v46 = vpack.c.bf16 %v13082_v35, %v13080_v53  ;;  %v13101_v3 = vpop.eup %10198 }
 0x535   : > { %2576 = vadd.xlane.f32.xlu1 %v13024_v2  ;;  %v2561_v43 = vpop.xlane.xlu1 %2560  ;;  %v13103_v34 = vpop.eup %10200 }
 0x536   : > { %9389 = vmatmul.mubr.bf16.gmra.mxu0 %v2649_v46  ;;  %v13105_v46 = vpop.eup %10202  ;;  %v2555_v45 = vpop.xlane.xlu0 %2554  ;;  %10216 = vrcp.f32 %v2561_v43 }
 0x537   : > { %v13113_v9 = vpop.eup %10204  ;;  %10218 = vrcp.f32 %v2555_v45 }
 0x538   : > { %2582 = vadd.xlane.f32.xlu0 %v13044_v1  ;;  %v13125_v60 = vpop.eup %10206 }
 0x539   : > { %2572 = vadd.xlane.f32.xlu1 %v13026_v37  ;;  %v2557_v15 = vpop.xlane.xlu1 %2556 }
 0x53a   : > { %10220 = vrcp.f32 %v2557_v15 }
 0x53b   : > { %v13127_v48 = vpop.eup %10208 }
 0x53c   : > { %2578 = vadd.xlane.f32.xlu0 %v13036_v51 }
 0x53d   : > { %2584 = vadd.xlane.f32.xlu1 %v13040_v63 }
 0x540   : > { %2590 = vadd.xlane.f32.xlu0 %v13060_v24 }
 0x541   : > { %2580 = vadd.xlane.f32.xlu1 %v13042_v61 }
 0x544   : > { %2586 = vadd.xlane.f32.xlu0 %v13051_v42 }
 0x545   : > { %2592 = vadd.xlane.f32.xlu1 %v13053_v26 }
 0x548   : > { %2594 = vadd.xlane.f32.xlu0 %v13072_v4 }
 0x549   : > { %2588 = vadd.xlane.f32.xlu1 %v13057_v29 }
 0x54c   : > { %2598 = vadd.xlane.f32.xlu0 %v13080_v53 }
 0x54d   : > { %2596 = vadd.xlane.f32.xlu1 %v13074_v59 }
 0x551   : > { %2600 = vadd.xlane.f32.xlu1 %v13082_v35 }
 0x55a   : > { %v9346_v23 = vpop.f32.mrf.mxu1 }
 0x55b   : > { %v13108_v21 = vmul.f32 %v13101_v3, %v9346_v23 }
 0x55c   : > { %v2700_v27 = vpop.f32.mrf.mxu1 }
 0x55d   : > { %17813 = vst [vmem:[#allocation210_spill] sm:$0xff] %v13108_v21  ;;  %v13116_v49 = vmul.f32 %v13105_v46, %v2700_v27  ;;  %v13129_v27 = vpop.eup %10210 }
 0x55e   : > { %v9347_v11 = vpop.f32.mrf.mxu1  ;;  %v13137_v45 = vpop.eup %10212 }
 0x55f   : > { %v13111_v39 = vmul.f32 %v13103_v34, %v9347_v11  ;;  %17815 = vst [vmem:[#allocation212_spill] sm:$0xff] %v13116_v49 }
 0x560   : > { %v2703_v25 = vpop.f32.mrf.mxu1 }
 0x561   : > { %17814 = vst [vmem:[#allocation211_spill] sm:$0xff] %v13111_v39  ;;  %v13121_v16 = vmul.f32 %v13113_v9, %v2703_v25 }
 0x562   : > { %v9350_v23 = vpop.f32.mrf.mxu1 }
 0x563   : > { %17816 = vst [vmem:[#allocation213_spill] sm:$0xff] %v13121_v16  ;;  %v13132_v13 = vmul.f32 %v13125_v60, %v9350_v23  ;;  %v13149_v16 = vpop.eup %10214 }
 0x564   : > { %v2716_v30 = vpop.f32.mrf.mxu1 }
 0x565   : > { %17817 = vst [vmem:[#allocation214_spill] sm:$0xff] %v13132_v13  ;;  %v13140_v41 = vmul.f32 %v13129_v27, %v2716_v30 }
 0x566   : > { %v9351_v43 = vpop.f32.mrf.mxu1 }
 0x567   : > { %v13135_v25 = vmul.f32 %v13127_v48, %v9351_v43  ;;  %17819 = vst [vmem:[#allocation216_spill] sm:$0xff] %v13140_v41  ;;  %v13151_v43 = vpop.eup %10216 }
 0x568   : > { %v2719_v15 = vpop.f32.mrf.mxu1  ;;  %v13153_v17 = vpop.eup %10218 }
 0x569   : > { %17818 = vst [vmem:[#allocation215_spill] sm:$0xff] %v13135_v25  ;;  %v13145_v21 = vmul.f32 %v13137_v45, %v2719_v15  ;;  %v13161_v15 = vpop.eup %10220 }
 0x56a   : > { %v9354_v39 = vpop.f32.mrf.mxu1 }
 0x56b   : > { %17820 = vst [vmem:[#allocation217_spill] sm:$0xff] %v13145_v21  ;;  %v13156_v30 = vmul.f32 %v13149_v16, %v9354_v39 }
 0x56c   : > { %v2732_v49 = vpop.f32.mrf.mxu1 }
 0x56d   : > { %17821 = vst [vmem:[#allocation218_spill] sm:$0xff] %v13156_v30  ;;  %v13164_v25 = vmul.f32 %v13153_v17, %v2732_v49 }
 0x56e   : > { %v9355_v62 = vpop.f32.mrf.mxu1 }
 0x56f   : > { %v13159_v11 = vmul.f32 %v13151_v43, %v9355_v62  ;;  %17823 = vst [vmem:[#allocation220_spill] sm:$0xff] %v13164_v25 }
 0x570   : > { %v2735_v13 = vpop.f32.mrf.mxu1 }
 0x571   : > { %17822 = vst [vmem:[#allocation219_spill] sm:$0xff] %v13159_v11  ;;  %v13169_v41 = vmul.f32 %v13161_v15, %v2735_v13 }
 0x573   : > { %17824 = vst [vmem:[#allocation221_spill] sm:$0xff] %v13169_v41 }
 0x5b1   : > { %v2567_v39 = vpop.xlane.xlu0 %2566 }
 0x5b5   : > { %v2563_v18 = vpop.xlane.xlu0 %2562 }
 0x5b6   : > { %v2569_v14 = vpop.xlane.xlu1 %2568 }
 0x5b9   : > { %v2575_v8 = vpop.xlane.xlu0 %2574 }
 0x5ba   : > { %v2565_v62 = vpop.xlane.xlu1 %2564  ;;  %10222 = vrcp.f32 %v2575_v8 }
 0x5bd   : > { %v2571_v44 = vpop.xlane.xlu0 %2570 }
 0x5be   : > { %v2577_v31 = vpop.xlane.xlu1 %2576 }
 0x5bf   : > { %10224 = vrcp.f32 %v2577_v31 }
 0x5c0   : > { %10226 = vrcp.f32 %v2571_v44 }
 0x5c1   : > { %v2583_v57 = vpop.xlane.xlu0 %2582 }
 0x5c2   : > { %v2573_v52 = vpop.xlane.xlu1 %2572 }
 0x5c3   : > { %10228 = vrcp.f32 %v2573_v52 }
 0x5c4   : > { %10230 = vrcp.f32 %v2583_v57 }
 0x5c5   : > { %v2579_v36 = vpop.xlane.xlu0 %2578 }
 0x5c6   : > { %v2585_v49 = vpop.xlane.xlu1 %2584 }
 0x5c7   : > { %10232 = vrcp.f32 %v2585_v49  ;;  %v13173_v41 = vpop.eup %10222 }
 0x5c8   : > { %10234 = vrcp.f32 %v2579_v36 }
 0x5c9   : > { %v2591_v13 = vpop.xlane.xlu0 %2590 }
 0x5ca   : > { %v2581_v19 = vpop.xlane.xlu1 %2580 }
 0x5cb   : > { %10236 = vrcp.f32 %v2581_v19 }
 0x5cc   : > { %v13175_v58 = vpop.eup %10224  ;;  %10238 = vrcp.f32 %v2567_v39 }
 0x5cd   : > { %v2587_v30 = vpop.xlane.xlu0 %2586  ;;  %v13177_v35 = vpop.eup %10226  ;;  %10240 = vrcp.f32 %v2569_v14 }
 0x5ce   : > { %v2593_v23 = vpop.xlane.xlu1 %2592  ;;  %10242 = vrcp.f32 %v2591_v13 }
 0x5cf   : > { %10244 = vrcp.f32 %v2593_v23 }
 0x5d0   : > { %v13185_v36 = vpop.eup %10228  ;;  %10246 = vrcp.f32 %v2587_v30 }
 0x5d1   : > { %v2595_v57 = vpop.xlane.xlu0 %2594  ;;  %v13197_v23 = vpop.eup %10230 }
 0x5d2   : > { %v2589_v11 = vpop.xlane.xlu1 %2588 }
 0x5d3   : > { %10248 = vrcp.f32 %v2589_v11 }
 0x5d4   : > { %10250 = vrcp.f32 %v2563_v18 }
 0x5d5   : > { %10252 = vrcp.f32 %v2565_v62  ;;  %v2599_v39 = vpop.xlane.xlu0 %2598 }
 0x5d6   : > { %10254 = vrcp.f32 %v2599_v39 }
 0x5db   : > { %v9378_v21 = vpop.f32.mrf.mxu0 }
 0x5dc   : > { %v13180_v52 = vmul.f32 %v13173_v41, %v9378_v21  ;;  %v2597_v21 = vpop.xlane.xlu1 %2596 }
 0x5dd   : > { %v2797_v25 = vpop.f32.mrf.mxu0 }
 0x5de   : > { %17825 = vst [vmem:[#allocation222_spill] sm:$0xff] %v13180_v52  ;;  %v13188_v44 = vmul.f32 %v13177_v35, %v2797_v25  ;;  %v13199_v25 = vpop.eup %10232 }
 0x5df   : > { %v9379_v8 = vpop.f32.mrf.mxu0  ;;  %17829 = vst [vmem:[#allocation226_spill] sm:$0xff] %v13199_v25  ;;  %v13201_v59 = vpop.eup %10234 }
 0x5e0   : > { %v13183_v31 = vmul.f32 %v13175_v58, %v9379_v8  ;;  %17827 = vst [vmem:[#allocation224_spill] sm:$0xff] %v13188_v44  ;;  %v13209_v11 = vpop.eup %10236  ;;  %v2601_v8 = vpop.xlane.xlu1 %2600 }
 0x5e1   : > { %v2800_v19 = vpop.f32.mrf.mxu0  ;;  %10256 = vrcp.f32 %v2601_v8 }
 0x5e2   : > { %17826 = vst [vmem:[#allocation223_spill] sm:$0xff] %v13183_v31  ;;  %v13193_v14 = vmul.f32 %v13185_v36, %v2800_v19  ;;  %10258 = vrcp.f32 %v2595_v57 }
 0x5e3   : > { %v9382_v49 = vpop.f32.mrf.mxu0  ;;  %10260 = vrcp.f32 %v2597_v21 }
 0x5e4   : > { %17828 = vst [vmem:[#allocation225_spill] sm:$0xff] %v13193_v14  ;;  %v13204_v19 = vmul.f32 %v13197_v23, %v9382_v49  ;;  %v13219_v49 = vpop.eup %10238 }
 0x5e5   : > { %v2813_v13 = vpop.f32.mrf.mxu0  ;;  %v13223_v14 = vpop.eup %10240 }
 0x5e6   : > { %17830 = vst [vmem:[#allocation227_spill] sm:$0xff] %v13204_v19  ;;  %v13212_v52 = vmul.f32 %v13201_v59, %v2813_v13  ;;  %v13225_v26 = vpop.eup %10242 }
 0x5e7   : > { %v9383_v53 = vpop.f32.mrf.mxu0  ;;  %17834 = vst [vmem:[#allocation231_spill] sm:$0xff] %v13225_v26  ;;  %v13227_v62 = vpop.eup %10244 }
 0x5e8   : > { %v13207_v30 = vmul.f32 %v13199_v25, %v9383_v53  ;;  %17832 = vst [vmem:[#allocation229_spill] sm:$0xff] %v13212_v52  ;;  %17835 = vst [vmem:[#allocation232_spill] sm:$0xff] %v13227_v62  ;;  %v13229_v39 = vpop.eup %10246 }
 0x5e9   : > { %v2816_v18 = vpop.f32.mrf.mxu0  ;;  %17836 = vst [vmem:[#allocation233_spill] sm:$0xff] %v13229_v39  ;;  %v13237_v53 = vpop.eup %10248 }
 0x5ea   : > { %17831 = vst [vmem:[#allocation228_spill] sm:$0xff] %v13207_v30  ;;  %v13217_v31 = vmul.f32 %v13209_v11, %v2816_v18  ;;  %17839 = vst [vmem:[#allocation236_spill] sm:$0xff] %v13237_v53  ;;  %v10251_v21 = vpop.eup %10250 }
 0x5ec   : > { %17833 = vst [vmem:[#allocation230_spill] sm:$0xff] %v13217_v31  ;;  %v9386_v44 = vpop.f32.mrf.mxu0 }
 0x5ed   : > { %v13232_v30 = vmul.f32 %v13225_v26, %v9386_v44 }
 0x5ee   : > { %v2829_v4 = vpop.f32.mrf.mxu0  ;;  %v9358_v13 = vpop.f32.mrf.mxu1 }
 0x5ef   : > { %17837 = vst [vmem:[#allocation234_spill] sm:$0xff] %v13232_v30  ;;  %v13240_v57 = vmul.f32 %v13229_v39, %v2829_v4  ;;  %v13243_v24 = vmul.f32 %v13219_v49, %v9358_v13 }
 0x5f0   : > { %v9387_v18 = vpop.f32.mrf.mxu0  ;;  %v2748_v19 = vpop.f32.mrf.mxu1 }
 0x5f1   : > { %v13235_v8 = vmul.f32 %v13227_v62, %v9387_v18  ;;  %17840 = vst [vmem:[#allocation237_spill] sm:$0xff] %v13240_v57  ;;  %17841 = vst [vmem:[#allocation238_spill] sm:$0xff] %v13243_v24  ;;  %v10253_v62 = vpop.eup %10252  ;;  %v13253_v42 = vmul.f32 %v10251_v21, %v2748_v19 }
 0x5f2   : > { %v2832_v52 = vpop.f32.mrf.mxu0  ;;  %v9359_v31 = vpop.f32.mrf.mxu1 }
 0x5f3   : > { %17838 = vst [vmem:[#allocation235_spill] sm:$0xff] %v13235_v8  ;;  %v13248_v44 = vmul.f32 %v13237_v53, %v2832_v52  ;;  %v13251_v18 = vmul.f32 %v13223_v14, %v9359_v31  ;;  %17844 = vst [vmem:[#allocation241_spill] sm:$0xff] %v13253_v42  ;;  %v13263_v30 = vpop.eup %10254 }
 0x5f4   : > { %v2751_v26 = vpop.f32.mrf.mxu1  ;;  %v13265_v31 = vpop.eup %10256 }
 0x5f5   : > { %17842 = vst [vmem:[#allocation239_spill] sm:$0xff] %v13248_v44  ;;  %17843 = vst [vmem:[#allocation240_spill] sm:$0xff] %v13251_v18  ;;  %v13259_v39 = vmul.f32 %v10253_v62, %v2751_v26  ;;  %v13267_v19 = vpop.eup %10258 }
 0x5f6   : > { %v9390_v25 = vpop.f32.mrf.mxu0  ;;  %v10261_v26 = vpop.eup %10260 }
 0x5f7   : > { %17845 = vst [vmem:[#allocation242_spill] sm:$0xff] %v13259_v39  ;;  %v13270_v53 = vmul.f32 %v13263_v30, %v9390_v25 }
 0x5f8   : > { %v2845_v29 = vpop.f32.mrf.mxu0 }
 0x5f9   : > { %17846 = vst [vmem:[#allocation243_spill] sm:$0xff] %v13270_v53  ;;  %v13276_v57 = vmul.f32 %v13267_v19, %v2845_v29 }
 0x5fa   : > { %v9391_v8 = vpop.f32.mrf.mxu0 }
 0x5fb   : > { %v13273_v4 = vmul.f32 %v13265_v31, %v9391_v8  ;;  %17848 = vst [vmem:[#allocation245_spill] sm:$0xff] %v13276_v57  ;;  %2910 = sbr.rel (%p8559_p1) target bundleno = 1554 (0x612), region = 108 }
 0x5fc   : > { %v2848_v13 = vpop.f32.mrf.mxu0 }
 0x5fd   : > { %17847 = vst [vmem:[#allocation244_spill] sm:$0xff] %v13273_v4  ;;  %v13280_v44 = vmul.f32 %v10261_v26, %v2848_v13 }
 0x5ff   : > { %17849 = vst [vmem:[#allocation246_spill] sm:$0xff] %v13280_v44 }
 0x600   : > { %v2911_v29 = vmul.f32 %v13105_v46, %v12949_v7  ;;  %v2912_v25 = vmul.f32 %v13113_v9, %v12956_v20  ;;  %v2913_v8 = vmul.f32 %v13101_v3, %v12958_v0  ;;  %v2914_v13 = vmul.f32 %v13103_v34, %v12953_v47  ;;  %v17859_v3 = vld [vmem:[#allocation206_spill] sm:$0xff]  ;;  %v17860_v46 = vld [vmem:[#allocation207_spill] sm:$0xff] }
 0x601   : > { %v2915_v52 = vmul.f32 %v13129_v27, %v12968_v5  ;;  %v2916_v24 = vmul.f32 %v13137_v45, %v12974_v54  ;;  %v2917_v7 = vmul.f32 %v13125_v60, %v12976_v40  ;;  %v2918_v20 = vmul.f32 %v13127_v48, %v12972_v6  ;;  %v17862_v27 = vld [vmem:[#allocation209_spill] sm:$0xff] }
 0x602   : > { %2943 = vst [vmem:[%s11514_s23] sm:$0xff] %v2911_v29  ;;  %2944 = vst [vmem:[%s11514_s23 + $0x8] sm:$0xff] %v2912_v25  ;;  %v2919_v47 = vmul.f32 %v13153_v17, %v12984_v55  ;;  %v2920_v0 = vmul.f32 %v13161_v15, %v12990_v22  ;;  %v2921_v5 = vmul.f32 %v13149_v16, %v12992_v10 }
 0x603   : > { %2945 = vst [vmem:[%s11514_s23 + $0x10] sm:$0xff] %v2913_v8  ;;  %2946 = vst [vmem:[%s11514_s23 + $0x18] sm:$0xff] %v2914_v13  ;;  %v2922_v48 = vmul.f32 %v13151_v43, %v12988_v38  ;;  %v2923_v6 = vmul.f32 %v10251_v21, %v13000_v33  ;;  %v2924_v17 = vmul.f32 %v10253_v62, %v13002_v32 }
 0x604   : > { %2947 = vst [vmem:[%s11514_s23 + $0x20] sm:$0xff] %v2915_v52  ;;  %2948 = vst [vmem:[%s11514_s23 + $0x28] sm:$0xff] %v2916_v24  ;;  %v2925_v54 = vmul.f32 %v13219_v49, %v13055_v12  ;;  %v2926_v16 = vmul.f32 %v13223_v14, %v13066_v28  ;;  %v2927_v40 = vmul.f32 %v13177_v35, %v13020_v56  ;;  %v17850_v56 = vld [vmem:[#allocation226_spill] sm:$0xff]  ;;  %v17854_v12 = vld [vmem:[#allocation236_spill] sm:$0xff] }
 0x605   : > { %2949 = vst [vmem:[%s11514_s23 + $0x30] sm:$0xff] %v2917_v7  ;;  %2950 = vst [vmem:[%s11514_s23 + $0x38] sm:$0xff] %v2918_v20  ;;  %v2928_v55 = vmul.f32 %v13185_v36, %v13026_v37  ;;  %v2929_v38 = vmul.f32 %v13173_v41, %v13028_v50  ;;  %v2930_v22 = vmul.f32 %v13175_v58, %v13024_v2  ;;  %v17851_v2 = vld [vmem:[#allocation202_spill] sm:$0xff]  ;;  %v17852_v37 = vld [vmem:[#allocation233_spill] sm:$0xff] }
 0x606   : > { %2951 = vst [vmem:[%s11514_s23 + $0x40] sm:$0xff] %v2919_v47  ;;  %2952 = vst [vmem:[%s11514_s23 + $0x48] sm:$0xff] %v2920_v0  ;;  %v2931_v10 = vmul.f32 %v13201_v59, %v13036_v51  ;;  %v2932_v33 = vmul.f32 %v13209_v11, %v13042_v61  ;;  %v2933_v32 = vmul.f32 %v13197_v23, %v13044_v1  ;;  %v17853_v51 = vld [vmem:[#allocation204_spill] sm:$0xff]  ;;  %v17855_v24 = vld [vmem:[#allocation205_spill] sm:$0xff] }
 0x607   : > { %2953 = vst [vmem:[%s11514_s23 + $0x50] sm:$0xff] %v2921_v5  ;;  %2954 = vst [vmem:[%s11514_s23 + $0x58] sm:$0xff] %v2922_v48  ;;  %v2934_v58 = vmul.f32 %v17850_v56, %v13040_v63  ;;  %v2935_v50 = vmul.f32 %v17852_v37, %v17851_v2  ;;  %v2936_v61 = vmul.f32 %v17854_v12, %v17853_v51  ;;  %v17856_v1 = vld [vmem:[#allocation231_spill] sm:$0xff]  ;;  %v17858_v59 = vld [vmem:[#allocation232_spill] sm:$0xff] }
 0x608   : > { %2955 = vst [vmem:[%s11514_s23 + $0x60] sm:$0xff] %v2923_v6  ;;  %2956 = vst [vmem:[%s11514_s23 + $0x68] sm:$0xff] %v2924_v17  ;;  %v2937_v28 = vmul.f32 %v17856_v1, %v17855_v24  ;;  %v17857_v63 = vld [vmem:[#allocation203_spill] sm:$0xff]  ;;  %v2939_v34 = vmul.f32 %v13267_v19, %v17859_v3  ;;  %v2940_v9 = vmul.f32 %v10261_v26, %v17860_v46  ;;  %v17861_v41 = vld [vmem:[#allocation208_spill] sm:$0xff] }
 0x609   : > { %2957 = vst [vmem:[%s11514_s23 + $0x70] sm:$0xff] %v2925_v54  ;;  %2958 = vst [vmem:[%s11514_s23 + $0x78] sm:$0xff] %v2926_v16  ;;  %v2938_v35 = vmul.f32 %v17858_v59, %v17857_v63  ;;  %v2941_v60 = vmul.f32 %v13263_v30, %v17861_v41  ;;  %v2942_v45 = vmul.f32 %v13265_v31, %v17862_v27 }
 0x60a   : > { %2959 = vst [vmem:[%s11514_s23 + $0x200] sm:$0xff] %v2927_v40  ;;  %2960 = vst [vmem:[%s11514_s23 + $0x208] sm:$0xff] %v2928_v55 }
 0x60b   : > { %2961 = vst [vmem:[%s11514_s23 + $0x210] sm:$0xff] %v2929_v38  ;;  %2962 = vst [vmem:[%s11514_s23 + $0x218] sm:$0xff] %v2930_v22 }
 0x60c   : > { %2963 = vst [vmem:[%s11514_s23 + $0x220] sm:$0xff] %v2931_v10  ;;  %2964 = vst [vmem:[%s11514_s23 + $0x228] sm:$0xff] %v2932_v33 }
 0x60d   : > { %2965 = vst [vmem:[%s11514_s23 + $0x230] sm:$0xff] %v2933_v32  ;;  %2966 = vst [vmem:[%s11514_s23 + $0x238] sm:$0xff] %v2934_v58 }
 0x60e   : > { %2967 = vst [vmem:[%s11514_s23 + $0x240] sm:$0xff] %v2935_v50  ;;  %2968 = vst [vmem:[%s11514_s23 + $0x248] sm:$0xff] %v2936_v61 }
 0x60f   : > { %2969 = vst [vmem:[%s11514_s23 + $0x250] sm:$0xff] %v2937_v28  ;;  %2970 = vst [vmem:[%s11514_s23 + $0x258] sm:$0xff] %v2938_v35 }
 0x610   : > { %2971 = vst [vmem:[%s11514_s23 + $0x260] sm:$0xff] %v2939_v34  ;;  %2972 = vst [vmem:[%s11514_s23 + $0x268] sm:$0xff] %v2940_v9 }
 0x611   : > { %2973 = vst [vmem:[%s11514_s23 + $0x270] sm:$0xff] %v2941_v60  ;;  %2974 = vst [vmem:[%s11514_s23 + $0x278] sm:$0xff] %v2942_v45 }
 0x612 PF: > { %s11236_s3 = smov 64   ;;  %v17863_v43 = vld [vmem:[#allocation99_spill] sm:$0xff]  ;;  %v17864_v15 = vld [vmem:[#allocation102_spill] sm:$0xff]  ;;  %v17867_v23 = vld [vmem:[#allocation109_spill] sm:$0xff] }
 0x613   : > { %3021 = vrot.lane.b32.xlu0 %v17863_v43, %s11236_s3  ;;  %3019 = vrot.lane.b32.xlu1 %v17864_v15, %s11236_s3  ;;  %v17865_v36 = vld [vmem:[#allocation147_spill] sm:$0xff]  ;;  %v17866_v14 = vld [vmem:[#allocation150_spill] sm:$0xff]  ;;  %v17869_v11 = vld [vmem:[#allocation116_spill] sm:$0xff] }
 0x614   : > { %v17868_v30 = vld [vmem:[#allocation154_spill] sm:$0xff]  ;;  %v17871_v49 = vld [vmem:[#allocation117_spill] sm:$0xff]  ;;  %v17875_v19 = vld [vmem:[#allocation67_spill] sm:$0xff] }
 0x615   : > { %v17870_v62 = vld [vmem:[#allocation158_spill] sm:$0xff]  ;;  %v17872_v21 = vld [vmem:[#allocation161_spill] sm:$0xff]  ;;  %v17879_v8 = vld [vmem:[#allocation60_spill] sm:$0xff] }
 0x616   : > { %v17873_v52 = vld [vmem:[#allocation73_spill] sm:$0xff]  ;;  %v17878_v25 = vld [vmem:[#allocation106_spill] sm:$0xff]  ;;  %v17882_v20 = vld [vmem:[#allocation112_spill] sm:$0xff] }
 0x617   : > { %3214 = vrot.lane.b32.xlu0 %v17865_v36, %s11236_s3  ;;  %3212 = vrot.lane.b32.xlu1 %v17866_v14, %s11236_s3  ;;  %v17874_v31 = vld [vmem:[#allocation121_spill] sm:$0xff]  ;;  %v17881_v7 = vld [vmem:[#allocation66_spill] sm:$0xff]  ;;  %v17883_v47 = vld [vmem:[#allocation72_spill] sm:$0xff] }
 0x618   : > { %v17876_v26 = vld [vmem:[#allocation113_spill] sm:$0xff]  ;;  %v17884_v0 = vld [vmem:[#allocation120_spill] sm:$0xff]  ;;  %v17885_v5 = vld [vmem:[#allocation78_spill] sm:$0xff] }
 0x619   : > { %v17877_v29 = vld [vmem:[#allocation61_spill] sm:$0xff]  ;;  %v17886_v48 = vld [vmem:[#allocation126_spill] sm:$0xff]  ;;  %v17887_v6 = vld [vmem:[#allocation83_spill] sm:$0xff] }
 0x61a   : > { %v17880_v13 = vld [vmem:[#allocation105_spill] sm:$0xff]  ;;  %v17888_v17 = vld [vmem:[#allocation131_spill] sm:$0xff]  ;;  %v17889_v54 = vld [vmem:[#allocation88_spill] sm:$0xff] }
 0x61b   : > { %3017 = vrot.lane.b32.xlu0 %v17867_v23, %s11236_s3  ;;  %3210 = vrot.lane.b32.xlu1 %v17868_v30, %s11236_s3  ;;  %v17890_v16 = vld [vmem:[#allocation136_spill] sm:$0xff]  ;;  %v17891_v40 = vld [vmem:[#allocation93_spill] sm:$0xff]  ;;  %v17893_v38 = vld [vmem:[#allocation98_spill] sm:$0xff] }
 0x61c   : > { %v17892_v55 = vld [vmem:[#allocation141_spill] sm:$0xff]  ;;  %v17894_v22 = vld [vmem:[#allocation146_spill] sm:$0xff]  ;;  %v17895_v10 = vld [vmem:[#allocation171_spill] sm:$0xff] }
 0x61d   : > { %v17896_v33 = vld [vmem:[#allocation195_spill] sm:$0xff]  ;;  %v17897_v32 = vld [vmem:[#allocation173_spill] sm:$0xff]  ;;  %v17898_v56 = vld [vmem:[#allocation198_spill] sm:$0xff] }
 0x61e   : > { %v17899_v58 = vld [vmem:[#allocation197_spill] sm:$0xff]  ;;  %v17900_v2 = vld [vmem:[#allocation200_spill] sm:$0xff]  ;;  %v17901_v37 = vld [vmem:[#allocation175_spill] sm:$0xff] }
 0x61f   : > { %3015 = vrot.lane.b32.xlu0 %v17869_v11, %s11236_s3  ;;  %3208 = vrot.lane.b32.xlu1 %v17870_v62, %s11236_s3  ;;  %v17902_v50 = vld [vmem:[#allocation178_spill] sm:$0xff]  ;;  %v17903_v51 = vld [vmem:[#allocation199_spill] sm:$0xff]  ;;  %v17904_v12 = vld [vmem:[#allocation180_spill] sm:$0xff] }
 0x620   : > { %v17905_v61 = vld [vmem:[#allocation183_spill] sm:$0xff]  ;;  %v17906_v24 = vld [vmem:[#allocation201_spill] sm:$0xff]  ;;  %v17907_v1 = vld [vmem:[#allocation156_spill] sm:$0xff] }
 0x623   : > { %3013 = vrot.lane.b32.xlu0 %v17871_v49, %s11236_s3  ;;  %3206 = vrot.lane.b32.xlu1 %v17872_v21, %s11236_s3 }
 0x627   : > { %3011 = vrot.lane.b32.xlu0 %v17873_v52, %s11236_s3  ;;  %3204 = vrot.lane.b32.xlu1 %v17874_v31, %s11236_s3 }
 0x62b   : > { %3009 = vrot.lane.b32.xlu0 %v17875_v19, %s11236_s3  ;;  %3202 = vrot.lane.b32.xlu1 %v17876_v26, %s11236_s3 }
 0x62f   : > { %3007 = vrot.lane.b32.xlu0 %v17877_v29, %s11236_s3  ;;  %3200 = vrot.lane.b32.xlu1 %v17878_v25, %s11236_s3 }
 0x633   : > { %2983 = vrot.lane.b32.xlu0 %v17879_v8, %s11236_s3  ;;  %3176 = vrot.lane.b32.xlu1 %v17880_v13, %s11236_s3 }
 0x637   : > { %2985 = vrot.lane.b32.xlu0 %v17881_v7, %s11236_s3  ;;  %3178 = vrot.lane.b32.xlu1 %v17882_v20, %s11236_s3 }
 0x63b   : > { %2987 = vrot.lane.b32.xlu0 %v17883_v47, %s11236_s3  ;;  %3180 = vrot.lane.b32.xlu1 %v17884_v0, %s11236_s3 }
 0x63f   : > { %2989 = vrot.lane.b32.xlu0 %v17885_v5, %s11236_s3  ;;  %3182 = vrot.lane.b32.xlu1 %v17886_v48, %s11236_s3 }
 0x643   : > { %2991 = vrot.lane.b32.xlu0 %v17887_v6, %s11236_s3  ;;  %3184 = vrot.lane.b32.xlu1 %v17888_v17, %s11236_s3 }
 0x647   : > { %2993 = vrot.lane.b32.xlu0 %v17889_v54, %s11236_s3  ;;  %3186 = vrot.lane.b32.xlu1 %v17890_v16, %s11236_s3 }
 0x64b   : > { %2995 = vrot.lane.b32.xlu0 %v17891_v40, %s11236_s3  ;;  %3188 = vrot.lane.b32.xlu1 %v17892_v55, %s11236_s3 }
 0x64f   : > { %2997 = vrot.lane.b32.xlu0 %v17893_v38, %s11236_s3  ;;  %3190 = vrot.lane.b32.xlu1 %v17894_v22, %s11236_s3 }
 0x653   : > { %3655 = vrot.lane.b32.xlu1 %v17895_v10, %s11236_s3  ;;  %3784 = vrot.lane.b32.xlu0 %v17896_v33, %s11236_s3 }
 0x657   : > { %3653 = vrot.lane.b32.xlu1 %v17897_v32, %s11236_s3  ;;  %3780 = vrot.lane.b32.xlu0 %v17898_v56, %s11236_s3 }
 0x65b   : > { %3782 = vrot.lane.b32.xlu1 %v17899_v58, %s11236_s3  ;;  %3776 = vrot.lane.b32.xlu0 %v17900_v2, %s11236_s3 }
 0x65f   : > { %3651 = vrot.lane.b32.xlu1 %v17901_v37, %s11236_s3 }
 0x663   : > { %3649 = vrot.lane.b32.xlu1 %v17902_v50, %s11236_s3 }
 0x667   : > { %3778 = vrot.lane.b32.xlu1 %v17903_v51, %s11236_s3 }
 0x66b   : > { %3647 = vrot.lane.b32.xlu1 %v17904_v12, %s11236_s3 }
 0x66f   : > { %3645 = vrot.lane.b32.xlu1 %v17905_v61, %s11236_s3 }
 0x673   : > { %3774 = vrot.lane.b32.xlu1 %v17906_v24, %s11236_s3 }
 0x677   : > { %3643 = vrot.lane.b32.xlu1 %v17907_v1, %s11236_s3 }
 0x685   : > { %v3022_v28 = vpop.permute.xlu0 %3021  ;;  %v3020_v63 = vpop.permute.xlu1 %3019 }
 0x686   : > { %9792 = vmatprep.subr.msk.bf16.mxu1 %vm2087_vm0, %v3022_v28  ;;  %v3069_v59 = vsel %vm2087_vm0, %v3022_v28, 0  ;;  %v3066_v46 = vsel %vm2087_vm0, %v3020_v63, 0 }
 0x687   : > { %9393 = vmatpush3.bf16.xpose.msra.mxu1 %v3069_v59 }
 0x688   : > { %9793 = vmatprep.subr.msk.bf16.mxu1 %vm2087_vm0, %v3020_v63 }
 0x689   : > { %v3215_v35 = vpop.permute.xlu0 %3214  ;;  %v3213_v3 = vpop.permute.xlu1 %3212 }
 0x68a   : > { %9800 = vmatprep.subr.msk.bf16.mxu0 %vm2087_vm0, %v3215_v35  ;;  %v3262_v34 = vsel %vm2087_vm0, %v3215_v35, 0  ;;  %v3259_v60 = vsel %vm2087_vm0, %v3213_v3, 0 }
 0x68b   : > { %9425 = vmatpush3.bf16.xpose.msra.mxu0 %v3262_v34 }
 0x68c   : > { %9801 = vmatprep.subr.msk.bf16.mxu0 %vm2087_vm0, %v3213_v3 }
 0x68d   : > { %v3018_v9 = vpop.permute.xlu0 %3017  ;;  %v3211_v41 = vpop.permute.xlu1 %3210 }
 0x68e   : > { %v3063_v43 = vsel %vm2087_vm0, %v3018_v9, 0  ;;  %v3256_v14 = vsel %vm2087_vm0, %v3211_v41, 0 }
 0x68f   : > { %9395 = vmatpush3.bf16.xpose.msra.mxu1 %v3066_v46 }
 0x690   : > { %9794 = vmatprep.subr.msk.bf16.mxu1 %vm2087_vm0, %v3018_v9 }
 0x691   : > { %v3016_v27 = vpop.permute.xlu0 %3015  ;;  %v3209_v45 = vpop.permute.xlu1 %3208 }
 0x692   : > { %v3060_v11 = vsel %vm2087_vm0, %v3016_v27, 0  ;;  %v3253_v21 = vsel %vm2087_vm0, %v3209_v45, 0 }
 0x693   : > { %9427 = vmatpush3.bf16.xpose.msra.mxu0 %v3259_v60 }
 0x694   : > { %9802 = vmatprep.subr.msk.bf16.mxu0 %vm2087_vm0, %v3211_v41 }
 0x695   : > { %v3014_v15 = vpop.permute.xlu0 %3013  ;;  %v3207_v36 = vpop.permute.xlu1 %3206 }
 0x696   : > { %v3057_v19 = vsel %vm2087_vm0, %v3014_v15, 0  ;;  %v3250_v25 = vsel %vm2087_vm0, %v3207_v36, 0 }
 0x697   : > { %9397 = vmatpush3.bf16.xpose.msra.mxu1 %v3063_v43 }
 0x698   : > { %9795 = vmatprep.subr.msk.bf16.mxu1 %vm2087_vm0, %v3016_v27 }
 0x699   : > { %v3012_v23 = vpop.permute.xlu0 %3011  ;;  %v3205_v30 = vpop.permute.xlu1 %3204 }
 0x69a   : > { %v3054_v8 = vsel %vm2087_vm0, %v3012_v23, 0  ;;  %v3247_v13 = vsel %vm2087_vm0, %v3205_v30, 0 }
 0x69b   : > { %9429 = vmatpush3.bf16.xpose.msra.mxu0 %v3256_v14 }
 0x69c   : > { %9803 = vmatprep.subr.msk.bf16.mxu0 %vm2087_vm0, %v3209_v45 }
 0x69d   : > { %v3010_v62 = vpop.permute.xlu0 %3009  ;;  %v3203_v49 = vpop.permute.xlu1 %3202 }
 0x69e   : > { %v3051_v7 = vsel %vm2087_vm0, %v3010_v62, 0  ;;  %v3244_v20 = vsel %vm2087_vm0, %v3203_v49, 0 }
 0x69f   : > { %9399 = vmatpush3.bf16.xpose.msra.mxu1 %v3060_v11 }
 0x6a0   : > { %9796 = vmatprep.subr.msk.bf16.mxu1 %vm2087_vm0, %v3014_v15 }
 0x6a1   : > { %v3008_v52 = vpop.permute.xlu0 %3007  ;;  %v3201_v31 = vpop.permute.xlu1 %3200 }
 0x6a2   : > { %v3048_v47 = vsel %vm2087_vm0, %v3008_v52, 0  ;;  %v3241_v5 = vsel %vm2087_vm0, %v3201_v31, 0 }
 0x6a3   : > { %9431 = vmatpush3.bf16.xpose.msra.mxu0 %v3253_v21 }
 0x6a4   : > { %9804 = vmatprep.subr.msk.bf16.mxu0 %vm2087_vm0, %v3207_v36 }
 0x6a5   : > { %v2984_v26 = vpop.permute.xlu0 %2983  ;;  %v3177_v29 = vpop.permute.xlu1 %3176 }
 0x6a6   : > { %9408 = vmatprep.mubr.msk.bf16.mxu1 %vm2087_vm0, %v2984_v26  ;;  %9440 = vmatprep.mubr.msk.bf16.mxu0 %vm2087_vm0, %v3177_v29 }
 0x6a7   : > { %9401 = vmatpush3.bf16.xpose.msra.mxu1 %v3057_v19 }
 0x6a8   : > { %9797 = vmatprep.subr.msk.bf16.mxu1 %vm2087_vm0, %v3012_v23 }
 0x6a9   : > { %v2986_v0 = vpop.permute.xlu0 %2985  ;;  %v3179_v48 = vpop.permute.xlu1 %3178 }
 0x6ab   : > { %9433 = vmatpush3.bf16.xpose.msra.mxu0 %v3250_v25 }
 0x6ac   : > { %9805 = vmatprep.subr.msk.bf16.mxu0 %vm2087_vm0, %v3205_v30 }
 0x6ad   : > { %v2988_v6 = vpop.permute.xlu0 %2987  ;;  %v3181_v17 = vpop.permute.xlu1 %3180 }
 0x6af   : > { %9403 = vmatpush3.bf16.xpose.msra.mxu1 %v3054_v8 }
 0x6b0   : > { %9798 = vmatprep.subr.msk.bf16.mxu1 %vm2087_vm0, %v3010_v62 }
 0x6b1   : > { %v2990_v54 = vpop.permute.xlu0 %2989  ;;  %v3183_v16 = vpop.permute.xlu1 %3182 }
 0x6b3   : > { %9435 = vmatpush3.bf16.xpose.msra.mxu0 %v3247_v13 }
 0x6b4   : > { %9806 = vmatprep.subr.msk.bf16.mxu0 %vm2087_vm0, %v3203_v49 }
 0x6b5   : > { %v2992_v40 = vpop.permute.xlu0 %2991  ;;  %v3185_v55 = vpop.permute.xlu1 %3184 }
 0x6b7   : > { %9405 = vmatpush3.bf16.xpose.msra.mxu1 %v3051_v7 }
 0x6b8   : > { %9799 = vmatprep.subr.msk.bf16.mxu1 %vm2087_vm0, %v3008_v52 }
 0x6b9   : > { %v2994_v38 = vpop.permute.xlu0 %2993  ;;  %v3187_v22 = vpop.permute.xlu1 %3186 }
 0x6bb   : > { %9437 = vmatpush3.bf16.xpose.msra.mxu0 %v3244_v20 }
 0x6bc   : > { %9807 = vmatprep.subr.msk.bf16.mxu0 %vm2087_vm0, %v3201_v31 }
 0x6bd   : > { %v2996_v10 = vpop.permute.xlu0 %2995  ;;  %v3189_v33 = vpop.permute.xlu1 %3188 }
 0x6bf   : > { %9407 = vmatpush3.bf16.xpose.msra.mxu1 %v3048_v47 }
 0x6c1   : > { %v2998_v32 = vpop.permute.xlu0 %2997  ;;  %v3191_v56 = vpop.permute.xlu1 %3190 }
 0x6c3   : > { %9439 = vmatpush3.bf16.xpose.msra.mxu0 %v3241_v5 }
 0x6c5   : > { %v3656_v58 = vpop.permute.xlu1 %3655  ;;  %v3785_v50 = vpop.permute.xlu0 %3784 }
 0x6c6   : > { %9409 = vmatmul.mubr.msk.bf16.vlgmr.msra.gmra.mxu1 %vm2087_vm0, %v2986_v0  ;;  %9456 = vmatprep.subr.bf16.mxu1 %v3656_v58  ;;  %v17908_v0 = vld [vmem:[#allocation152_spill] sm:$0xff] }
 0x6c7   : > { %9412 = vmatprep.mubr.msk.bf16.mxu1 %vm2087_vm0, %v2988_v6  ;;  %9457 = vmatpush3.bf16.msra.mxu1 %v3656_v58 }
 0x6c8   : > { %9488 = vmatprep.subr.bf16.mxu0 %v3785_v50 }
 0x6c9   : > { %v3654_v2 = vpop.permute.xlu1 %3653  ;;  %v3781_v61 = vpop.permute.xlu0 %3780 }
 0x6ca   : > { %9441 = vmatmul.mubr.msk.bf16.vlgmr.msra.gmra.mxu0 %vm2087_vm0, %v3179_v48  ;;  %9458 = vmatprep.subr.bf16.mxu1 %v3654_v2  ;;  %v17909_v48 = vld [vmem:[#allocation176_spill] sm:$0xff] }
 0x6cb   : > { %9444 = vmatprep.mubr.msk.bf16.mxu0 %vm2087_vm0, %v3181_v17  ;;  %9459 = vmatpush3.bf16.msra.mxu1 %v3654_v2 }
 0x6cc   : > { %9489 = vmatpush3.bf16.msra.mxu0 %v3785_v50 }
 0x6cd   : > { %v3783_v37 = vpop.permute.xlu1 %3782  ;;  %v3777_v1 = vpop.permute.xlu0 %3776 }
 0x6ce   : > { %9413 = vmatmul.mubr.msk.bf16.gmra.mxu1 %vm2087_vm0, %v2990_v54  ;;  %9490 = vmatprep.subr.bf16.mxu0 %v3783_v37  ;;  %v17910_v54 = vld [vmem:[#allocation181_spill] sm:$0xff] }
 0x6cf   : > { %9416 = vmatprep.mubr.msk.bf16.mxu1 %vm2087_vm0, %v2992_v40 }
 0x6d0   : > { %9491 = vmatpush3.bf16.msra.mxu0 %v3783_v37 }
 0x6d1   : > { %v3652_v51 = vpop.permute.xlu1 %3651  ;;  %9492 = vmatprep.subr.bf16.mxu0 %v3781_v61 }
 0x6d2   : > { %9445 = vmatmul.mubr.msk.bf16.gmra.mxu0 %vm2087_vm0, %v3183_v16  ;;  %9460 = vmatprep.subr.bf16.mxu1 %v3652_v51 }
 0x6d3   : > { %9448 = vmatprep.mubr.msk.bf16.mxu0 %vm2087_vm0, %v3185_v55  ;;  %9461 = vmatpush3.bf16.msra.mxu1 %v3652_v51 }
 0x6d4   : > { %9493 = vmatpush3.bf16.msra.mxu0 %v3781_v61 }
 0x6d5   : > { %v3650_v12 = vpop.permute.xlu1 %3649 }
 0x6d6   : > { %9417 = vmatmul.mubr.msk.bf16.gmra.mxu1 %vm2087_vm0, %v2994_v38  ;;  %9462 = vmatprep.subr.bf16.mxu1 %v3650_v12 }
 0x6d7   : > { %9420 = vmatprep.mubr.msk.bf16.mxu1 %vm2087_vm0, %v2996_v10  ;;  %9463 = vmatpush3.bf16.msra.mxu1 %v3650_v12 }
 0x6d9   : > { %v3779_v24 = vpop.permute.xlu1 %3778 }
 0x6da   : > { %9449 = vmatmul.mubr.msk.bf16.gmra.mxu0 %vm2087_vm0, %v3187_v22  ;;  %9494 = vmatprep.subr.bf16.mxu0 %v3779_v24 }
 0x6db   : > { %9452 = vmatprep.mubr.msk.bf16.mxu0 %vm2087_vm0, %v3189_v33  ;;  %9495 = vmatpush3.bf16.msra.mxu0 %v3779_v24 }
 0x6dc   : > { %9496 = vmatprep.subr.bf16.mxu0 %v3777_v1 }
 0x6dd   : > { %v3648_v28 = vpop.permute.xlu1 %3647 }
 0x6de   : > { %9421 = vmatmul.mubr.msk.bf16.gmra.mxu1 %vm2087_vm0, %v2998_v32  ;;  %9464 = vmatprep.subr.bf16.mxu1 %v3648_v28 }
 0x6df   : > { %9497 = vmatpush3.bf16.msra.mxu0 %v3777_v1  ;;  %9465 = vmatpush3.bf16.msra.mxu1 %v3648_v28 }
 0x6e1   : > { %v3646_v63 = vpop.permute.xlu1 %3645 }
 0x6e2   : > { %9453 = vmatmul.mubr.msk.bf16.gmra.mxu0 %vm2087_vm0, %v3191_v56  ;;  %9466 = vmatprep.subr.bf16.mxu1 %v3646_v63 }
 0x6e3   : > { %9467 = vmatpush3.bf16.msra.mxu1 %v3646_v63 }
 0x6e5   : > { %v3775_v59 = vpop.permute.xlu1 %3774 }
 0x6e6   : > { %9498 = vmatprep.subr.bf16.mxu0 %v3775_v59 }
 0x6e7   : > { %9499 = vmatpush3.bf16.msra.mxu0 %v3775_v59 }
 0x6e9   : > { %v3644_v35 = vpop.permute.xlu1 %3643 }
 0x6ea   : > { %9468 = vmatprep.subr.bf16.mxu1 %v3644_v35 }
 0x6eb   : > { %9469 = vmatpush3.bf16.msra.mxu1 %v3644_v35 }
 0x786   : > { %v13518_v3 = vpop.f32.mrf.mxu1 }
 0x787   : > { %3365 = vmax.xlane.f32.xlu1 %v13518_v3 }
 0x788   : > { %v13521_v34 = vpop.f32.mrf.mxu1 }
 0x789   : > { %3361 = vmax.xlane.f32.xlu0 %v13521_v34 }
 0x78a   : > { %v13524_v46 = vpop.f32.mrf.mxu1  ;;  %v13526_v9 = vpop.f32.mrf.mxu0 }
 0x78b   : > { %3397 = vmax.xlane.f32.xlu1 %v13526_v9 }
 0x78c   : > { %v13529_v41 = vpop.f32.mrf.mxu1  ;;  %v13531_v60 = vpop.f32.mrf.mxu0 }
 0x78d   : > { %3393 = vmax.xlane.f32.xlu0 %v13531_v60 }
 0x78e   : > { %v13534_v27 = vpop.f32.mrf.mxu0  ;;  %v13536_v45 = vpop.f32.mrf.mxu1 }
 0x78f   : > { %3363 = vmax.xlane.f32.xlu1 %v13529_v41 }
 0x790   : > { %v13539_v43 = vpop.f32.mrf.mxu0  ;;  %v13541_v15 = vpop.f32.mrf.mxu1 }
 0x791   : > { %3367 = vmax.xlane.f32.xlu0 %v13524_v46 }
 0x792   : > { %v13544_v36 = vpop.f32.mrf.mxu0  ;;  %v13547_v14 = vpop.f32.mrf.mxu1 }
 0x793   : > { %3373 = vmax.xlane.f32.xlu1 %v13536_v45 }
 0x794   : > { %v13549_v23 = vpop.f32.mrf.mxu0  ;;  %v13553_v30 = vpop.f32.mrf.mxu1 }
 0x795   : > { %3399 = vmax.xlane.f32.xlu0 %v13534_v27 }
 0x796   : > { %v13555_v11 = vpop.f32.mrf.mxu0  ;;  %v13558_v62 = vpop.f32.mrf.mxu1 }
 0x797   : > { %3405 = vmax.xlane.f32.xlu1 %v13544_v36 }
 0x798   : > { %v13561_v49 = vpop.f32.mrf.mxu0  ;;  %v13563_v21 = vpop.f32.mrf.mxu1 }
 0x799   : > { %3395 = vmax.xlane.f32.xlu0 %v13539_v43 }
 0x79a   : > { %v13566_v52 = vpop.f32.mrf.mxu0  ;;  %v13569_v31 = vpop.f32.mrf.mxu1 }
 0x79b   : > { %3371 = vmax.xlane.f32.xlu1 %v13553_v30 }
 0x79c   : > { %v13571_v19 = vpop.f32.mrf.mxu0  ;;  %v13575_v26 = vpop.f32.mrf.mxu1 }
 0x79d   : > { %3369 = vmax.xlane.f32.xlu0 %v13541_v15 }
 0x79e   : > { %v13577_v29 = vpop.f32.mrf.mxu0  ;;  %v13580_v25 = vpop.f32.mrf.mxu1 }
 0x79f   : > { %3381 = vmax.xlane.f32.xlu1 %v13558_v62 }
 0x7a0   : > { %v13583_v8 = vpop.f32.mrf.mxu0  ;;  %v13585_v13 = vpop.f32.mrf.mxu1 }
 0x7a1   : > { %3401 = vmax.xlane.f32.xlu0 %v13549_v23 }
 0x7a2   : > { %v13589_v7 = vpop.f32.mrf.mxu0  ;;  %v13591_v20 = vpop.f32.mrf.mxu1 }
 0x7a3   : > { %3413 = vmax.xlane.f32.xlu1 %v13566_v52 }
 0x7a4   : > { %v13595_v47 = vpop.f32.mrf.mxu1  ;;  %v13606_v5 = vpop.f32.mrf.mxu0 }
 0x7a5   : > { %3375 = vmax.xlane.f32.xlu0 %v13547_v14 }
 0x7a6   : > { %v13612_v6 = vpop.f32.mrf.mxu0 }
 0x7a7   : > { %3379 = vmax.xlane.f32.xlu1 %v13575_v26 }
 0x7a8   : > { %v13615_v17 = vpop.f32.mrf.mxu0 }
 0x7a9   : > { %3407 = vmax.xlane.f32.xlu0 %v13555_v11 }
 0x7ab   : > { %3389 = vmax.xlane.f32.xlu1 %v13580_v25 }
 0x7ad   : > { %3403 = vmax.xlane.f32.xlu0 %v13561_v49 }
 0x7af   : > { %3421 = vmax.xlane.f32.xlu1 %v13589_v7 }
 0x7b1   : > { %3377 = vmax.xlane.f32.xlu0 %v13563_v21 }
 0x7b3   : > { %3387 = vmax.xlane.f32.xlu1 %v13595_v47 }
 0x7b5   : > { %3409 = vmax.xlane.f32.xlu0 %v13571_v19 }
 0x7b9   : > { %3383 = vmax.xlane.f32.xlu0 %v13569_v31 }
 0x7bd   : > { %3415 = vmax.xlane.f32.xlu0 %v13577_v29 }
 0x7c1   : > { %3411 = vmax.xlane.f32.xlu0 %v13583_v8 }
 0x7c4   : > { %3641 = vrot.lane.b32.xlu1 %v17908_v0, %s11236_s3 }
 0x7c5   : > { %3385 = vmax.xlane.f32.xlu0 %v13585_v13 }
 0x7c8   : > { %3770 = vrot.lane.b32.xlu1 %v17909_v48, %s11236_s3 }
 0x7c9   : > { %3417 = vmax.xlane.f32.xlu0 %v13606_v5 }
 0x7cd   : > { %3391 = vmax.xlane.f32.xlu0 %v13591_v20 }
 0x7d1   : > { %3423 = vmax.xlane.f32.xlu0 %v13612_v6 }
 0x7d5   : > { %3419 = vmax.xlane.f32.xlu0 %v13615_v17 }
 0x7eb   : > { %3772 = vrot.lane.b32.xlu0 %v17910_v54, %s11236_s3 }
 0x810   : > { %v3366_v16 = vpop.xlane.xlu1 %3365 }
 0x811   : > { %v3427_v40 = vsub.f32 %v13518_v3, %v3366_v16 }
 0x812   : > { %v3362_v55 = vpop.xlane.xlu0 %3361 }
 0x813   : > { %v3461_v38 = vmul.f32 1.442695, %v3427_v40  ;;  %v3425_v22 = vsub.f32 %v13521_v34, %v3362_v55 }
 0x814   : > { %v3398_v10 = vpop.xlane.xlu1 %3397 }
 0x815   : > { %10262 = vpow2.f32 %v3461_v38  ;;  %v3457_v33 = vmul.f32 1.442695, %v3425_v22  ;;  %v3443_v32 = vsub.f32 %v13526_v9, %v3398_v10 }
 0x816   : > { %v3394_v56 = vpop.xlane.xlu0 %3393 }
 0x817   : > { %v3493_v58 = vmul.f32 1.442695, %v3443_v32  ;;  %v3441_v2 = vsub.f32 %v13531_v60, %v3394_v56  ;;  %10264 = vpow2.f32 %v3457_v33 }
 0x818   : > { %v3364_v37 = vpop.xlane.xlu1 %3363 }
 0x819   : > { %10266 = vpow2.f32 %v3493_v58  ;;  %v3489_v50 = vmul.f32 1.442695, %v3441_v2  ;;  %v3426_v51 = vsub.f32 %v13529_v41, %v3364_v37 }
 0x81a   : > { %v3368_v12 = vpop.xlane.xlu0 %3367 }
 0x81b   : > { %v3459_v61 = vmul.f32 1.442695, %v3426_v51  ;;  %v3428_v24 = vsub.f32 %v13524_v46, %v3368_v12  ;;  %10268 = vpow2.f32 %v3489_v50 }
 0x81c   : > { %v3374_v1 = vpop.xlane.xlu1 %3373 }
 0x81d   : > { %10270 = vpow2.f32 %v3459_v61  ;;  %v3463_v28 = vmul.f32 1.442695, %v3428_v24  ;;  %v3431_v63 = vsub.f32 %v13536_v45, %v3374_v1 }
 0x81e   : > { %v3400_v59 = vpop.xlane.xlu0 %3399 }
 0x81f   : > { %10272 = vpow2.f32 %v3463_v28  ;;  %v3444_v35 = vsub.f32 %v13534_v27, %v3400_v59  ;;  %v3469_v34 = vmul.f32 1.442695, %v3431_v63 }
 0x820   : > { %v3406_v3 = vpop.xlane.xlu1 %3405 }
 0x821   : > { %v3495_v9 = vmul.f32 1.442695, %v3444_v35  ;;  %v3447_v60 = vsub.f32 %v13544_v36, %v3406_v3 }
 0x822   : > { %v13629_v41 = vpop.eup %10262  ;;  %v3396_v0 = vpop.xlane.xlu0 %3395 }
 0x823   : > { %10274 = vpow2.f32 %v3495_v9  ;;  %v3442_v46 = vsub.f32 %v13539_v43, %v3396_v0  ;;  %3525 = vadd.xlane.f32.xlu0 %v13629_v41  ;;  %v3501_v45 = vmul.f32 1.442695, %v3447_v60 }
 0x824   : > { %v3372_v48 = vpop.xlane.xlu1 %3371  ;;  %v13633_v54 = vpop.eup %10264  ;;  %10276 = vpow2.f32 %v3469_v34 }
 0x825   : > { %v3491_v16 = vmul.f32 1.442695, %v3442_v46  ;;  %v3430_v37 = vsub.f32 %v13553_v30, %v3372_v48 }
 0x826   : > { %v13635_v27 = vpop.eup %10266  ;;  %v3370_v40 = vpop.xlane.xlu0 %3369 }
 0x827   : > { %10278 = vpow2.f32 %v3491_v16  ;;  %v3429_v36 = vsub.f32 %v13541_v15, %v3370_v40  ;;  %3557 = vadd.xlane.f32.xlu1 %v13635_v27  ;;  %3521 = vadd.xlane.f32.xlu0 %v13633_v54  ;;  %v3467_v30 = vmul.f32 1.442695, %v3430_v37 }
 0x828   : > { %v3382_v55 = vpop.xlane.xlu1 %3381  ;;  %v13640_v43 = vpop.eup %10268  ;;  %10280 = vpow2.f32 %v3501_v45 }
 0x829   : > { %v3465_v38 = vmul.f32 1.442695, %v3429_v36  ;;  %v3435_v56 = vsub.f32 %v13558_v62, %v3382_v55 }
 0x82a   : > { %v13642_v22 = vpop.eup %10270  ;;  %v3402_v10 = vpop.xlane.xlu0 %3401 }
 0x82b   : > { %v3445_v33 = vsub.f32 %v13549_v23, %v3402_v10  ;;  %3553 = vadd.xlane.f32.xlu1 %v13640_v43  ;;  %v3617_v32 = vpack.c.bf16 %v13642_v22, %v13633_v54  ;;  %10282 = vpow2.f32 %v3465_v38  ;;  %v3477_v12 = vmul.f32 1.442695, %v3435_v56 }
 0x82c   : > { %v13648_v15 = vpop.eup %10272  ;;  %v3414_v58 = vpop.xlane.xlu1 %3413 }
 0x82d   : > { %v3497_v2 = vmul.f32 1.442695, %v3445_v33  ;;  %9472 = vmatprep.mubr.bf16.mxu1 %v3617_v32  ;;  %3527 = vadd.xlane.f32.xlu0 %v13648_v15  ;;  %v3451_v62 = vsub.f32 %v13566_v52, %v3414_v58 }
 0x82e   : > { %v3376_v50 = vpop.xlane.xlu0 %3375 }
 0x82f   : > { %v3432_v23 = vsub.f32 %v13547_v14, %v3376_v50  ;;  %3523 = vadd.xlane.f32.xlu1 %v13642_v22  ;;  %10284 = vpow2.f32 %v3497_v2  ;;  %v3509_v52 = vmul.f32 1.442695, %v3451_v62  ;;  %v3618_v50 = vpack.c.bf16 %v13648_v15, %v13629_v41 }
 0x830   : > { %v13655_v51 = vpop.eup %10274  ;;  %v3380_v61 = vpop.xlane.xlu1 %3379 }
 0x831   : > { %v3471_v24 = vmul.f32 1.442695, %v3432_v23  ;;  %3559 = vadd.xlane.f32.xlu0 %v13655_v51  ;;  %v3626_v1 = vpack.c.bf16 %v13655_v51, %v13635_v27  ;;  %v13661_v28 = vpop.eup %10276  ;;  %v3434_v3 = vsub.f32 %v13575_v26, %v3380_v61 }
 0x832   : > { %v3408_v63 = vpop.xlane.xlu0 %3407 }
 0x833   : > { %10286 = vpow2.f32 %v3471_v24  ;;  %v3448_v14 = vsub.f32 %v13555_v11, %v3408_v63  ;;  %3533 = vadd.xlane.f32.xlu1 %v13661_v28  ;;  %v3475_v26 = vmul.f32 1.442695, %v3434_v3 }
 0x834   : > { %v13665_v59 = vpop.eup %10278  ;;  %10288 = vpow2.f32 %v3477_v12  ;;  %v3390_v35 = vpop.xlane.xlu1 %3389 }
 0x835   : > { %v3503_v34 = vmul.f32 1.442695, %v3448_v14  ;;  %3555 = vadd.xlane.f32.xlu0 %v13665_v59  ;;  %v3625_v9 = vpack.c.bf16 %v13665_v59, %v13640_v43  ;;  %v13671_v60 = vpop.eup %10280  ;;  %10290 = vpow2.f32 %v3467_v30  ;;  %v3439_v32 = vsub.f32 %v13580_v25, %v3390_v35 }
 0x836   : > { %v3404_v0 = vpop.xlane.xlu0 %3403 }
 0x837   : > { %10292 = vpow2.f32 %v3503_v34  ;;  %v3446_v11 = vsub.f32 %v13561_v49, %v3404_v0  ;;  %3565 = vadd.xlane.f32.xlu1 %v13671_v60  ;;  %9504 = vmatprep.mubr.bf16.mxu0 %v3625_v9  ;;  %v3485_v23 = vmul.f32 1.442695, %v3439_v32 }
 0x838   : > { %v13675_v46 = vpop.xlane.xlu1 %3421  ;;  %10294 = vpow2.f32 %v3509_v52  ;;  %v13677_v48 = vpop.eup %10282 }
 0x839   : > { %v3499_v45 = vmul.f32 1.442695, %v3446_v11  ;;  %10296 = vpow2.f32 %v3475_v26 }
 0x83a   : > { %v3378_v16 = vpop.xlane.xlu0 %3377 }
 0x83b   : > { %v3433_v40 = vsub.f32 %v13563_v21, %v3378_v16  ;;  %3529 = vadd.xlane.f32.xlu1 %v13677_v48  ;;  %10298 = vpow2.f32 %v3499_v45  ;;  %v3455_v16 = vsub.f32 %v13589_v7, %v13675_v46 }
 0x83c   : > { %v3388_v36 = vpop.xlane.xlu1 %3387  ;;  %v13681_v38 = vpop.eup %10284 }
 0x83d   : > { %v3473_v55 = vmul.f32 1.442695, %v3433_v40  ;;  %v3438_v30 = vsub.f32 %v13595_v47, %v3388_v36  ;;  %v3517_v32 = vmul.f32 1.442695, %v3455_v16 }
 0x83e   : > { %v3410_v49 = vpop.xlane.xlu0 %3409 }
 0x83f   : > { %10300 = vpow2.f32 %v3473_v55  ;;  %v3449_v10 = vsub.f32 %v13571_v19, %v3410_v49  ;;  %3561 = vadd.xlane.f32.xlu1 %v13681_v38  ;;  %v3483_v9 = vmul.f32 1.442695, %v3438_v30 }
 0x840   : > { %v13685_v33 = vpop.eup %10286  ;;  %v3642_v56 = vpop.permute.xlu1 %3641 }
 0x841   : > { %v13688_v21 = vpop.eup %10288  ;;  %v3505_v58 = vmul.f32 1.442695, %v3449_v10  ;;  %9470 = vmatprep.subr.bf16.mxu1 %v3642_v56  ;;  %3535 = vadd.xlane.f32.xlu0 %v13685_v33  ;;  %v3620_v34 = vpack.c.bf16 %v13685_v33, %v13661_v28 }
 0x842   : > { %9471 = vmatpush3.bf16.msra.mxu1 %v3642_v56  ;;  %v3384_v2 = vpop.xlane.xlu0 %3383  ;;  %v13691_v37 = vpop.eup %10290 }
 0x843   : > { %10302 = vpow2.f32 %v3505_v58  ;;  %v3436_v19 = vsub.f32 %v13569_v31, %v3384_v2  ;;  %3541 = vadd.xlane.f32.xlu1 %v13688_v21  ;;  %v3619_v12 = vpack.c.bf16 %v13691_v37, %v13677_v48 }
 0x844   : > { %v13697_v25 = vpop.eup %10292  ;;  %v3771_v30 = vpop.permute.xlu1 %3770 }
 0x845   : > { %v3479_v61 = vmul.f32 1.442695, %v3436_v19  ;;  %9473 = vmatmul.mubr.bf16.vlgmr.msra.gmra.mxu1 %v3618_v50  ;;  %3567 = vadd.xlane.f32.xlu0 %v13697_v25  ;;  %v13702_v62 = vpop.eup %10294 }
 0x846   : > { %17911 = vst [vmem:[#allocation226_spill] sm:$0xff] %v13702_v62  ;;  %9476 = vmatprep.mubr.bf16.mxu1 %v3619_v12  ;;  %v3416_v24 = vpop.xlane.xlu0 %3415  ;;  %v13708_v14 = vpop.eup %10296 }
 0x847   : > { %10304 = vpow2.f32 %v3479_v61  ;;  %v3452_v31 = vsub.f32 %v13577_v29, %v3416_v24  ;;  %3573 = vadd.xlane.f32.xlu1 %v13702_v62 }
 0x848   : > { %10306 = vpow2.f32 %v3485_v23  ;;  %v13710_v52 = vpop.eup %10298 }
 0x849   : > { %v3511_v63 = vmul.f32 1.442695, %v3452_v31  ;;  %3531 = vadd.xlane.f32.xlu0 %v13691_v37 }
 0x84a   : > { %v3412_v35 = vpop.xlane.xlu0 %3411 }
 0x84b   : > { %10308 = vpow2.f32 %v3511_v63  ;;  %v3450_v3 = vsub.f32 %v13583_v8, %v3412_v35 }
 0x84c   : > { %v13715_v29 = vpop.eup %10300  ;;  %10310 = vpow2.f32 %v3483_v9 }
 0x84d   : > { %9477 = vmatmul.mubr.bf16.gmra.mxu1 %v3620_v34  ;;  %3563 = vadd.xlane.f32.xlu0 %v13710_v52  ;;  %v3621_v47 = vpack.c.bf16 %v13708_v14, %v13715_v29  ;;  %v3507_v0 = vmul.f32 1.442695, %v3450_v3  ;;  %v3627_v34 = vpack.c.bf16 %v13710_v52, %v13681_v38 }
 0x84e   : > { %3537 = vadd.xlane.f32.xlu1 %v13715_v29  ;;  %v3386_v11 = vpop.xlane.xlu0 %3385 }
 0x84f   : > { %v3437_v26 = vsub.f32 %v13585_v13, %v3386_v11  ;;  %9480 = vmatprep.mubr.bf16.mxu1 %v3621_v47  ;;  %10312 = vpow2.f32 %v3507_v0  ;;  %v3628_v47 = vpack.c.bf16 %v13697_v25, %v13671_v60 }
 0x850   : > { %v13722_v8 = vpop.eup %10302 }
 0x851   : > { %17912 = vst [vmem:[#allocation202_spill] sm:$0xff] %v13722_v8  ;;  %v3481_v45 = vmul.f32 1.442695, %v3437_v26 }
 0x852   : > { %3569 = vadd.xlane.f32.xlu1 %v13722_v8  ;;  %v3418_v40 = vpop.xlane.xlu0 %3417 }
 0x853   : > { %10314 = vpow2.f32 %v3481_v45  ;;  %v3453_v36 = vsub.f32 %v13606_v5, %v3418_v40 }
 0x854   : > { %v13728_v55 = vpop.eup %10304 }
 0x855   : > { %v13730_v49 = vpop.eup %10306  ;;  %v3513_v13 = vmul.f32 1.442695, %v3453_v36  ;;  %3543 = vadd.xlane.f32.xlu0 %v13728_v55  ;;  %v3622_v10 = vpack.c.bf16 %v13728_v55, %v13688_v21 }
 0x856   : > { %3549 = vadd.xlane.f32.xlu1 %v13730_v49  ;;  %v3392_v7 = vpop.xlane.xlu0 %3391 }
 0x857   : > { %10316 = vpow2.f32 %v3513_v13  ;;  %v3440_v46 = vsub.f32 %v13591_v20, %v3392_v7  ;;  %9481 = vmatmul.mubr.bf16.gmra.mxu1 %v3622_v10 }
 0x858   : > { %v13737_v56 = vpop.eup %10308  ;;  %10318 = vpow2.f32 %v3517_v32 }
 0x859   : > { %17913 = vst [vmem:[#allocation233_spill] sm:$0xff] %v13737_v56  ;;  %v3487_v5 = vmul.f32 1.442695, %v3440_v46  ;;  %3575 = vadd.xlane.f32.xlu0 %v13737_v56  ;;  %v13741_v2 = vpop.eup %10310 }
 0x85a   : > { %v3424_v58 = vpop.xlane.xlu0 %3423 }
 0x85b   : > { %10320 = vpow2.f32 %v3487_v5  ;;  %v3456_v23 = vsub.f32 %v13612_v6, %v3424_v58 }
 0x85c   : > { %v13743_v50 = vpop.eup %10312 }
 0x85d   : > { %3539 = vadd.xlane.f32.xlu0 %v13708_v14  ;;  %17914 = vst [vmem:[#allocation204_spill] sm:$0xff] %v13743_v50  ;;  %v3519_v63 = vmul.f32 1.442695, %v3456_v23  ;;  %v3629_v0 = vpack.c.bf16 %v13743_v50, %v13722_v8 }
 0x85e   : > { %v3420_v19 = vpop.xlane.xlu0 %3419 }
 0x85f   : > { %v3454_v20 = vsub.f32 %v13615_v17, %v3420_v19 }
 0x860   : > { %v13747_v12 = vpop.eup %10314 }
 0x861   : > { %v3515_v61 = vmul.f32 1.442695, %v3454_v20  ;;  %3571 = vadd.xlane.f32.xlu0 %v13743_v50  ;;  %3545 = vadd.xlane.f32.xlu1 %v13747_v12  ;;  %v3623_v24 = vpack.c.bf16 %v13741_v2, %v13747_v12 }
 0x862   : > { %v3773_v31 = vpop.permute.xlu0 %3772 }
 0x863   : > { %10322 = vpow2.f32 %v3515_v61  ;;  %9484 = vmatprep.mubr.bf16.mxu1 %v3623_v24  ;;  %9500 = vmatprep.subr.bf16.mxu0 %v3773_v31 }
 0x864   : > { %v13753_v35 = vpop.eup %10316  ;;  %9501 = vmatpush3.bf16.msra.mxu0 %v3773_v31  ;;  %10324 = vpow2.f32 %v3519_v63 }
 0x865   : > { %17915 = vst [vmem:[#allocation236_spill] sm:$0xff] %v13753_v35  ;;  %3577 = vadd.xlane.f32.xlu1 %v13753_v35  ;;  %9502 = vmatprep.subr.bf16.mxu0 %v3771_v30  ;;  %v13756_v6 = vpop.eup %10318 }
 0x866   : > { %17916 = vst [vmem:[#allocation205_spill] sm:$0xff] %v13756_v6 }
 0x868   : > { %v13758_v17 = vpop.eup %10320  ;;  %9503 = vmatpush3.bf16.msra.mxu0 %v3771_v30 }
 0x869   : > { %3581 = vadd.xlane.f32.xlu1 %v13756_v6  ;;  %3551 = vadd.xlane.f32.xlu0 %v13758_v17  ;;  %v3624_v3 = vpack.c.bf16 %v13758_v17, %v13730_v49 }
 0x86b   : > { %9485 = vmatmul.mubr.bf16.gmra.mxu1 %v3624_v3  ;;  %9505 = vmatmul.mubr.bf16.vlgmr.msra.gmra.mxu0 %v3626_v1  ;;  %v3630_v1 = vpack.c.bf16 %v13737_v56, %v13702_v62 }
 0x86c   : > { %9508 = vmatprep.mubr.bf16.mxu0 %v3627_v34 }
 0x86d   : > { %3547 = vadd.xlane.f32.xlu0 %v13741_v2 }
 0x870   : > { %v13770_v9 = vpop.eup %10322 }
 0x871   : > { %17917 = vst [vmem:[#allocation231_spill] sm:$0xff] %v13770_v9  ;;  %3579 = vadd.xlane.f32.xlu0 %v13770_v9  ;;  %v13777_v11 = vpop.eup %10324  ;;  %v3631_v26 = vpack.c.bf16 %v13770_v9, %v13753_v35 }
 0x872   : > { %17918 = vst [vmem:[#allocation203_spill] sm:$0xff] %v13777_v11  ;;  %v3632_v45 = vpack.c.bf16 %v13777_v11, %v13756_v6 }
 0x873   : > { %9509 = vmatmul.mubr.bf16.gmra.mxu0 %v3628_v47 }
 0x874   : > { %9512 = vmatprep.mubr.bf16.mxu0 %v3629_v0 }
 0x875   : > { %3583 = vadd.xlane.f32.xlu0 %v13777_v11 }
 0x87b   : > { %9513 = vmatmul.mubr.bf16.gmra.mxu0 %v3630_v1 }
 0x87c   : > { %9516 = vmatprep.mubr.bf16.mxu0 %v3631_v26 }
 0x883   : > { %9517 = vmatmul.mubr.bf16.gmra.mxu0 %v3632_v45 }
 0x8ac   : > { %v3526_v16 = vpop.xlane.xlu0 %3525 }
 0x8ad   : > { %10326 = vrcp.f32 %v3526_v16 }
 0x8b0   : > { %v3522_v40 = vpop.xlane.xlu0 %3521  ;;  %v13786_v36 = vpop.xlane.xlu1 %3557 }
 0x8b4   : > { %v13788_v10 = vpop.xlane.xlu1 %3553 }
 0x8b6   : > { %v3528_v13 = vpop.xlane.xlu0 %3527 }
 0x8b7   : > { %10328 = vrcp.f32 %v3528_v13 }
 0x8b8   : > { %v3524_v7 = vpop.xlane.xlu1 %3523  ;;  %10330 = vrcp.f32 %v3522_v40 }
 0x8b9   : > { %10332 = vrcp.f32 %v3524_v7 }
 0x8ba   : > { %v13790_v32 = vpop.xlane.xlu0 %3559  ;;  %v13804_v0 = vpop.eup %10326 }
 0x8bc   : > { %v3534_v5 = vpop.xlane.xlu1 %3533 }
 0x8bd   : > { %10334 = vrcp.f32 %v3534_v5 }
 0x8be   : > { %v13792_v46 = vpop.xlane.xlu0 %3555 }
 0x8c0   : > { %v13794_v19 = vpop.xlane.xlu1 %3565 }
 0x8c4   : > { %v3530_v20 = vpop.xlane.xlu1 %3529  ;;  %v13808_v26 = vpop.eup %10328 }
 0x8c5   : > { %v13810_v16 = vpop.eup %10330 }
 0x8c6   : > { %v13818_v7 = vpop.eup %10332 }
 0x8c8   : > { %v13798_v24 = vpop.xlane.xlu1 %3561 }
 0x8ca   : > { %v3536_v58 = vpop.xlane.xlu0 %3535  ;;  %v13830_v44 = vpop.eup %10334 }
 0x8cb   : > { %10336 = vrcp.f32 %v3536_v58 }
 0x8cc   : > { %v3542_v63 = vpop.xlane.xlu1 %3541  ;;  %10338 = vrcp.f32 %v3530_v20 }
 0x8ce   : > { %v13796_v23 = vpop.xlane.xlu0 %3567 }
 0x8d0   : > { %v13806_v1 = vpop.xlane.xlu1 %3573 }
 0x8d2   : > { %v3532_v61 = vpop.xlane.xlu0 %3531 }
 0x8d3   : > { %10340 = vrcp.f32 %v3532_v61 }
 0x8d4   : > { %10342 = vrcp.f32 %v3542_v63 }
 0x8d6   : > { %v13800_v31 = vpop.xlane.xlu0 %3563 }
 0x8d7   : > { %v3538_v58 = vpop.xlane.xlu1 %3537 }
 0x8db   : > { %v13852_v39 = vpop.xlane.xlu1 %3569 }
 0x8de   : > { %v3544_v30 = vpop.xlane.xlu0 %3543 }
 0x8df   : > { %10344 = vrcp.f32 %v3544_v30 }
 0x8e0   : > { %10346 = vrcp.f32 %v3538_v58 }
 0x8e2   : > { %v13802_v34 = vpop.xlane.xlu0 %3575 }
 0x8e6   : > { %v3540_v4 = vpop.xlane.xlu0 %3539 }
 0x8e7   : > { %10348 = vrcp.f32 %v3540_v4  ;;  %v3550_v4 = vpop.xlane.xlu1 %3549 }
 0x8e8   : > { %10350 = vrcp.f32 %v13786_v36 }
 0x8e9   : > { %10352 = vrcp.f32 %v13788_v10 }
 0x8ea   : > { %10354 = vrcp.f32 %v13790_v32 }
 0x8eb   : > { %10356 = vrcp.f32 %v13792_v46 }
 0x8ec   : > { %10358 = vrcp.f32 %v3550_v4 }
 0x905   : > { %v9474_v3 = vpop.f32.mrf.mxu1 }
 0x906   : > { %v13813_v40 = vmul.f32 %v13804_v0, %v9474_v3 }
 0x907   : > { %v3699_v47 = vpop.f32.mrf.mxu1 }
 0x908   : > { %17919 = vst [vmem:[#allocation232_spill] sm:$0xff] %v13813_v40  ;;  %v13821_v20 = vmul.f32 %v13810_v16, %v3699_v47  ;;  %v13832_v47 = vpop.eup %10336  ;;  %v3572_v40 = vpop.xlane.xlu0 %3571 }
 0x909   : > { %v9475_v45 = vpop.f32.mrf.mxu1  ;;  %v13834_v42 = vpop.eup %10338 }
 0x90a   : > { %v13816_v13 = vmul.f32 %v13808_v26, %v9475_v45  ;;  %17921 = vst [vmem:[#allocation207_spill] sm:$0xff] %v13821_v20  ;;  %v13842_v30 = vpop.eup %10340 }
 0x90b   : > { %v3702_v5 = vpop.f32.mrf.mxu1  ;;  %v13856_v20 = vpop.eup %10342 }
 0x90c   : > { %17920 = vst [vmem:[#allocation206_spill] sm:$0xff] %v13816_v13  ;;  %v13826_v53 = vmul.f32 %v13818_v7, %v3702_v5 }
 0x90d   : > { %v9478_v3 = vpop.f32.mrf.mxu1 }
 0x90e   : > { %17922 = vst [vmem:[#allocation208_spill] sm:$0xff] %v13826_v53  ;;  %v13837_v5 = vmul.f32 %v13830_v44, %v9478_v3  ;;  %v13858_v53 = vpop.eup %10344 }
 0x90f   : > { %v3715_v57 = vpop.f32.mrf.mxu1  ;;  %v13860_v6 = vpop.eup %10346 }
 0x910   : > { %17923 = vst [vmem:[#allocation209_spill] sm:$0xff] %v13837_v5  ;;  %v13845_v58 = vmul.f32 %v13834_v42, %v3715_v57  ;;  %v3552_v57 = vpop.xlane.xlu0 %3551 }
 0x911   : > { %v9479_v18 = vpop.f32.mrf.mxu1  ;;  %10360 = vrcp.f32 %v3552_v57 }
 0x912   : > { %v13840_v63 = vmul.f32 %v13832_v47, %v9479_v18  ;;  %17925 = vst [vmem:[#allocation102_spill] sm:$0xff] %v13845_v58 }
 0x913   : > { %v3718_v61 = vpop.f32.mrf.mxu1 }
 0x914   : > { %17924 = vst [vmem:[#allocation99_spill] sm:$0xff] %v13840_v63  ;;  %v13850_v45 = vmul.f32 %v13842_v30, %v3718_v61  ;;  %v13868_v63 = vpop.eup %10348 }
 0x915   : > { %v13885_v10 = vpop.eup %10350 }
 0x916   : > { %17926 = vst [vmem:[#allocation147_spill] sm:$0xff] %v13850_v45 }
 0x917   : > { %v9482_v18 = vpop.f32.mrf.mxu1 }
 0x918   : > { %v13863_v61 = vmul.f32 %v13856_v20, %v9482_v18  ;;  %v3548_v18 = vpop.xlane.xlu0 %3547 }
 0x919   : > { %v3731_v13 = vpop.f32.mrf.mxu1 }
 0x91a   : > { %17927 = vst [vmem:[#allocation150_spill] sm:$0xff] %v13863_v61  ;;  %v13873_v58 = vmul.f32 %v13860_v6, %v3731_v13  ;;  %v13888_v13 = vpop.eup %10352 }
 0x91b   : > { %v9483_v11 = vpop.f32.mrf.mxu1 }
 0x91c   : > { %v13866_v5 = vmul.f32 %v13858_v53, %v9483_v11  ;;  %17929 = vst [vmem:[#allocation154_spill] sm:$0xff] %v13873_v58  ;;  %v3546_v11 = vpop.xlane.xlu1 %3545  ;;  %v3580_v61 = vpop.xlane.xlu0 %3579 }
 0x91d   : > { %v3734_v3 = vpop.f32.mrf.mxu1  ;;  %10362 = vrcp.f32 %v3546_v11 }
 0x91e   : > { %17928 = vst [vmem:[#allocation109_spill] sm:$0xff] %v13866_v5  ;;  %v13878_v9 = vmul.f32 %v13868_v63, %v3734_v3  ;;  %10364 = vrcp.f32 %v3548_v18  ;;  %v13891_v3 = vpop.eup %10354 }
 0x91f   : > { %10366 = vrcp.f32 %v13794_v19  ;;  %v13894_v4 = vpop.eup %10356 }
 0x920   : > { %17930 = vst [vmem:[#allocation116_spill] sm:$0xff] %v13878_v9  ;;  %10368 = vrcp.f32 %v13796_v23  ;;  %v13896_v18 = vpop.eup %10358 }
 0x921   : > { %10370 = vrcp.f32 %v13798_v24  ;;  %v13898_v19 = vpop.eup %10360  ;;  %v3578_v24 = vpop.xlane.xlu1 %3577 }
 0x922   : > { %10372 = vrcp.f32 %v13800_v31 }
 0x923   : > { %10374 = vrcp.f32 %v13806_v1 }
 0x924   : > { %10376 = vrcp.f32 %v13802_v34 }
 0x925   : > { %10378 = vrcp.f32 %v13852_v39 }
 0x926   : > { %10380 = vrcp.f32 %v3572_v40 }
 0x92a   : > { %v13901_v36 = vpop.eup %10362 }
 0x92b   : > { %v9486_v32 = vpop.f32.mrf.mxu1  ;;  %v9506_v46 = vpop.f32.mrf.mxu0 }
 0x92c   : > { %v13904_v5 = vmul.f32 %v13896_v18, %v9486_v32  ;;  %v13907_v31 = vmul.f32 %v13885_v10, %v9506_v46  ;;  %v13915_v35 = vpop.eup %10364 }
 0x92d   : > { %v3747_v57 = vpop.f32.mrf.mxu1  ;;  %v3828_v11 = vpop.f32.mrf.mxu0 }
 0x92e   : > { %17931 = vst [vmem:[#allocation158_spill] sm:$0xff] %v13904_v5  ;;  %17932 = vst [vmem:[#allocation117_spill] sm:$0xff] %v13907_v31  ;;  %v13919_v1 = vmul.f32 %v13901_v36, %v3747_v57  ;;  %v13922_v56 = vmul.f32 %v13888_v13, %v3828_v11  ;;  %v13939_v5 = vpop.eup %10366 }
 0x92f   : > { %v9487_v23 = vpop.f32.mrf.mxu1  ;;  %v9507_v45 = vpop.f32.mrf.mxu0 }
 0x930   : > { %v13910_v58 = vmul.f32 %v13898_v19, %v9487_v23  ;;  %v13913_v9 = vmul.f32 %v13891_v3, %v9507_v45  ;;  %17935 = vst [vmem:[#allocation121_spill] sm:$0xff] %v13919_v1  ;;  %17936 = vst [vmem:[#allocation67_spill] sm:$0xff] %v13922_v56  ;;  %v3582_v23 = vpop.xlane.xlu1 %3581  ;;  %v13941_v31 = vpop.eup %10368 }
 0x931   : > { %v3750_v32 = vpop.f32.mrf.mxu1  ;;  %v3831_v62 = vpop.f32.mrf.mxu0  ;;  %10382 = vrcp.f32 %v3582_v23 }
 0x932   : > { %17933 = vst [vmem:[#allocation161_spill] sm:$0xff] %v13910_v58  ;;  %17934 = vst [vmem:[#allocation73_spill] sm:$0xff] %v13913_v9  ;;  %v13929_v45 = vmul.f32 %v13915_v35, %v3750_v32  ;;  %v13932_v50 = vmul.f32 %v13894_v4, %v3831_v62  ;;  %v3584_v32 = vpop.xlane.xlu0 %3583  ;;  %v13943_v62 = vpop.eup %10370 }
 0x933   : > { %v9510_v34 = vpop.f32.mrf.mxu0  ;;  %v13951_v57 = vpop.eup %10372  ;;  %10384 = vrcp.f32 %v3584_v32 }
 0x934   : > { %17937 = vst [vmem:[#allocation113_spill] sm:$0xff] %v13929_v45  ;;  %17938 = vst [vmem:[#allocation61_spill] sm:$0xff] %v13932_v50  ;;  %v13946_v39 = vmul.f32 %v13939_v5, %v9510_v34  ;;  %10386 = vrcp.f32 %v3578_v24  ;;  %v13961_v1 = vpop.eup %10374 }
 0x935   : > { %v3844_v46 = vpop.f32.mrf.mxu0  ;;  %17943 = vst [vmem:[#allocation112_spill] sm:$0xff] %v13961_v1  ;;  %10388 = vrcp.f32 %v3580_v61  ;;  %v13965_v45 = vpop.eup %10376 }
 0x936   : > { %17939 = vst [vmem:[#allocation106_spill] sm:$0xff] %v13946_v39  ;;  %v13954_v56 = vmul.f32 %v13943_v62, %v3844_v46  ;;  %17944 = vst [vmem:[#allocation72_spill] sm:$0xff] %v13965_v45  ;;  %v13967_v46 = vpop.eup %10378 }
 0x937   : > { %v9511_v9 = vpop.f32.mrf.mxu0  ;;  %17945 = vst [vmem:[#allocation120_spill] sm:$0xff] %v13967_v46  ;;  %v13975_v24 = vpop.eup %10380 }
 0x938   : > { %v13949_v40 = vmul.f32 %v13941_v31, %v9511_v9  ;;  %17941 = vst [vmem:[#allocation105_spill] sm:$0xff] %v13954_v56 }
 0x939   : > { %v3847_v11 = vpop.f32.mrf.mxu0 }
 0x93a   : > { %17940 = vst [vmem:[#allocation60_spill] sm:$0xff] %v13949_v40  ;;  %v13959_v58 = vmul.f32 %v13951_v57, %v3847_v11 }
 0x93b   : > { %v9514_v34 = vpop.f32.mrf.mxu0 }
 0x93c   : > { %17942 = vst [vmem:[#allocation66_spill] sm:$0xff] %v13959_v58  ;;  %v13970_v8 = vmul.f32 %v13961_v1, %v9514_v34 }
 0x93d   : > { %v3860_v23 = vpop.f32.mrf.mxu0 }
 0x93e   : > { %17946 = vst [vmem:[#allocation78_spill] sm:$0xff] %v13970_v8  ;;  %v13978_v61 = vmul.f32 %v13967_v46, %v3860_v23  ;;  %v13987_v58 = vpop.eup %10382 }
 0x93f   : > { %v9515_v32 = vpop.f32.mrf.mxu0 }
 0x940   : > { %v13973_v11 = vmul.f32 %v13965_v45, %v9515_v32  ;;  %17948 = vst [vmem:[#allocation83_spill] sm:$0xff] %v13978_v61  ;;  %v13989_v32 = vpop.eup %10384 }
 0x941   : > { %v3863_v50 = vpop.f32.mrf.mxu0  ;;  %v10387_v1 = vpop.eup %10386 }
 0x942   : > { %17947 = vst [vmem:[#allocation126_spill] sm:$0xff] %v13973_v11  ;;  %v13983_v39 = vmul.f32 %v13975_v24, %v3863_v50  ;;  %v10389_v9 = vpop.eup %10388 }
 0x943   : > { %v9518_v40 = vpop.f32.mrf.mxu0 }
 0x944   : > { %17949 = vst [vmem:[#allocation131_spill] sm:$0xff] %v13983_v39  ;;  %v13992_v23 = vmul.f32 %v13987_v58, %v9518_v40 }
 0x945   : > { %v3876_v56 = vpop.f32.mrf.mxu0 }
 0x946   : > { %17950 = vst [vmem:[#allocation88_spill] sm:$0xff] %v13992_v23  ;;  %v13997_v8 = vmul.f32 %v10387_v1, %v3876_v56 }
 0x947   : > { %v9519_v45 = vpop.f32.mrf.mxu0 }
 0x948   : > { %v13995_v46 = vmul.f32 %v13989_v32, %v9519_v45  ;;  %17952 = vst [vmem:[#allocation93_spill] sm:$0xff] %v13997_v8  ;;  %3941 = sbr.rel (%p8559_p1) target bundleno = 2399 (0x95f), region = 112 }
 0x949   : > { %v3879_v50 = vpop.f32.mrf.mxu0 }
 0x94a   : > { %17951 = vst [vmem:[#allocation136_spill] sm:$0xff] %v13995_v46  ;;  %v14001_v11 = vmul.f32 %v10389_v9, %v3879_v50 }
 0x94c   : > { %17953 = vst [vmem:[#allocation141_spill] sm:$0xff] %v14001_v11 }
 0x94d   : > { %v3942_v45 = vmul.f32 %v13810_v16, %v13633_v54  ;;  %v3943_v56 = vmul.f32 %v13818_v7, %v13642_v22  ;;  %v3944_v40 = vmul.f32 %v13804_v0, %v13629_v41  ;;  %v3945_v50 = vmul.f32 %v13808_v26, %v13648_v15  ;;  %v17961_v0 = vld [vmem:[#allocation236_spill] sm:$0xff]  ;;  %v17962_v16 = vld [vmem:[#allocation231_spill] sm:$0xff] }
 0x94e   : > { %v3946_v34 = vmul.f32 %v13834_v42, %v13677_v48  ;;  %v3947_v61 = vmul.f32 %v13842_v30, %v13691_v37  ;;  %v3948_v54 = vmul.f32 %v13830_v44, %v13661_v28  ;;  %v3949_v22 = vmul.f32 %v13832_v47, %v13685_v33 }
 0x94f   : > { %8577 = vst [vmem:[%s11514_s23 + $0x80] sm:$0xff] %v3942_v45  ;;  %8578 = vst [vmem:[%s11514_s23 + $0x88] sm:$0xff] %v3943_v56  ;;  %v3950_v42 = vmul.f32 %v13860_v6, %v13715_v29  ;;  %v3951_v41 = vmul.f32 %v13868_v63, %v13708_v14  ;;  %v3952_v44 = vmul.f32 %v13856_v20, %v13688_v21  ;;  %v17960_v6 = vld [vmem:[#allocation72_spill] sm:$0xff]  ;;  %v17963_v20 = vld [vmem:[#allocation205_spill] sm:$0xff] }
 0x950   : > { %8579 = vst [vmem:[%s11514_s23 + $0x90] sm:$0xff] %v3944_v40  ;;  %8580 = vst [vmem:[%s11514_s23 + $0x98] sm:$0xff] %v3945_v50  ;;  %v3953_v15 = vmul.f32 %v13858_v53, %v13728_v55  ;;  %v3954_v28 = vmul.f32 %v13901_v36, %v13747_v12  ;;  %v3955_v48 = vmul.f32 %v13915_v35, %v13741_v2  ;;  %v17954_v55 = vld [vmem:[#allocation202_spill] sm:$0xff]  ;;  %v17956_v2 = vld [vmem:[#allocation204_spill] sm:$0xff] }
 0x951   : > { %8581 = vst [vmem:[%s11514_s23 + $0xa0] sm:$0xff] %v3946_v34  ;;  %8582 = vst [vmem:[%s11514_s23 + $0xa8] sm:$0xff] %v3947_v61  ;;  %v3956_v33 = vmul.f32 %v13896_v18, %v13730_v49  ;;  %v3957_v53 = vmul.f32 %v13898_v19, %v13758_v17  ;;  %v3958_v21 = vmul.f32 %v13888_v13, %v13640_v43  ;;  %v17955_v49 = vld [vmem:[#allocation120_spill] sm:$0xff]  ;;  %v17957_v12 = vld [vmem:[#allocation226_spill] sm:$0xff] }
 0x952   : > { %8583 = vst [vmem:[%s11514_s23 + $0xb0] sm:$0xff] %v3948_v54  ;;  %8584 = vst [vmem:[%s11514_s23 + $0xb8] sm:$0xff] %v3949_v22  ;;  %v3959_v37 = vmul.f32 %v13894_v4, %v13665_v59  ;;  %v3960_v14 = vmul.f32 %v13885_v10, %v13635_v27  ;;  %v3961_v29 = vmul.f32 %v13891_v3, %v13655_v51 }
 0x953   : > { %8585 = vst [vmem:[%s11514_s23 + $0xc0] sm:$0xff] %v3950_v42  ;;  %8586 = vst [vmem:[%s11514_s23 + $0xc8] sm:$0xff] %v3951_v41  ;;  %v3962_v43 = vmul.f32 %v13943_v62, %v13681_v38  ;;  %v3963_v59 = vmul.f32 %v13951_v57, %v13710_v52  ;;  %v3964_v27 = vmul.f32 %v13939_v5, %v13671_v60  ;;  %v17958_v60 = vld [vmem:[#allocation112_spill] sm:$0xff]  ;;  %v17964_v5 = vld [vmem:[#allocation203_spill] sm:$0xff] }
 0x954   : > { %8587 = vst [vmem:[%s11514_s23 + $0xd0] sm:$0xff] %v3952_v44  ;;  %8588 = vst [vmem:[%s11514_s23 + $0xd8] sm:$0xff] %v3953_v15  ;;  %v3965_v51 = vmul.f32 %v13941_v31, %v13697_v25  ;;  %v3966_v38 = vmul.f32 %v17955_v49, %v17954_v55  ;;  %v3967_v52 = vmul.f32 %v13975_v24, %v17956_v2  ;;  %v17959_v25 = vld [vmem:[#allocation233_spill] sm:$0xff] }
 0x955   : > { %8589 = vst [vmem:[%s11514_s23 + $0xe0] sm:$0xff] %v3954_v28  ;;  %8590 = vst [vmem:[%s11514_s23 + $0xe8] sm:$0xff] %v3955_v48  ;;  %v3968_v35 = vmul.f32 %v17958_v60, %v17957_v12  ;;  %v3969_v17 = vmul.f32 %v17960_v6, %v17959_v25  ;;  %v3970_v26 = vmul.f32 %v10387_v1, %v17961_v0 }
 0x956   : > { %8591 = vst [vmem:[%s11514_s23 + $0xf0] sm:$0xff] %v3956_v33  ;;  %8592 = vst [vmem:[%s11514_s23 + $0xf8] sm:$0xff] %v3957_v53  ;;  %v3971_v7 = vmul.f32 %v10389_v9, %v17962_v16  ;;  %v3972_v47 = vmul.f32 %v13987_v58, %v17963_v20  ;;  %v3973_v63 = vmul.f32 %v13989_v32, %v17964_v5 }
 0x957   : > { %8593 = vst [vmem:[%s11514_s23 + $0x280] sm:$0xff] %v3958_v21  ;;  %8594 = vst [vmem:[%s11514_s23 + $0x288] sm:$0xff] %v3959_v37 }
 0x958   : > { %8595 = vst [vmem:[%s11514_s23 + $0x290] sm:$0xff] %v3960_v14  ;;  %8596 = vst [vmem:[%s11514_s23 + $0x298] sm:$0xff] %v3961_v29 }
 0x959   : > { %8597 = vst [vmem:[%s11514_s23 + $0x2a0] sm:$0xff] %v3962_v43  ;;  %8598 = vst [vmem:[%s11514_s23 + $0x2a8] sm:$0xff] %v3963_v59 }
 0x95a   : > { %8599 = vst [vmem:[%s11514_s23 + $0x2b0] sm:$0xff] %v3964_v27  ;;  %8600 = vst [vmem:[%s11514_s23 + $0x2b8] sm:$0xff] %v3965_v51 }
 0x95b   : > { %8601 = vst [vmem:[%s11514_s23 + $0x2c0] sm:$0xff] %v3966_v38  ;;  %8602 = vst [vmem:[%s11514_s23 + $0x2c8] sm:$0xff] %v3967_v52 }
 0x95c   : > { %8603 = vst [vmem:[%s11514_s23 + $0x2d0] sm:$0xff] %v3968_v35  ;;  %8604 = vst [vmem:[%s11514_s23 + $0x2d8] sm:$0xff] %v3969_v17 }
 0x95d   : > { %8605 = vst [vmem:[%s11514_s23 + $0x2e0] sm:$0xff] %v3970_v26  ;;  %8606 = vst [vmem:[%s11514_s23 + $0x2e8] sm:$0xff] %v3971_v7 }
 0x95e   : > { %8607 = vst [vmem:[%s11514_s23 + $0x2f0] sm:$0xff] %v3972_v47  ;;  %8608 = vst [vmem:[%s11514_s23 + $0x2f8] sm:$0xff] %v3973_v63 }
 0x95f PF: > { %v17965_v30 = vld [vmem:[#allocation97_spill] sm:$0xff]  ;;  %v17971_v58 = vld [vmem:[#allocation92_spill] sm:$0xff]  ;;  %v17972_v18 = vld [vmem:[#allocation95_spill] sm:$0xff] }
 0x960   : > { %v17966_v36 = vld [vmem:[#allocation101_spill] sm:$0xff]  ;;  %v14111_v19 = vpack.c.bf16 %v17972_v18, %v17971_v58  ;;  %v17974_v31 = vld [vmem:[#allocation140_spill] sm:$0xff]  ;;  %v17975_v1 = vld [vmem:[#allocation143_spill] sm:$0xff] }
 0x961   : > { %v14103_v10 = vpack.c.bf16 %v17966_v36, %v17965_v30  ;;  %v17968_v13 = vld [vmem:[#allocation145_spill] sm:$0xff]  ;;  %v14115_v57 = vpack.c.bf16 %v17975_v1, %v17974_v31  ;;  %v17977_v24 = vld [vmem:[#allocation87_spill] sm:$0xff]  ;;  %v17978_v61 = vld [vmem:[#allocation90_spill] sm:$0xff] }
 0x962   : > { %v17969_v3 = vld [vmem:[#allocation149_spill] sm:$0xff]  ;;  %17973 = vst [vmem:[#allocation171_spill] sm:$0xff] %v14111_v19  ;;  %v14131_v34 = vpack.c.bf16 %v17978_v61, %v17977_v24  ;;  %v17980_v32 = vld [vmem:[#allocation135_spill] sm:$0xff]  ;;  %v17981_v45 = vld [vmem:[#allocation138_spill] sm:$0xff]  ;;  %v4082_v40 = vsel %vm2087_vm0, %v14111_v19, 0 }
 0x963   : > { %17967 = vst [vmem:[#allocation98_spill] sm:$0xff] %v14103_v10  ;;  %v14107_v4 = vpack.c.bf16 %v17969_v3, %v17968_v13  ;;  %17976 = vst [vmem:[#allocation195_spill] sm:$0xff] %v14115_v57  ;;  %9808 = vmatprep.subr.msk.bf16.mxu1 %vm2087_vm0, %v14103_v10  ;;  %v4085_v62 = vsel %vm2087_vm0, %v14103_v10, 0  ;;  %v14135_v56 = vpack.c.bf16 %v17981_v45, %v17980_v32  ;;  %v4227_v50 = vsel %vm2087_vm0, %v14115_v57, 0  ;;  %v17983_v54 = vld [vmem:[#allocation58_spill] sm:$0xff]  ;;  %v17986_v41 = vld [vmem:[#allocation103_spill] sm:$0xff] }
 0x964   : > { %9521 = vmatpush3.bf16.xpose.msra.mxu1 %v4085_v62  ;;  %17979 = vst [vmem:[#allocation173_spill] sm:$0xff] %v14131_v34  ;;  %v17984_v22 = vld [vmem:[#allocation62_spill] sm:$0xff]  ;;  %v17987_v44 = vld [vmem:[#allocation107_spill] sm:$0xff]  ;;  %v4079_v28 = vsel %vm2087_vm0, %v14131_v34, 0  ;;  %v17990_v53 = vld [vmem:[#allocation85_spill] sm:$0xff] }
 0x965   : > { %17970 = vst [vmem:[#allocation146_spill] sm:$0xff] %v14107_v4  ;;  %9816 = vmatprep.subr.msk.bf16.mxu0 %vm2087_vm0, %v14107_v4  ;;  %v4230_v9 = vsel %vm2087_vm0, %v14107_v4, 0  ;;  %9809 = vmatprep.subr.msk.bf16.mxu1 %vm2087_vm0, %v14111_v19  ;;  %17982 = vst [vmem:[#allocation198_spill] sm:$0xff] %v14135_v56  ;;  %v14143_v42 = vpack.c.bf16 %v17984_v22, %v17983_v54  ;;  %v14147_v15 = vpack.c.bf16 %v17987_v44, %v17986_v41  ;;  %v17989_v33 = vld [vmem:[#allocation82_spill] sm:$0xff]  ;;  %v17993_v14 = vld [vmem:[#allocation133_spill] sm:$0xff] }
 0x966   : > { %9553 = vmatpush3.bf16.xpose.msra.mxu0 %v4230_v9  ;;  %v4224_v48 = vsel %vm2087_vm0, %v14135_v56, 0  ;;  %v14163_v21 = vpack.c.bf16 %v17990_v53, %v17989_v33  ;;  %v17992_v37 = vld [vmem:[#allocation130_spill] sm:$0xff]  ;;  %v17995_v27 = vld [vmem:[#allocation77_spill] sm:$0xff]  ;;  %v17996_v51 = vld [vmem:[#allocation80_spill] sm:$0xff] }
 0x967   : > { %9817 = vmatprep.subr.msk.bf16.mxu0 %vm2087_vm0, %v14115_v57  ;;  %17985 = vst [vmem:[#allocation197_spill] sm:$0xff] %v14143_v42  ;;  %17988 = vst [vmem:[#allocation200_spill] sm:$0xff] %v14147_v15  ;;  %9536 = vmatprep.mubr.msk.bf16.mxu1 %vm2087_vm0, %v14143_v42  ;;  %v14167_v29 = vpack.c.bf16 %v17993_v14, %v17992_v37  ;;  %v14179_v55 = vpack.c.bf16 %v17996_v51, %v17995_v27  ;;  %v17998_v49 = vld [vmem:[#allocation125_spill] sm:$0xff]  ;;  %v17999_v38 = vld [vmem:[#allocation128_spill] sm:$0xff] }
 0x968   : > { %9568 = vmatprep.mubr.msk.bf16.mxu0 %vm2087_vm0, %v14147_v15  ;;  %17991 = vst [vmem:[#allocation175_spill] sm:$0xff] %v14163_v21  ;;  %v4076_v43 = vsel %vm2087_vm0, %v14163_v21, 0  ;;  %v14183_v2 = vpack.c.bf16 %v17999_v38, %v17998_v49  ;;  %v18001_v60 = vld [vmem:[#allocation71_spill] sm:$0xff]  ;;  %v18007_v7 = vld [vmem:[#allocation65_spill] sm:$0xff]  ;;  %v18016_v31 = vld [vmem:[#allocation104_spill] sm:$0xff] }
 0x969   : > { %17994 = vst [vmem:[#allocation178_spill] sm:$0xff] %v14167_v29  ;;  %v4221_v59 = vsel %vm2087_vm0, %v14167_v29, 0  ;;  %17997 = vst [vmem:[#allocation199_spill] sm:$0xff] %v14179_v55  ;;  %v4073_v52 = vsel %vm2087_vm0, %v14179_v55, 0  ;;  %v18002_v35 = vld [vmem:[#allocation75_spill] sm:$0xff]  ;;  %v18008_v20 = vld [vmem:[#allocation69_spill] sm:$0xff] }
 0x96a   : > { %18000 = vst [vmem:[#allocation180_spill] sm:$0xff] %v14183_v2  ;;  %v4218_v12 = vsel %vm2087_vm0, %v14183_v2, 0  ;;  %v14195_v25 = vpack.c.bf16 %v18002_v35, %v18001_v60  ;;  %v18004_v6 = vld [vmem:[#allocation119_spill] sm:$0xff]  ;;  %v14211_v47 = vpack.c.bf16 %v18008_v20, %v18007_v7  ;;  %v18017_v1 = vld [vmem:[#allocation108_spill] sm:$0xff]  ;;  %v18025_v22 = vld [vmem:[#allocation70_spill] sm:$0xff] }
 0x96b   : > { %v18005_v17 = vld [vmem:[#allocation123_spill] sm:$0xff]  ;;  %v14231_v62 = vpack.c.bf16 %v18017_v1, %v18016_v31  ;;  %v18019_v61 = vld [vmem:[#allocation64_spill] sm:$0xff]  ;;  %v18026_v41 = vld [vmem:[#allocation74_spill] sm:$0xff] }
 0x96c   : > { %9523 = vmatpush3.bf16.xpose.msra.mxu1 %v4082_v40  ;;  %18003 = vst [vmem:[#allocation183_spill] sm:$0xff] %v14195_v25  ;;  %v14199_v0 = vpack.c.bf16 %v18005_v17, %v18004_v6  ;;  %v4070_v26 = vsel %vm2087_vm0, %v14195_v25, 0  ;;  %18009 = vst [vmem:[#allocation156_spill] sm:$0xff] %v14211_v47  ;;  %v18010_v5 = vld [vmem:[#allocation111_spill] sm:$0xff]  ;;  %v4067_v36 = vsel %vm2087_vm0, %v14211_v47, 0  ;;  %v18020_v32 = vld [vmem:[#allocation68_spill] sm:$0xff]  ;;  %v14251_v44 = vpack.c.bf16 %v18026_v41, %v18025_v22 }
 0x96d   : > { %9810 = vmatprep.subr.msk.bf16.mxu1 %vm2087_vm0, %v14131_v34  ;;  %v18011_v63 = vld [vmem:[#allocation115_spill] sm:$0xff]  ;;  %18018 = vst [vmem:[#allocation181_spill] sm:$0xff] %v14231_v62  ;;  %v4209_v24 = vsel %vm2087_vm0, %v14231_v62, 0  ;;  %v14243_v45 = vpack.c.bf16 %v18020_v32, %v18019_v61  ;;  %v18022_v40 = vld [vmem:[#allocation110_spill] sm:$0xff]  ;;  %v18031_v53 = vld [vmem:[#allocation76_spill] sm:$0xff] }
 0x96e   : > { %9555 = vmatpush3.bf16.xpose.msra.mxu0 %v4227_v50  ;;  %18006 = vst [vmem:[#allocation201_spill] sm:$0xff] %v14199_v0  ;;  %v4215_v16 = vsel %vm2087_vm0, %v14199_v0, 0  ;;  %v14215_v30 = vpack.c.bf16 %v18011_v63, %v18010_v5  ;;  %v18013_v3 = vld [vmem:[#allocation59_spill] sm:$0xff]  ;;  %v18023_v50 = vld [vmem:[#allocation114_spill] sm:$0xff]  ;;  %18027 = vst [vmem:[#allocation204_spill] sm:$0xff] %v14251_v44 }
 0x96f   : > { %9818 = vmatprep.subr.msk.bf16.mxu0 %vm2087_vm0, %v14135_v56  ;;  %v18014_v58 = vld [vmem:[#allocation63_spill] sm:$0xff]  ;;  %18021 = vst [vmem:[#allocation202_spill] sm:$0xff] %v14243_v45  ;;  %v14247_v54 = vpack.c.bf16 %v18023_v50, %v18022_v40  ;;  %v18037_v51 = vld [vmem:[#allocation81_spill] sm:$0xff]  ;;  %v18038_v49 = vld [vmem:[#allocation84_spill] sm:$0xff] }
 0x970   : > { %18012 = vst [vmem:[#allocation152_spill] sm:$0xff] %v14215_v30  ;;  %v4212_v13 = vsel %vm2087_vm0, %v14215_v30, 0  ;;  %v14227_v18 = vpack.c.bf16 %v18014_v58, %v18013_v3  ;;  %v18032_v37 = vld [vmem:[#allocation79_spill] sm:$0xff]  ;;  %v14275_v38 = vpack.c.bf16 %v18038_v49, %v18037_v51  ;;  %v18043_v35 = vld [vmem:[#allocation86_spill] sm:$0xff]  ;;  %v18044_v6 = vld [vmem:[#allocation89_spill] sm:$0xff] }
 0x971   : > { %18024 = vst [vmem:[#allocation120_spill] sm:$0xff] %v14247_v54  ;;  %v14267_v14 = vpack.c.bf16 %v18032_v37, %v18031_v53  ;;  %v14291_v17 = vpack.c.bf16 %v18044_v6, %v18043_v35  ;;  %v18049_v20 = vld [vmem:[#allocation91_spill] sm:$0xff]  ;;  %v18050_v5 = vld [vmem:[#allocation94_spill] sm:$0xff]  ;;  %v18055_v58 = vld [vmem:[#allocation96_spill] sm:$0xff] }
 0x972   : > { %18015 = vst [vmem:[#allocation176_spill] sm:$0xff] %v14227_v18  ;;  %v4064_v9 = vsel %vm2087_vm0, %v14227_v18, 0  ;;  %18039 = vst [vmem:[#allocation72_spill] sm:$0xff] %v14275_v38  ;;  %v14299_v63 = vpack.c.bf16 %v18050_v5, %v18049_v20  ;;  %v18056_v31 = vld [vmem:[#allocation100_spill] sm:$0xff]  ;;  %v18061_v37 = vld [vmem:[#allocation170_spill] sm:$0xff] }
 0x973   : > { %18033 = vst [vmem:[#allocation112_spill] sm:$0xff] %v14267_v14  ;;  %18045 = vst [vmem:[#allocation231_spill] sm:$0xff] %v14291_v17  ;;  %v14315_v1 = vpack.c.bf16 %v18056_v31, %v18055_v58  ;;  %v18064_v49 = vld [vmem:[#allocation194_spill] sm:$0xff]  ;;  %v18070_v5 = vld [vmem:[#allocation192_spill] sm:$0xff] }
 0x974   : > { %9525 = vmatpush3.bf16.xpose.msra.mxu1 %v4079_v28  ;;  %v18028_v28 = vld [vmem:[#allocation118_spill] sm:$0xff]  ;;  %18051 = vst [vmem:[#allocation203_spill] sm:$0xff] %v14299_v63 }
 0x975   : > { %9811 = vmatprep.subr.msk.bf16.mxu1 %vm2087_vm0, %v14163_v21  ;;  %18057 = vst [vmem:[#allocation101_spill] sm:$0xff] %v14315_v1 }
 0x976   : > { %9557 = vmatpush3.bf16.xpose.msra.mxu0 %v4224_v48  ;;  %v18029_v48 = vld [vmem:[#allocation122_spill] sm:$0xff] }
 0x977   : > { %9819 = vmatprep.subr.msk.bf16.mxu0 %vm2087_vm0, %v14167_v29  ;;  %v14255_v33 = vpack.c.bf16 %v18029_v48, %v18028_v28 }
 0x979   : > { %18030 = vst [vmem:[#allocation226_spill] sm:$0xff] %v14255_v33 }
 0x97c   : > { %9527 = vmatpush3.bf16.xpose.msra.mxu1 %v4076_v43  ;;  %v18034_v43 = vld [vmem:[#allocation124_spill] sm:$0xff] }
 0x97d   : > { %9812 = vmatprep.subr.msk.bf16.mxu1 %vm2087_vm0, %v14179_v55 }
 0x97e   : > { %9559 = vmatpush3.bf16.xpose.msra.mxu0 %v4221_v59  ;;  %v18035_v59 = vld [vmem:[#allocation127_spill] sm:$0xff] }
 0x97f   : > { %9820 = vmatprep.subr.msk.bf16.mxu0 %vm2087_vm0, %v14183_v2  ;;  %v14271_v27 = vpack.c.bf16 %v18035_v59, %v18034_v43  ;;  %v18062_v43 = vld [vmem:[#allocation172_spill] sm:$0xff] }
 0x980   : > { %v14348_v59 = vpack.c.bf16 %v18062_v43, %v18061_v37  ;;  %v18076_v43 = vld [vmem:[#allocation190_spill] sm:$0xff] }
 0x981   : > { %18036 = vst [vmem:[#allocation233_spill] sm:$0xff] %v14271_v27 }
 0x982   : > { %18063 = vst [vmem:[#allocation149_spill] sm:$0xff] %v14348_v59 }
 0x984   : > { %9529 = vmatpush3.bf16.xpose.msra.mxu1 %v4073_v52  ;;  %v18040_v52 = vld [vmem:[#allocation129_spill] sm:$0xff] }
 0x985   : > { %9813 = vmatprep.subr.msk.bf16.mxu1 %vm2087_vm0, %v14195_v25 }
 0x986   : > { %9561 = vmatpush3.bf16.xpose.msra.mxu0 %v4218_v12  ;;  %v18041_v12 = vld [vmem:[#allocation132_spill] sm:$0xff] }
 0x987   : > { %9821 = vmatprep.subr.msk.bf16.mxu0 %vm2087_vm0, %v14199_v0  ;;  %v14279_v60 = vpack.c.bf16 %v18041_v12, %v18040_v52  ;;  %v18065_v52 = vld [vmem:[#allocation196_spill] sm:$0xff] }
 0x988   : > { %v14356_v12 = vpack.c.bf16 %v18065_v52, %v18064_v49  ;;  %v18077_v49 = vld [vmem:[#allocation191_spill] sm:$0xff] }
 0x989   : > { %18042 = vst [vmem:[#allocation236_spill] sm:$0xff] %v14279_v60  ;;  %v14392_v52 = vpack.c.bf16 %v18077_v49, %v18076_v43  ;;  %v18083_v43 = vld [vmem:[#allocation189_spill] sm:$0xff] }
 0x98a   : > { %18066 = vst [vmem:[#allocation92_spill] sm:$0xff] %v14356_v12 }
 0x98b   : > { %18078 = vst [vmem:[#allocation87_spill] sm:$0xff] %v14392_v52 }
 0x98c   : > { %9531 = vmatpush3.bf16.xpose.msra.mxu1 %v4070_v26  ;;  %v18046_v26 = vld [vmem:[#allocation134_spill] sm:$0xff] }
 0x98d   : > { %9814 = vmatprep.subr.msk.bf16.mxu1 %vm2087_vm0, %v14211_v47 }
 0x98e   : > { %9563 = vmatpush3.bf16.xpose.msra.mxu0 %v4215_v16  ;;  %v18047_v16 = vld [vmem:[#allocation137_spill] sm:$0xff] }
 0x98f   : > { %9822 = vmatprep.subr.msk.bf16.mxu0 %vm2087_vm0, %v14215_v30  ;;  %v14295_v7 = vpack.c.bf16 %v18047_v16, %v18046_v26  ;;  %v18067_v26 = vld [vmem:[#allocation168_spill] sm:$0xff]  ;;  %v18068_v16 = vld [vmem:[#allocation169_spill] sm:$0xff] }
 0x990   : > { %v14367_v20 = vpack.c.bf16 %v18068_v16, %v18067_v26  ;;  %v18079_v16 = vld [vmem:[#allocation164_spill] sm:$0xff] }
 0x991   : > { %18048 = vst [vmem:[#allocation205_spill] sm:$0xff] %v14295_v7 }
 0x992   : > { %18069 = vst [vmem:[#allocation95_spill] sm:$0xff] %v14367_v20 }
 0x994   : > { %9533 = vmatpush3.bf16.xpose.msra.mxu1 %v4067_v36  ;;  %v18052_v36 = vld [vmem:[#allocation139_spill] sm:$0xff] }
 0x995   : > { %9815 = vmatprep.subr.msk.bf16.mxu1 %vm2087_vm0, %v14227_v18 }
 0x996   : > { %9565 = vmatpush3.bf16.xpose.msra.mxu0 %v4212_v13  ;;  %v18053_v13 = vld [vmem:[#allocation142_spill] sm:$0xff] }
 0x997   : > { %9823 = vmatprep.subr.msk.bf16.mxu0 %vm2087_vm0, %v14231_v62  ;;  %v14303_v3 = vpack.c.bf16 %v18053_v13, %v18052_v36  ;;  %v18071_v36 = vld [vmem:[#allocation193_spill] sm:$0xff] }
 0x998   : > { %v14374_v13 = vpack.c.bf16 %v18071_v36, %v18070_v5  ;;  %v18080_v5 = vld [vmem:[#allocation165_spill] sm:$0xff] }
 0x999   : > { %18054 = vst [vmem:[#allocation97_spill] sm:$0xff] %v14303_v3  ;;  %v14401_v36 = vpack.c.bf16 %v18080_v5, %v18079_v16  ;;  %v18085_v16 = vld [vmem:[#allocation162_spill] sm:$0xff]  ;;  %v18086_v5 = vld [vmem:[#allocation163_spill] sm:$0xff] }
 0x99a   : > { %18072 = vst [vmem:[#allocation140_spill] sm:$0xff] %v14374_v13  ;;  %v14419_v46 = vpack.c.bf16 %v18086_v5, %v18085_v16  ;;  %v18091_v5 = vld [vmem:[#allocation159_spill] sm:$0xff] }
 0x99b   : > { %18081 = vst [vmem:[#allocation90_spill] sm:$0xff] %v14401_v36 }
 0x99c   : > { %9535 = vmatpush3.bf16.xpose.msra.mxu1 %v4064_v9  ;;  %v18058_v9 = vld [vmem:[#allocation144_spill] sm:$0xff]  ;;  %18087 = vst [vmem:[#allocation138_spill] sm:$0xff] %v14419_v46 }
 0x99d   : > { %9584 = vmatprep.subr.bf16.mxu1 %v14348_v59 }
 0x99e   : > { %9567 = vmatpush3.bf16.xpose.msra.mxu0 %v4209_v24  ;;  %v18059_v24 = vld [vmem:[#allocation148_spill] sm:$0xff] }
 0x99f   : > { %v14319_v61 = vpack.c.bf16 %v18059_v24, %v18058_v9  ;;  %9616 = vmatprep.subr.bf16.mxu0 %v14356_v12  ;;  %v18073_v9 = vld [vmem:[#allocation166_spill] sm:$0xff]  ;;  %v18074_v24 = vld [vmem:[#allocation167_spill] sm:$0xff] }
 0x9a0   : > { %v14385_v37 = vpack.c.bf16 %v18074_v24, %v18073_v9  ;;  %v18082_v24 = vld [vmem:[#allocation188_spill] sm:$0xff] }
 0x9a1   : > { %18060 = vst [vmem:[#allocation145_spill] sm:$0xff] %v14319_v61  ;;  %v14410_v49 = vpack.c.bf16 %v18083_v43, %v18082_v24  ;;  %v18088_v24 = vld [vmem:[#allocation186_spill] sm:$0xff]  ;;  %v18089_v43 = vld [vmem:[#allocation187_spill] sm:$0xff] }
 0x9a2   : > { %18075 = vst [vmem:[#allocation143_spill] sm:$0xff] %v14385_v37  ;;  %v14428_v11 = vpack.c.bf16 %v18089_v43, %v18088_v24  ;;  %v18094_v24 = vld [vmem:[#allocation184_spill] sm:$0xff]  ;;  %v18095_v43 = vld [vmem:[#allocation185_spill] sm:$0xff] }
 0x9a3   : > { %9537 = vmatmul.mubr.msk.bf16.vlgmr.msra.gmra.mxu1 %vm2087_vm0, %v14243_v45  ;;  %18084 = vst [vmem:[#allocation135_spill] sm:$0xff] %v14410_v49 }
 0x9a4   : > { %9540 = vmatprep.mubr.msk.bf16.mxu1 %vm2087_vm0, %v14251_v44  ;;  %9585 = vmatpush3.bf16.msra.mxu1 %v14348_v59  ;;  %18090 = vst [vmem:[#allocation58_spill] sm:$0xff] %v14428_v11 }
 0x9a5   : > { %9569 = vmatmul.mubr.msk.bf16.vlgmr.msra.gmra.mxu0 %vm2087_vm0, %v14247_v54  ;;  %9586 = vmatprep.subr.bf16.mxu1 %v14367_v20 }
 0x9a6   : > { %9572 = vmatprep.mubr.msk.bf16.mxu0 %vm2087_vm0, %v14255_v33  ;;  %9617 = vmatpush3.bf16.msra.mxu0 %v14356_v12 }
 0x9a7   : > { %9618 = vmatprep.subr.bf16.mxu0 %v14374_v13 }
 0x9a8   : > { %9587 = vmatpush3.bf16.msra.mxu1 %v14367_v20 }
 0x9a9   : > { %9588 = vmatprep.subr.bf16.mxu1 %v14385_v37 }
 0x9aa   : > { %9619 = vmatpush3.bf16.msra.mxu0 %v14374_v13 }
 0x9ab   : > { %9541 = vmatmul.mubr.msk.bf16.gmra.mxu1 %vm2087_vm0, %v14267_v14  ;;  %9620 = vmatprep.subr.bf16.mxu0 %v14392_v52 }
 0x9ac   : > { %9544 = vmatprep.mubr.msk.bf16.mxu1 %vm2087_vm0, %v14275_v38  ;;  %9589 = vmatpush3.bf16.msra.mxu1 %v14385_v37  ;;  %v14446_v37 = vpack.c.bf16 %v18095_v43, %v18094_v24  ;;  %v18100_v24 = vld [vmem:[#allocation179_spill] sm:$0xff]  ;;  %v18101_v43 = vld [vmem:[#allocation182_spill] sm:$0xff] }
 0x9ad   : > { %9573 = vmatmul.mubr.msk.bf16.gmra.mxu0 %vm2087_vm0, %v14271_v27  ;;  %9590 = vmatprep.subr.bf16.mxu1 %v14401_v36 }
 0x9ae   : > { %9576 = vmatprep.mubr.msk.bf16.mxu0 %vm2087_vm0, %v14279_v60  ;;  %9621 = vmatpush3.bf16.msra.mxu0 %v14392_v52  ;;  %18096 = vst [vmem:[#allocation103_spill] sm:$0xff] %v14446_v37 }
 0x9af   : > { %9622 = vmatprep.subr.bf16.mxu0 %v14410_v49 }
 0x9b0   : > { %9591 = vmatpush3.bf16.msra.mxu1 %v14401_v36 }
 0x9b1   : > { %9592 = vmatprep.subr.bf16.mxu1 %v14419_v46 }
 0x9b2   : > { %9623 = vmatpush3.bf16.msra.mxu0 %v14410_v49  ;;  %v18092_v49 = vld [vmem:[#allocation160_spill] sm:$0xff] }
 0x9b3   : > { %9545 = vmatmul.mubr.msk.bf16.gmra.mxu1 %vm2087_vm0, %v14291_v17  ;;  %9624 = vmatprep.subr.bf16.mxu0 %v14428_v11  ;;  %v14439_v36 = vpack.c.bf16 %v18092_v49, %v18091_v5  ;;  %v18097_v49 = vld [vmem:[#allocation155_spill] sm:$0xff]  ;;  %v18098_v5 = vld [vmem:[#allocation157_spill] sm:$0xff] }
 0x9b4   : > { %9548 = vmatprep.mubr.msk.bf16.mxu1 %vm2087_vm0, %v14299_v63  ;;  %9593 = vmatpush3.bf16.msra.mxu1 %v14419_v46  ;;  %v14457_v52 = vpack.c.bf16 %v18098_v5, %v18097_v49  ;;  %v18103_v49 = vld [vmem:[#allocation151_spill] sm:$0xff]  ;;  %v18104_v5 = vld [vmem:[#allocation153_spill] sm:$0xff] }
 0x9b5   : > { %9577 = vmatmul.mubr.msk.bf16.gmra.mxu0 %vm2087_vm0, %v14295_v7  ;;  %18093 = vst [vmem:[#allocation62_spill] sm:$0xff] %v14439_v36  ;;  %9594 = vmatprep.subr.bf16.mxu1 %v14439_v36  ;;  %v14473_v20 = vpack.c.bf16 %v18104_v5, %v18103_v49 }
 0x9b6   : > { %9580 = vmatprep.mubr.msk.bf16.mxu0 %vm2087_vm0, %v14303_v3  ;;  %9625 = vmatpush3.bf16.msra.mxu0 %v14428_v11  ;;  %18099 = vst [vmem:[#allocation107_spill] sm:$0xff] %v14457_v52  ;;  %v14464_v11 = vpack.c.bf16 %v18101_v43, %v18100_v24  ;;  %v18106_v24 = vld [vmem:[#allocation174_spill] sm:$0xff]  ;;  %v18107_v43 = vld [vmem:[#allocation177_spill] sm:$0xff] }
 0x9b7   : > { %9626 = vmatprep.subr.bf16.mxu0 %v14446_v37  ;;  %18105 = vst [vmem:[#allocation85_spill] sm:$0xff] %v14473_v20  ;;  %v14482_v12 = vpack.c.bf16 %v18107_v43, %v18106_v24 }
 0x9b8   : > { %9595 = vmatpush3.bf16.msra.mxu1 %v14439_v36  ;;  %18102 = vst [vmem:[#allocation82_spill] sm:$0xff] %v14464_v11 }
 0x9b9   : > { %9596 = vmatprep.subr.bf16.mxu1 %v14457_v52  ;;  %18108 = vst [vmem:[#allocation130_spill] sm:$0xff] %v14482_v12 }
 0x9ba   : > { %9627 = vmatpush3.bf16.msra.mxu0 %v14446_v37 }
 0x9bb   : > { %9549 = vmatmul.mubr.msk.bf16.gmra.mxu1 %vm2087_vm0, %v14315_v1  ;;  %9628 = vmatprep.subr.bf16.mxu0 %v14464_v11 }
 0x9bc   : > { %9597 = vmatpush3.bf16.msra.mxu1 %v14457_v52 }
 0x9bd   : > { %9581 = vmatmul.mubr.msk.bf16.gmra.mxu0 %vm2087_vm0, %v14319_v61  ;;  %9598 = vmatprep.subr.bf16.mxu1 %v14473_v20 }
 0x9be   : > { %9629 = vmatpush3.bf16.msra.mxu0 %v14464_v11 }
 0x9bf   : > { %9630 = vmatprep.subr.bf16.mxu0 %v14482_v12 }
 0x9c0   : > { %9599 = vmatpush3.bf16.msra.mxu1 %v14473_v20 }
 0x9c2   : > { %9631 = vmatpush3.bf16.msra.mxu0 %v14482_v12 }
 0xa63   : > { %v14325_v32 = vpop.f32.mrf.mxu1 }
 0xa64   : > { %4333 = vmax.xlane.f32.xlu0 %v14325_v32 }
 0xa65   : > { %v14327_v40 = vpop.f32.mrf.mxu0  ;;  %v14330_v50 = vpop.f32.mrf.mxu1 }
 0xa67   : > { %v14332_v22 = vpop.f32.mrf.mxu0  ;;  %v14335_v41 = vpop.f32.mrf.mxu1 }
 0xa68   : > { %4361 = vmax.xlane.f32.xlu1 %v14332_v22  ;;  %4365 = vmax.xlane.f32.xlu0 %v14327_v40 }
 0xa69   : > { %v14338_v28 = vpop.f32.mrf.mxu1  ;;  %v14341_v48 = vpop.f32.mrf.mxu0 }
 0xa6b   : > { %v14344_v53 = vpop.f32.mrf.mxu1  ;;  %v14351_v51 = vpop.f32.mrf.mxu0 }
 0xa6c   : > { %4335 = vmax.xlane.f32.xlu1 %v14335_v41  ;;  %4329 = vmax.xlane.f32.xlu0 %v14330_v50 }
 0xa6d   : > { %v14360_v35 = vpop.f32.mrf.mxu1  ;;  %v14362_v6 = vpop.f32.mrf.mxu0 }
 0xa6f   : > { %v14378_v58 = vpop.f32.mrf.mxu1  ;;  %v14380_v31 = vpop.f32.mrf.mxu0 }
 0xa70   : > { %4367 = vmax.xlane.f32.xlu1 %v14341_v48  ;;  %4331 = vmax.xlane.f32.xlu0 %v14338_v28 }
 0xa71   : > { %v14396_v26 = vpop.f32.mrf.mxu0  ;;  %v14405_v9 = vpop.f32.mrf.mxu1 }
 0xa73   : > { %v14414_v23 = vpop.f32.mrf.mxu1  ;;  %v14423_v8 = vpop.f32.mrf.mxu0 }
 0xa74   : > { %4363 = vmax.xlane.f32.xlu1 %v14351_v51  ;;  %4341 = vmax.xlane.f32.xlu0 %v14344_v53 }
 0xa75   : > { %v14432_v39 = vpop.f32.mrf.mxu1  ;;  %v14434_v16 = vpop.f32.mrf.mxu0 }
 0xa77   : > { %v14450_v46 = vpop.f32.mrf.mxu1  ;;  %v14452_v13 = vpop.f32.mrf.mxu0 }
 0xa78   : > { %4343 = vmax.xlane.f32.xlu1 %v14378_v58  ;;  %4373 = vmax.xlane.f32.xlu0 %v14362_v6 }
 0xa79   : > { %v14468_v36 = vpop.f32.mrf.mxu0  ;;  %v14477_v37 = vpop.f32.mrf.mxu1 }
 0xa7b   : > { %v14486_v52 = vpop.f32.mrf.mxu1  ;;  %v14491_v49 = vpop.f32.mrf.mxu0 }
 0xa7c   : > { %4375 = vmax.xlane.f32.xlu1 %v14396_v26  ;;  %4337 = vmax.xlane.f32.xlu0 %v14360_v35 }
 0xa7d   : > { %v14494_v5 = vpop.f32.mrf.mxu1  ;;  %v14496_v24 = vpop.f32.mrf.mxu0 }
 0xa7f   : > { %v14500_v43 = vpop.f32.mrf.mxu1  ;;  %v14502_v11 = vpop.f32.mrf.mxu0 }
 0xa80   : > { %4339 = vmax.xlane.f32.xlu1 %v14405_v9  ;;  %4369 = vmax.xlane.f32.xlu0 %v14380_v31 }
 0xa81   : > { %v14506_v12 = vpop.f32.mrf.mxu1  ;;  %v14508_v20 = vpop.f32.mrf.mxu0 }
 0xa83   : > { %v14512_v59 = vpop.f32.mrf.mxu0 }
 0xa84   : > { %4371 = vmax.xlane.f32.xlu1 %v14423_v8  ;;  %4349 = vmax.xlane.f32.xlu0 %v14414_v23 }
 0xa88   : > { %4351 = vmax.xlane.f32.xlu1 %v14450_v46  ;;  %4381 = vmax.xlane.f32.xlu0 %v14434_v16 }
 0xa8c   : > { %4383 = vmax.xlane.f32.xlu1 %v14468_v36  ;;  %4345 = vmax.xlane.f32.xlu0 %v14432_v39 }
 0xa90   : > { %4347 = vmax.xlane.f32.xlu1 %v14477_v37  ;;  %4377 = vmax.xlane.f32.xlu0 %v14452_v13 }
 0xa94   : > { %4379 = vmax.xlane.f32.xlu1 %v14491_v49  ;;  %4357 = vmax.xlane.f32.xlu0 %v14486_v52 }
 0xa98   : > { %4359 = vmax.xlane.f32.xlu1 %v14500_v43  ;;  %4353 = vmax.xlane.f32.xlu0 %v14494_v5 }
 0xa9c   : > { %4355 = vmax.xlane.f32.xlu1 %v14506_v12  ;;  %4385 = vmax.xlane.f32.xlu0 %v14502_v11 }
 0xaa0   : > { %4387 = vmax.xlane.f32.xlu1 %v14512_v59  ;;  %4389 = vmax.xlane.f32.xlu0 %v14496_v24 }
 0xaa4   : > { %4391 = vmax.xlane.f32.xlu1 %v14508_v20 }
 0xaed   : > { %v4334_v61 = vpop.xlane.xlu0 %4333 }
 0xaee   : > { %v4395_v1 = vsub.f32 %v14325_v32, %v4334_v61 }
 0xaf0   : > { %v4429_v63 = vmul.f32 1.442695, %v4395_v1 }
 0xaf1   : > { %v4362_v3 = vpop.xlane.xlu1 %4361  ;;  %v4366_v7 = vpop.xlane.xlu0 %4365 }
 0xaf2   : > { %10390 = vpow2.f32 %v4429_v63  ;;  %v4411_v17 = vsub.f32 %v14327_v40, %v4366_v7  ;;  %v4409_v14 = vsub.f32 %v14332_v22, %v4362_v3 }
 0xaf4   : > { %v4461_v38 = vmul.f32 1.442695, %v4411_v17  ;;  %v4457_v32 = vmul.f32 1.442695, %v4409_v14 }
 0xaf5   : > { %v4336_v60 = vpop.xlane.xlu1 %4335  ;;  %v4330_v33 = vpop.xlane.xlu0 %4329 }
 0xaf6   : > { %v4396_v27 = vsub.f32 %v14335_v41, %v4336_v60  ;;  %10392 = vpow2.f32 %v4461_v38  ;;  %v4393_v54 = vsub.f32 %v14330_v50, %v4330_v33 }
 0xaf8   : > { %v4431_v44 = vmul.f32 1.442695, %v4396_v27  ;;  %v4425_v61 = vmul.f32 1.442695, %v4393_v54 }
 0xaf9   : > { %v4368_v45 = vpop.xlane.xlu1 %4367  ;;  %v4332_v63 = vpop.xlane.xlu0 %4331 }
 0xafa   : > { %10394 = vpow2.f32 %v4431_v44  ;;  %v4412_v1 = vsub.f32 %v14341_v48, %v4368_v45  ;;  %v4394_v17 = vsub.f32 %v14338_v28, %v4332_v63 }
 0xafb   : > { %10396 = vpow2.f32 %v4425_v61 }
 0xafc   : > { %v4463_v7 = vmul.f32 1.442695, %v4412_v1  ;;  %v4427_v60 = vmul.f32 1.442695, %v4394_v17 }
 0xafd   : > { %v4364_v40 = vpop.xlane.xlu1 %4363  ;;  %v4342_v27 = vpop.xlane.xlu0 %4341 }
 0xafe   : > { %10398 = vpow2.f32 %v4463_v7  ;;  %v4410_v3 = vsub.f32 %v14351_v51, %v4364_v40  ;;  %v4399_v44 = vsub.f32 %v14344_v53, %v4342_v27 }
 0xaff   : > { %10400 = vpow2.f32 %v4457_v32  ;;  %v14526_v54 = vpop.eup %10390 }
 0xb00   : > { %10402 = vpow2.f32 %v4427_v60  ;;  %v4459_v33 = vmul.f32 1.442695, %v4410_v3  ;;  %v4437_v14 = vmul.f32 1.442695, %v4399_v44  ;;  %4493 = vadd.xlane.f32.xlu0 %v14526_v54 }
 0xb01   : > { %v4344_v45 = vpop.xlane.xlu1 %4343  ;;  %v4374_v50 = vpop.xlane.xlu0 %4373 }
 0xb02   : > { %10404 = vpow2.f32 %v4459_v33  ;;  %v4400_v38 = vsub.f32 %v14378_v58, %v4344_v45  ;;  %v4415_v22 = vsub.f32 %v14362_v6, %v4374_v50 }
 0xb03   : > { %10406 = vpow2.f32 %v4437_v14  ;;  %v14531_v41 = vpop.eup %10392 }
 0xb04   : > { %v4439_v48 = vmul.f32 1.442695, %v4400_v38  ;;  %v4469_v51 = vmul.f32 1.442695, %v4415_v22  ;;  %4525 = vadd.xlane.f32.xlu0 %v14531_v41 }
 0xb05   : > { %v4376_v28 = vpop.xlane.xlu1 %4375  ;;  %v4338_v1 = vpop.xlane.xlu0 %4337 }
 0xb06   : > { %v4416_v53 = vsub.f32 %v14396_v26, %v4376_v28  ;;  %10408 = vpow2.f32 %v4469_v51  ;;  %v4397_v58 = vsub.f32 %v14360_v35, %v4338_v1 }
 0xb07   : > { %v14535_v61 = vpop.eup %10394  ;;  %10410 = vpow2.f32 %v4439_v48 }
 0xb08   : > { %4495 = vadd.xlane.f32.xlu1 %v14535_v61  ;;  %v14539_v32 = vpop.eup %10396  ;;  %v4471_v6 = vmul.f32 1.442695, %v4416_v53  ;;  %v4433_v7 = vmul.f32 1.442695, %v4397_v58 }
 0xb09   : > { %v4340_v63 = vpop.xlane.xlu1 %4339  ;;  %4489 = vadd.xlane.f32.xlu0 %v14539_v32  ;;  %v4370_v40 = vpop.xlane.xlu0 %4369 }
 0xb0a   : > { %v4398_v17 = vsub.f32 %v14405_v9, %v4340_v63  ;;  %10412 = vpow2.f32 %v4433_v7  ;;  %v4413_v35 = vsub.f32 %v14380_v31, %v4370_v40  ;;  %v4586_v31 = vpack.c.bf16 %v14535_v61, %v14526_v54 }
 0xb0b   : > { %v14543_v26 = vpop.eup %10398  ;;  %10414 = vpow2.f32 %v4471_v6 }
 0xb0c   : > { %v14545_v60 = vpop.eup %10400  ;;  %v4435_v3 = vmul.f32 1.442695, %v4398_v17  ;;  %4527 = vadd.xlane.f32.xlu1 %v14543_v26  ;;  %v4465_v44 = vmul.f32 1.442695, %v4413_v35  ;;  %v4594_v51 = vpack.c.bf16 %v14543_v26, %v14531_v41 }
 0xb0d   : > { %v14549_v27 = vpop.eup %10402  ;;  %v4372_v33 = vpop.xlane.xlu1 %4371  ;;  %4521 = vadd.xlane.f32.xlu0 %v14545_v60 }
 0xb0e   : > { %10416 = vpow2.f32 %v4435_v3  ;;  %v4414_v9 = vsub.f32 %v14423_v8, %v4372_v33  ;;  %v4585_v45 = vpack.c.bf16 %v14549_v27, %v14539_v32  ;;  %v4350_v38 = vpop.xlane.xlu0 %4349 }
 0xb0f   : > { %v14555_v14 = vpop.eup %10404  ;;  %10418 = vpow2.f32 %v4465_v44  ;;  %v4403_v22 = vsub.f32 %v14414_v23, %v4350_v38 }
 0xb10   : > { %v4467_v50 = vmul.f32 1.442695, %v4414_v9  ;;  %9600 = vmatprep.mubr.bf16.mxu1 %v4585_v45  ;;  %4491 = vadd.xlane.f32.xlu1 %v14549_v27  ;;  %v4593_v8 = vpack.c.bf16 %v14555_v14, %v14545_v60  ;;  %v14563_v28 = vpop.eup %10406 }
 0xb11   : > { %9601 = vmatmul.mubr.bf16.vlgmr.msra.gmra.mxu1 %v4586_v31  ;;  %v4352_v48 = vpop.xlane.xlu1 %4351  ;;  %v4445_v53 = vmul.f32 1.442695, %v4403_v22  ;;  %4501 = vadd.xlane.f32.xlu0 %v14563_v28 }
 0xb12   : > { %10420 = vpow2.f32 %v4467_v50  ;;  %v4404_v1 = vsub.f32 %v14450_v46, %v4352_v48  ;;  %9632 = vmatprep.mubr.bf16.mxu0 %v4593_v8  ;;  %v4382_v23 = vpop.xlane.xlu0 %4381 }
 0xb13   : > { %9633 = vmatmul.mubr.bf16.vlgmr.msra.gmra.mxu0 %v4594_v51  ;;  %10422 = vpow2.f32 %v4445_v53  ;;  %v4419_v58 = vsub.f32 %v14434_v16, %v4382_v23  ;;  %v14571_v6 = vpop.eup %10408 }
 0xb14   : > { %4523 = vadd.xlane.f32.xlu1 %v14555_v14  ;;  %v4447_v7 = vmul.f32 1.442695, %v4404_v1  ;;  %v14575_v46 = vpop.eup %10410 }
 0xb15   : > { %v4384_v63 = vpop.xlane.xlu1 %4383  ;;  %v4477_v17 = vmul.f32 1.442695, %v4419_v58  ;;  %4533 = vadd.xlane.f32.xlu0 %v14571_v6 }
 0xb16   : > { %v4420_v40 = vsub.f32 %v14468_v36, %v4384_v63  ;;  %v4346_v3 = vpop.xlane.xlu0 %4345 }
 0xb17   : > { %10424 = vpow2.f32 %v4477_v17  ;;  %v4401_v35 = vsub.f32 %v14432_v39, %v4346_v3  ;;  %v14579_v16 = vpop.eup %10412 }
 0xb18   : > { %4503 = vadd.xlane.f32.xlu1 %v14575_v46  ;;  %v4479_v33 = vmul.f32 1.442695, %v4420_v40  ;;  %v14581_v9 = vpop.eup %10414  ;;  %10426 = vpow2.f32 %v4447_v7 }
 0xb19   : > { %v4348_v44 = vpop.xlane.xlu1 %4347  ;;  %v4441_v45 = vmul.f32 1.442695, %v4401_v35  ;;  %4497 = vadd.xlane.f32.xlu0 %v14579_v16 }
 0xb1a   : > { %v4402_v36 = vsub.f32 %v14477_v37, %v4348_v44  ;;  %v4378_v31 = vpop.xlane.xlu0 %4377  ;;  %v4588_v37 = vpack.c.bf16 %v14575_v46, %v14563_v28 }
 0xb1b   : > { %v14585_v38 = vpop.eup %10416  ;;  %10428 = vpow2.f32 %v4441_v45  ;;  %v4417_v39 = vsub.f32 %v14452_v13, %v4378_v31 }
 0xb1c   : > { %v4443_v50 = vmul.f32 1.442695, %v4402_v36  ;;  %4535 = vadd.xlane.f32.xlu1 %v14581_v9  ;;  %v4587_v22 = vpack.c.bf16 %v14585_v38, %v14579_v16  ;;  %v14591_v8 = vpop.eup %10418  ;;  %10430 = vpow2.f32 %v4479_v33 }
 0xb1d   : > { %v4380_v48 = vpop.xlane.xlu1 %4379  ;;  %v4473_v51 = vmul.f32 1.442695, %v4417_v39  ;;  %4529 = vadd.xlane.f32.xlu0 %v14591_v8 }
 0xb1e   : > { %10432 = vpow2.f32 %v4443_v50  ;;  %v4418_v53 = vsub.f32 %v14491_v49, %v4380_v48  ;;  %9604 = vmatprep.mubr.bf16.mxu1 %v4587_v22  ;;  %v4358_v1 = vpop.xlane.xlu0 %4357  ;;  %v4596_v49 = vpack.c.bf16 %v14581_v9, %v14571_v6 }
 0xb1f   : > { %v14597_v13 = vpop.eup %10420  ;;  %9605 = vmatmul.mubr.bf16.gmra.mxu1 %v4588_v37  ;;  %10434 = vpow2.f32 %v4473_v51  ;;  %v4407_v58 = vsub.f32 %v14486_v52, %v4358_v1 }
 0xb20   : > { %v4475_v23 = vmul.f32 1.442695, %v4418_v53  ;;  %4499 = vadd.xlane.f32.xlu1 %v14585_v38  ;;  %v4595_v63 = vpack.c.bf16 %v14597_v13, %v14591_v8  ;;  %v14603_v7 = vpop.eup %10422 }
 0xb21   : > { %v4360_v17 = vpop.xlane.xlu1 %4359  ;;  %v4453_v40 = vmul.f32 1.442695, %v4407_v58  ;;  %4509 = vadd.xlane.f32.xlu0 %v14603_v7 }
 0xb22   : > { %10436 = vpow2.f32 %v4475_v23  ;;  %v4408_v3 = vsub.f32 %v14500_v43, %v4360_v17  ;;  %9636 = vmatprep.mubr.bf16.mxu0 %v4595_v63  ;;  %v4354_v52 = vpop.xlane.xlu0 %4353 }
 0xb23   : > { %9637 = vmatmul.mubr.bf16.gmra.mxu0 %v4596_v49  ;;  %10438 = vpow2.f32 %v4453_v40  ;;  %v4405_v35 = vsub.f32 %v14494_v5, %v4354_v52 }
 0xb24   : > { %4531 = vadd.xlane.f32.xlu1 %v14597_v13  ;;  %v14611_v33 = vpop.eup %10424  ;;  %v4455_v44 = vmul.f32 1.442695, %v4408_v3 }
 0xb25   : > { %18109 = vst [vmem:[#allocation133_spill] sm:$0xff] %v14611_v33  ;;  %v4356_v45 = vpop.xlane.xlu1 %4355  ;;  %v4449_v36 = vmul.f32 1.442695, %v4405_v35  ;;  %4541 = vadd.xlane.f32.xlu0 %v14611_v33  ;;  %v14615_v43 = vpop.eup %10426 }
 0xb26   : > { %v4406_v31 = vsub.f32 %v14506_v12, %v4356_v45  ;;  %v4386_v50 = vpop.xlane.xlu0 %4385 }
 0xb27   : > { %10440 = vpow2.f32 %v4449_v36  ;;  %v4421_v22 = vsub.f32 %v14502_v11, %v4386_v50 }
 0xb28   : > { %v4451_v39 = vmul.f32 1.442695, %v4406_v31  ;;  %4511 = vadd.xlane.f32.xlu1 %v14615_v43  ;;  %v14619_v5 = vpop.eup %10428  ;;  %10442 = vpow2.f32 %v4455_v44 }
 0xb29   : > { %v4388_v48 = vpop.xlane.xlu1 %4387  ;;  %v14621_v37 = vpop.eup %10430  ;;  %v4481_v51 = vmul.f32 1.442695, %v4421_v22  ;;  %4505 = vadd.xlane.f32.xlu0 %v14619_v5 }
 0xb2a   : > { %18110 = vst [vmem:[#allocation77_spill] sm:$0xff] %v14621_v37  ;;  %10444 = vpow2.f32 %v4451_v39  ;;  %v4422_v12 = vsub.f32 %v14512_v59, %v4388_v48  ;;  %v4390_v1 = vpop.xlane.xlu0 %4389  ;;  %v4590_v59 = vpack.c.bf16 %v14615_v43, %v14603_v7  ;;  %v4598_v44 = vpack.c.bf16 %v14621_v37, %v14611_v33 }
 0xb2b   : > { %v14625_v53 = vpop.eup %10432  ;;  %10446 = vpow2.f32 %v4481_v51  ;;  %v4423_v11 = vsub.f32 %v14496_v24, %v4390_v1 }
 0xb2c   : > { %v4483_v23 = vmul.f32 1.442695, %v4422_v12  ;;  %4543 = vadd.xlane.f32.xlu1 %v14621_v37  ;;  %v4589_v58 = vpack.c.bf16 %v14625_v53, %v14619_v5  ;;  %v14631_v63 = vpop.eup %10434 }
 0xb2d   : > { %18111 = vst [vmem:[#allocation80_spill] sm:$0xff] %v14631_v63  ;;  %v4392_v17 = vpop.xlane.xlu1 %4391  ;;  %v4485_v49 = vmul.f32 1.442695, %v4423_v11  ;;  %4537 = vadd.xlane.f32.xlu0 %v14631_v63 }
 0xb2e   : > { %10448 = vpow2.f32 %v4483_v23  ;;  %v4424_v40 = vsub.f32 %v14508_v20, %v4392_v17  ;;  %9608 = vmatprep.mubr.bf16.mxu1 %v4589_v58 }
 0xb2f   : > { %v14637_v3 = vpop.eup %10436  ;;  %9609 = vmatmul.mubr.bf16.gmra.mxu1 %v4590_v59  ;;  %10450 = vpow2.f32 %v4485_v49 }
 0xb30   : > { %18112 = vst [vmem:[#allocation125_spill] sm:$0xff] %v14637_v3  ;;  %v4487_v24 = vmul.f32 1.442695, %v4424_v40  ;;  %4507 = vadd.xlane.f32.xlu1 %v14625_v53  ;;  %v4597_v52 = vpack.c.bf16 %v14637_v3, %v14631_v63  ;;  %v14642_v35 = vpop.eup %10438 }
 0xb31   : > { %4517 = vadd.xlane.f32.xlu0 %v14642_v35 }
 0xb32   : > { %10452 = vpow2.f32 %v4487_v24  ;;  %9640 = vmatprep.mubr.bf16.mxu0 %v4597_v52 }
 0xb33   : > { %9641 = vmatmul.mubr.bf16.gmra.mxu0 %v4598_v44 }
 0xb34   : > { %4539 = vadd.xlane.f32.xlu1 %v14637_v3  ;;  %v14648_v20 = vpop.eup %10440 }
 0xb35   : > { %v14650_v45 = vpop.eup %10442  ;;  %4513 = vadd.xlane.f32.xlu0 %v14648_v20 }
 0xb36   : > { %v4592_v39 = vpack.c.bf16 %v14650_v45, %v14642_v35 }
 0xb37   : > { %v14653_v36 = vpop.eup %10444 }
 0xb38   : > { %4519 = vadd.xlane.f32.xlu1 %v14650_v45  ;;  %v4591_v31 = vpack.c.bf16 %v14653_v36, %v14648_v20  ;;  %v14658_v50 = vpop.eup %10446 }
 0xb39   : > { %18113 = vst [vmem:[#allocation128_spill] sm:$0xff] %v14658_v50  ;;  %4545 = vadd.xlane.f32.xlu0 %v14658_v50 }
 0xb3a   : > { %9612 = vmatprep.mubr.bf16.mxu1 %v4591_v31 }
 0xb3b   : > { %v14663_v22 = vpop.eup %10448  ;;  %9613 = vmatmul.mubr.bf16.gmra.mxu1 %v4592_v39 }
 0xb3c   : > { %18114 = vst [vmem:[#allocation71_spill] sm:$0xff] %v14663_v22  ;;  %4515 = vadd.xlane.f32.xlu1 %v14653_v36  ;;  %v4599_v48 = vpack.c.bf16 %v14663_v22, %v14658_v50  ;;  %v14668_v51 = vpop.eup %10450 }
 0xb3d   : > { %18115 = vst [vmem:[#allocation75_spill] sm:$0xff] %v14668_v51  ;;  %4549 = vadd.xlane.f32.xlu0 %v14668_v51 }
 0xb3e   : > { %9644 = vmatprep.mubr.bf16.mxu0 %v4599_v48 }
 0xb3f   : > { %v14671_v12 = vpop.eup %10452 }
 0xb40   : > { %18116 = vst [vmem:[#allocation119_spill] sm:$0xff] %v14671_v12  ;;  %4547 = vadd.xlane.f32.xlu1 %v14663_v22  ;;  %v4600_v1 = vpack.c.bf16 %v14671_v12, %v14668_v51 }
 0xb42   : > { %9645 = vmatmul.mubr.bf16.gmra.mxu0 %v4600_v1 }
 0xb44   : > { %4551 = vadd.xlane.f32.xlu1 %v14671_v12 }
 0xb89   : > { %v4494_v23 = vpop.xlane.xlu0 %4493 }
 0xb8a   : > { %10454 = vrcp.f32 %v4494_v23 }
 0xb8d   : > { %v4526_v58 = vpop.xlane.xlu0 %4525 }
 0xb8e   : > { %10456 = vrcp.f32 %v4526_v58 }
 0xb91   : > { %v4496_v11 = vpop.xlane.xlu1 %4495 }
 0xb92   : > { %v4490_v59 = vpop.xlane.xlu0 %4489  ;;  %10458 = vrcp.f32 %v4496_v11 }
 0xb93   : > { %10460 = vrcp.f32 %v4490_v59 }
 0xb95   : > { %v4528_v17 = vpop.xlane.xlu1 %4527 }
 0xb96   : > { %v4522_v40 = vpop.xlane.xlu0 %4521  ;;  %10462 = vrcp.f32 %v4528_v17 }
 0xb97   : > { %v14679_v0 = vpop.eup %10454 }
 0xb99   : > { %v4492_v49 = vpop.xlane.xlu1 %4491 }
 0xb9a   : > { %v4502_v52 = vpop.xlane.xlu0 %4501  ;;  %10464 = vrcp.f32 %v4492_v49 }
 0xb9b   : > { %10466 = vrcp.f32 %v4522_v40  ;;  %v14683_v2 = vpop.eup %10456 }
 0xb9d   : > { %v4524_v24 = vpop.xlane.xlu1 %4523 }
 0xb9e   : > { %v4534_v31 = vpop.xlane.xlu0 %4533  ;;  %10468 = vrcp.f32 %v4524_v24 }
 0xb9f   : > { %10470 = vrcp.f32 %v4502_v52  ;;  %v14685_v11 = vpop.eup %10458 }
 0xba0   : > { %10472 = vrcp.f32 %v4534_v31  ;;  %v14687_v17 = vpop.eup %10460 }
 0xba1   : > { %v4504_v44 = vpop.xlane.xlu1 %4503 }
 0xba2   : > { %v4498_v48 = vpop.xlane.xlu0 %4497  ;;  %10474 = vrcp.f32 %v4504_v44 }
 0xba3   : > { %v14689_v40 = vpop.eup %10462  ;;  %10476 = vrcp.f32 %v4498_v48 }
 0xba5   : > { %v4536_v39 = vpop.xlane.xlu1 %4535 }
 0xba6   : > { %v4530_v42 = vpop.xlane.xlu0 %4529 }
 0xba7   : > { %v14697_v52 = vpop.eup %10464 }
 0xba8   : > { %v14702_v56 = vpop.eup %10466 }
 0xba9   : > { %v4500_v15 = vpop.xlane.xlu1 %4499 }
 0xbaa   : > { %v4510_v62 = vpop.xlane.xlu0 %4509  ;;  %10478 = vrcp.f32 %v4500_v15 }
 0xbab   : > { %v14715_v15 = vpop.eup %10468  ;;  %10480 = vrcp.f32 %v4536_v39 }
 0xbac   : > { %10482 = vrcp.f32 %v4530_v42 }
 0xbad   : > { %v4532_v1 = vpop.xlane.xlu1 %4531 }
 0xbae   : > { %v14677_v30 = vpop.xlane.xlu0 %4541  ;;  %10484 = vrcp.f32 %v4532_v1 }
 0xbaf   : > { %10486 = vrcp.f32 %v4510_v62 }
 0xbb1   : > { %v4512_v18 = vpop.xlane.xlu1 %4511 }
 0xbb2   : > { %v4506_v24 = vpop.xlane.xlu0 %4505  ;;  %10488 = vrcp.f32 %v4512_v18 }
 0xbb3   : > { %10490 = vrcp.f32 %v4506_v24 }
 0xbb5   : > { %v14681_v25 = vpop.xlane.xlu1 %4543 }
 0xbb9   : > { %v4508_v34 = vpop.xlane.xlu1 %4507 }
 0xbba   : > { %10492 = vrcp.f32 %v4508_v34 }
 0xbbb   : > { %10494 = vrcp.f32 %v14677_v30 }
 0xbbc   : > { %10496 = vrcp.f32 %v14681_v25 }
 0xbbd   : > { %v4540_v39 = vpop.xlane.xlu1 %4539 }
 0xbc1   : > { %v4520_v1 = vpop.xlane.xlu1 %4519 }
 0xbc5   : > { %v4516_v24 = vpop.xlane.xlu1 %4515 }
 0xbd1   : > { %v9602_v47 = vpop.f32.mrf.mxu1 }
 0xbd2   : > { %v14692_v55 = vmul.f32 %v14679_v0, %v9602_v47 }
 0xbd3   : > { %v4651_v23 = vpop.f32.mrf.mxu1  ;;  %v9634_v58 = vpop.f32.mrf.mxu0 }
 0xbd4   : > { %18117 = vst [vmem:[#allocation123_spill] sm:$0xff] %v14692_v55  ;;  %v14700_v31 = vmul.f32 %v14687_v17, %v4651_v23  ;;  %v14705_v48 = vmul.f32 %v14683_v2, %v9634_v58 }
 0xbd5   : > { %v9603_v59 = vpop.f32.mrf.mxu1  ;;  %v4748_v49 = vpop.f32.mrf.mxu0 }
 0xbd6   : > { %v14695_v29 = vmul.f32 %v14685_v11, %v9603_v59  ;;  %18119 = vst [vmem:[#allocation69_spill] sm:$0xff] %v14700_v31  ;;  %18120 = vst [vmem:[#allocation111_spill] sm:$0xff] %v14705_v48  ;;  %v14718_v4 = vmul.f32 %v14702_v56, %v4748_v49 }
 0xbd7   : > { %v4654_v21 = vpop.f32.mrf.mxu1  ;;  %v9635_v44 = vpop.f32.mrf.mxu0 }
 0xbd8   : > { %18118 = vst [vmem:[#allocation65_spill] sm:$0xff] %v14695_v29  ;;  %v14710_v59 = vmul.f32 %v14697_v52, %v4654_v21  ;;  %v14713_v57 = vmul.f32 %v14689_v40, %v9635_v44  ;;  %18123 = vst [vmem:[#allocation63_spill] sm:$0xff] %v14718_v4  ;;  %v4538_v21 = vpop.xlane.xlu0 %4537  ;;  %v14729_v29 = vpop.eup %10470 }
 0xbd9   : > { %v4751_v23 = vpop.f32.mrf.mxu0  ;;  %v14731_v49 = vpop.eup %10472  ;;  %10498 = vrcp.f32 %v4538_v21 }
 0xbda   : > { %18121 = vst [vmem:[#allocation115_spill] sm:$0xff] %v14710_v59  ;;  %18122 = vst [vmem:[#allocation59_spill] sm:$0xff] %v14713_v57  ;;  %v14725_v47 = vmul.f32 %v14715_v15, %v4751_v23  ;;  %v14733_v58 = vpop.eup %10474  ;;  %10500 = vrcp.f32 %v4540_v39 }
 0xbdb   : > { %v14735_v19 = vpop.eup %10476 }
 0xbdc   : > { %18124 = vst [vmem:[#allocation104_spill] sm:$0xff] %v14725_v47  ;;  %v4518_v31 = vpop.xlane.xlu0 %4517  ;;  %v14737_v42 = vpop.eup %10478 }
 0xbdd   : > { %v14745_v59 = vpop.eup %10480  ;;  %10502 = vrcp.f32 %v4518_v31 }
 0xbde   : > { %v14755_v50 = vpop.eup %10482  ;;  %10504 = vrcp.f32 %v4520_v1 }
 0xbdf   : > { %v9606_v55 = vpop.f32.mrf.mxu1  ;;  %v14765_v37 = vpop.eup %10484 }
 0xbe0   : > { %v14740_v57 = vmul.f32 %v14729_v29, %v9606_v55  ;;  %v4514_v62 = vpop.xlane.xlu0 %4513 }
 0xbe1   : > { %v4667_v10 = vpop.f32.mrf.mxu1  ;;  %10506 = vrcp.f32 %v4514_v62 }
 0xbe2   : > { %18125 = vst [vmem:[#allocation108_spill] sm:$0xff] %v14740_v57  ;;  %v14748_v12 = vmul.f32 %v14735_v19, %v4667_v10  ;;  %v4548_v57 = vpop.xlane.xlu1 %4547  ;;  %10508 = vrcp.f32 %v4516_v24 }
 0xbe3   : > { %v9607_v23 = vpop.f32.mrf.mxu1  ;;  %v9638_v48 = vpop.f32.mrf.mxu0 }
 0xbe4   : > { %v14743_v44 = vmul.f32 %v14733_v58, %v9607_v23  ;;  %18127 = vst [vmem:[#allocation68_spill] sm:$0xff] %v14748_v12  ;;  %v14758_v23 = vmul.f32 %v14731_v49, %v9638_v48  ;;  %v4546_v18 = vpop.xlane.xlu0 %4545 }
 0xbe5   : > { %v4670_v4 = vpop.f32.mrf.mxu1  ;;  %v4764_v47 = vpop.f32.mrf.mxu0 }
 0xbe6   : > { %18126 = vst [vmem:[#allocation64_spill] sm:$0xff] %v14743_v44  ;;  %v14753_v22 = vmul.f32 %v14737_v42, %v4670_v4  ;;  %18129 = vst [vmem:[#allocation114_spill] sm:$0xff] %v14758_v23  ;;  %v14770_v34 = vmul.f32 %v14755_v50, %v4764_v47  ;;  %v14779_v44 = vpop.eup %10486 }
 0xbe7   : > { %v9639_v55 = vpop.f32.mrf.mxu0  ;;  %v14781_v47 = vpop.eup %10488 }
 0xbe8   : > { %18128 = vst [vmem:[#allocation110_spill] sm:$0xff] %v14753_v22  ;;  %v14763_v10 = vmul.f32 %v14745_v59, %v9639_v55  ;;  %18131 = vst [vmem:[#allocation74_spill] sm:$0xff] %v14770_v34  ;;  %v4550_v21 = vpop.xlane.xlu0 %4549 }
 0xbe9   : > { %v4767_v4 = vpop.f32.mrf.mxu0  ;;  %10510 = vrcp.f32 %v4550_v21 }
 0xbea   : > { %18130 = vst [vmem:[#allocation70_spill] sm:$0xff] %v14763_v10  ;;  %v14775_v51 = vmul.f32 %v14765_v37, %v4767_v4  ;;  %v14783_v4 = vpop.eup %10490 }
 0xbeb   : > { %v14791_v31 = vpop.eup %10492 }
 0xbec   : > { %18132 = vst [vmem:[#allocation118_spill] sm:$0xff] %v14775_v51  ;;  %v14793_v1 = vpop.eup %10494  ;;  %v4552_v51 = vpop.xlane.xlu1 %4551 }
 0xbed   : > { %18135 = vst [vmem:[#allocation79_spill] sm:$0xff] %v14793_v1  ;;  %10512 = vrcp.f32 %v4552_v51 }
 0xbee   : > { %10514 = vrcp.f32 %v4546_v18 }
 0xbef   : > { %v9610_v30 = vpop.f32.mrf.mxu1  ;;  %10516 = vrcp.f32 %v4548_v57 }
 0xbf0   : > { %v14786_v39 = vmul.f32 %v14779_v44, %v9610_v30  ;;  %v14803_v30 = vpop.eup %10496 }
 0xbf1   : > { %v4683_v25 = vpop.f32.mrf.mxu1  ;;  %18138 = vst [vmem:[#allocation81_spill] sm:$0xff] %v14803_v30  ;;  %v14805_v22 = vpop.eup %10498 }
 0xbf2   : > { %18133 = vst [vmem:[#allocation122_spill] sm:$0xff] %v14786_v39  ;;  %v14796_v62 = vmul.f32 %v14783_v4, %v4683_v25  ;;  %v14815_v63 = vpop.eup %10500 }
 0xbf3   : > { %v9611_v48 = vpop.f32.mrf.mxu1  ;;  %v9642_v23 = vpop.f32.mrf.mxu0  ;;  %18141 = vst [vmem:[#allocation132_spill] sm:$0xff] %v14815_v63 }
 0xbf4   : > { %v14789_v55 = vmul.f32 %v14781_v47, %v9611_v48  ;;  %18136 = vst [vmem:[#allocation124_spill] sm:$0xff] %v14796_v62  ;;  %v14808_v33 = vmul.f32 %v14793_v1, %v9642_v23 }
 0xbf5   : > { %v4686_v10 = vpop.f32.mrf.mxu1  ;;  %v4780_v34 = vpop.f32.mrf.mxu0 }
 0xbf6   : > { %18134 = vst [vmem:[#allocation76_spill] sm:$0xff] %v14789_v55  ;;  %v14801_v12 = vmul.f32 %v14791_v31, %v4686_v10  ;;  %18139 = vst [vmem:[#allocation84_spill] sm:$0xff] %v14808_v33  ;;  %v14818_v24 = vmul.f32 %v14805_v22, %v4780_v34  ;;  %v10503_v55 = vpop.eup %10502 }
 0xbf7   : > { %v9643_v48 = vpop.f32.mrf.mxu0  ;;  %v10505_v62 = vpop.eup %10504 }
 0xbf8   : > { %18137 = vst [vmem:[#allocation127_spill] sm:$0xff] %v14801_v12  ;;  %v14813_v25 = vmul.f32 %v14803_v30, %v9643_v48  ;;  %18142 = vst [vmem:[#allocation86_spill] sm:$0xff] %v14818_v24  ;;  %v10507_v12 = vpop.eup %10506 }
 0xbf9   : > { %v4783_v10 = vpop.f32.mrf.mxu0  ;;  %v10509_v30 = vpop.eup %10508 }
 0xbfa   : > { %18140 = vst [vmem:[#allocation129_spill] sm:$0xff] %v14813_v25  ;;  %v14823_v23 = vmul.f32 %v14815_v63, %v4783_v10  ;;  %v14839_v24 = vpop.eup %10510 }
 0xbfb   : > { %v9614_v39 = vpop.f32.mrf.mxu1 }
 0xbfc   : > { %18143 = vst [vmem:[#allocation89_spill] sm:$0xff] %v14823_v23  ;;  %v14827_v18 = vmul.f32 %v10503_v55, %v9614_v39  ;;  %v14841_v39 = vpop.eup %10512 }
 0xbfd   : > { %v4699_v3 = vpop.f32.mrf.mxu1  ;;  %v10515_v23 = vpop.eup %10514 }
 0xbfe   : > { %18144 = vst [vmem:[#allocation134_spill] sm:$0xff] %v14827_v18  ;;  %v14831_v21 = vmul.f32 %v10507_v12, %v4699_v3  ;;  %v10517_v57 = vpop.eup %10516 }
 0xbff   : > { %v9615_v51 = vpop.f32.mrf.mxu1 }
 0xc00   : > { %v14829_v34 = vmul.f32 %v10505_v62, %v9615_v51  ;;  %18146 = vst [vmem:[#allocation91_spill] sm:$0xff] %v14831_v21 }
 0xc01   : > { %v4702_v1 = vpop.f32.mrf.mxu1 }
 0xc02   : > { %18145 = vst [vmem:[#allocation137_spill] sm:$0xff] %v14829_v34  ;;  %v14835_v10 = vmul.f32 %v10509_v30, %v4702_v1  ;;  %v9646_v33 = vpop.f32.mrf.mxu0 }
 0xc03   : > { %v14844_v63 = vmul.f32 %v14839_v24, %v9646_v33 }
 0xc04   : > { %18147 = vst [vmem:[#allocation94_spill] sm:$0xff] %v14835_v10  ;;  %v4796_v25 = vpop.f32.mrf.mxu0 }
 0xc05   : > { %18148 = vst [vmem:[#allocation139_spill] sm:$0xff] %v14844_v63  ;;  %v14849_v18 = vmul.f32 %v10515_v23, %v4796_v25 }
 0xc06   : > { %v9647_v51 = vpop.f32.mrf.mxu0 }
 0xc07   : > { %v14847_v3 = vmul.f32 %v14841_v39, %v9647_v51  ;;  %18150 = vst [vmem:[#allocation96_spill] sm:$0xff] %v14849_v18  ;;  %4861 = sbr.rel (%p8559_p1) target bundleno = 3102 (0xc1e), region = 116 }
 0xc08   : > { %v4799_v1 = vpop.f32.mrf.mxu0 }
 0xc09   : > { %18149 = vst [vmem:[#allocation142_spill] sm:$0xff] %v14847_v3  ;;  %v14853_v34 = vmul.f32 %v10517_v57, %v4799_v1 }
 0xc0b   : > { %18151 = vst [vmem:[#allocation100_spill] sm:$0xff] %v14853_v34 }
 0xc0c   : > { %v4862_v33 = vmul.f32 %v14687_v17, %v14539_v32  ;;  %v4863_v25 = vmul.f32 %v14697_v52, %v14549_v27  ;;  %v4864_v51 = vmul.f32 %v14679_v0, %v14526_v54  ;;  %v4865_v1 = vmul.f32 %v14685_v11, %v14535_v61  ;;  %v18161_v11 = vld [vmem:[#allocation75_spill] sm:$0xff] }
 0xc0d   : > { %v4866_v48 = vmul.f32 %v14735_v19, %v14579_v16  ;;  %v4867_v21 = vmul.f32 %v14737_v42, %v14585_v38  ;;  %v4868_v32 = vmul.f32 %v14729_v29, %v14563_v28  ;;  %v4869_v27 = vmul.f32 %v14733_v58, %v14575_v46 }
 0xc0e   : > { %8626 = vst [vmem:[%s11514_s23 + $0x100] sm:$0xff] %v4862_v33  ;;  %8627 = vst [vmem:[%s11514_s23 + $0x108] sm:$0xff] %v4863_v25  ;;  %v4870_v19 = vmul.f32 %v14783_v4, %v14619_v5  ;;  %v4871_v0 = vmul.f32 %v14791_v31, %v14625_v53  ;;  %v4872_v29 = vmul.f32 %v14779_v44, %v14603_v7  ;;  %v18154_v53 = vld [vmem:[#allocation132_spill] sm:$0xff] }
 0xc0f   : > { %8628 = vst [vmem:[%s11514_s23 + $0x110] sm:$0xff] %v4864_v51  ;;  %8629 = vst [vmem:[%s11514_s23 + $0x118] sm:$0xff] %v4865_v1  ;;  %v4873_v54 = vmul.f32 %v14781_v47, %v14615_v43  ;;  %v4874_v61 = vmul.f32 %v10507_v12, %v14648_v20  ;;  %v4875_v28 = vmul.f32 %v10509_v30, %v14653_v36  ;;  %v18158_v20 = vld [vmem:[#allocation81_spill] sm:$0xff]  ;;  %v18159_v36 = vld [vmem:[#allocation128_spill] sm:$0xff] }
 0xc10   : > { %8630 = vst [vmem:[%s11514_s23 + $0x120] sm:$0xff] %v4866_v48  ;;  %8631 = vst [vmem:[%s11514_s23 + $0x128] sm:$0xff] %v4867_v21  ;;  %v4876_v46 = vmul.f32 %v10503_v55, %v14642_v35  ;;  %v4877_v16 = vmul.f32 %v10505_v62, %v14650_v45  ;;  %v4878_v38 = vmul.f32 %v14702_v56, %v14545_v60 }
 0xc11   : > { %8632 = vst [vmem:[%s11514_s23 + $0x130] sm:$0xff] %v4868_v32  ;;  %8633 = vst [vmem:[%s11514_s23 + $0x138] sm:$0xff] %v4869_v27  ;;  %v4879_v7 = vmul.f32 %v14715_v15, %v14555_v14  ;;  %v4880_v43 = vmul.f32 %v14683_v2, %v14531_v41  ;;  %v4881_v5 = vmul.f32 %v14689_v40, %v14543_v26  ;;  %v18152_v26 = vld [vmem:[#allocation80_spill] sm:$0xff]  ;;  %v18162_v40 = vld [vmem:[#allocation119_spill] sm:$0xff] }
 0xc12   : > { %8634 = vst [vmem:[%s11514_s23 + $0x140] sm:$0xff] %v4870_v19  ;;  %8635 = vst [vmem:[%s11514_s23 + $0x148] sm:$0xff] %v4871_v0  ;;  %v4882_v56 = vmul.f32 %v14755_v50, %v14591_v8  ;;  %v4883_v60 = vmul.f32 %v14765_v37, %v14597_v13  ;;  %v4884_v2 = vmul.f32 %v14731_v49, %v14571_v6  ;;  %v18153_v8 = vld [vmem:[#allocation125_spill] sm:$0xff]  ;;  %v18156_v6 = vld [vmem:[#allocation79_spill] sm:$0xff] }
 0xc13   : > { %8636 = vst [vmem:[%s11514_s23 + $0x150] sm:$0xff] %v4872_v29  ;;  %8637 = vst [vmem:[%s11514_s23 + $0x158] sm:$0xff] %v4873_v54  ;;  %v4885_v41 = vmul.f32 %v14745_v59, %v14581_v9  ;;  %v4886_v14 = vmul.f32 %v14805_v22, %v18152_v26  ;;  %v4887_v13 = vmul.f32 %v18154_v53, %v18153_v8  ;;  %v18155_v37 = vld [vmem:[#allocation133_spill] sm:$0xff]  ;;  %v18160_v22 = vld [vmem:[#allocation71_spill] sm:$0xff] }
 0xc14   : > { %8638 = vst [vmem:[%s11514_s23 + $0x160] sm:$0xff] %v4874_v61  ;;  %8639 = vst [vmem:[%s11514_s23 + $0x168] sm:$0xff] %v4875_v28  ;;  %v4888_v35 = vmul.f32 %v18156_v6, %v18155_v37  ;;  %v18157_v9 = vld [vmem:[#allocation77_spill] sm:$0xff]  ;;  %v4890_v50 = vmul.f32 %v10515_v23, %v18159_v36  ;;  %v4891_v12 = vmul.f32 %v10517_v57, %v18160_v22 }
 0xc15   : > { %8640 = vst [vmem:[%s11514_s23 + $0x170] sm:$0xff] %v4876_v46  ;;  %8641 = vst [vmem:[%s11514_s23 + $0x178] sm:$0xff] %v4877_v16  ;;  %v4889_v45 = vmul.f32 %v18158_v20, %v18157_v9  ;;  %v4892_v17 = vmul.f32 %v14839_v24, %v18161_v11  ;;  %v4893_v52 = vmul.f32 %v14841_v39, %v18162_v40 }
 0xc16   : > { %8642 = vst [vmem:[%s11514_s23 + $0x300] sm:$0xff] %v4878_v38  ;;  %8643 = vst [vmem:[%s11514_s23 + $0x308] sm:$0xff] %v4879_v7 }
 0xc17   : > { %8644 = vst [vmem:[%s11514_s23 + $0x310] sm:$0xff] %v4880_v43  ;;  %8645 = vst [vmem:[%s11514_s23 + $0x318] sm:$0xff] %v4881_v5 }
 0xc18   : > { %8646 = vst [vmem:[%s11514_s23 + $0x320] sm:$0xff] %v4882_v56  ;;  %8647 = vst [vmem:[%s11514_s23 + $0x328] sm:$0xff] %v4883_v60 }
 0xc19   : > { %8648 = vst [vmem:[%s11514_s23 + $0x330] sm:$0xff] %v4884_v2  ;;  %8649 = vst [vmem:[%s11514_s23 + $0x338] sm:$0xff] %v4885_v41 }
 0xc1a   : > { %8650 = vst [vmem:[%s11514_s23 + $0x340] sm:$0xff] %v4886_v14  ;;  %8651 = vst [vmem:[%s11514_s23 + $0x348] sm:$0xff] %v4887_v13 }
 0xc1b   : > { %8652 = vst [vmem:[%s11514_s23 + $0x350] sm:$0xff] %v4888_v35  ;;  %8653 = vst [vmem:[%s11514_s23 + $0x358] sm:$0xff] %v4889_v45 }
 0xc1c   : > { %8654 = vst [vmem:[%s11514_s23 + $0x360] sm:$0xff] %v4890_v50  ;;  %8655 = vst [vmem:[%s11514_s23 + $0x368] sm:$0xff] %v4891_v12 }
 0xc1d   : > { %8656 = vst [vmem:[%s11514_s23 + $0x370] sm:$0xff] %v4892_v17  ;;  %8657 = vst [vmem:[%s11514_s23 + $0x378] sm:$0xff] %v4893_v52 }
 0xc1e PF: > { %v18163_v59 = vld [vmem:[#allocation98_spill] sm:$0xff]  ;;  %v18164_v15 = vld [vmem:[#allocation171_spill] sm:$0xff]  ;;  %v18167_v49 = vld [vmem:[#allocation173_spill] sm:$0xff] }
 0xc1f   : > { %4973 = vrot.lane.b32.xlu0 %v18163_v59, %s11236_s3  ;;  %4971 = vrot.lane.b32.xlu1 %v18164_v15, %s11236_s3  ;;  %v18165_v58 = vld [vmem:[#allocation146_spill] sm:$0xff]  ;;  %v18166_v44 = vld [vmem:[#allocation195_spill] sm:$0xff]  ;;  %v18172_v31 = vld [vmem:[#allocation180_spill] sm:$0xff] }
 0xc20   : > { %v18168_v42 = vld [vmem:[#allocation198_spill] sm:$0xff]  ;;  %v18169_v55 = vld [vmem:[#allocation175_spill] sm:$0xff]  ;;  %v18174_v24 = vld [vmem:[#allocation201_spill] sm:$0xff] }
 0xc21   : > { %v18170_v47 = vld [vmem:[#allocation178_spill] sm:$0xff]  ;;  %v18171_v4 = vld [vmem:[#allocation199_spill] sm:$0xff]  ;;  %v18175_v30 = vld [vmem:[#allocation156_spill] sm:$0xff] }
 0xc22   : > { %v18173_v62 = vld [vmem:[#allocation183_spill] sm:$0xff]  ;;  %v18176_v21 = vld [vmem:[#allocation152_spill] sm:$0xff]  ;;  %v18178_v48 = vld [vmem:[#allocation181_spill] sm:$0xff] }
 0xc23   : > { %5166 = vrot.lane.b32.xlu0 %v18165_v58, %s11236_s3  ;;  %5164 = vrot.lane.b32.xlu1 %v18166_v44, %s11236_s3  ;;  %v18177_v23 = vld [vmem:[#allocation176_spill] sm:$0xff]  ;;  %v18179_v57 = vld [vmem:[#allocation197_spill] sm:$0xff]  ;;  %v18181_v33 = vld [vmem:[#allocation202_spill] sm:$0xff] }
 0xc24   : > { %v18180_v39 = vld [vmem:[#allocation200_spill] sm:$0xff]  ;;  %v18184_v1 = vld [vmem:[#allocation226_spill] sm:$0xff]  ;;  %v18186_v27 = vld [vmem:[#allocation233_spill] sm:$0xff] }
 0xc25   : > { %v18182_v25 = vld [vmem:[#allocation120_spill] sm:$0xff]  ;;  %v18189_v29 = vld [vmem:[#allocation231_spill] sm:$0xff]  ;;  %v18190_v54 = vld [vmem:[#allocation205_spill] sm:$0xff] }
 0xc26   : > { %v18183_v51 = vld [vmem:[#allocation204_spill] sm:$0xff]  ;;  %v18191_v61 = vld [vmem:[#allocation203_spill] sm:$0xff]  ;;  %v18192_v28 = vld [vmem:[#allocation97_spill] sm:$0xff] }
 0xc27   : > { %4969 = vrot.lane.b32.xlu0 %v18167_v49, %s11236_s3  ;;  %5162 = vrot.lane.b32.xlu1 %v18168_v42, %s11236_s3  ;;  %v18185_v32 = vld [vmem:[#allocation112_spill] sm:$0xff]  ;;  %v18193_v46 = vld [vmem:[#allocation101_spill] sm:$0xff]  ;;  %v18197_v43 = vld [vmem:[#allocation95_spill] sm:$0xff] }
 0xc28   : > { %v18187_v19 = vld [vmem:[#allocation72_spill] sm:$0xff]  ;;  %v18194_v16 = vld [vmem:[#allocation145_spill] sm:$0xff]  ;;  %v18198_v5 = vld [vmem:[#allocation87_spill] sm:$0xff] }
 0xc29   : > { %v18188_v0 = vld [vmem:[#allocation236_spill] sm:$0xff]  ;;  %v18195_v38 = vld [vmem:[#allocation149_spill] sm:$0xff]  ;;  %v18200_v60 = vld [vmem:[#allocation58_spill] sm:$0xff] }
 0xc2a   : > { %v18196_v7 = vld [vmem:[#allocation92_spill] sm:$0xff]  ;;  %v18201_v2 = vld [vmem:[#allocation143_spill] sm:$0xff]  ;;  %v18202_v41 = vld [vmem:[#allocation90_spill] sm:$0xff] }
 0xc2b   : > { %4967 = vrot.lane.b32.xlu0 %v18169_v55, %s11236_s3  ;;  %5160 = vrot.lane.b32.xlu1 %v18170_v47, %s11236_s3  ;;  %v18199_v56 = vld [vmem:[#allocation140_spill] sm:$0xff]  ;;  %v18203_v26 = vld [vmem:[#allocation135_spill] sm:$0xff]  ;;  %v18204_v14 = vld [vmem:[#allocation138_spill] sm:$0xff] }
 0xc2c   : > { %v18205_v8 = vld [vmem:[#allocation62_spill] sm:$0xff]  ;;  %v18206_v53 = vld [vmem:[#allocation103_spill] sm:$0xff] }
 0xc2d   : > { %v18207_v13 = vld [vmem:[#allocation107_spill] sm:$0xff] }
 0xc2f   : > { %4965 = vrot.lane.b32.xlu0 %v18171_v4, %s11236_s3  ;;  %5158 = vrot.lane.b32.xlu1 %v18172_v31, %s11236_s3 }
 0xc33   : > { %4963 = vrot.lane.b32.xlu0 %v18173_v62, %s11236_s3  ;;  %5156 = vrot.lane.b32.xlu1 %v18174_v24, %s11236_s3 }
 0xc37   : > { %4961 = vrot.lane.b32.xlu0 %v18175_v30, %s11236_s3  ;;  %5154 = vrot.lane.b32.xlu1 %v18176_v21, %s11236_s3 }
 0xc3b   : > { %4959 = vrot.lane.b32.xlu0 %v18177_v23, %s11236_s3  ;;  %5152 = vrot.lane.b32.xlu1 %v18178_v48, %s11236_s3 }
 0xc3f   : > { %4935 = vrot.lane.b32.xlu0 %v18179_v57, %s11236_s3  ;;  %5128 = vrot.lane.b32.xlu1 %v18180_v39, %s11236_s3 }
 0xc43   : > { %4937 = vrot.lane.b32.xlu0 %v18181_v33, %s11236_s3  ;;  %5130 = vrot.lane.b32.xlu1 %v18182_v25, %s11236_s3 }
 0xc47   : > { %4939 = vrot.lane.b32.xlu0 %v18183_v51, %s11236_s3  ;;  %5132 = vrot.lane.b32.xlu1 %v18184_v1, %s11236_s3 }
 0xc4b   : > { %4941 = vrot.lane.b32.xlu0 %v18185_v32, %s11236_s3  ;;  %5134 = vrot.lane.b32.xlu1 %v18186_v27, %s11236_s3 }
 0xc4f   : > { %4943 = vrot.lane.b32.xlu0 %v18187_v19, %s11236_s3  ;;  %5136 = vrot.lane.b32.xlu1 %v18188_v0, %s11236_s3 }
 0xc53   : > { %4945 = vrot.lane.b32.xlu0 %v18189_v29, %s11236_s3  ;;  %5138 = vrot.lane.b32.xlu1 %v18190_v54, %s11236_s3 }
 0xc57   : > { %4947 = vrot.lane.b32.xlu0 %v18191_v61, %s11236_s3  ;;  %5140 = vrot.lane.b32.xlu1 %v18192_v28, %s11236_s3 }
 0xc5b   : > { %4949 = vrot.lane.b32.xlu0 %v18193_v46, %s11236_s3  ;;  %5142 = vrot.lane.b32.xlu1 %v18194_v16, %s11236_s3 }
 0xc5f   : > { %5607 = vrot.lane.b32.xlu1 %v18195_v38, %s11236_s3  ;;  %5736 = vrot.lane.b32.xlu0 %v18196_v7, %s11236_s3 }
 0xc63   : > { %5605 = vrot.lane.b32.xlu1 %v18197_v43, %s11236_s3  ;;  %5732 = vrot.lane.b32.xlu0 %v18198_v5, %s11236_s3 }
 0xc67   : > { %5734 = vrot.lane.b32.xlu1 %v18199_v56, %s11236_s3  ;;  %5728 = vrot.lane.b32.xlu0 %v18200_v60, %s11236_s3 }
 0xc6b   : > { %5603 = vrot.lane.b32.xlu1 %v18201_v2, %s11236_s3 }
 0xc6f   : > { %5601 = vrot.lane.b32.xlu1 %v18202_v41, %s11236_s3 }
 0xc73   : > { %5730 = vrot.lane.b32.xlu1 %v18203_v26, %s11236_s3 }
 0xc77   : > { %5599 = vrot.lane.b32.xlu1 %v18204_v14, %s11236_s3 }
 0xc7b   : > { %5597 = vrot.lane.b32.xlu1 %v18205_v8, %s11236_s3 }
 0xc7f   : > { %5726 = vrot.lane.b32.xlu1 %v18206_v53, %s11236_s3 }
 0xc83   : > { %5595 = vrot.lane.b32.xlu1 %v18207_v13, %s11236_s3 }
 0xc91   : > { %v4974_v37 = vpop.permute.xlu0 %4973  ;;  %v4972_v6 = vpop.permute.xlu1 %4971 }
 0xc92   : > { %9824 = vmatprep.subr.msk.bf16.mxu1 %vm2087_vm0, %v4974_v37  ;;  %v5021_v35 = vsel %vm2087_vm0, %v4974_v37, 0  ;;  %v5018_v36 = vsel %vm2087_vm0, %v4972_v6, 0 }
 0xc93   : > { %9649 = vmatpush3.bf16.xpose.msra.mxu1 %v5021_v35 }
 0xc94   : > { %9825 = vmatprep.subr.msk.bf16.mxu1 %vm2087_vm0, %v4972_v6 }
 0xc95   : > { %v5167_v9 = vpop.permute.xlu0 %5166  ;;  %v5165_v20 = vpop.permute.xlu1 %5164 }
 0xc96   : > { %9832 = vmatprep.subr.msk.bf16.mxu0 %vm2087_vm0, %v5167_v9  ;;  %v5214_v45 = vsel %vm2087_vm0, %v5167_v9, 0  ;;  %v5211_v12 = vsel %vm2087_vm0, %v5165_v20, 0 }
 0xc97   : > { %9681 = vmatpush3.bf16.xpose.msra.mxu0 %v5214_v45 }
 0xc98   : > { %9833 = vmatprep.subr.msk.bf16.mxu0 %vm2087_vm0, %v5165_v20 }
 0xc99   : > { %v4970_v50 = vpop.permute.xlu0 %4969  ;;  %v5163_v22 = vpop.permute.xlu1 %5162 }
 0xc9a   : > { %v5015_v40 = vsel %vm2087_vm0, %v4970_v50, 0  ;;  %v5208_v15 = vsel %vm2087_vm0, %v5163_v22, 0 }
 0xc9b   : > { %9651 = vmatpush3.bf16.xpose.msra.mxu1 %v5018_v36 }
 0xc9c   : > { %9826 = vmatprep.subr.msk.bf16.mxu1 %vm2087_vm0, %v4970_v50 }
 0xc9d   : > { %v4968_v11 = vpop.permute.xlu0 %4967  ;;  %v5161_v17 = vpop.permute.xlu1 %5160 }
 0xc9e   : > { %v5012_v49 = vsel %vm2087_vm0, %v4968_v11, 0  ;;  %v5205_v47 = vsel %vm2087_vm0, %v5161_v17, 0 }
 0xc9f   : > { %9683 = vmatpush3.bf16.xpose.msra.mxu0 %v5211_v12 }
 0xca0   : > { %9834 = vmatprep.subr.msk.bf16.mxu0 %vm2087_vm0, %v5163_v22 }
 0xca1   : > { %v4966_v52 = vpop.permute.xlu0 %4965  ;;  %v5159_v59 = vpop.permute.xlu1 %5158 }
 0xca2   : > { %v5009_v62 = vsel %vm2087_vm0, %v4966_v52, 0  ;;  %v5202_v21 = vsel %vm2087_vm0, %v5159_v59, 0 }
 0xca3   : > { %9653 = vmatpush3.bf16.xpose.msra.mxu1 %v5015_v40 }
 0xca4   : > { %9827 = vmatprep.subr.msk.bf16.mxu1 %vm2087_vm0, %v4968_v11 }
 0xca5   : > { %v4964_v58 = vpop.permute.xlu0 %4963  ;;  %v5157_v44 = vpop.permute.xlu1 %5156 }
 0xca6   : > { %v5006_v23 = vsel %vm2087_vm0, %v4964_v58, 0  ;;  %v5199_v48 = vsel %vm2087_vm0, %v5157_v44, 0 }
 0xca7   : > { %9685 = vmatpush3.bf16.xpose.msra.mxu0 %v5208_v15 }
 0xca8   : > { %9835 = vmatprep.subr.msk.bf16.mxu0 %vm2087_vm0, %v5161_v17 }
 0xca9   : > { %v4962_v42 = vpop.permute.xlu0 %4961  ;;  %v5155_v55 = vpop.permute.xlu1 %5154 }
 0xcaa   : > { %v5003_v57 = vsel %vm2087_vm0, %v4962_v42, 0  ;;  %v5196_v39 = vsel %vm2087_vm0, %v5155_v55, 0 }
 0xcab   : > { %9655 = vmatpush3.bf16.xpose.msra.mxu1 %v5012_v49 }
 0xcac   : > { %9828 = vmatprep.subr.msk.bf16.mxu1 %vm2087_vm0, %v4966_v52 }
 0xcad   : > { %v4960_v4 = vpop.permute.xlu0 %4959  ;;  %v5153_v31 = vpop.permute.xlu1 %5152 }
 0xcae   : > { %v5000_v33 = vsel %vm2087_vm0, %v4960_v4, 0  ;;  %v5193_v51 = vsel %vm2087_vm0, %v5153_v31, 0 }
 0xcaf   : > { %9687 = vmatpush3.bf16.xpose.msra.mxu0 %v5205_v47 }
 0xcb0   : > { %9836 = vmatprep.subr.msk.bf16.mxu0 %vm2087_vm0, %v5159_v59 }
 0xcb1   : > { %v4936_v24 = vpop.permute.xlu0 %4935  ;;  %v5129_v30 = vpop.permute.xlu1 %5128 }
 0xcb2   : > { %9664 = vmatprep.mubr.msk.bf16.mxu1 %vm2087_vm0, %v4936_v24  ;;  %9696 = vmatprep.mubr.msk.bf16.mxu0 %vm2087_vm0, %v5129_v30 }
 0xcb3   : > { %9657 = vmatpush3.bf16.xpose.msra.mxu1 %v5009_v62 }
 0xcb4   : > { %9829 = vmatprep.subr.msk.bf16.mxu1 %vm2087_vm0, %v4964_v58 }
 0xcb5   : > { %v4938_v25 = vpop.permute.xlu0 %4937  ;;  %v5131_v1 = vpop.permute.xlu1 %5130 }
 0xcb7   : > { %9689 = vmatpush3.bf16.xpose.msra.mxu0 %v5202_v21 }
 0xcb8   : > { %9837 = vmatprep.subr.msk.bf16.mxu0 %vm2087_vm0, %v5157_v44 }
 0xcb9   : > { %v4940_v32 = vpop.permute.xlu0 %4939  ;;  %v5133_v27 = vpop.permute.xlu1 %5132 }
 0xcbb   : > { %9659 = vmatpush3.bf16.xpose.msra.mxu1 %v5006_v23 }
 0xcbc   : > { %9830 = vmatprep.subr.msk.bf16.mxu1 %vm2087_vm0, %v4962_v42 }
 0xcbd   : > { %v4942_v19 = vpop.permute.xlu0 %4941  ;;  %v5135_v0 = vpop.permute.xlu1 %5134 }
 0xcbf   : > { %9691 = vmatpush3.bf16.xpose.msra.mxu0 %v5199_v48 }
 0xcc0   : > { %9838 = vmatprep.subr.msk.bf16.mxu0 %vm2087_vm0, %v5155_v55 }
 0xcc1   : > { %v4944_v29 = vpop.permute.xlu0 %4943  ;;  %v5137_v54 = vpop.permute.xlu1 %5136 }
 0xcc3   : > { %9661 = vmatpush3.bf16.xpose.msra.mxu1 %v5003_v57 }
 0xcc4   : > { %9831 = vmatprep.subr.msk.bf16.mxu1 %vm2087_vm0, %v4960_v4 }
 0xcc5   : > { %v4946_v61 = vpop.permute.xlu0 %4945  ;;  %v5139_v28 = vpop.permute.xlu1 %5138 }
 0xcc7   : > { %9693 = vmatpush3.bf16.xpose.msra.mxu0 %v5196_v39  ;;  %v18208_v39 = vld [vmem:[#allocation85_spill] sm:$0xff] }
 0xcc8   : > { %9839 = vmatprep.subr.msk.bf16.mxu0 %vm2087_vm0, %v5153_v31 }
 0xcc9   : > { %v4948_v46 = vpop.permute.xlu0 %4947  ;;  %v5141_v16 = vpop.permute.xlu1 %5140 }
 0xccb   : > { %9663 = vmatpush3.bf16.xpose.msra.mxu1 %v5000_v33 }
 0xccd   : > { %v4950_v38 = vpop.permute.xlu0 %4949  ;;  %v5143_v7 = vpop.permute.xlu1 %5142 }
 0xccf   : > { %9695 = vmatpush3.bf16.xpose.msra.mxu0 %v5193_v51 }
 0xcd1   : > { %v5608_v43 = vpop.permute.xlu1 %5607  ;;  %v5737_v60 = vpop.permute.xlu0 %5736 }
 0xcd2   : > { %9665 = vmatmul.mubr.msk.bf16.vlgmr.msra.gmra.mxu1 %vm2087_vm0, %v4938_v25  ;;  %9712 = vmatprep.subr.bf16.mxu1 %v5608_v43  ;;  %v18209_v25 = vld [vmem:[#allocation130_spill] sm:$0xff] }
 0xcd3   : > { %9668 = vmatprep.mubr.msk.bf16.mxu1 %vm2087_vm0, %v4940_v32  ;;  %9713 = vmatpush3.bf16.msra.mxu1 %v5608_v43  ;;  %v18210_v32 = vld [vmem:[#allocation82_spill] sm:$0xff] }
 0xcd4   : > { %9744 = vmatprep.subr.bf16.mxu0 %v5737_v60 }
 0xcd5   : > { %v5606_v5 = vpop.permute.xlu1 %5605  ;;  %v5733_v26 = vpop.permute.xlu0 %5732 }
 0xcd6   : > { %9697 = vmatmul.mubr.msk.bf16.vlgmr.msra.gmra.mxu0 %vm2087_vm0, %v5131_v1  ;;  %9714 = vmatprep.subr.bf16.mxu1 %v5606_v5 }
 0xcd7   : > { %9700 = vmatprep.mubr.msk.bf16.mxu0 %vm2087_vm0, %v5133_v27  ;;  %9715 = vmatpush3.bf16.msra.mxu1 %v5606_v5 }
 0xcd8   : > { %9745 = vmatpush3.bf16.msra.mxu0 %v5737_v60 }
 0xcd9   : > { %v5735_v56 = vpop.permute.xlu1 %5734  ;;  %v5729_v8 = vpop.permute.xlu0 %5728 }
 0xcda   : > { %9669 = vmatmul.mubr.msk.bf16.gmra.mxu1 %vm2087_vm0, %v4942_v19  ;;  %9746 = vmatprep.subr.bf16.mxu0 %v5735_v56 }
 0xcdb   : > { %9672 = vmatprep.mubr.msk.bf16.mxu1 %vm2087_vm0, %v4944_v29 }
 0xcdc   : > { %9747 = vmatpush3.bf16.msra.mxu0 %v5735_v56 }
 0xcdd   : > { %v5604_v2 = vpop.permute.xlu1 %5603  ;;  %9748 = vmatprep.subr.bf16.mxu0 %v5733_v26 }
 0xcde   : > { %9701 = vmatmul.mubr.msk.bf16.gmra.mxu0 %vm2087_vm0, %v5135_v0  ;;  %9716 = vmatprep.subr.bf16.mxu1 %v5604_v2 }
 0xcdf   : > { %9704 = vmatprep.mubr.msk.bf16.mxu0 %vm2087_vm0, %v5137_v54  ;;  %9717 = vmatpush3.bf16.msra.mxu1 %v5604_v2 }
 0xce0   : > { %9749 = vmatpush3.bf16.msra.mxu0 %v5733_v26 }
 0xce1   : > { %v5602_v41 = vpop.permute.xlu1 %5601 }
 0xce2   : > { %9673 = vmatmul.mubr.msk.bf16.gmra.mxu1 %vm2087_vm0, %v4946_v61  ;;  %9718 = vmatprep.subr.bf16.mxu1 %v5602_v41 }
 0xce3   : > { %9676 = vmatprep.mubr.msk.bf16.mxu1 %vm2087_vm0, %v4948_v46  ;;  %9719 = vmatpush3.bf16.msra.mxu1 %v5602_v41 }
 0xce5   : > { %v5731_v14 = vpop.permute.xlu1 %5730 }
 0xce6   : > { %9705 = vmatmul.mubr.msk.bf16.gmra.mxu0 %vm2087_vm0, %v5139_v28  ;;  %9750 = vmatprep.subr.bf16.mxu0 %v5731_v14 }
 0xce7   : > { %9708 = vmatprep.mubr.msk.bf16.mxu0 %vm2087_vm0, %v5141_v16  ;;  %9751 = vmatpush3.bf16.msra.mxu0 %v5731_v14 }
 0xce8   : > { %9752 = vmatprep.subr.bf16.mxu0 %v5729_v8 }
 0xce9   : > { %v5600_v53 = vpop.permute.xlu1 %5599 }
 0xcea   : > { %9677 = vmatmul.mubr.msk.bf16.gmra.mxu1 %vm2087_vm0, %v4950_v38  ;;  %9720 = vmatprep.subr.bf16.mxu1 %v5600_v53 }
 0xceb   : > { %9753 = vmatpush3.bf16.msra.mxu0 %v5729_v8  ;;  %9721 = vmatpush3.bf16.msra.mxu1 %v5600_v53 }
 0xced   : > { %v5598_v13 = vpop.permute.xlu1 %5597 }
 0xcee   : > { %9709 = vmatmul.mubr.msk.bf16.gmra.mxu0 %vm2087_vm0, %v5143_v7  ;;  %9722 = vmatprep.subr.bf16.mxu1 %v5598_v13 }
 0xcef   : > { %9723 = vmatpush3.bf16.msra.mxu1 %v5598_v13 }
 0xcf1   : > { %v5727_v37 = vpop.permute.xlu1 %5726 }
 0xcf2   : > { %9754 = vmatprep.subr.bf16.mxu0 %v5727_v37 }
 0xcf3   : > { %9755 = vmatpush3.bf16.msra.mxu0 %v5727_v37 }
 0xcf5   : > { %v5596_v6 = vpop.permute.xlu1 %5595 }
 0xcf6   : > { %9724 = vmatprep.subr.bf16.mxu1 %v5596_v6 }
 0xcf7   : > { %9725 = vmatpush3.bf16.msra.mxu1 %v5596_v6 }
 0xd92   : > { %v15087_v35 = vpop.f32.mrf.mxu1 }
 0xd93   : > { %5317 = vmax.xlane.f32.xlu1 %v15087_v35 }
 0xd94   : > { %v15090_v9 = vpop.f32.mrf.mxu1 }
 0xd95   : > { %5313 = vmax.xlane.f32.xlu0 %v15090_v9 }
 0xd96   : > { %v15093_v20 = vpop.f32.mrf.mxu1  ;;  %v15095_v45 = vpop.f32.mrf.mxu0 }
 0xd97   : > { %5349 = vmax.xlane.f32.xlu1 %v15095_v45 }
 0xd98   : > { %v15098_v36 = vpop.f32.mrf.mxu1  ;;  %v15100_v50 = vpop.f32.mrf.mxu0 }
 0xd99   : > { %5345 = vmax.xlane.f32.xlu0 %v15100_v50 }
 0xd9a   : > { %v15103_v22 = vpop.f32.mrf.mxu0  ;;  %v15105_v12 = vpop.f32.mrf.mxu1 }
 0xd9b   : > { %5315 = vmax.xlane.f32.xlu1 %v15098_v36 }
 0xd9c   : > { %v15108_v11 = vpop.f32.mrf.mxu0  ;;  %v15110_v17 = vpop.f32.mrf.mxu1 }
 0xd9d   : > { %5319 = vmax.xlane.f32.xlu0 %v15093_v20 }
 0xd9e   : > { %v15113_v40 = vpop.f32.mrf.mxu0  ;;  %v15116_v52 = vpop.f32.mrf.mxu1 }
 0xd9f   : > { %5325 = vmax.xlane.f32.xlu1 %v15105_v12 }
 0xda0   : > { %v15118_v59 = vpop.f32.mrf.mxu0  ;;  %v15122_v15 = vpop.f32.mrf.mxu1 }
 0xda1   : > { %5351 = vmax.xlane.f32.xlu0 %v15103_v22 }
 0xda2   : > { %v15124_v58 = vpop.f32.mrf.mxu0  ;;  %v15127_v44 = vpop.f32.mrf.mxu1 }
 0xda3   : > { %5357 = vmax.xlane.f32.xlu1 %v15113_v40 }
 0xda4   : > { %v15130_v49 = vpop.f32.mrf.mxu0  ;;  %v15132_v42 = vpop.f32.mrf.mxu1 }
 0xda5   : > { %5347 = vmax.xlane.f32.xlu0 %v15108_v11 }
 0xda6   : > { %v15135_v55 = vpop.f32.mrf.mxu0  ;;  %v15138_v47 = vpop.f32.mrf.mxu1 }
 0xda7   : > { %5323 = vmax.xlane.f32.xlu1 %v15122_v15 }
 0xda8   : > { %v15140_v4 = vpop.f32.mrf.mxu0  ;;  %v15144_v31 = vpop.f32.mrf.mxu1 }
 0xda9   : > { %5321 = vmax.xlane.f32.xlu0 %v15110_v17 }
 0xdaa   : > { %v15146_v62 = vpop.f32.mrf.mxu0  ;;  %v15149_v24 = vpop.f32.mrf.mxu1 }
 0xdab   : > { %5333 = vmax.xlane.f32.xlu1 %v15127_v44 }
 0xdac   : > { %v15152_v30 = vpop.f32.mrf.mxu0  ;;  %v15154_v21 = vpop.f32.mrf.mxu1 }
 0xdad   : > { %5353 = vmax.xlane.f32.xlu0 %v15118_v59 }
 0xdae   : > { %v15158_v23 = vpop.f32.mrf.mxu0  ;;  %v15160_v48 = vpop.f32.mrf.mxu1 }
 0xdaf   : > { %5365 = vmax.xlane.f32.xlu1 %v15135_v55 }
 0xdb0   : > { %v15164_v57 = vpop.f32.mrf.mxu1  ;;  %v15175_v33 = vpop.f32.mrf.mxu0 }
 0xdb1   : > { %5327 = vmax.xlane.f32.xlu0 %v15116_v52 }
 0xdb2   : > { %v15181_v51 = vpop.f32.mrf.mxu0 }
 0xdb3   : > { %5331 = vmax.xlane.f32.xlu1 %v15144_v31 }
 0xdb4   : > { %v15184_v1 = vpop.f32.mrf.mxu0 }
 0xdb5   : > { %5359 = vmax.xlane.f32.xlu0 %v15124_v58 }
 0xdb7   : > { %5341 = vmax.xlane.f32.xlu1 %v15149_v24 }
 0xdb9   : > { %5355 = vmax.xlane.f32.xlu0 %v15130_v49 }
 0xdbb   : > { %5373 = vmax.xlane.f32.xlu1 %v15158_v23 }
 0xdbd   : > { %5329 = vmax.xlane.f32.xlu0 %v15132_v42 }
 0xdbf   : > { %5339 = vmax.xlane.f32.xlu1 %v15164_v57 }
 0xdc1   : > { %5361 = vmax.xlane.f32.xlu0 %v15140_v4 }
 0xdc5   : > { %5335 = vmax.xlane.f32.xlu0 %v15138_v47 }
 0xdc9   : > { %5367 = vmax.xlane.f32.xlu0 %v15146_v62 }
 0xdcd   : > { %5363 = vmax.xlane.f32.xlu0 %v15152_v30 }
 0xdd0   : > { %5593 = vrot.lane.b32.xlu1 %v18208_v39, %s11236_s3 }
 0xdd1   : > { %5337 = vmax.xlane.f32.xlu0 %v15154_v21 }
 0xdd4   : > { %5722 = vrot.lane.b32.xlu1 %v18209_v25, %s11236_s3 }
 0xdd5   : > { %5369 = vmax.xlane.f32.xlu0 %v15175_v33 }
 0xdd9   : > { %5343 = vmax.xlane.f32.xlu0 %v15160_v48 }
 0xddd   : > { %5375 = vmax.xlane.f32.xlu0 %v15181_v51 }
 0xde1   : > { %5371 = vmax.xlane.f32.xlu0 %v15184_v1 }
 0xdf7   : > { %5724 = vrot.lane.b32.xlu0 %v18210_v32, %s11236_s3 }
 0xe1c   : > { %v5318_v27 = vpop.xlane.xlu1 %5317 }
 0xe1d   : > { %v5379_v19 = vsub.f32 %v15087_v35, %v5318_v27 }
 0xe1e   : > { %v5314_v0 = vpop.xlane.xlu0 %5313 }
 0xe1f   : > { %v5413_v29 = vmul.f32 1.442695, %v5379_v19  ;;  %v5377_v54 = vsub.f32 %v15090_v9, %v5314_v0 }
 0xe20   : > { %v5350_v61 = vpop.xlane.xlu1 %5349 }
 0xe21   : > { %10518 = vpow2.f32 %v5413_v29  ;;  %v5409_v28 = vmul.f32 1.442695, %v5377_v54  ;;  %v5395_v46 = vsub.f32 %v15095_v45, %v5350_v61 }
 0xe22   : > { %v5346_v16 = vpop.xlane.xlu0 %5345 }
 0xe23   : > { %v5445_v38 = vmul.f32 1.442695, %v5395_v46  ;;  %v5393_v7 = vsub.f32 %v15100_v50, %v5346_v16  ;;  %10520 = vpow2.f32 %v5409_v28 }
 0xe24   : > { %v5316_v43 = vpop.xlane.xlu1 %5315 }
 0xe25   : > { %10522 = vpow2.f32 %v5445_v38  ;;  %v5441_v5 = vmul.f32 1.442695, %v5393_v7  ;;  %v5378_v56 = vsub.f32 %v15098_v36, %v5316_v43 }
 0xe26   : > { %v5320_v60 = vpop.xlane.xlu0 %5319 }
 0xe27   : > { %v5411_v2 = vmul.f32 1.442695, %v5378_v56  ;;  %v5380_v41 = vsub.f32 %v15093_v20, %v5320_v60  ;;  %10524 = vpow2.f32 %v5441_v5 }
 0xe28   : > { %v5326_v26 = vpop.xlane.xlu1 %5325 }
 0xe29   : > { %10526 = vpow2.f32 %v5411_v2  ;;  %v5415_v14 = vmul.f32 1.442695, %v5380_v41  ;;  %v5383_v8 = vsub.f32 %v15105_v12, %v5326_v26 }
 0xe2a   : > { %v5352_v53 = vpop.xlane.xlu0 %5351 }
 0xe2b   : > { %10528 = vpow2.f32 %v5415_v14  ;;  %v5396_v13 = vsub.f32 %v15103_v22, %v5352_v53  ;;  %v5421_v6 = vmul.f32 1.442695, %v5383_v8 }
 0xe2c   : > { %v5358_v37 = vpop.xlane.xlu1 %5357 }
 0xe2d   : > { %v5447_v35 = vmul.f32 1.442695, %v5396_v13  ;;  %v5399_v9 = vsub.f32 %v15113_v40, %v5358_v37 }
 0xe2e   : > { %v15198_v45 = vpop.eup %10518  ;;  %v5348_v36 = vpop.xlane.xlu0 %5347 }
 0xe2f   : > { %10530 = vpow2.f32 %v5447_v35  ;;  %v5394_v20 = vsub.f32 %v15108_v11, %v5348_v36  ;;  %5477 = vadd.xlane.f32.xlu0 %v15198_v45  ;;  %v5453_v12 = vmul.f32 1.442695, %v5399_v9 }
 0xe30   : > { %v5324_v50 = vpop.xlane.xlu1 %5323  ;;  %v15202_v39 = vpop.eup %10520  ;;  %10532 = vpow2.f32 %v5421_v6 }
 0xe31   : > { %v5443_v25 = vmul.f32 1.442695, %v5394_v20  ;;  %v5382_v38 = vsub.f32 %v15122_v15, %v5324_v50 }
 0xe32   : > { %v15204_v22 = vpop.eup %10522  ;;  %v5322_v32 = vpop.xlane.xlu0 %5321 }
 0xe33   : > { %10534 = vpow2.f32 %v5443_v25  ;;  %v5381_v40 = vsub.f32 %v15110_v17, %v5322_v32  ;;  %5509 = vadd.xlane.f32.xlu1 %v15204_v22  ;;  %5473 = vadd.xlane.f32.xlu0 %v15202_v39  ;;  %v5419_v15 = vmul.f32 1.442695, %v5382_v38 }
 0xe34   : > { %v5334_v27 = vpop.xlane.xlu1 %5333  ;;  %v15209_v11 = vpop.eup %10524  ;;  %10536 = vpow2.f32 %v5453_v12 }
 0xe35   : > { %v5417_v19 = vmul.f32 1.442695, %v5381_v40  ;;  %v5387_v28 = vsub.f32 %v15127_v44, %v5334_v27 }
 0xe36   : > { %v15211_v0 = vpop.eup %10526  ;;  %v5354_v29 = vpop.xlane.xlu0 %5353 }
 0xe37   : > { %v5397_v54 = vsub.f32 %v15118_v59, %v5354_v29  ;;  %5505 = vadd.xlane.f32.xlu1 %v15209_v11  ;;  %v5569_v61 = vpack.c.bf16 %v15211_v0, %v15202_v39  ;;  %10538 = vpow2.f32 %v5417_v19  ;;  %v5429_v5 = vmul.f32 1.442695, %v5387_v28 }
 0xe38   : > { %v15217_v17 = vpop.eup %10528  ;;  %v5366_v46 = vpop.xlane.xlu1 %5365 }
 0xe39   : > { %v5449_v16 = vmul.f32 1.442695, %v5397_v54  ;;  %9728 = vmatprep.mubr.bf16.mxu1 %v5569_v61  ;;  %5479 = vadd.xlane.f32.xlu0 %v15217_v17  ;;  %v5403_v44 = vsub.f32 %v15135_v55, %v5366_v46 }
 0xe3a   : > { %v5328_v7 = vpop.xlane.xlu0 %5327 }
 0xe3b   : > { %v5384_v59 = vsub.f32 %v15116_v52, %v5328_v7  ;;  %5475 = vadd.xlane.f32.xlu1 %v15211_v0  ;;  %10540 = vpow2.f32 %v5449_v16  ;;  %v5461_v55 = vmul.f32 1.442695, %v5403_v44  ;;  %v5570_v16 = vpack.c.bf16 %v15217_v17, %v15198_v45 }
 0xe3c   : > { %v15224_v43 = vpop.eup %10530  ;;  %v5332_v56 = vpop.xlane.xlu1 %5331 }
 0xe3d   : > { %v5423_v60 = vmul.f32 1.442695, %v5384_v59  ;;  %5511 = vadd.xlane.f32.xlu0 %v15224_v43  ;;  %v5578_v2 = vpack.c.bf16 %v15224_v43, %v15204_v22  ;;  %v15230_v41 = vpop.eup %10532  ;;  %v5386_v53 = vsub.f32 %v15144_v31, %v5332_v56 }
 0xe3e   : > { %v5360_v26 = vpop.xlane.xlu0 %5359 }
 0xe3f   : > { %10542 = vpow2.f32 %v5423_v60  ;;  %v5400_v52 = vsub.f32 %v15124_v58, %v5360_v26  ;;  %5485 = vadd.xlane.f32.xlu1 %v15230_v41  ;;  %v5427_v31 = vmul.f32 1.442695, %v5386_v53 }
 0xe40   : > { %v15234_v14 = vpop.eup %10534  ;;  %10544 = vpow2.f32 %v5429_v5  ;;  %v5342_v8 = vpop.xlane.xlu1 %5341 }
 0xe41   : > { %v5455_v13 = vmul.f32 1.442695, %v5400_v52  ;;  %5507 = vadd.xlane.f32.xlu0 %v15234_v14  ;;  %v5577_v37 = vpack.c.bf16 %v15234_v14, %v15209_v11  ;;  %v15240_v6 = vpop.eup %10536  ;;  %10546 = vpow2.f32 %v5419_v15  ;;  %v5391_v29 = vsub.f32 %v15149_v24, %v5342_v8 }
 0xe42   : > { %v5356_v35 = vpop.xlane.xlu0 %5355 }
 0xe43   : > { %10548 = vpow2.f32 %v5455_v13  ;;  %v5398_v58 = vsub.f32 %v15130_v49, %v5356_v35  ;;  %5517 = vadd.xlane.f32.xlu1 %v15240_v6  ;;  %9760 = vmatprep.mubr.bf16.mxu0 %v5577_v37  ;;  %v5437_v38 = vmul.f32 1.442695, %v5391_v29 }
 0xe44   : > { %v15244_v9 = vpop.xlane.xlu1 %5373  ;;  %10550 = vpow2.f32 %v5461_v55  ;;  %v15246_v36 = vpop.eup %10538 }
 0xe45   : > { %v5451_v20 = vmul.f32 1.442695, %v5398_v58  ;;  %10552 = vpow2.f32 %v5427_v31  ;;  %v5407_v31 = vsub.f32 %v15158_v23, %v15244_v9 }
 0xe46   : > { %v5330_v50 = vpop.xlane.xlu0 %5329 }
 0xe47   : > { %v5385_v12 = vsub.f32 %v15132_v42, %v5330_v50  ;;  %5481 = vadd.xlane.f32.xlu1 %v15246_v36  ;;  %10554 = vpow2.f32 %v5451_v20 }
 0xe48   : > { %v5340_v25 = vpop.xlane.xlu1 %5339  ;;  %v15250_v40 = vpop.eup %10540 }
 0xe49   : > { %v5425_v32 = vmul.f32 1.442695, %v5385_v12  ;;  %v5390_v44 = vsub.f32 %v15164_v57, %v5340_v25 }
 0xe4a   : > { %v5362_v49 = vpop.xlane.xlu0 %5361 }
 0xe4b   : > { %10556 = vpow2.f32 %v5425_v32  ;;  %v5401_v27 = vsub.f32 %v15140_v4, %v5362_v49  ;;  %5513 = vadd.xlane.f32.xlu1 %v15250_v40  ;;  %v5435_v53 = vmul.f32 1.442695, %v5390_v44  ;;  %v5469_v49 = vmul.f32 1.442695, %v5407_v31 }
 0xe4c   : > { %v15254_v19 = vpop.eup %10542  ;;  %v5594_v54 = vpop.permute.xlu1 %5593 }
 0xe4d   : > { %v15257_v42 = vpop.eup %10544  ;;  %v5457_v61 = vmul.f32 1.442695, %v5401_v27  ;;  %9726 = vmatprep.subr.bf16.mxu1 %v5594_v54  ;;  %5487 = vadd.xlane.f32.xlu0 %v15254_v19  ;;  %v5572_v55 = vpack.c.bf16 %v15254_v19, %v15230_v41 }
 0xe4e   : > { %9727 = vmatpush3.bf16.msra.mxu1 %v5594_v54  ;;  %v5336_v28 = vpop.xlane.xlu0 %5335  ;;  %v15260_v46 = vpop.eup %10546 }
 0xe4f   : > { %10558 = vpow2.f32 %v5457_v61  ;;  %v5388_v4 = vsub.f32 %v15138_v47, %v5336_v28  ;;  %5493 = vadd.xlane.f32.xlu1 %v15257_v42  ;;  %v5571_v7 = vpack.c.bf16 %v15260_v46, %v15246_v36 }
 0xe50   : > { %v15266_v24 = vpop.eup %10548 }
 0xe51   : > { %v5431_v59 = vmul.f32 1.442695, %v5388_v4  ;;  %9729 = vmatmul.mubr.bf16.vlgmr.msra.gmra.mxu1 %v5570_v16  ;;  %5519 = vadd.xlane.f32.xlu0 %v15266_v24  ;;  %v15271_v5 = vpop.eup %10550 }
 0xe52   : > { %18211 = vst [vmem:[#allocation144_spill] sm:$0xff] %v15271_v5  ;;  %9732 = vmatprep.mubr.bf16.mxu1 %v5571_v7  ;;  %v5368_v56 = vpop.xlane.xlu0 %5367  ;;  %v15277_v15 = vpop.eup %10552 }
 0xe53   : > { %10560 = vpow2.f32 %v5431_v59  ;;  %v5404_v47 = vsub.f32 %v15146_v62, %v5368_v56  ;;  %5525 = vadd.xlane.f32.xlu1 %v15271_v5  ;;  %v5723_v56 = vpop.permute.xlu1 %5722 }
 0xe54   : > { %10562 = vpow2.f32 %v5437_v38  ;;  %v15279_v52 = vpop.eup %10554 }
 0xe55   : > { %v5463_v60 = vmul.f32 1.442695, %v5404_v47  ;;  %5483 = vadd.xlane.f32.xlu0 %v15260_v46 }
 0xe56   : > { %v5364_v26 = vpop.xlane.xlu0 %5363 }
 0xe57   : > { %10564 = vpow2.f32 %v5463_v60  ;;  %v5402_v8 = vsub.f32 %v15152_v30, %v5364_v26  ;;  %v5579_v26 = vpack.c.bf16 %v15279_v52, %v15250_v40 }
 0xe58   : > { %v15284_v62 = vpop.eup %10556  ;;  %10566 = vpow2.f32 %v5435_v53 }
 0xe59   : > { %9733 = vmatmul.mubr.bf16.gmra.mxu1 %v5572_v55  ;;  %5515 = vadd.xlane.f32.xlu0 %v15279_v52  ;;  %v5573_v57 = vpack.c.bf16 %v15277_v15, %v15284_v62  ;;  %v5459_v13 = vmul.f32 1.442695, %v5402_v8  ;;  %v5580_v55 = vpack.c.bf16 %v15266_v24, %v15240_v6 }
 0xe5a   : > { %5489 = vadd.xlane.f32.xlu1 %v15284_v62  ;;  %v5338_v37 = vpop.xlane.xlu0 %5337 }
 0xe5b   : > { %v5389_v35 = vsub.f32 %v15154_v21, %v5338_v37  ;;  %9736 = vmatprep.mubr.bf16.mxu1 %v5573_v57  ;;  %10568 = vpow2.f32 %v5459_v13 }
 0xe5c   : > { %v15291_v30 = vpop.eup %10558 }
 0xe5d   : > { %18212 = vst [vmem:[#allocation148_spill] sm:$0xff] %v15291_v30  ;;  %v5433_v58 = vmul.f32 1.442695, %v5389_v35 }
 0xe5e   : > { %5521 = vadd.xlane.f32.xlu1 %v15291_v30  ;;  %v5370_v20 = vpop.xlane.xlu0 %5369 }
 0xe5f   : > { %10570 = vpow2.f32 %v5433_v58  ;;  %v5405_v50 = vsub.f32 %v15175_v33, %v5370_v20 }
 0xe60   : > { %v15297_v12 = vpop.eup %10560 }
 0xe61   : > { %v15299_v25 = vpop.eup %10562  ;;  %v5465_v21 = vmul.f32 1.442695, %v5405_v50  ;;  %5495 = vadd.xlane.f32.xlu0 %v15297_v12  ;;  %v5574_v32 = vpack.c.bf16 %v15297_v12, %v15257_v42 }
 0xe62   : > { %5501 = vadd.xlane.f32.xlu1 %v15299_v25  ;;  %v5344_v23 = vpop.xlane.xlu0 %5343 }
 0xe63   : > { %10572 = vpow2.f32 %v5465_v21  ;;  %v5392_v9 = vsub.f32 %v15160_v48, %v5344_v23  ;;  %9737 = vmatmul.mubr.bf16.gmra.mxu1 %v5574_v32 }
 0xe64   : > { %v15306_v27 = vpop.eup %10564  ;;  %10574 = vpow2.f32 %v5469_v49 }
 0xe65   : > { %18213 = vst [vmem:[#allocation170_spill] sm:$0xff] %v15306_v27  ;;  %v5439_v33 = vmul.f32 1.442695, %v5392_v9  ;;  %5527 = vadd.xlane.f32.xlu0 %v15306_v27  ;;  %v15310_v54 = vpop.eup %10566 }
 0xe66   : > { %v5376_v29 = vpop.xlane.xlu0 %5375 }
 0xe67   : > { %10576 = vpow2.f32 %v5439_v33  ;;  %v5408_v4 = vsub.f32 %v15181_v51, %v5376_v29 }
 0xe68   : > { %v15312_v28 = vpop.eup %10568 }
 0xe69   : > { %5491 = vadd.xlane.f32.xlu0 %v15277_v15  ;;  %18214 = vst [vmem:[#allocation172_spill] sm:$0xff] %v15312_v28  ;;  %v5471_v47 = vmul.f32 1.442695, %v5408_v4  ;;  %v5581_v53 = vpack.c.bf16 %v15312_v28, %v15291_v30 }
 0xe6a   : > { %v5372_v61 = vpop.xlane.xlu0 %5371 }
 0xe6b   : > { %v5406_v48 = vsub.f32 %v15184_v1, %v5372_v61 }
 0xe6c   : > { %v15316_v16 = vpop.eup %10570 }
 0xe6d   : > { %v5467_v38 = vmul.f32 1.442695, %v5406_v48  ;;  %5523 = vadd.xlane.f32.xlu0 %v15312_v28  ;;  %5497 = vadd.xlane.f32.xlu1 %v15316_v16  ;;  %v5575_v7 = vpack.c.bf16 %v15310_v54, %v15316_v16 }
 0xe6e   : > { %v5725_v59 = vpop.permute.xlu0 %5724 }
 0xe6f   : > { %10578 = vpow2.f32 %v5467_v38  ;;  %9740 = vmatprep.mubr.bf16.mxu1 %v5575_v7  ;;  %9756 = vmatprep.subr.bf16.mxu0 %v5725_v59 }
 0xe70   : > { %v15322_v44 = vpop.eup %10572  ;;  %9757 = vmatpush3.bf16.msra.mxu0 %v5725_v59  ;;  %10580 = vpow2.f32 %v5471_v47 }
 0xe71   : > { %18215 = vst [vmem:[#allocation194_spill] sm:$0xff] %v15322_v44  ;;  %5529 = vadd.xlane.f32.xlu1 %v15322_v44  ;;  %9758 = vmatprep.subr.bf16.mxu0 %v5723_v56  ;;  %v15325_v51 = vpop.eup %10574 }
 0xe72   : > { %18216 = vst [vmem:[#allocation196_spill] sm:$0xff] %v15325_v51 }
 0xe74   : > { %v15327_v1 = vpop.eup %10576  ;;  %9759 = vmatpush3.bf16.msra.mxu0 %v5723_v56 }
 0xe75   : > { %5533 = vadd.xlane.f32.xlu1 %v15325_v51  ;;  %5503 = vadd.xlane.f32.xlu0 %v15327_v1  ;;  %v5576_v60 = vpack.c.bf16 %v15327_v1, %v15299_v25 }
 0xe77   : > { %9741 = vmatmul.mubr.bf16.gmra.mxu1 %v5576_v60  ;;  %9761 = vmatmul.mubr.bf16.vlgmr.msra.gmra.mxu0 %v5578_v2  ;;  %v5582_v2 = vpack.c.bf16 %v15306_v27, %v15271_v5 }
 0xe78   : > { %9764 = vmatprep.mubr.bf16.mxu0 %v5579_v26 }
 0xe79   : > { %5499 = vadd.xlane.f32.xlu0 %v15310_v54 }
 0xe7c   : > { %v15339_v8 = vpop.eup %10578 }
 0xe7d   : > { %18217 = vst [vmem:[#allocation168_spill] sm:$0xff] %v15339_v8  ;;  %5531 = vadd.xlane.f32.xlu0 %v15339_v8  ;;  %v15346_v57 = vpop.eup %10580  ;;  %v5583_v13 = vpack.c.bf16 %v15339_v8, %v15322_v44 }
 0xe7e   : > { %18218 = vst [vmem:[#allocation169_spill] sm:$0xff] %v15346_v57  ;;  %v5584_v37 = vpack.c.bf16 %v15346_v57, %v15325_v51 }
 0xe7f   : > { %9765 = vmatmul.mubr.bf16.gmra.mxu0 %v5580_v55 }
 0xe80   : > { %9768 = vmatprep.mubr.bf16.mxu0 %v5581_v53 }
 0xe81   : > { %5535 = vadd.xlane.f32.xlu0 %v15346_v57 }
 0xe87   : > { %9769 = vmatmul.mubr.bf16.gmra.mxu0 %v5582_v2 }
 0xe88   : > { %9772 = vmatprep.mubr.bf16.mxu0 %v5583_v13 }
 0xe8f   : > { %9773 = vmatmul.mubr.bf16.gmra.mxu0 %v5584_v37 }
 0xeb8   : > { %v5478_v35 = vpop.xlane.xlu0 %5477 }
 0xeb9   : > { %10582 = vrcp.f32 %v5478_v35 }
 0xebc   : > { %v5474_v58 = vpop.xlane.xlu0 %5473  ;;  %v15355_v31 = vpop.xlane.xlu1 %5509 }
 0xec0   : > { %v15357_v50 = vpop.xlane.xlu1 %5505 }
 0xec2   : > { %v5480_v20 = vpop.xlane.xlu0 %5479 }
 0xec3   : > { %10584 = vrcp.f32 %v5480_v20 }
 0xec4   : > { %v5476_v32 = vpop.xlane.xlu1 %5475  ;;  %10586 = vrcp.f32 %v5474_v58 }
 0xec5   : > { %10588 = vrcp.f32 %v5476_v32 }
 0xec6   : > { %v15359_v21 = vpop.xlane.xlu0 %5511  ;;  %v15373_v26 = vpop.eup %10582 }
 0xec8   : > { %v5486_v23 = vpop.xlane.xlu1 %5485 }
 0xec9   : > { %10590 = vrcp.f32 %v5486_v23 }
 0xeca   : > { %v15361_v49 = vpop.xlane.xlu0 %5507 }
 0xecc   : > { %v15363_v33 = vpop.xlane.xlu1 %5517 }
 0xed0   : > { %v5482_v61 = vpop.xlane.xlu1 %5481  ;;  %v15377_v53 = vpop.eup %10584 }
 0xed1   : > { %v15379_v13 = vpop.eup %10586 }
 0xed2   : > { %v15387_v58 = vpop.eup %10588 }
 0xed4   : > { %v15367_v48 = vpop.xlane.xlu1 %5513 }
 0xed6   : > { %v5488_v9 = vpop.xlane.xlu0 %5487  ;;  %v15399_v3 = vpop.eup %10590 }
 0xed7   : > { %10592 = vrcp.f32 %v5488_v9 }
 0xed8   : > { %v5494_v59 = vpop.xlane.xlu1 %5493  ;;  %10594 = vrcp.f32 %v5482_v61 }
 0xeda   : > { %v15365_v29 = vpop.xlane.xlu0 %5519 }
 0xedc   : > { %v15375_v55 = vpop.xlane.xlu1 %5525 }
 0xede   : > { %v5484_v4 = vpop.xlane.xlu0 %5483 }
 0xedf   : > { %10596 = vrcp.f32 %v5484_v4 }
 0xee0   : > { %10598 = vrcp.f32 %v5494_v59 }
 0xee2   : > { %v15369_v38 = vpop.xlane.xlu0 %5515 }
 0xee3   : > { %v5490_v32 = vpop.xlane.xlu1 %5489 }
 0xee7   : > { %v15421_v10 = vpop.xlane.xlu1 %5521 }
 0xeea   : > { %v5496_v7 = vpop.xlane.xlu0 %5495 }
 0xeeb   : > { %10600 = vrcp.f32 %v5496_v7 }
 0xeec   : > { %10602 = vrcp.f32 %v5490_v32 }
 0xeee   : > { %v15371_v47 = vpop.xlane.xlu0 %5527 }
 0xef2   : > { %v5492_v4 = vpop.xlane.xlu0 %5491 }
 0xef3   : > { %10604 = vrcp.f32 %v5492_v4  ;;  %v5502_v4 = vpop.xlane.xlu1 %5501 }
 0xef4   : > { %10606 = vrcp.f32 %v15355_v31 }
 0xef5   : > { %10608 = vrcp.f32 %v15357_v50 }
 0xef6   : > { %10610 = vrcp.f32 %v15359_v21 }
 0xef7   : > { %10612 = vrcp.f32 %v15361_v49 }
 0xef8   : > { %10614 = vrcp.f32 %v5502_v4 }
 0xf11   : > { %v9730_v56 = vpop.f32.mrf.mxu1 }
 0xf12   : > { %v15382_v37 = vmul.f32 %v15373_v26, %v9730_v56 }
 0xf13   : > { %v5651_v60 = vpop.f32.mrf.mxu1 }
 0xf14   : > { %18219 = vst [vmem:[#allocation192_spill] sm:$0xff] %v15382_v37  ;;  %v15390_v23 = vmul.f32 %v15379_v13, %v5651_v60  ;;  %v15401_v60 = vpop.eup %10592  ;;  %v5524_v37 = vpop.xlane.xlu0 %5523 }
 0xf15   : > { %v9731_v2 = vpop.f32.mrf.mxu1  ;;  %v15403_v34 = vpop.eup %10594 }
 0xf16   : > { %v15385_v35 = vmul.f32 %v15377_v53, %v9731_v2  ;;  %18221 = vst [vmem:[#allocation166_spill] sm:$0xff] %v15390_v23  ;;  %v15411_v7 = vpop.eup %10596 }
 0xf17   : > { %v5654_v20 = vpop.f32.mrf.mxu1  ;;  %v15425_v23 = vpop.eup %10598 }
 0xf18   : > { %18220 = vst [vmem:[#allocation193_spill] sm:$0xff] %v15385_v35  ;;  %v15395_v61 = vmul.f32 %v15387_v58, %v5654_v20 }
 0xf19   : > { %v9734_v56 = vpop.f32.mrf.mxu1 }
 0xf1a   : > { %18222 = vst [vmem:[#allocation167_spill] sm:$0xff] %v15395_v61  ;;  %v15406_v20 = vmul.f32 %v15399_v3, %v9734_v56  ;;  %v15427_v61 = vpop.eup %10600 }
 0xf1b   : > { %v5667_v63 = vpop.f32.mrf.mxu1  ;;  %v15429_v51 = vpop.eup %10602 }
 0xf1c   : > { %18223 = vst [vmem:[#allocation190_spill] sm:$0xff] %v15406_v20  ;;  %v15414_v32 = vmul.f32 %v15403_v34, %v5667_v63  ;;  %v5504_v63 = vpop.xlane.xlu0 %5503 }
 0xf1d   : > { %v9735_v18 = vpop.f32.mrf.mxu1  ;;  %10616 = vrcp.f32 %v5504_v63 }
 0xf1e   : > { %v15409_v59 = vmul.f32 %v15401_v60, %v9735_v18  ;;  %18225 = vst [vmem:[#allocation164_spill] sm:$0xff] %v15414_v32 }
 0xf1f   : > { %v5670_v9 = vpop.f32.mrf.mxu1 }
 0xf20   : > { %18224 = vst [vmem:[#allocation191_spill] sm:$0xff] %v15409_v59  ;;  %v15419_v2 = vmul.f32 %v15411_v7, %v5670_v9  ;;  %v15437_v59 = vpop.eup %10604 }
 0xf21   : > { %v15454_v50 = vpop.eup %10606 }
 0xf22   : > { %18226 = vst [vmem:[#allocation165_spill] sm:$0xff] %v15419_v2 }
 0xf23   : > { %v9738_v18 = vpop.f32.mrf.mxu1 }
 0xf24   : > { %v15432_v9 = vmul.f32 %v15425_v23, %v9738_v18  ;;  %v5500_v18 = vpop.xlane.xlu0 %5499 }
 0xf25   : > { %v5683_v35 = vpop.f32.mrf.mxu1 }
 0xf26   : > { %18227 = vst [vmem:[#allocation188_spill] sm:$0xff] %v15432_v9  ;;  %v15442_v32 = vmul.f32 %v15429_v51, %v5683_v35  ;;  %v15457_v35 = vpop.eup %10608 }
 0xf27   : > { %v9739_v57 = vpop.f32.mrf.mxu1 }
 0xf28   : > { %v15435_v20 = vmul.f32 %v15427_v61, %v9739_v57  ;;  %18229 = vst [vmem:[#allocation162_spill] sm:$0xff] %v15442_v32  ;;  %v5498_v57 = vpop.xlane.xlu1 %5497  ;;  %v5532_v9 = vpop.xlane.xlu0 %5531 }
 0xf29   : > { %v5686_v56 = vpop.f32.mrf.mxu1  ;;  %10618 = vrcp.f32 %v5498_v57 }
 0xf2a   : > { %18228 = vst [vmem:[#allocation189_spill] sm:$0xff] %v15435_v20  ;;  %v15447_v8 = vmul.f32 %v15437_v59, %v5686_v56  ;;  %10620 = vrcp.f32 %v5500_v18  ;;  %v15460_v56 = vpop.eup %10610 }
 0xf2b   : > { %10622 = vrcp.f32 %v15363_v33  ;;  %v15463_v4 = vpop.eup %10612 }
 0xf2c   : > { %18230 = vst [vmem:[#allocation163_spill] sm:$0xff] %v15447_v8  ;;  %10624 = vrcp.f32 %v15365_v29  ;;  %v15465_v18 = vpop.eup %10614 }
 0xf2d   : > { %10626 = vrcp.f32 %v15367_v48  ;;  %v15467_v33 = vpop.eup %10616  ;;  %v5530_v48 = vpop.xlane.xlu1 %5529 }
 0xf2e   : > { %10628 = vrcp.f32 %v15369_v38 }
 0xf2f   : > { %10630 = vrcp.f32 %v15375_v55 }
 0xf30   : > { %10632 = vrcp.f32 %v15371_v47 }
 0xf31   : > { %10634 = vrcp.f32 %v15421_v10 }
 0xf32   : > { %10636 = vrcp.f32 %v5524_v37 }
 0xf36   : > { %v15470_v31 = vpop.eup %10618 }
 0xf37   : > { %v9742_v21 = vpop.f32.mrf.mxu1  ;;  %v9762_v49 = vpop.f32.mrf.mxu0 }
 0xf38   : > { %v15473_v20 = vmul.f32 %v15465_v18, %v9742_v21  ;;  %v15476_v38 = vmul.f32 %v15454_v50, %v9762_v49  ;;  %v15484_v44 = vpop.eup %10620 }
 0xf39   : > { %v5699_v63 = vpop.f32.mrf.mxu1  ;;  %v5780_v57 = vpop.f32.mrf.mxu0 }
 0xf3a   : > { %18231 = vst [vmem:[#allocation186_spill] sm:$0xff] %v15473_v20  ;;  %18232 = vst [vmem:[#allocation187_spill] sm:$0xff] %v15476_v38  ;;  %v15488_v55 = vmul.f32 %v15470_v31, %v5699_v63  ;;  %v15491_v27 = vmul.f32 %v15457_v35, %v5780_v57  ;;  %v15508_v20 = vpop.eup %10622 }
 0xf3b   : > { %v9743_v29 = vpop.f32.mrf.mxu1  ;;  %v9763_v2 = vpop.f32.mrf.mxu0 }
 0xf3c   : > { %v15479_v32 = vmul.f32 %v15467_v33, %v9743_v29  ;;  %v15482_v8 = vmul.f32 %v15460_v56, %v9763_v2  ;;  %18235 = vst [vmem:[#allocation184_spill] sm:$0xff] %v15488_v55  ;;  %18236 = vst [vmem:[#allocation185_spill] sm:$0xff] %v15491_v27  ;;  %v5534_v29 = vpop.xlane.xlu1 %5533  ;;  %v15510_v38 = vpop.eup %10624 }
 0xf3d   : > { %v5702_v21 = vpop.f32.mrf.mxu1  ;;  %v5783_v5 = vpop.f32.mrf.mxu0  ;;  %10638 = vrcp.f32 %v5534_v29 }
 0xf3e   : > { %18233 = vst [vmem:[#allocation159_spill] sm:$0xff] %v15479_v32  ;;  %18234 = vst [vmem:[#allocation160_spill] sm:$0xff] %v15482_v8  ;;  %v15498_v2 = vmul.f32 %v15484_v44, %v5702_v21  ;;  %v15501_v28 = vmul.f32 %v15463_v4, %v5783_v5  ;;  %v5536_v21 = vpop.xlane.xlu0 %5535  ;;  %v15512_v5 = vpop.eup %10626 }
 0xf3f   : > { %v9766_v47 = vpop.f32.mrf.mxu0  ;;  %v15520_v63 = vpop.eup %10628  ;;  %10640 = vrcp.f32 %v5536_v21 }
 0xf40   : > { %18237 = vst [vmem:[#allocation155_spill] sm:$0xff] %v15498_v2  ;;  %18238 = vst [vmem:[#allocation157_spill] sm:$0xff] %v15501_v28  ;;  %v15515_v10 = vmul.f32 %v15508_v20, %v9766_v47  ;;  %10642 = vrcp.f32 %v5530_v48  ;;  %v15530_v55 = vpop.eup %10630 }
 0xf41   : > { %v5796_v49 = vpop.f32.mrf.mxu0  ;;  %18243 = vst [vmem:[#allocation174_spill] sm:$0xff] %v15530_v55  ;;  %10644 = vrcp.f32 %v5532_v9  ;;  %v15534_v2 = vpop.eup %10632 }
 0xf42   : > { %18239 = vst [vmem:[#allocation179_spill] sm:$0xff] %v15515_v10  ;;  %v15523_v27 = vmul.f32 %v15512_v5, %v5796_v49  ;;  %18244 = vst [vmem:[#allocation177_spill] sm:$0xff] %v15534_v2  ;;  %v15536_v49 = vpop.eup %10634 }
 0xf43   : > { %v9767_v8 = vpop.f32.mrf.mxu0  ;;  %18245 = vst [vmem:[#allocation80_spill] sm:$0xff] %v15536_v49  ;;  %v15544_v48 = vpop.eup %10636 }
 0xf44   : > { %v15518_v37 = vmul.f32 %v15510_v38, %v9767_v8  ;;  %18241 = vst [vmem:[#allocation151_spill] sm:$0xff] %v15523_v27 }
 0xf45   : > { %v5799_v57 = vpop.f32.mrf.mxu0 }
 0xf46   : > { %18240 = vst [vmem:[#allocation182_spill] sm:$0xff] %v15518_v37  ;;  %v15528_v32 = vmul.f32 %v15520_v63, %v5799_v57 }
 0xf47   : > { %v9770_v47 = vpop.f32.mrf.mxu0 }
 0xf48   : > { %18242 = vst [vmem:[#allocation153_spill] sm:$0xff] %v15528_v32  ;;  %v15539_v30 = vmul.f32 %v15530_v55, %v9770_v47 }
 0xf49   : > { %v5812_v29 = vpop.f32.mrf.mxu0 }
 0xf4a   : > { %18246 = vst [vmem:[#allocation125_spill] sm:$0xff] %v15539_v30  ;;  %v15547_v9 = vmul.f32 %v15536_v49, %v5812_v29  ;;  %v15556_v32 = vpop.eup %10638 }
 0xf4b   : > { %v9771_v21 = vpop.f32.mrf.mxu0 }
 0xf4c   : > { %v15542_v57 = vmul.f32 %v15534_v2, %v9771_v21  ;;  %18248 = vst [vmem:[#allocation133_spill] sm:$0xff] %v15547_v9  ;;  %v15558_v21 = vpop.eup %10640 }
 0xf4d   : > { %v5815_v28 = vpop.f32.mrf.mxu0  ;;  %v10643_v55 = vpop.eup %10642 }
 0xf4e   : > { %18247 = vst [vmem:[#allocation132_spill] sm:$0xff] %v15542_v57  ;;  %v15552_v10 = vmul.f32 %v15544_v48, %v5815_v28  ;;  %v10645_v8 = vpop.eup %10644 }
 0xf4f   : > { %v9774_v37 = vpop.f32.mrf.mxu0 }
 0xf50   : > { %v15561_v29 = vmul.f32 %v15556_v32, %v9774_v37 }
 0xf51   : > { %v5828_v27 = vpop.f32.mrf.mxu0 }
 0xf52   : > { %v15566_v30 = vmul.f32 %v10643_v55, %v5828_v27  ;;  %5893 = sbr.rel (%p8559_p1) target bundleno = 3945 (0xf69), region = 120 }
 0xf53   : > { %v9775_v2 = vpop.f32.mrf.mxu0 }
 0xf54   : > { %v15564_v49 = vmul.f32 %v15558_v21, %v9775_v2 }
 0xf55   : > { %v5831_v28 = vpop.f32.mrf.mxu0 }
 0xf56   : > { %v15570_v57 = vmul.f32 %v10645_v8, %v5831_v28 }
 0xf57   : > { %v5894_v2 = vmul.f32 %v15379_v13, %v15202_v39  ;;  %v5895_v27 = vmul.f32 %v15387_v58, %v15211_v0  ;;  %v5896_v37 = vmul.f32 %v15373_v26, %v15198_v45  ;;  %v5897_v28 = vmul.f32 %v15377_v53, %v15217_v17  ;;  %v18256_v53 = vld [vmem:[#allocation194_spill] sm:$0xff]  ;;  %v18257_v58 = vld [vmem:[#allocation168_spill] sm:$0xff] }
 0xf58   : > { %v5898_v47 = vmul.f32 %v15403_v34, %v15246_v36  ;;  %v5899_v9 = vmul.f32 %v15411_v7, %v15260_v46  ;;  %v5900_v39 = vmul.f32 %v15399_v3, %v15230_v41  ;;  %v5901_v0 = vmul.f32 %v15401_v60, %v15254_v19 }
 0xf59   : > { %8675 = vst [vmem:[%s11514_s23 + $0x180] sm:$0xff] %v5894_v2  ;;  %8676 = vst [vmem:[%s11514_s23 + $0x188] sm:$0xff] %v5895_v27  ;;  %v5902_v34 = vmul.f32 %v15429_v51, %v15284_v62  ;;  %v5903_v45 = vmul.f32 %v15437_v59, %v15277_v15  ;;  %v5904_v3 = vmul.f32 %v15425_v23, %v15257_v42 }
 0xf5a   : > { %8677 = vst [vmem:[%s11514_s23 + $0x190] sm:$0xff] %v5896_v37  ;;  %8678 = vst [vmem:[%s11514_s23 + $0x198] sm:$0xff] %v5897_v28  ;;  %v5905_v17 = vmul.f32 %v15427_v61, %v15297_v12  ;;  %v5906_v41 = vmul.f32 %v15470_v31, %v15316_v16  ;;  %v5907_v36 = vmul.f32 %v15484_v44, %v15310_v54  ;;  %v18250_v54 = vld [vmem:[#allocation80_spill] sm:$0xff] }
 0xf5b   : > { %8679 = vst [vmem:[%s11514_s23 + $0x1a0] sm:$0xff] %v5898_v47  ;;  %8680 = vst [vmem:[%s11514_s23 + $0x1a8] sm:$0xff] %v5899_v9  ;;  %v5908_v19 = vmul.f32 %v15465_v18, %v15299_v25  ;;  %v5909_v42 = vmul.f32 %v15467_v33, %v15327_v1  ;;  %v5910_v46 = vmul.f32 %v15457_v35, %v15209_v11  ;;  %v18249_v25 = vld [vmem:[#allocation148_spill] sm:$0xff]  ;;  %v18255_v1 = vld [vmem:[#allocation177_spill] sm:$0xff] }
 0xf5c   : > { %8681 = vst [vmem:[%s11514_s23 + $0x1b0] sm:$0xff] %v5900_v39  ;;  %8682 = vst [vmem:[%s11514_s23 + $0x1b8] sm:$0xff] %v5901_v0  ;;  %v5911_v15 = vmul.f32 %v15463_v4, %v15234_v14  ;;  %v5912_v62 = vmul.f32 %v15454_v50, %v15204_v22  ;;  %v5913_v12 = vmul.f32 %v15460_v56, %v15224_v43  ;;  %v18251_v16 = vld [vmem:[#allocation172_spill] sm:$0xff] }
 0xf5d   : > { %8683 = vst [vmem:[%s11514_s23 + $0x1c0] sm:$0xff] %v5902_v34  ;;  %8684 = vst [vmem:[%s11514_s23 + $0x1c8] sm:$0xff] %v5903_v45  ;;  %v5914_v11 = vmul.f32 %v15512_v5, %v15250_v40  ;;  %v5915_v14 = vmul.f32 %v15520_v63, %v15279_v52  ;;  %v5916_v22 = vmul.f32 %v15508_v20, %v15240_v6  ;;  %v18252_v44 = vld [vmem:[#allocation144_spill] sm:$0xff]  ;;  %v18253_v6 = vld [vmem:[#allocation174_spill] sm:$0xff] }
 0xf5e   : > { %8685 = vst [vmem:[%s11514_s23 + $0x1d0] sm:$0xff] %v5904_v3  ;;  %8686 = vst [vmem:[%s11514_s23 + $0x1d8] sm:$0xff] %v5905_v17  ;;  %v5917_v43 = vmul.f32 %v15510_v38, %v15266_v24  ;;  %v5918_v40 = vmul.f32 %v18250_v54, %v18249_v25  ;;  %v5919_v52 = vmul.f32 %v15544_v48, %v18251_v16  ;;  %v18254_v24 = vld [vmem:[#allocation170_spill] sm:$0xff]  ;;  %v18258_v61 = vld [vmem:[#allocation196_spill] sm:$0xff] }
 0xf5f   : > { %8687 = vst [vmem:[%s11514_s23 + $0x1e0] sm:$0xff] %v5906_v41  ;;  %8688 = vst [vmem:[%s11514_s23 + $0x1e8] sm:$0xff] %v5907_v36  ;;  %v5920_v51 = vmul.f32 %v18253_v6, %v18252_v44  ;;  %v5921_v26 = vmul.f32 %v18255_v1, %v18254_v24  ;;  %v5922_v13 = vmul.f32 %v10643_v55, %v18256_v53  ;;  %v18259_v20 = vld [vmem:[#allocation169_spill] sm:$0xff] }
 0xf60   : > { %8689 = vst [vmem:[%s11514_s23 + $0x1f0] sm:$0xff] %v5908_v19  ;;  %8690 = vst [vmem:[%s11514_s23 + $0x1f8] sm:$0xff] %v5909_v42  ;;  %v5923_v23 = vmul.f32 %v10645_v8, %v18257_v58  ;;  %v5924_v60 = vmul.f32 %v15556_v32, %v18258_v61  ;;  %v5925_v59 = vmul.f32 %v15558_v21, %v18259_v20 }
 0xf61   : > { %8691 = vst [vmem:[%s11514_s23 + $0x380] sm:$0xff] %v5910_v46  ;;  %8692 = vst [vmem:[%s11514_s23 + $0x388] sm:$0xff] %v5911_v15 }
 0xf62   : > { %8693 = vst [vmem:[%s11514_s23 + $0x390] sm:$0xff] %v5912_v62  ;;  %8694 = vst [vmem:[%s11514_s23 + $0x398] sm:$0xff] %v5913_v12 }
 0xf63   : > { %8695 = vst [vmem:[%s11514_s23 + $0x3a0] sm:$0xff] %v5914_v11  ;;  %8696 = vst [vmem:[%s11514_s23 + $0x3a8] sm:$0xff] %v5915_v14 }
 0xf64   : > { %8697 = vst [vmem:[%s11514_s23 + $0x3b0] sm:$0xff] %v5916_v22  ;;  %8698 = vst [vmem:[%s11514_s23 + $0x3b8] sm:$0xff] %v5917_v43 }
 0xf65   : > { %8699 = vst [vmem:[%s11514_s23 + $0x3c0] sm:$0xff] %v5918_v40  ;;  %8700 = vst [vmem:[%s11514_s23 + $0x3c8] sm:$0xff] %v5919_v52 }
 0xf66   : > { %8701 = vst [vmem:[%s11514_s23 + $0x3d0] sm:$0xff] %v5920_v51  ;;  %8702 = vst [vmem:[%s11514_s23 + $0x3d8] sm:$0xff] %v5921_v26 }
 0xf67   : > { %8703 = vst [vmem:[%s11514_s23 + $0x3e0] sm:$0xff] %v5922_v13  ;;  %8704 = vst [vmem:[%s11514_s23 + $0x3e8] sm:$0xff] %v5923_v23 }
 0xf68   : > { %8705 = vst [vmem:[%s11514_s23 + $0x3f0] sm:$0xff] %v5924_v60  ;;  %8706 = vst [vmem:[%s11514_s23 + $0x3f8] sm:$0xff] %v5925_v59 }
 0xf69 PF: > { %v18260_v7 = vld [vmem:[#allocation167_spill] sm:$0xff]  ;;  %v18261_v31 = vld [vmem:[#allocation166_spill] sm:$0xff]  ;;  %v18263_v32 = vld [vmem:[#allocation193_spill] sm:$0xff]  ;;  %s15679_s5 = sshll.u32 %s11200_s16, 7  ;;  %v18266_v4 = vmov 0   ;;  %s6218_s4 = scalar_lea.vmem %s17248_s6, %s11200_s16 }
 0xf6a   : > { %v18262_v50 = vpack.c.bf16 %v18260_v7, %v18261_v31  ;;  %v18264_v35 = vld [vmem:[#allocation192_spill] sm:$0xff]  ;;  %7107 = vmatprep.mubr.bf16.mxu0 %v18266_v4  ;;  %s15683_s26 = scalar_lea.vmem [#allocation10], %s15679_s5  ;;  %v18268_v55 = vld [vmem:[#allocation207_spill] sm:$0xff]  ;;  %v18270_v5 = vld [vmem:[#allocation206_spill] sm:$0xff]  ;;  %s16056_s22 = scalar_lea.vmem [#allocation11], %s15679_s5 }
 0xf6b   : > { %v18265_v56 = vpack.c.bf16 %v18263_v32, %v18264_v35  ;;  %v10646_v18 = vld [vmem:[%s15683_s26 + $0x78] sm:$0xff]   ;;  %v18267_v38 = vld [vmem:[#allocation208_spill] sm:$0xff]  ;;  %v10648_v9 = vld [vmem:[%s15683_s26 + $0x70] sm:$0xff]   ;;  %s18505_s10 = sld [smem:[#allocation251_spill]]  ;;  %s8276_s25 = sshll.u32 %s11514_s23, 4  ;;  %s17107_s25 = int_to_ptr.vmem [resolvable:$true] %s8276_s25 }
 0xf6c   : > { %6023 = vrot.lane.b32.xlu0 %v18262_v50, %s11236_s3  ;;  %v10647_v33 = vld [vmem:[%s15683_s26 + $0x38] sm:$0xff]   ;;  %v18269_v63 = vpack.c.bf16 %v18267_v38, %v18268_v55  ;;  %v18271_v8 = vld [vmem:[#allocation232_spill] sm:$0xff]  ;;  %9040 = vmatprep.subr.bf16.mxu1 %v10646_v18  ;;  %v10649_v47 = vld [vmem:[%s15683_s26 + $0x30] sm:$0xff]   ;;  %s18506_s1 = sld [smem:[#allocation252_spill]]  ;;  %s8245_s11 = scalar_lea.sflag [#allocation16], %s11489_s24 }
 0xf6d   : > { %6025 = vrot.lane.b32.xlu1 %v18265_v56, %s11236_s3  ;;  %v18272_v48 = vpack.c.bf16 %v18270_v5, %v18271_v8  ;;  %9041 = vmatpush3.bf16.msra.mxu1 %v10647_v33  ;;  %v10650_v21 = vld [vmem:[%s15683_s26 + $0x68] sm:$0xff]   ;;  %v18276_v28 = vld [vmem:[#allocation147_spill] sm:$0xff]  ;;  %v18277_v39 = vld [vmem:[#allocation102_spill] sm:$0xff]  ;;  %s11078_s12 = scalar_lea.vmem %s17107_s25, 16384  ;;  %s11237_s23 = smov [#allocation15]  }
 0xf6e   : > { %9042 = vmatprep.subr.bf16.mxu1 %v10648_v9  ;;  %v18273_v2 = vld [vmem:[#allocation165_spill] sm:$0xff]  ;;  %v18274_v27 = vld [vmem:[#allocation164_spill] sm:$0xff]  ;;  %v18278_v0 = vpack.c.bf16 %v18276_v28, %v18277_v39  ;;  %v18279_v3 = vld [vmem:[#allocation191_spill] sm:$0xff]  ;;  %p11079_p6 = scmp.ne.s32.totalorder %s17107_s25, %s11078_s12 }
 0xf6f   : > { %v18275_v37 = vpack.c.bf16 %v18273_v2, %v18274_v27  ;;  %v10651_v34 = vld [vmem:[%s15683_s26 + $0x28] sm:$0xff]   ;;  %v10652_v45 = vld [vmem:[%s15683_s26 + $0x60] sm:$0xff]   ;;  %v18280_v17 = vld [vmem:[#allocation190_spill] sm:$0xff] }
 0xf70   : > { %5975 = vrot.lane.b32.xlu0 %v18269_v63, %s11236_s3  ;;  %v18281_v41 = vpack.c.bf16 %v18279_v3, %v18280_v17  ;;  %v18282_v36 = vld [vmem:[#allocation99_spill] sm:$0xff]  ;;  %v18283_v19 = vld [vmem:[#allocation209_spill] sm:$0xff]  ;;  %v18286_v12 = vld [vmem:[#allocation162_spill] sm:$0xff]  ;;  %p11080_p2 = pnand %p11079_p6, %p11454_p11 }
 0xf71   : > { %5977 = vrot.lane.b32.xlu1 %v18272_v48, %s11236_s3  ;;  %9043 = vmatpush3.bf16.msra.mxu1 %v10649_v47  ;;  %v18284_v42 = vpack.c.bf16 %v18282_v36, %v18283_v19  ;;  %v10653_v46 = vld [vmem:[%s15683_s26 + $0x20] sm:$0xff]   ;;  %v10654_v15 = vld [vmem:[%s15683_s26 + $0x58] sm:$0xff]   ;;  %v10656_v54 = vld [vmem:[%s15683_s26 + $0x50] sm:$0xff]   ;;  %s6515_s21 = scalar_lea.vmem %s18505_s10, %s11200_s16  ;;  %s18511_s10 = sld [smem:[#allocation256_spill]] }
 0xf72   : > { %9044 = vmatprep.subr.bf16.mxu1 %v10650_v21  ;;  %v18285_v62 = vld [vmem:[#allocation163_spill] sm:$0xff]  ;;  %v18288_v14 = vld [vmem:[#allocation116_spill] sm:$0xff]  ;;  %v18289_v22 = vld [vmem:[#allocation154_spill] sm:$0xff]  ;;  %p11081_p4 = pneg %p11080_p2 }
 0xf73   : > { %v18287_v11 = vpack.c.bf16 %v18285_v62, %v18286_v12  ;;  %v18290_v43 = vpack.c.bf16 %v18288_v14, %v18289_v22  ;;  %v10655_v25 = vld [vmem:[%s15683_s26 + $0x18] sm:$0xff]   ;;  %v18291_v40 = vld [vmem:[#allocation189_spill] sm:$0xff]  ;;  %v18292_v16 = vld [vmem:[#allocation188_spill] sm:$0xff] }
 0xf74   : > { %6027 = vrot.lane.b32.xlu0 %v18275_v37, %s11236_s3  ;;  %v18293_v52 = vpack.c.bf16 %v18291_v40, %v18292_v16  ;;  %v18294_v44 = vld [vmem:[#allocation109_spill] sm:$0xff]  ;;  %v18295_v6 = vld [vmem:[#allocation150_spill] sm:$0xff]  ;;  %v18297_v26 = vld [vmem:[#allocation155_spill] sm:$0xff] }
 0xf75   : > { %5979 = vrot.lane.b32.xlu1 %v18278_v0, %s11236_s3  ;;  %9045 = vmatpush3.bf16.msra.mxu1 %v10651_v34  ;;  %v18296_v51 = vpack.c.bf16 %v18294_v44, %v18295_v6  ;;  %v10657_v24 = vld [vmem:[%s15683_s26 + $0x10] sm:$0xff]   ;;  %v10658_v1 = vld [vmem:[%s15683_s26 + $0x48] sm:$0xff]   ;;  %v10660_v20 = vld [vmem:[%s15683_s26 + $0x40] sm:$0xff]   ;;  %v18348_v44 = vpack.c.bf16 %v15564_v49, %v15561_v29 }
 0xf76   : > { %9046 = vmatprep.subr.bf16.mxu1 %v10652_v45  ;;  %v18298_v53 = vld [vmem:[#allocation184_spill] sm:$0xff]  ;;  %v18300_v58 = vld [vmem:[#allocation113_spill] sm:$0xff]  ;;  %v18303_v59 = vld [vmem:[#allocation159_spill] sm:$0xff] }
 0xf77   : > { %v18299_v13 = vpack.c.bf16 %v18297_v26, %v18298_v53  ;;  %v18301_v23 = vld [vmem:[#allocation121_spill] sm:$0xff]  ;;  %v18304_v7 = vld [vmem:[#allocation186_spill] sm:$0xff]  ;;  %v10661_v56 = vld [vmem:[%s15683_s26] sm:$0xff]  }
 0xf78   : > { %6029 = vrot.lane.b32.xlu0 %v18281_v41, %s11236_s3  ;;  %v18302_v61 = vpack.c.bf16 %v18300_v58, %v18301_v23  ;;  %v10659_v60 = vld [vmem:[%s15683_s26 + $0x8] sm:$0xff]   ;;  %v18305_v31 = vpack.c.bf16 %v18303_v59, %v18304_v7  ;;  %v18307_v32 = vld [vmem:[#allocation158_spill] sm:$0xff]  ;;  %v18313_v63 = vld [vmem:[#allocation67_spill] sm:$0xff]  ;;  %s16359_s26 = scalar_lea.vmem [#allocation13], %s15679_s5  ;;  %s8729_s5 = sshll.u32 %s11200_s16, 1 }
 0xf79   : > { %5981 = vrot.lane.b32.xlu1 %v18284_v42, %s11236_s3  ;;  %9047 = vmatpush3.bf16.msra.mxu1 %v10653_v46  ;;  %v18306_v50 = vld [vmem:[#allocation161_spill] sm:$0xff]  ;;  %v18315_v8 = vld [vmem:[#allocation160_spill] sm:$0xff]  ;;  %v18316_v48 = vld [vmem:[#allocation187_spill] sm:$0xff] }
 0xf7a   : > { %9048 = vmatprep.subr.bf16.mxu1 %v10654_v15  ;;  %v18308_v35 = vpack.c.bf16 %v18306_v50, %v18307_v32  ;;  %v18309_v18 = vld [vmem:[#allocation157_spill] sm:$0xff]  ;;  %v18317_v9 = vpack.c.bf16 %v18315_v8, %v18316_v48  ;;  %v18322_v37 = vld [vmem:[#allocation151_spill] sm:$0xff]  ;;  %v18324_v39 = vld [vmem:[#allocation66_spill] sm:$0xff] }
 0xf7b   : > { %v18310_v33 = vld [vmem:[#allocation185_spill] sm:$0xff]  ;;  %v18327_v45 = vld [vmem:[#allocation182_spill] sm:$0xff]  ;;  %v18328_v3 = vld [vmem:[#allocation179_spill] sm:$0xff] }
 0xf7c   : > { %6031 = vrot.lane.b32.xlu0 %v18287_v11, %s11236_s3  ;;  %v18311_v38 = vpack.c.bf16 %v18309_v18, %v18310_v33  ;;  %v18312_v55 = vld [vmem:[#allocation61_spill] sm:$0xff]  ;;  %v18329_v17 = vpack.c.bf16 %v18327_v45, %v18328_v3  ;;  %v18330_v41 = vld [vmem:[#allocation60_spill] sm:$0xff]  ;;  %v18331_v36 = vld [vmem:[#allocation106_spill] sm:$0xff] }
 0xf7d   : > { %5983 = vrot.lane.b32.xlu1 %v18290_v43, %s11236_s3  ;;  %9049 = vmatpush3.bf16.msra.mxu1 %v10655_v25  ;;  %v18314_v5 = vpack.c.bf16 %v18312_v55, %v18313_v63  ;;  %v18318_v47 = vld [vmem:[#allocation73_spill] sm:$0xff]  ;;  %v18332_v19 = vpack.c.bf16 %v18330_v41, %v18331_v36  ;;  %v18335_v15 = vld [vmem:[#allocation131_spill] sm:$0xff]  ;;  %v18338_v11 = vld [vmem:[#allocation132_spill] sm:$0xff] }
 0xf7e   : > { %9050 = vmatprep.subr.bf16.mxu1 %v10656_v54  ;;  %v18319_v21 = vld [vmem:[#allocation117_spill] sm:$0xff]  ;;  %v18336_v62 = vld [vmem:[#allocation83_spill] sm:$0xff]  ;;  %v18341_v43 = vld [vmem:[#allocation126_spill] sm:$0xff] }
 0xf7f   : > { %v18320_v2 = vpack.c.bf16 %v18318_v47, %v18319_v21  ;;  %v18321_v27 = vld [vmem:[#allocation153_spill] sm:$0xff]  ;;  %v18337_v12 = vpack.c.bf16 %v18335_v15, %v18336_v62  ;;  %v18342_v25 = vld [vmem:[#allocation78_spill] sm:$0xff]  ;;  %v18349_v6 = vld [vmem:[#allocation136_spill] sm:$0xff] }
 0xf80   : > { %6033 = vrot.lane.b32.xlu0 %v18293_v52, %s11236_s3  ;;  %v18323_v28 = vpack.c.bf16 %v18321_v27, %v18322_v37  ;;  %v18325_v0 = vld [vmem:[#allocation105_spill] sm:$0xff]  ;;  %v18343_v54 = vpack.c.bf16 %v18341_v43, %v18342_v25  ;;  %v18352_v26 = vld [vmem:[#allocation115_spill] sm:$0xff]  ;;  %v18364_v33 = vld [vmem:[#allocation110_spill] sm:$0xff] }
 0xf81   : > { %5985 = vrot.lane.b32.xlu1 %v18296_v51, %s11236_s3  ;;  %9051 = vmatpush3.bf16.msra.mxu1 %v10657_v24  ;;  %v18326_v34 = vpack.c.bf16 %v18324_v39, %v18325_v0  ;;  %v18333_v42 = vld [vmem:[#allocation133_spill] sm:$0xff]  ;;  %v18350_v51 = vld [vmem:[#allocation88_spill] sm:$0xff]  ;;  %v18361_v32 = vld [vmem:[#allocation211_spill] sm:$0xff] }
 0xf82   : > { %9052 = vmatprep.subr.bf16.mxu1 %v10658_v1  ;;  %v18334_v46 = vpack.c.bf16 %v15552_v10, %v18333_v42  ;;  %v18339_v14 = vld [vmem:[#allocation125_spill] sm:$0xff]  ;;  %v18344_v10 = vpack.c.bf16 %v15570_v57, %v15566_v30  ;;  %v18351_v24 = vpack.c.bf16 %v18349_v6, %v18350_v51  ;;  %v18371_v27 = vld [vmem:[#allocation108_spill] sm:$0xff]  ;;  %v18374_v45 = vld [vmem:[#allocation214_spill] sm:$0xff] }
 0xf83   : > { %v18340_v22 = vpack.c.bf16 %v18338_v11, %v18339_v14  ;;  %v18345_v40 = vld [vmem:[#allocation141_spill] sm:$0xff]  ;;  %v18376_v41 = vld [vmem:[#allocation127_spill] sm:$0xff]  ;;  %v18377_v36 = vld [vmem:[#allocation124_spill] sm:$0xff] }
 0xf84   : > { %6035 = vrot.lane.b32.xlu0 %v18299_v13, %s11236_s3  ;;  %v18346_v16 = vld [vmem:[#allocation93_spill] sm:$0xff]  ;;  %v18383_v43 = vld [vmem:[#allocation122_spill] sm:$0xff] }
 0xf85   : > { %5987 = vrot.lane.b32.xlu1 %v18302_v61, %s11236_s3  ;;  %9053 = vmatpush3.bf16.msra.mxu1 %v10659_v60  ;;  %v18347_v52 = vpack.c.bf16 %v18345_v40, %v18346_v16  ;;  %v18353_v53 = vld [vmem:[#allocation69_spill] sm:$0xff]  ;;  %v18356_v61 = vld [vmem:[#allocation123_spill] sm:$0xff]  ;;  %v18388_v51 = vld [vmem:[#allocation94_spill] sm:$0xff] }
 0xf86   : > { %9054 = vmatprep.subr.bf16.mxu1 %v10660_v20  ;;  %v18354_v30 = vpack.c.bf16 %v18352_v26, %v18353_v53  ;;  %v18355_v23 = vld [vmem:[#allocation65_spill] sm:$0xff]  ;;  %v18359_v20 = vld [vmem:[#allocation212_spill] sm:$0xff]  ;;  %v18385_v16 = vld [vmem:[#allocation219_spill] sm:$0xff] }
 0xf87   : > { %v18357_v60 = vpack.c.bf16 %v18355_v23, %v18356_v61  ;;  %v18358_v29 = vld [vmem:[#allocation213_spill] sm:$0xff] }
 0xf88   : > { %6037 = vrot.lane.b32.xlu0 %v18305_v31, %s11236_s3  ;;  %v18360_v59 = vpack.c.bf16 %v18358_v29, %v18359_v20  ;;  %v18367_v48 = vld [vmem:[#allocation217_spill] sm:$0xff] }
 0xf89   : > { %5989 = vrot.lane.b32.xlu1 %v18308_v35, %s11236_s3  ;;  %9055 = vmatpush3.bf16.msra.mxu1 %v10661_v56  ;;  %v18362_v35 = vld [vmem:[#allocation210_spill] sm:$0xff]  ;;  %v18379_v62 = vld [vmem:[#allocation221_spill] sm:$0xff] }
 0xf8a   : > { %v18363_v56 = vpack.c.bf16 %v18361_v32, %v18362_v35  ;;  %v18394_v61 = vld [vmem:[#allocation137_spill] sm:$0xff]  ;;  %v18400_v35 = vld [vmem:[#allocation104_spill] sm:$0xff] }
 0xf8c   : > { %6039 = vrot.lane.b32.xlu0 %v18311_v38, %s11236_s3  ;;  %v18365_v38 = vld [vmem:[#allocation68_spill] sm:$0xff] }
 0xf8d   : > { %5991 = vrot.lane.b32.xlu1 %v18314_v5, %s11236_s3  ;;  %v18366_v55 = vpack.c.bf16 %v18364_v33, %v18365_v38 }
 0xf90   : > { %6041 = vrot.lane.b32.xlu0 %v18317_v9, %s11236_s3  ;;  %v18368_v9 = vld [vmem:[#allocation216_spill] sm:$0xff] }
 0xf91   : > { %5993 = vrot.lane.b32.xlu1 %v18320_v2, %s11236_s3  ;;  %v18369_v47 = vpack.c.bf16 %v18367_v48, %v18368_v9  ;;  %v18370_v2 = vld [vmem:[#allocation64_spill] sm:$0xff]  ;;  %v18406_v9 = vld [vmem:[#allocation59_spill] sm:$0xff] }
 0xf92   : > { %v18372_v37 = vpack.c.bf16 %v18370_v2, %v18371_v27 }
 0xf94   : > { %6043 = vrot.lane.b32.xlu0 %v18323_v28, %s11236_s3 }
 0xf95   : > { %5995 = vrot.lane.b32.xlu1 %v18326_v34, %s11236_s3  ;;  %v18373_v34 = vld [vmem:[#allocation215_spill] sm:$0xff] }
 0xf96   : > { %v18375_v3 = vpack.c.bf16 %v18373_v34, %v18374_v45  ;;  %v18412_v45 = vld [vmem:[#allocation118_spill] sm:$0xff] }
 0xf98   : > { %6045 = vrot.lane.b32.xlu0 %v18329_v17, %s11236_s3 }
 0xf99   : > { %5997 = vrot.lane.b32.xlu1 %v18332_v19, %s11236_s3  ;;  %v18378_v19 = vpack.c.bf16 %v18376_v41, %v18377_v36 }
 0xf9c   : > { %6047 = vrot.lane.b32.xlu0 %v18334_v46, %s11236_s3 }
 0xf9d   : > { %5999 = vrot.lane.b32.xlu1 %v18337_v12, %s11236_s3  ;;  %v18380_v12 = vld [vmem:[#allocation220_spill] sm:$0xff] }
 0xf9e   : > { %v18381_v11 = vpack.c.bf16 %v18379_v62, %v18380_v12  ;;  %v18418_v12 = vld [vmem:[#allocation70_spill] sm:$0xff] }
 0xfa0   : > { %6049 = vrot.lane.b32.xlu0 %v18340_v22, %s11236_s3  ;;  %v18382_v22 = vld [vmem:[#allocation76_spill] sm:$0xff] }
 0xfa1   : > { %6001 = vrot.lane.b32.xlu1 %v18343_v54, %s11236_s3  ;;  %v18384_v25 = vpack.c.bf16 %v18382_v22, %v18383_v43 }
 0xfa4   : > { %6051 = vrot.lane.b32.xlu0 %v18344_v10, %s11236_s3 }
 0xfa5   : > { %6003 = vrot.lane.b32.xlu1 %v18347_v52, %s11236_s3  ;;  %v18386_v52 = vld [vmem:[#allocation218_spill] sm:$0xff] }
 0xfa8   : > { %6053 = vrot.lane.b32.xlu0 %v18348_v44, %s11236_s3  ;;  %v18387_v44 = vpack.c.bf16 %v18385_v16, %v18386_v52  ;;  %v18424_v52 = vld [vmem:[#allocation89_spill] sm:$0xff] }
 0xfa9   : > { %6005 = vrot.lane.b32.xlu1 %v18351_v24, %s11236_s3  ;;  %v18389_v24 = vld [vmem:[#allocation91_spill] sm:$0xff]  ;;  %s6517_s3 = scalar_lea.vmem %s18506_s1, %s11200_s16 }
 0xfde   : > { %v6024_v1 = vpop.permute.xlu0 %6023 }
 0xfdf   : > { %v6121_v57 = vsel %vm2087_vm0, %v18354_v30, %v6024_v1  ;;  %v6026_v13 = vpop.permute.xlu1 %6025  ;;  %v18390_v1 = vpack.c.bf16 %v18388_v51, %v18389_v24 }
 0xfe0   : > { %6354 = vmatprep.mubr.bf16.mxu1 %v6121_v57  ;;  %v6125_v49 = vsel %vm2087_vm0, %v18357_v60, %v6026_v13  ;;  %v18391_v57 = vld [vmem:[#allocation242_spill] sm:$0xff]  ;;  %v18392_v13 = vld [vmem:[#allocation241_spill] sm:$0xff] }
 0xfe1   : > { %v18395_v60 = vld [vmem:[#allocation134_spill] sm:$0xff] }
 0xfe2   : > { %v5976_v58 = vpop.permute.xlu0 %5975 }
 0xfe3   : > { %v6057_v7 = vsel %vm2087_vm0, %v18360_v59, %v5976_v58  ;;  %v5978_v31 = vpop.permute.xlu1 %5977  ;;  %v18393_v58 = vpack.c.bf16 %v18391_v57, %v18392_v13  ;;  %v18430_v13 = vld [vmem:[#allocation129_spill] sm:$0xff] }
 0xfe4   : > { %6355 = vmatmul.mubr.bf16.vlgmr.msra.gmra.mxu1 %v6057_v7  ;;  %v6061_v18 = vsel %vm2087_vm0, %v18363_v56, %v5978_v31  ;;  %v18397_v7 = vld [vmem:[#allocation240_spill] sm:$0xff]  ;;  %v18398_v31 = vld [vmem:[#allocation238_spill] sm:$0xff]  ;;  %v18401_v56 = vld [vmem:[#allocation63_spill] sm:$0xff] }
 0xfe5   : > { %6362 = vmatprep.mubr.bf16.mxu1 %v6125_v49  ;;  %v18396_v49 = vpack.c.bf16 %v18394_v61, %v18395_v60 }
 0xfe6   : > { %v6028_v50 = vpop.permute.xlu0 %6027 }
 0xfe7   : > { %v6129_v63 = vsel %vm2087_vm0, %v18366_v55, %v6028_v50  ;;  %v5980_v5 = vpop.permute.xlu1 %5979  ;;  %v18399_v50 = vpack.c.bf16 %v18397_v7, %v18398_v31  ;;  %v18436_v31 = vld [vmem:[#allocation100_spill] sm:$0xff] }
 0xfe8   : > { %v6065_v21 = vsel %vm2087_vm0, %v18369_v47, %v5980_v5  ;;  %v18404_v5 = vld [vmem:[#allocation224_spill] sm:$0xff]  ;;  %v18407_v47 = vld [vmem:[#allocation111_spill] sm:$0xff] }
 0xfea   : > { %v6030_v8 = vpop.permute.xlu0 %6029 }
 0xfeb   : > { %v6133_v28 = vsel %vm2087_vm0, %v18372_v37, %v6030_v8  ;;  %v5982_v39 = vpop.permute.xlu1 %5981 }
 0xfec   : > { %6363 = vmatmul.mubr.bf16.gmra.mxu1 %v6061_v18  ;;  %v6069_v17 = vsel %vm2087_vm0, %v18375_v3, %v5982_v39  ;;  %v18402_v18 = vpack.c.bf16 %v18400_v35, %v18401_v56  ;;  %v18410_v39 = vld [vmem:[#allocation222_spill] sm:$0xff] }
 0xfed   : > { %6370 = vmatprep.mubr.bf16.mxu1 %v6129_v63  ;;  %v18403_v63 = vld [vmem:[#allocation225_spill] sm:$0xff]  ;;  %v18413_v3 = vld [vmem:[#allocation74_spill] sm:$0xff] }
 0xfee   : > { %v6032_v0 = vpop.permute.xlu0 %6031  ;;  %v18405_v8 = vpack.c.bf16 %v18403_v63, %v18404_v5  ;;  %v18442_v5 = vld [vmem:[#allocation142_spill] sm:$0xff] }
 0xfef   : > { %v6137_v42 = vsel %vm2087_vm0, %v18378_v19, %v6032_v0  ;;  %v5984_v46 = vpop.permute.xlu1 %5983 }
 0xff0   : > { %v6073_v14 = vsel %vm2087_vm0, %v18381_v11, %v5984_v46  ;;  %v18416_v46 = vld [vmem:[#allocation229_spill] sm:$0xff]  ;;  %v18419_v11 = vld [vmem:[#allocation114_spill] sm:$0xff] }
 0xff2   : > { %v6034_v15 = vpop.permute.xlu0 %6033 }
 0xff3   : > { %v6141_v54 = vsel %vm2087_vm0, %v18384_v25, %v6034_v15  ;;  %v5986_v10 = vpop.permute.xlu1 %5985 }
 0xff4   : > { %6371 = vmatmul.mubr.bf16.gmra.mxu1 %v6065_v21  ;;  %v6077_v6 = vsel %vm2087_vm0, %v18387_v44, %v5986_v10  ;;  %v18408_v21 = vpack.c.bf16 %v18406_v9, %v18407_v47  ;;  %v18422_v10 = vld [vmem:[#allocation227_spill] sm:$0xff]  ;;  %v18425_v44 = vld [vmem:[#allocation86_spill] sm:$0xff] }
 0xff5   : > { %6378 = vmatprep.mubr.bf16.mxu1 %v6133_v28  ;;  %v18409_v28 = vld [vmem:[#allocation223_spill] sm:$0xff] }
 0xff6   : > { %v6036_v40 = vpop.permute.xlu0 %6035  ;;  %v18411_v0 = vpack.c.bf16 %v18409_v28, %v18410_v39  ;;  %v15953_v39 = vld [vmem:[%s6218_s4] ss:$0 sm:$0xff]  ;;  %s18507_s4 = sld [smem:[#allocation254_spill]] }
 0xff7   : > { %v6145_v26 = vsel %vm2087_vm0, %v18390_v1, %v6036_v40  ;;  %v5988_v53 = vpop.permute.xlu1 %5987 }
 0xff8   : > { %v6081_v23 = vsel %vm2087_vm0, %v18393_v58, %v5988_v53  ;;  %v18428_v53 = vld [vmem:[#allocation237_spill] sm:$0xff]  ;;  %v18431_v58 = vld [vmem:[#allocation84_spill] sm:$0xff] }
 0xffa   : > { %v6038_v30 = vpop.permute.xlu0 %6037 }
 0xffb   : > { %v6149_v29 = vsel %vm2087_vm0, %v18396_v49, %v6038_v30  ;;  %v5990_v20 = vpop.permute.xlu1 %5989 }
 0xffc   : > { %6379 = vmatmul.mubr.bf16.gmra.mxu1 %v6069_v17  ;;  %v6085_v32 = vsel %vm2087_vm0, %v18399_v50, %v5990_v20  ;;  %v18414_v17 = vpack.c.bf16 %v18412_v45, %v18413_v3  ;;  %v18434_v20 = vld [vmem:[#allocation234_spill] sm:$0xff]  ;;  %v18437_v50 = vld [vmem:[#allocation96_spill] sm:$0xff] }
 0xffd   : > { %6386 = vmatprep.mubr.bf16.mxu1 %v6137_v42  ;;  %v18415_v42 = vld [vmem:[#allocation230_spill] sm:$0xff] }
 0xffe   : > { %v6040_v59 = vpop.permute.xlu0 %6039  ;;  %v18417_v15 = vpack.c.bf16 %v18415_v42, %v18416_v46 }
 0xfff   : > { %v6153_v33 = vsel %vm2087_vm0, %v18402_v18, %v6040_v59  ;;  %v5992_v38 = vpop.permute.xlu1 %5991 }
0x1000   : > { %v6089_v48 = vsel %vm2087_vm0, %v18405_v8, %v5992_v38  ;;  %v18440_v38 = vld [vmem:[#allocation245_spill] sm:$0xff]  ;;  %v18443_v8 = vld [vmem:[#allocation139_spill] sm:$0xff] }
0x1002   : > { %v6042_v55 = vpop.permute.xlu0 %6041 }
0x1003   : > { %v6157_v2 = vsel %vm2087_vm0, %v18408_v21, %v6042_v55  ;;  %v5994_v27 = vpop.permute.xlu1 %5993  ;;  %v18445_v21 = vld [vmem:[#allocation244_spill] sm:$0xff] }
0x1004   : > { %6387 = vmatmul.mubr.bf16.gmra.mxu1 %v6073_v14  ;;  %v6093_v34 = vsel %vm2087_vm0, %v18411_v0, %v5994_v27  ;;  %v18420_v14 = vpack.c.bf16 %v18418_v12, %v18419_v11  ;;  %v18449_v12 = vld [vmem:[#allocation27_spill] sm:$0xff] }
0x1005   : > { %6394 = vmatprep.mubr.bf16.mxu1 %v6141_v54  ;;  %v18421_v54 = vld [vmem:[#allocation228_spill] sm:$0xff] }
0x1006   : > { %v6044_v37 = vpop.permute.xlu0 %6043  ;;  %v18423_v40 = vpack.c.bf16 %v18421_v54, %v18422_v10 }
0x1007   : > { %v6161_v41 = vsel %vm2087_vm0, %v18414_v17, %v6044_v37  ;;  %v5996_v36 = vpop.permute.xlu1 %5995 }
0x1008   : > { %v6097_v62 = vsel %vm2087_vm0, %v18417_v15, %v5996_v36 }
0x100a   : > { %v6046_v19 = vpop.permute.xlu0 %6045 }
0x100b   : > { %v6165_v22 = vsel %vm2087_vm0, %v18420_v14, %v6046_v19  ;;  %v5998_v43 = vpop.permute.xlu1 %5997 }
0x100c   : > { %6395 = vmatmul.mubr.bf16.gmra.mxu1 %v6077_v6  ;;  %v6101_v16 = vsel %vm2087_vm0, %v18423_v40, %v5998_v43  ;;  %v18426_v6 = vpack.c.bf16 %v18424_v52, %v18425_v44 }
0x100d   : > { %6402 = vmatprep.mubr.bf16.mxu1 %v6145_v26  ;;  %v18427_v26 = vld [vmem:[#allocation239_spill] sm:$0xff] }
0x100e   : > { %v6048_v25 = vpop.permute.xlu0 %6047  ;;  %v18429_v30 = vpack.c.bf16 %v18427_v26, %v18428_v53  ;;  %v18452_v53 = vld [vmem:[#allocation29_spill] sm:$0xff] }
0x100f   : > { %v6169_v51 = vsel %vm2087_vm0, %v18426_v6, %v6048_v25  ;;  %v6000_v24 = vpop.permute.xlu1 %5999  ;;  %v18450_v25 = vld [vmem:[#allocation26_spill] sm:$0xff]  ;;  %v18451_v6 = vld [vmem:[#allocation28_spill] sm:$0xff] }
0x1010   : > { %v6105_v57 = vsel %vm2087_vm0, %v18429_v30, %v6000_v24 }
0x1012   : > { %v6050_v1 = vpop.permute.xlu0 %6049 }
0x1013   : > { %v6002_v60 = vpop.permute.xlu1 %6001 }
0x1014   : > { %6403 = vmatmul.mubr.bf16.gmra.mxu1 %v6081_v23  ;;  %v18432_v23 = vpack.c.bf16 %v18430_v13, %v18431_v58 }
0x1015   : > { %6410 = vmatprep.mubr.bf16.mxu1 %v6149_v29  ;;  %v18433_v29 = vld [vmem:[#allocation235_spill] sm:$0xff] }
0x1016   : > { %v6173_v61 = vsel %vm2087_vm0, %v18432_v23, %v6050_v1  ;;  %v6052_v49 = vpop.permute.xlu0 %6051  ;;  %v18435_v59 = vpack.c.bf16 %v18433_v29, %v18434_v20 }
0x1017   : > { %v6004_v56 = vpop.permute.xlu1 %6003 }
0x1018   : > { %v6109_v7 = vsel %vm2087_vm0, %v18435_v59, %v6002_v60  ;;  %v18453_v60 = vld [vmem:[#allocation30_spill] sm:$0xff] }
0x101a   : > { %v6054_v18 = vpop.permute.xlu0 %6053 }
0x101b   : > { %v6006_v47 = vpop.permute.xlu1 %6005 }
0x101c   : > { %6411 = vmatmul.mubr.bf16.gmra.mxu1 %v6085_v32  ;;  %v18438_v32 = vpack.c.bf16 %v18436_v31, %v18437_v50 }
0x101d   : > { %6418 = vmatprep.mubr.bf16.mxu1 %v6153_v33  ;;  %v18439_v33 = vld [vmem:[#allocation246_spill] sm:$0xff] }
0x101e   : > { %v6177_v35 = vsel %vm2087_vm0, %v18438_v32, %v6052_v49  ;;  %v18441_v55 = vpack.c.bf16 %v18439_v33, %v18440_v38  ;;  %v18455_v33 = vld [vmem:[#allocation32_spill] sm:$0xff] }
0x1020   : > { %v6113_v63 = vsel %vm2087_vm0, %v18441_v55, %v6004_v56 }
0x1024   : > { %6419 = vmatmul.mubr.bf16.gmra.mxu1 %v6089_v48  ;;  %v18444_v48 = vpack.c.bf16 %v18442_v5, %v18443_v8  ;;  %v18457_v8 = vld [vmem:[#allocation33_spill] sm:$0xff] }
0x1025   : > { %6426 = vmatprep.mubr.bf16.mxu1 %v6157_v2  ;;  %v18446_v2 = vld [vmem:[#allocation243_spill] sm:$0xff] }
0x1026   : > { %v6181_v9 = vsel %vm2087_vm0, %v18444_v48, %v6054_v18  ;;  %v18447_v27 = vpack.c.bf16 %v18445_v21, %v18446_v2 }
0x1028   : > { %v6117_v37 = vsel %vm2087_vm0, %v18447_v27, %v6006_v47  ;;  %v18459_v27 = vld [vmem:[#allocation34_spill] sm:$0xff] }
0x102c   : > { %6427 = vmatmul.mubr.bf16.gmra.mxu1 %v6093_v34 }
0x102d   : > { %6434 = vmatprep.mubr.bf16.mxu1 %v6161_v41  ;;  %v18448_v41 = vld [vmem:[#allocation25_spill] sm:$0xff] }
0x1034   : > { %6435 = vmatmul.mubr.bf16.gmra.mxu1 %v6097_v62 }
0x1035   : > { %6442 = vmatprep.mubr.bf16.mxu1 %v6165_v22 }
0x103c   : > { %6443 = vmatmul.mubr.bf16.gmra.mxu1 %v6101_v16 }
0x103d   : > { %6450 = vmatprep.mubr.bf16.mxu1 %v6169_v51 }
0x1044   : > { %6451 = vmatmul.mubr.bf16.gmra.mxu1 %v6105_v57 }
0x1045   : > { %6458 = vmatprep.mubr.bf16.mxu1 %v6173_v61 }
0x104c   : > { %6459 = vmatmul.mubr.bf16.gmra.mxu1 %v6109_v7  ;;  %v18454_v7 = vld [vmem:[#allocation31_spill] sm:$0xff] }
0x104d   : > { %6466 = vmatprep.mubr.bf16.mxu1 %v6177_v35 }
0x1054   : > { %6467 = vmatmul.mubr.bf16.gmra.mxu1 %v6113_v63 }
0x1055   : > { %6474 = vmatprep.mubr.bf16.mxu1 %v6181_v9 }
0x105c   : > { %6475 = vmatmul.mubr.bf16.gmra.mxu1 %v6117_v37 }
0x10a4   : > { %v9056_v28 = vpop.f32.mrf.mxu1 }
0x10a6   : > { %v9057_v0 = vpop.f32.mrf.mxu1 }
0x10a7   : > { %v9058_v34 = vadd.f32 %v9057_v0, %v9056_v28 }
0x10a8   : > { %v9059_v45 = vpop.f32.mrf.mxu1 }
0x10a9   : > { %v6357_v3 = vadd.f32 %v9058_v34, %v15953_v39 }
0x10aa   : > { %v9060_v17 = vpop.f32.mrf.mxu1 }
0x10ab   : > { %v15957_v36 = vadd.f32 %v6357_v3, %v18448_v41  ;;  %v9061_v19 = vadd.f32 %v9060_v17, %v9059_v45  ;;  %v18461_v3 = vld [vmem:[#allocation35_spill] sm:$0xff] }
0x10ac   : > { %v9062_v42 = vpop.f32.mrf.mxu1 }
0x10ad   : > { %v6360_v46 = vadd.f32 %v9061_v19, %v15953_v39  ;;  %6519 = vadd.xlane.f32.xlu0 %v15957_v36 }
0x10ae   : > { %v9063_v15 = vpop.f32.mrf.mxu1 }
0x10af   : > { %v9064_v62 = vadd.f32 %v9063_v15, %v9062_v42  ;;  %v15962_v11 = vadd.f32 %v6360_v46, %v18449_v12  ;;  %v18463_v15 = vld [vmem:[#allocation36_spill] sm:$0xff] }
0x10b0   : > { %v9065_v14 = vpop.f32.mrf.mxu1 }
0x10b1   : > { %v6365_v22 = vadd.f32 %v9064_v62, %v15953_v39  ;;  %6521 = vadd.xlane.f32.xlu1 %v15962_v11 }
0x10b2   : > { %v9066_v43 = vpop.f32.mrf.mxu1 }
0x10b3   : > { %v15967_v54 = vadd.f32 %v6365_v22, %v18450_v25  ;;  %v9067_v10 = vadd.f32 %v9066_v43, %v9065_v14  ;;  %v18465_v25 = vld [vmem:[#allocation37_spill] sm:$0xff] }
0x10b4   : > { %v9068_v40 = vpop.f32.mrf.mxu1 }
0x10b5   : > { %v6368_v16 = vadd.f32 %v9067_v10, %v15953_v39  ;;  %6523 = vadd.xlane.f32.xlu0 %v15967_v54 }
0x10b6   : > { %v9069_v52 = vpop.f32.mrf.mxu1 }
0x10b7   : > { %v9070_v44 = vadd.f32 %v9069_v52, %v9068_v40  ;;  %v15972_v51 = vadd.f32 %v6368_v16, %v18451_v6  ;;  %v18467_v6 = vld [vmem:[#allocation38_spill] sm:$0xff] }
0x10b8   : > { %v9071_v24 = vpop.f32.mrf.mxu1 }
0x10b9   : > { %v6373_v1 = vadd.f32 %v9070_v44, %v15953_v39  ;;  %6525 = vadd.xlane.f32.xlu0 %v15972_v51 }
0x10ba   : > { %v9072_v26 = vpop.f32.mrf.mxu1 }
0x10bb   : > { %v15977_v30 = vadd.f32 %v6373_v1, %v18452_v53  ;;  %v9073_v57 = vadd.f32 %v9072_v26, %v9071_v24 }
0x10bc   : > { %v9074_v13 = vpop.f32.mrf.mxu1 }
0x10bd   : > { %v6376_v58 = vadd.f32 %v9073_v57, %v15953_v39  ;;  %6527 = vadd.xlane.f32.xlu1 %v15977_v30 }
0x10be   : > { %v9075_v23 = vpop.f32.mrf.mxu1 }
0x10bf   : > { %v9076_v61 = vadd.f32 %v9075_v23, %v9074_v13  ;;  %v15982_v49 = vadd.f32 %v6376_v58, %v18453_v60  ;;  %v18469_v13 = vld [vmem:[#allocation39_spill] sm:$0xff] }
0x10c0   : > { %v9077_v29 = vpop.f32.mrf.mxu1 }
0x10c1   : > { %v6381_v20 = vadd.f32 %v9076_v61, %v15953_v39  ;;  %6529 = vadd.xlane.f32.xlu0 %v15982_v49 }
0x10c2   : > { %v9078_v59 = vpop.f32.mrf.mxu1 }
0x10c3   : > { %v15987_v31 = vadd.f32 %v6381_v20, %v18454_v7  ;;  %v9079_v50 = vadd.f32 %v9078_v59, %v9077_v29  ;;  %v18471_v20 = vld [vmem:[#allocation40_spill] sm:$0xff] }
0x10c4   : > { %v9080_v32 = vpop.f32.mrf.mxu1 }
0x10c5   : > { %v6384_v35 = vadd.f32 %v9079_v50, %v15953_v39  ;;  %6531 = vadd.xlane.f32.xlu1 %v15987_v31 }
0x10c6   : > { %v9081_v56 = vpop.f32.mrf.mxu1 }
0x10c7   : > { %v9082_v18 = vadd.f32 %v9081_v56, %v9080_v32  ;;  %v15992_v38 = vadd.f32 %v6384_v35, %v18455_v33  ;;  %v18473_v56 = vld [vmem:[#allocation41_spill] sm:$0xff] }
0x10c8   : > { %v9083_v55 = vpop.f32.mrf.mxu1 }
0x10c9   : > { %18456 = vst [vmem:[#allocation79_spill] sm:$0xff] %v15992_v38  ;;  %v6389_v63 = vadd.f32 %v9082_v18, %v15953_v39  ;;  %6533 = vadd.xlane.f32.xlu0 %v15992_v38 }
0x10ca   : > { %v9084_v5 = vpop.f32.mrf.mxu1 }
0x10cb   : > { %v15997_v48 = vadd.f32 %v6389_v63, %v18457_v8  ;;  %v9085_v9 = vadd.f32 %v9084_v5, %v9083_v55  ;;  %v18475_v8 = vld [vmem:[#allocation42_spill] sm:$0xff] }
0x10cc   : > { %v9086_v47 = vpop.f32.mrf.mxu1 }
0x10cd   : > { %18458 = vst [vmem:[#allocation77_spill] sm:$0xff] %v15997_v48  ;;  %v6392_v21 = vadd.f32 %v9085_v9, %v15953_v39  ;;  %6535 = vadd.xlane.f32.xlu1 %v15997_v48 }
0x10ce   : > { %v9087_v2 = vpop.f32.mrf.mxu1 }
0x10cf   : > { %v16002_v37 = vadd.f32 %v6392_v21, %v18459_v27  ;;  %v9088_v28 = vadd.f32 %v9087_v2, %v9086_v47 }
0x10d0   : > { %v9089_v0 = vpop.f32.mrf.mxu1 }
0x10d1   : > { %18460 = vst [vmem:[#allocation81_spill] sm:$0xff] %v16002_v37  ;;  %v6397_v34 = vadd.f32 %v9088_v28, %v15953_v39  ;;  %6537 = vadd.xlane.f32.xlu0 %v16002_v37  ;;  %v18477_v28 = vld [vmem:[#allocation43_spill] sm:$0xff] }
0x10d2   : > { %v9090_v45 = vpop.f32.mrf.mxu1 }
0x10d3   : > { %v16007_v17 = vadd.f32 %v6397_v34, %v18461_v3  ;;  %v9091_v41 = vadd.f32 %v9090_v45, %v9089_v0  ;;  %v18479_v3 = vld [vmem:[#allocation44_spill] sm:$0xff] }
0x10d4   : > { %v9092_v19 = vpop.f32.mrf.mxu1 }
0x10d5   : > { %18462 = vst [vmem:[#allocation128_spill] sm:$0xff] %v16007_v17  ;;  %v6400_v42 = vadd.f32 %v9091_v41, %v15953_v39  ;;  %6539 = vadd.xlane.f32.xlu1 %v16007_v17 }
0x10d6   : > { %v9093_v46 = vpop.f32.mrf.mxu1 }
0x10d7   : > { %v16012_v62 = vadd.f32 %v6400_v42, %v18463_v15  ;;  %v9094_v12 = vadd.f32 %v9093_v46, %v9092_v19  ;;  %v10662_v46 = vld [vmem:[%s16056_s22 + $0x74] ss:$8 sps:$4 sm:$0xff]   ;;  %v10664_v15 = vld [vmem:[%s16056_s22 + $0x70] ss:$8 sps:$4 sm:$0xff]  }
0x10d8   : > { %v9095_v14 = vpop.f32.mrf.mxu1  ;;  %7075 = vmatprep.subr.bf16.mxu0 %v10662_v46 }
0x10d9   : > { %18464 = vst [vmem:[#allocation71_spill] sm:$0xff] %v16012_v62  ;;  %v6405_v22 = vadd.f32 %v9094_v12, %v15953_v39  ;;  %6541 = vadd.xlane.f32.xlu0 %v16012_v62  ;;  %7076 = vmatpush1.bf16.msra.mxu0 %v10664_v15 }
0x10da   : > { %v9096_v43 = vpop.f32.mrf.mxu1 }
0x10db   : > { %v16017_v10 = vadd.f32 %v6405_v22, %v18465_v25  ;;  %v9097_v40 = vadd.f32 %v9096_v43, %v9095_v14 }
0x10dc   : > { %v9098_v16 = vpop.f32.mrf.mxu1 }
0x10dd   : > { %18466 = vst [vmem:[#allocation75_spill] sm:$0xff] %v16017_v10  ;;  %v6408_v52 = vadd.f32 %v9097_v40, %v15953_v39  ;;  %6543 = vadd.xlane.f32.xlu1 %v16017_v10 }
0x10de   : > { %v9099_v44 = vpop.f32.mrf.mxu1 }
0x10df   : > { %v16022_v24 = vadd.f32 %v6408_v52, %v18467_v6  ;;  %v9100_v1 = vadd.f32 %v9099_v44, %v9098_v16 }
0x10e0   : > { %v9101_v26 = vpop.f32.mrf.mxu1 }
0x10e1   : > { %18468 = vst [vmem:[#allocation119_spill] sm:$0xff] %v16022_v24  ;;  %v6413_v53 = vadd.f32 %v9100_v1, %v15953_v39  ;;  %6545 = vadd.xlane.f32.xlu0 %v16022_v24 }
0x10e2   : > { %v9102_v57 = vpop.f32.mrf.mxu1 }
0x10e3   : > { %v16027_v58 = vadd.f32 %v6413_v53, %v18469_v13  ;;  %v9103_v23 = vadd.f32 %v9102_v57, %v9101_v26 }
0x10e4   : > { %v9104_v61 = vpop.f32.mrf.mxu1 }
0x10e5   : > { %18470 = vst [vmem:[#allocation98_spill] sm:$0xff] %v16027_v58  ;;  %v6416_v60 = vadd.f32 %v9103_v23, %v15953_v39  ;;  %6547 = vadd.xlane.f32.xlu1 %v16027_v58 }
0x10e6   : > { %v9105_v29 = vpop.f32.mrf.mxu1 }
0x10e7   : > { %v16032_v59 = vadd.f32 %v6416_v60, %v18471_v20  ;;  %v9106_v7 = vadd.f32 %v9105_v29, %v9104_v61 }
0x10e8   : > { %v9107_v50 = vpop.f32.mrf.mxu1 }
0x10e9   : > { %18472 = vst [vmem:[#allocation171_spill] sm:$0xff] %v16032_v59  ;;  %v6421_v32 = vadd.f32 %v9106_v7, %v15953_v39  ;;  %6549 = vadd.xlane.f32.xlu0 %v16032_v59 }
0x10ea   : > { %v9108_v35 = vpop.f32.mrf.mxu1 }
0x10eb   : > { %v16037_v18 = vadd.f32 %v6421_v32, %v18473_v56  ;;  %v9109_v33 = vadd.f32 %v9108_v35, %v9107_v50  ;;  %v18481_v35 = vld [vmem:[#allocation45_spill] sm:$0xff] }
0x10ec   : > { %v9110_v55 = vpop.f32.mrf.mxu1 }
0x10ed   : > { %18474 = vst [vmem:[#allocation146_spill] sm:$0xff] %v16037_v18  ;;  %v6424_v63 = vadd.f32 %v9109_v33, %v15953_v39  ;;  %6551 = vadd.xlane.f32.xlu1 %v16037_v18 }
0x10ee   : > { %v9111_v5 = vpop.f32.mrf.mxu1 }
0x10ef   : > { %v16042_v9 = vadd.f32 %v6424_v63, %v18475_v8  ;;  %v9112_v47 = vadd.f32 %v9111_v5, %v9110_v55 }
0x10f0   : > { %v9113_v21 = vpop.f32.mrf.mxu1 }
0x10f1   : > { %18476 = vst [vmem:[#allocation195_spill] sm:$0xff] %v16042_v9  ;;  %v6429_v2 = vadd.f32 %v9112_v47, %v15953_v39  ;;  %6553 = vadd.xlane.f32.xlu0 %v16042_v9 }
0x10f2   : > { %v9114_v27 = vpop.f32.mrf.mxu1 }
0x10f3   : > { %v16047_v0 = vadd.f32 %v6429_v2, %v18477_v28  ;;  %v9115_v34 = vadd.f32 %v9114_v27, %v9113_v21  ;;  %v18483_v28 = vld [vmem:[#allocation46_spill] sm:$0xff] }
0x10f4   : > { %v9116_v19 = vpop.f32.mrf.mxu1 }
0x10f5   : > { %18478 = vst [vmem:[#allocation173_spill] sm:$0xff] %v16047_v0  ;;  %v6432_v45 = vadd.f32 %v9115_v34, %v15953_v39  ;;  %6555 = vadd.xlane.f32.xlu1 %v16047_v0 }
0x10f6   : > { %v9117_v42 = vpop.f32.mrf.mxu1 }
0x10f7   : > { %v16052_v41 = vadd.f32 %v6432_v45, %v18479_v3  ;;  %v9118_v26 = vadd.f32 %v9117_v42, %v9116_v19 }
0x10f8   : > { %v9119_v12 = vpop.f32.mrf.mxu1 }
0x10f9   : > { %18480 = vst [vmem:[#allocation198_spill] sm:$0xff] %v16052_v41  ;;  %6557 = vadd.xlane.f32.xlu0 %v16052_v41  ;;  %v6437_v61 = vadd.f32 %v9118_v26, %v15953_v39  ;;  %v10665_v26 = vld [vmem:[%s16056_s22 + $0x64] ss:$8 sps:$4 sm:$0xff]  }
0x10fa   : > { %v9120_v14 = vpop.f32.mrf.mxu1  ;;  %7077 = vmatprep.subr.bf16.mxu0 %v10665_v26 }
0x10fb   : > { %v9121_v29 = vadd.f32 %v9120_v14, %v9119_v12  ;;  %v16072_v56 = vadd.f32 %v6437_v61, %v18481_v35  ;;  %v18485_v14 = vld [vmem:[#allocation47_spill] sm:$0xff] }
0x10fc   : > { %v9122_v22 = vpop.f32.mrf.mxu1 }
0x10fd   : > { %18482 = vst [vmem:[#allocation175_spill] sm:$0xff] %v16072_v56  ;;  %v6440_v55 = vadd.f32 %v9121_v29, %v15953_v39 }
0x10fe   : > { %v9123_v43 = vpop.f32.mrf.mxu1 }
0x10ff   : > { %v9124_v63 = vadd.f32 %v9123_v43, %v9122_v22  ;;  %v16082_v34 = vadd.f32 %v6440_v55, %v18483_v28 }
0x1100   : > { %v9125_v25 = vpop.f32.mrf.mxu1 }
0x1101   : > { %18484 = vst [vmem:[#allocation178_spill] sm:$0xff] %v16082_v34  ;;  %v6445_v45 = vadd.f32 %v9124_v63, %v15953_v39  ;;  %v10670_v63 = vld [vmem:[%s16056_s22 + $0x50] ss:$8 sps:$4 sm:$0xff]  }
0x1102   : > { %v9126_v40 = vpop.f32.mrf.mxu1 }
0x1103   : > { %v9127_v2 = vadd.f32 %v9126_v40, %v9125_v25  ;;  %v16093_v22 = vadd.f32 %v6445_v45, %v18485_v14  ;;  %v18491_v14 = vld [vmem:[#allocation50_spill] sm:$0xff] }
0x1104   : > { %v9128_v16 = vpop.f32.mrf.mxu1 }
0x1105   : > { %v6448_v15 = vadd.f32 %v9127_v2, %v15953_v39  ;;  %18486 = vst [vmem:[#allocation199_spill] sm:$0xff] %v16093_v22 }
0x1106   : > { %v9129_v52 = vpop.f32.mrf.mxu1 }
0x1107   : > { %v9130_v43 = vadd.f32 %v9129_v52, %v9128_v16 }
0x1108   : > { %v9131_v44 = vpop.f32.mrf.mxu1 }
0x1109   : > { %v6453_v16 = vadd.f32 %v9130_v43, %v15953_v39 }
0x110a   : > { %v9132_v6 = vpop.f32.mrf.mxu1 }
0x110b   : > { %v9133_v52 = vadd.f32 %v9132_v6, %v9131_v44  ;;  %v18489_v44 = vld [vmem:[#allocation49_spill] sm:$0xff] }
0x110c   : > { %v9134_v1 = vpop.f32.mrf.mxu1  ;;  %v16116_v6 = vadd.f32 %v6453_v16, %v18489_v44  ;;  %v10679_v44 = vld [vmem:[%s16056_s22 + $0x20] ss:$8 sps:$4 sm:$0xff]  }
0x110e   : > { %v9135_v13 = vpop.f32.mrf.mxu1  ;;  %18490 = vst [vmem:[#allocation183_spill] sm:$0xff] %v16116_v6 }
0x1110   : > { %v16066_v50 = vpop.f32.mrf.mxu1 }
0x1112   : > { %v9138_v47 = vpop.f32.mrf.mxu1 }
0x1114   : > { %v9140_v42 = vpop.f32.mrf.mxu1 }
0x1136   : > { %v6520_v53 = vpop.xlane.xlu0 %6519 }
0x1137   : > { %v6583_v57 = vmul.f32 0.0078125, %v6520_v53  ;;  %v9141_v53 = vpop.f32.mrf.mxu1 }
0x1139   : > { %v16061_v23 = vsub.f32 %v15957_v36, %v6583_v57  ;;  %v10667_v57 = vld [vmem:[%s16056_s22 + $0x60] ss:$8 sps:$4 sm:$0xff]   ;;  %v9143_v55 = vpop.f32.mrf.mxu1 }
0x113a   : > { %v6522_v60 = vpop.xlane.xlu1 %6521  ;;  %7078 = vmatpush1.bf16.msra.mxu0 %v10667_v57  ;;  %v10674_v57 = vld [vmem:[%s16056_s22 + $0x34] ss:$8 sps:$4 sm:$0xff]  }
0x113b   : > { %v6584_v20 = vmul.f32 0.0078125, %v6522_v60  ;;  %v6647_v7 = vmul.f32 %v16061_v23, %v16061_v23  ;;  %v18487_v60 = vld [vmem:[#allocation48_spill] sm:$0xff] }
0x113c   : > { %v16104_v29 = vadd.f32 %v6448_v15, %v18487_v60  ;;  %v10673_v15 = vld [vmem:[%s16056_s22 + $0x40] ss:$8 sps:$4 sm:$0xff]  }
0x113d   : > { %v16069_v32 = vsub.f32 %v15962_v11, %v6584_v20  ;;  %6679 = vadd.xlane.f32.xlu1 %v6647_v7 }
0x113e   : > { %v6524_v33 = vpop.xlane.xlu0 %6523  ;;  %18488 = vst [vmem:[#allocation180_spill] sm:$0xff] %v16104_v29 }
0x113f   : > { %v6585_v5 = vmul.f32 0.0078125, %v6524_v33  ;;  %v6648_v8 = vmul.f32 %v16069_v32, %v16069_v32  ;;  %v10668_v33 = vld [vmem:[%s16056_s22 + $0x54] ss:$8 sps:$4 sm:$0xff]  }
0x1140   : > { %7079 = vmatprep.subr.bf16.mxu0 %v10668_v33 }
0x1141   : > { %v16078_v21 = vsub.f32 %v15967_v54, %v6585_v5  ;;  %6681 = vadd.xlane.f32.xlu0 %v6648_v8  ;;  %6559 = vadd.xlane.f32.xlu1 %v16072_v56  ;;  %v9136_v8 = vadd.f32 %v9135_v13, %v9134_v1 }
0x1142   : > { %v6526_v27 = vpop.xlane.xlu0 %6525  ;;  %7080 = vmatpush1.bf16.msra.mxu0 %v10670_v63 }
0x1143   : > { %v6586_v3 = vmul.f32 0.0078125, %v6526_v27  ;;  %v6649_v19 = vmul.f32 %v16078_v21, %v16078_v21  ;;  %v6456_v27 = vadd.f32 %v9133_v52, %v15953_v39  ;;  %v6461_v1 = vadd.f32 %v9136_v8, %v15953_v39  ;;  %v18493_v52 = vld [vmem:[#allocation51_spill] sm:$0xff] }
0x1144   : > { %v10677_v8 = vld [vmem:[%s16056_s22 + $0x24] ss:$8 sps:$4 sm:$0xff]  }
0x1145   : > { %v16088_v46 = vsub.f32 %v15972_v51, %v6586_v3  ;;  %6561 = vadd.xlane.f32.xlu0 %v16082_v34  ;;  %6683 = vadd.xlane.f32.xlu1 %v6649_v19  ;;  %v10671_v3 = vld [vmem:[%s16056_s22 + $0x44] ss:$8 sps:$4 sm:$0xff]   ;;  %v9144_v19 = vpop.f32.mrf.mxu1  ;;  %v16129_v43 = vadd.f32 %v6456_v27, %v18491_v14 }
0x1146   : > { %v6528_v12 = vpop.xlane.xlu1 %6527  ;;  %7081 = vmatprep.subr.bf16.mxu0 %v10671_v3 }
0x1147   : > { %v6587_v25 = vmul.f32 0.0078125, %v6528_v12  ;;  %v6650_v40 = vmul.f32 %v16088_v46, %v16088_v46  ;;  %18492 = vst [vmem:[#allocation201_spill] sm:$0xff] %v16129_v43  ;;  %7082 = vmatpush1.bf16.msra.mxu0 %v10673_v15  ;;  %v9146_v60 = vpop.f32.mrf.mxu1 }
0x1148   : > { %7083 = vmatprep.subr.bf16.mxu0 %v10674_v57 }
0x1149   : > { %v16100_v61 = vsub.f32 %v15977_v30, %v6587_v25  ;;  %6563 = vadd.xlane.f32.xlu1 %v16093_v22  ;;  %6685 = vadd.xlane.f32.xlu0 %v6650_v40  ;;  %v9139_v25 = vadd.f32 %v9138_v47, %v16066_v50 }
0x114a   : > { %v6530_v20 = vpop.xlane.xlu0 %6529 }
0x114b   : > { %v6588_v7 = vmul.f32 0.0078125, %v6530_v20  ;;  %v6651_v35 = vmul.f32 %v16100_v61, %v16100_v61  ;;  %v10676_v20 = vld [vmem:[%s16056_s22 + $0x30] ss:$8 sps:$4 sm:$0xff]   ;;  %v6464_v47 = vadd.f32 %v9139_v25, %v15953_v39 }
0x114c   : > { %7084 = vmatpush1.bf16.msra.mxu0 %v10676_v20  ;;  %v10682_v25 = vld [vmem:[%s16056_s22 + $0x10] ss:$8 sps:$4 sm:$0xff]  }
0x114d   : > { %v16112_v5 = vsub.f32 %v15982_v49, %v6588_v7  ;;  %6687 = vadd.xlane.f32.xlu1 %v6651_v35  ;;  %6565 = vadd.xlane.f32.xlu0 %v16104_v29  ;;  %v16141_v7 = vadd.f32 %v6461_v1, %v18493_v52  ;;  %v9142_v35 = vadd.f32 %v9141_v53, %v9140_v42  ;;  %v18495_v42 = vld [vmem:[#allocation52_spill] sm:$0xff] }
0x114e   : > { %v6532_v2 = vpop.xlane.xlu1 %6531  ;;  %7085 = vmatprep.subr.bf16.mxu0 %v10677_v8  ;;  %v16153_v53 = vadd.f32 %v6464_v47, %v18495_v42  ;;  %v10683_v47 = vld [vmem:[%s16056_s22 + $0x4] ss:$8 sps:$4 sm:$0xff]   ;;  %v18499_v8 = vld [vmem:[#allocation54_spill] sm:$0xff] }
0x114f   : > { %v6589_v28 = vmul.f32 0.0078125, %v6532_v2  ;;  %v6652_v45 = vmul.f32 %v16112_v5, %v16112_v5  ;;  %18494 = vst [vmem:[#allocation156_spill] sm:$0xff] %v16141_v7  ;;  %v9147_v2 = vpop.f32.mrf.mxu1  ;;  %v6469_v3 = vadd.f32 %v9142_v35, %v15953_v39 }
0x1150   : > { %18496 = vst [vmem:[#allocation152_spill] sm:$0xff] %v16153_v53  ;;  %7086 = vmatpush1.bf16.msra.mxu0 %v10679_v44  ;;  %v9148_v20 = vadd.f32 %v9147_v2, %v9146_v60 }
0x1151   : > { %v16124_v12 = vsub.f32 %v15987_v31, %v6589_v28  ;;  %6567 = vadd.xlane.f32.xlu1 %v16116_v6  ;;  %6689 = vadd.xlane.f32.xlu0 %v6652_v45  ;;  %v9145_v28 = vadd.f32 %v9144_v19, %v9143_v55  ;;  %v9149_v14 = vpop.f32.mrf.mxu1 }
0x1152   : > { %v6534_v13 = vpop.xlane.xlu0 %6533  ;;  %v6477_v60 = vadd.f32 %v9148_v20, %v15953_v39  ;;  %v18503_v20 = vld [vmem:[#allocation56_spill] sm:$0xff] }
0x1153   : > { %v6590_v40 = vmul.f32 0.0078125, %v6534_v13  ;;  %v6653_v26 = vmul.f32 %v16124_v12, %v16124_v12  ;;  %v10680_v13 = vld [vmem:[%s16056_s22 + $0x14] ss:$8 sps:$4 sm:$0xff]   ;;  %v6472_v55 = vadd.f32 %v9145_v28, %v15953_v39  ;;  %v9150_v35 = vpop.f32.mrf.mxu1 }
0x1154   : > { %7087 = vmatprep.subr.bf16.mxu0 %v10680_v13  ;;  %v9151_v2 = vadd.f32 %v9150_v35, %v9149_v14 }
0x1155   : > { %v16137_v16 = vsub.f32 %v15992_v38, %v6590_v40  ;;  %6691 = vadd.xlane.f32.xlu1 %v6653_v26  ;;  %6569 = vadd.xlane.f32.xlu0 %v16129_v43  ;;  %v18497_v26 = vld [vmem:[#allocation53_spill] sm:$0xff]  ;;  %v16177_v44 = vadd.f32 %v6472_v55, %v18499_v8 }
0x1156   : > { %v6536_v50 = vpop.xlane.xlu1 %6535  ;;  %v16166_v57 = vadd.f32 %v6469_v3, %v18497_v26  ;;  %7088 = vmatpush1.bf16.msra.mxu0 %v10682_v25  ;;  %v6480_v25 = vadd.f32 %v9151_v2, %v15953_v39 }
0x1157   : > { %v6591_v33 = vmul.f32 0.0078125, %v6536_v50  ;;  %v6654_v63 = vmul.f32 %v16137_v16, %v16137_v16  ;;  %18500 = vst [vmem:[#allocation181_spill] sm:$0xff] %v16177_v44  ;;  %7089 = vmatprep.subr.bf16.mxu0 %v10683_v47 }
0x1158   : > { %18498 = vst [vmem:[#allocation176_spill] sm:$0xff] %v16166_v57 }
0x1159   : > { %v16149_v27 = vsub.f32 %v15997_v48, %v6591_v33  ;;  %6571 = vadd.xlane.f32.xlu1 %v16141_v7  ;;  %6693 = vadd.xlane.f32.xlu0 %v6654_v63  ;;  %v10685_v33 = vld [vmem:[%s16056_s22] ss:$8 sps:$4 sm:$0xff]   ;;  %s6982_s22 = scalar_lea.vmem %s18507_s4, %s8729_s5  ;;  %s11082_s4 = sshll.u32 %s11237_s23, 4  ;;  %s11083_s4 = int_to_ptr.vmem [resolvable:$false] %s11082_s4 }
0x115a   : > { %v6538_v45 = vpop.xlane.xlu0 %6537  ;;  %7090 = vmatpush1.bf16.msra.mxu0 %v10685_v33  ;;  %p11085_p7 = scmp.lt.s32.totalorder %s17107_s25, %s11083_s4 }
0x115b   : > { %v6592_v15 = vmul.f32 0.0078125, %v6538_v45  ;;  %v6655_v1 = vmul.f32 %v16149_v27, %v16149_v27 }
0x115d   : > { %v16161_v40 = vsub.f32 %v16002_v37, %v6592_v15  ;;  %6695 = vadd.xlane.f32.xlu1 %v6655_v1  ;;  %6573 = vadd.xlane.f32.xlu0 %v16153_v53  ;;  %v18501_v1 = vld [vmem:[#allocation55_spill] sm:$0xff] }
0x115e   : > { %v6540_v19 = vpop.xlane.xlu1 %6539  ;;  %v16187_v13 = vadd.f32 %v6477_v60, %v18501_v1 }
0x115f   : > { %v6593_v52 = vmul.f32 0.0078125, %v6540_v19  ;;  %v6656_v50 = vmul.f32 %v16161_v40, %v16161_v40 }
0x1160   : > { %18502 = vst [vmem:[#allocation197_spill] sm:$0xff] %v16187_v13 }
0x1161   : > { %v16173_v63 = vsub.f32 %v16007_v17, %v6593_v52  ;;  %6575 = vadd.xlane.f32.xlu1 %v16166_v57  ;;  %6697 = vadd.xlane.f32.xlu0 %v6656_v50  ;;  %v16197_v52 = vadd.f32 %v6480_v25, %v18503_v20 }
0x1162   : > { %v6542_v28 = vpop.xlane.xlu0 %6541 }
0x1163   : > { %v6594_v45 = vmul.f32 0.0078125, %v6542_v28  ;;  %v6657_v42 = vmul.f32 %v16173_v63, %v16173_v63  ;;  %18504 = vst [vmem:[#allocation200_spill] sm:$0xff] %v16197_v52 }
0x1165   : > { %v16183_v3 = vsub.f32 %v16012_v62, %v6594_v45  ;;  %6699 = vadd.xlane.f32.xlu1 %v6657_v42  ;;  %6577 = vadd.xlane.f32.xlu0 %v16177_v44 }
0x1166   : > { %v6544_v15 = vpop.xlane.xlu1 %6543 }
0x1167   : > { %v6595_v55 = vmul.f32 0.0078125, %v6544_v15  ;;  %v6658_v14 = vmul.f32 %v16183_v3, %v16183_v3 }
0x1169   : > { %v16193_v19 = vsub.f32 %v16017_v10, %v6595_v55  ;;  %6579 = vadd.xlane.f32.xlu1 %v16187_v13  ;;  %6701 = vadd.xlane.f32.xlu0 %v6658_v14 }
0x116a   : > { %v6546_v26 = vpop.xlane.xlu0 %6545 }
0x116b   : > { %v6596_v50 = vmul.f32 0.0078125, %v6546_v26  ;;  %v6659_v47 = vmul.f32 %v16193_v19, %v16193_v19 }
0x116d   : > { %v16202_v39 = vsub.f32 %v16022_v24, %v6596_v50  ;;  %6703 = vadd.xlane.f32.xlu1 %v6659_v47  ;;  %6581 = vadd.xlane.f32.xlu0 %v16197_v52 }
0x116e   : > { %v6548_v35 = vpop.xlane.xlu1 %6547 }
0x116f   : > { %v6597_v33 = vmul.f32 0.0078125, %v6548_v35  ;;  %v6660_v8 = vmul.f32 %v16202_v39, %v16202_v39 }
0x1171   : > { %v16208_v28 = vsub.f32 %v16027_v58, %v6597_v33  ;;  %6705 = vadd.xlane.f32.xlu0 %v6660_v8 }
0x1172   : > { %v6550_v60 = vpop.xlane.xlu0 %6549 }
0x1173   : > { %v6598_v2 = vmul.f32 0.0078125, %v6550_v60  ;;  %v6661_v45 = vmul.f32 %v16208_v28, %v16208_v28 }
0x1175   : > { %v16213_v42 = vsub.f32 %v16032_v59, %v6598_v2  ;;  %6707 = vadd.xlane.f32.xlu1 %v6661_v45 }
0x1176   : > { %v6552_v15 = vpop.xlane.xlu1 %6551 }
0x1177   : > { %v6599_v1 = vmul.f32 0.0078125, %v6552_v15  ;;  %v6662_v25 = vmul.f32 %v16213_v42, %v16213_v42 }
0x1179   : > { %v16218_v55 = vsub.f32 %v16037_v18, %v6599_v1  ;;  %6709 = vadd.xlane.f32.xlu0 %v6662_v25 }
0x117a   : > { %v6554_v14 = vpop.xlane.xlu0 %6553 }
0x117b   : > { %v6600_v26 = vmul.f32 0.0078125, %v6554_v14  ;;  %v6663_v20 = vmul.f32 %v16218_v55, %v16218_v55 }
0x117d   : > { %v16223_v50 = vsub.f32 %v16042_v9, %v6600_v26  ;;  %6711 = vadd.xlane.f32.xlu1 %v6663_v20 }
0x117e   : > { %v6556_v47 = vpop.xlane.xlu1 %6555 }
0x117f   : > { %v6601_v35 = vmul.f32 0.0078125, %v6556_v47  ;;  %v6664_v33 = vmul.f32 %v16223_v50, %v16223_v50 }
0x1181   : > { %v16228_v8 = vsub.f32 %v16047_v0, %v6601_v35  ;;  %6713 = vadd.xlane.f32.xlu0 %v6664_v33 }
0x1182   : > { %v6558_v60 = vpop.xlane.xlu0 %6557 }
0x1183   : > { %v6602_v2 = vmul.f32 0.0078125, %v6558_v60  ;;  %v6665_v45 = vmul.f32 %v16228_v8, %v16228_v8 }
0x1185   : > { %v16233_v15 = vsub.f32 %v16052_v41, %v6602_v2  ;;  %6715 = vadd.xlane.f32.xlu1 %v6665_v45 }
0x1187   : > { %v6666_v1 = vmul.f32 %v16233_v15, %v16233_v15 }
0x1189   : > { %6717 = vadd.xlane.f32.xlu0 %v6666_v1 }
0x11c6   : > { %v6680_v25 = vpop.xlane.xlu1 %6679 }
0x11c7   : > { %v6743_v14 = vmul.f32 0.0078125, %v6680_v25 }
0x11c9   : > { %v6775_v26 = vadd.f32 1e-05, %v6743_v14 }
0x11ca   : > { %v6560_v20 = vpop.xlane.xlu1 %6559  ;;  %v6682_v47 = vpop.xlane.xlu0 %6681 }
0x11cb   : > { %10702 = vrsqrt.f32 %v6775_v26  ;;  %v6603_v35 = vmul.f32 0.0078125, %v6560_v20  ;;  %v6744_v33 = vmul.f32 0.0078125, %v6682_v47 }
0x11cd   : > { %v16238_v60 = vsub.f32 %v16072_v56, %v6603_v35  ;;  %v6776_v0 = vadd.f32 1e-05, %v6744_v33  ;;  %v16275_v56 = vld [vmem:[%s6517_s3] ss:$0 sm:$0xff] }
0x11ce   : > { %v6684_v9 = vpop.xlane.xlu1 %6683  ;;  %v6562_v2 = vpop.xlane.xlu0 %6561 }
0x11cf   : > { %10704 = vrsqrt.f32 %v6776_v0  ;;  %v6745_v45 = vmul.f32 0.0078125, %v6684_v9  ;;  %v6604_v41 = vmul.f32 0.0078125, %v6562_v2  ;;  %v6667_v1 = vmul.f32 %v16238_v60, %v16238_v60 }
0x11d1   : > { %v6777_v18 = vadd.f32 1e-05, %v6745_v45  ;;  %v16243_v25 = vsub.f32 %v16082_v34, %v6604_v41  ;;  %6719 = vadd.xlane.f32.xlu1 %v6667_v1 }
0x11d2   : > { %v6564_v14 = vpop.xlane.xlu1 %6563  ;;  %v6686_v26 = vpop.xlane.xlu0 %6685 }
0x11d3   : > { %10706 = vrsqrt.f32 %v6777_v18  ;;  %v6605_v20 = vmul.f32 0.0078125, %v6564_v14  ;;  %v6746_v47 = vmul.f32 0.0078125, %v6686_v26  ;;  %v6668_v35 = vmul.f32 %v16243_v25, %v16243_v25 }
0x11d5   : > { %v16248_v9 = vsub.f32 %v16093_v22, %v6605_v20  ;;  %v6778_v0 = vadd.f32 1e-05, %v6746_v47  ;;  %6721 = vadd.xlane.f32.xlu0 %v6668_v35  ;;  %v16262_v22 = vld [vmem:[%s6515_s21] ss:$0 sm:$0xff]  ;;  %s7910_s21 = scalar_lea.vmem %s18511_s10, %s11200_s16  ;;  %s18519_s16 = sld [smem:[#allocation23_spill]] }
0x11d6   : > { %v6688_v33 = vpop.xlane.xlu1 %6687  ;;  %v6566_v2 = vpop.xlane.xlu0 %6565 }
0x11d7   : > { %10708 = vrsqrt.f32 %v6778_v0  ;;  %v6747_v41 = vmul.f32 0.0078125, %v6688_v33  ;;  %v6606_v45 = vmul.f32 0.0078125, %v6566_v2  ;;  %v6669_v1 = vmul.f32 %v16248_v9, %v16248_v9 }
0x11d8   : > { %v10703_v18 = vpop.eup %10702 }
0x11d9   : > { %v6779_v14 = vadd.f32 1e-05, %v6747_v41  ;;  %v16257_v26 = vsub.f32 %v16104_v29, %v6606_v45  ;;  %6723 = vadd.xlane.f32.xlu1 %v6669_v1  ;;  %v6839_v35 = vmul.f32 %v10703_v18, %v16061_v23 }
0x11da   : > { %v6568_v20 = vpop.xlane.xlu1 %6567  ;;  %v6690_v47 = vpop.xlane.xlu0 %6689 }
0x11db   : > { %10710 = vrsqrt.f32 %v6779_v14  ;;  %v6607_v0 = vmul.f32 0.0078125, %v6568_v20  ;;  %v6748_v33 = vmul.f32 0.0078125, %v6690_v47  ;;  %v6670_v2 = vmul.f32 %v16257_v26, %v16257_v26  ;;  %s8783_s14 = sshll.u32 %s18519_s16, 14 }
0x11dc   : > { %v10705_v34 = vpop.eup %10704  ;;  %v6877_v14 = vmul.f32 %v16262_v22, %v6839_v35 }
0x11dd   : > { %v16269_v41 = vsub.f32 %v16116_v6, %v6607_v0  ;;  %v6780_v45 = vadd.f32 1e-05, %v6748_v33  ;;  %6725 = vadd.xlane.f32.xlu0 %v6670_v2  ;;  %v6840_v23 = vmul.f32 %v10705_v34, %v16069_v32 }
0x11de   : > { %v6692_v1 = vpop.xlane.xlu1 %6691  ;;  %v6570_v18 = vpop.xlane.xlu0 %6569  ;;  %v6915_v35 = vadd.f32 %v16275_v56, %v6877_v14 }
0x11df   : > { %10712 = vrsqrt.f32 %v6780_v45  ;;  %v6749_v20 = vmul.f32 0.0078125, %v6692_v1  ;;  %v6608_v47 = vmul.f32 0.0078125, %v6570_v18  ;;  %v6671_v29 = vmul.f32 %v16269_v41, %v16269_v41 }
0x11e0   : > { %v10707_v59 = vpop.eup %10706  ;;  %v6878_v0 = vmul.f32 %v16262_v22, %v6840_v23 }
0x11e1   : > { %v6781_v6 = vadd.f32 1e-05, %v6749_v20  ;;  %v16279_v33 = vsub.f32 %v16129_v43, %v6608_v47  ;;  %6727 = vadd.xlane.f32.xlu1 %v6671_v29  ;;  %v6841_v45 = vmul.f32 %v10707_v59, %v16078_v21 }
0x11e2   : > { %v6572_v32 = vpop.xlane.xlu1 %6571  ;;  %v6694_v34 = vpop.xlane.xlu0 %6693  ;;  %v6916_v2 = vadd.f32 %v16275_v56, %v6878_v0 }
0x11e3   : > { %10714 = vrsqrt.f32 %v6781_v6  ;;  %v6609_v1 = vmul.f32 0.0078125, %v6572_v32  ;;  %v6750_v18 = vmul.f32 0.0078125, %v6694_v34  ;;  %v6672_v58 = vmul.f32 %v16279_v33, %v16279_v33 }
0x11e4   : > { %v10709_v23 = vpop.eup %10708  ;;  %v6947_v20 = vpack.c.bf16 %v6916_v2, %v6915_v35  ;;  %v6879_v59 = vmul.f32 %v16262_v22, %v6841_v45 }
0x11e5   : > { %v16287_v47 = vsub.f32 %v16141_v7, %v6609_v1  ;;  %v6782_v29 = vadd.f32 1e-05, %v6750_v18  ;;  %6729 = vadd.xlane.f32.xlu0 %v6672_v58  ;;  %v6842_v43 = vmul.f32 %v10709_v23, %v16088_v46 }
0x11e6   : > { %7108 = vmatmul.mubr.bf16.vlgmr.msra.gmra.mxu0 %v6947_v20  ;;  %v6696_v14 = vpop.xlane.xlu1 %6695  ;;  %v6574_v0 = vpop.xlane.xlu0 %6573  ;;  %v6917_v45 = vadd.f32 %v16275_v56, %v6879_v59 }
0x11e7   : > { %10716 = vrsqrt.f32 %v6782_v29  ;;  %v6751_v21 = vmul.f32 0.0078125, %v6696_v14  ;;  %v6610_v6 = vmul.f32 0.0078125, %v6574_v0  ;;  %v6673_v32 = vmul.f32 %v16287_v47, %v16287_v47  ;;  %7117 = vmatprep.mubr.bf16.mxu0 %v18266_v4 }
0x11e8   : > { %v10711_v34 = vpop.eup %10710  ;;  %v6880_v35 = vmul.f32 %v16262_v22, %v6842_v43 }
0x11e9   : > { %v6783_v2 = vadd.f32 1e-05, %v6751_v21  ;;  %v16296_v58 = vsub.f32 %v16153_v53, %v6610_v6  ;;  %6731 = vadd.xlane.f32.xlu1 %v6673_v32  ;;  %v6843_v23 = vmul.f32 %v10711_v34, %v16100_v61 }
0x11ea   : > { %v6576_v46 = vpop.xlane.xlu1 %6575  ;;  %v6698_v1 = vpop.xlane.xlu0 %6697  ;;  %v6918_v18 = vadd.f32 %v16275_v56, %v6880_v35 }
0x11eb   : > { %10718 = vrsqrt.f32 %v6783_v2  ;;  %v6611_v20 = vmul.f32 0.0078125, %v6576_v46  ;;  %v6752_v29 = vmul.f32 0.0078125, %v6698_v1  ;;  %v6674_v14 = vmul.f32 %v16296_v58, %v16296_v58 }
0x11ec   : > { %v10713_v43 = vpop.eup %10712  ;;  %v6948_v0 = vpack.c.bf16 %v6918_v18, %v6917_v45  ;;  %v6881_v61 = vmul.f32 %v16262_v22, %v6843_v23 }
0x11ed   : > { %v16304_v21 = vsub.f32 %v16166_v57, %v6611_v20  ;;  %v6784_v6 = vadd.f32 1e-05, %v6752_v29  ;;  %6733 = vadd.xlane.f32.xlu0 %v6674_v14  ;;  %v6844_v32 = vmul.f32 %v10713_v43, %v16112_v5 }
0x11ee   : > { %7118 = vmatmul.mubr.bf16.gmra.mxu0 %v6948_v0  ;;  %v6700_v59 = vpop.xlane.xlu1 %6699  ;;  %v6578_v35 = vpop.xlane.xlu0 %6577  ;;  %v6919_v23 = vadd.f32 %v16275_v56, %v6881_v61 }
0x11ef   : > { %10720 = vrsqrt.f32 %v6784_v6  ;;  %v6753_v34 = vmul.f32 0.0078125, %v6700_v59  ;;  %v6612_v2 = vmul.f32 0.0078125, %v6578_v35  ;;  %v6675_v46 = vmul.f32 %v16304_v21, %v16304_v21  ;;  %7127 = vmatprep.mubr.bf16.mxu0 %v18266_v4 }
0x11f0   : > { %v10715_v1 = vpop.eup %10714  ;;  %v6882_v45 = vmul.f32 %v16262_v22, %v6844_v32 }
0x11f1   : > { %v6785_v18 = vadd.f32 1e-05, %v6753_v34  ;;  %v16313_v20 = vsub.f32 %v16177_v44, %v6612_v2  ;;  %6735 = vadd.xlane.f32.xlu1 %v6675_v46  ;;  %v6845_v43 = vmul.f32 %v10715_v1, %v16124_v12 }
0x11f2   : > { %v6580_v5 = vpop.xlane.xlu1 %6579  ;;  %v6702_v29 = vpop.xlane.xlu0 %6701  ;;  %v6920_v14 = vadd.f32 %v16275_v56, %v6882_v45 }
0x11f3   : > { %10722 = vrsqrt.f32 %v6785_v18  ;;  %v6613_v0 = vmul.f32 0.0078125, %v6580_v5  ;;  %v6754_v6 = vmul.f32 0.0078125, %v6702_v29  ;;  %v6676_v59 = vmul.f32 %v16313_v20, %v16313_v20 }
0x11f4   : > { %v10717_v32 = vpop.eup %10716  ;;  %v6949_v35 = vpack.c.bf16 %v6920_v14, %v6919_v23  ;;  %v6883_v12 = vmul.f32 %v16262_v22, %v6845_v43 }
0x11f5   : > { %v16321_v34 = vsub.f32 %v16187_v13, %v6613_v0  ;;  %v6786_v2 = vadd.f32 1e-05, %v6754_v6  ;;  %6737 = vadd.xlane.f32.xlu0 %v6676_v59  ;;  %v6846_v46 = vmul.f32 %v10717_v32, %v16137_v16 }
0x11f6   : > { %7128 = vmatmul.mubr.bf16.gmra.mxu0 %v6949_v35  ;;  %v6704_v61 = vpop.xlane.xlu1 %6703  ;;  %v6582_v45 = vpop.xlane.xlu0 %6581  ;;  %v6921_v43 = vadd.f32 %v16275_v56, %v6883_v12 }
0x11f7   : > { %10724 = vrsqrt.f32 %v6786_v2  ;;  %v6755_v1 = vmul.f32 0.0078125, %v6704_v61  ;;  %v6614_v18 = vmul.f32 0.0078125, %v6582_v45  ;;  %v6677_v5 = vmul.f32 %v16321_v34, %v16321_v34  ;;  %7137 = vmatprep.mubr.bf16.mxu0 %v18266_v4 }
0x11f8   : > { %v10719_v29 = vpop.eup %10718  ;;  %v6884_v23 = vmul.f32 %v16262_v22, %v6846_v46 }
0x11f9   : > { %v6787_v14 = vadd.f32 1e-05, %v6755_v1  ;;  %v16330_v0 = vsub.f32 %v16197_v52, %v6614_v18  ;;  %6739 = vadd.xlane.f32.xlu1 %v6677_v5  ;;  %v6847_v16 = vmul.f32 %v10719_v29, %v16149_v27 }
0x11fa   : > { %v6706_v6 = vpop.xlane.xlu0 %6705  ;;  %v6922_v59 = vadd.f32 %v16275_v56, %v6884_v23 }
0x11fb   : > { %10726 = vrsqrt.f32 %v6787_v14  ;;  %v6756_v32 = vmul.f32 0.0078125, %v6706_v6  ;;  %v6678_v35 = vmul.f32 %v16330_v0, %v16330_v0  ;;  %v6885_v1 = vmul.f32 %v16262_v22, %v6847_v16 }
0x11fc   : > { %v10721_v2 = vpop.eup %10720  ;;  %v6950_v61 = vpack.c.bf16 %v6922_v59, %v6921_v43 }
0x11fd   : > { %v6788_v46 = vadd.f32 1e-05, %v6756_v32  ;;  %6741 = vadd.xlane.f32.xlu0 %v6678_v35  ;;  %v6848_v45 = vmul.f32 %v10721_v2, %v16161_v40  ;;  %v6923_v23 = vadd.f32 %v16275_v56, %v6885_v1 }
0x11fe   : > { %7138 = vmatmul.mubr.bf16.gmra.mxu0 %v6950_v61  ;;  %v6708_v27 = vpop.xlane.xlu1 %6707 }
0x11ff   : > { %10728 = vrsqrt.f32 %v6788_v46  ;;  %v6757_v18 = vmul.f32 0.0078125, %v6708_v27  ;;  %7147 = vmatprep.mubr.bf16.mxu0 %v18266_v4  ;;  %v6886_v12 = vmul.f32 %v16262_v22, %v6848_v45 }
0x1200   : > { %v10723_v5 = vpop.eup %10722 }
0x1201   : > { %v6789_v29 = vadd.f32 1e-05, %v6757_v18  ;;  %v6924_v14 = vadd.f32 %v16275_v56, %v6886_v12  ;;  %v6849_v6 = vmul.f32 %v10723_v5, %v16173_v63 }
0x1202   : > { %v6710_v43 = vpop.xlane.xlu0 %6709 }
0x1203   : > { %10730 = vrsqrt.f32 %v6789_v29  ;;  %v6758_v40 = vmul.f32 0.0078125, %v6710_v43  ;;  %v6951_v16 = vpack.c.bf16 %v6924_v14, %v6923_v23  ;;  %v6887_v2 = vmul.f32 %v16262_v22, %v6849_v6 }
0x1204   : > { %v10725_v59 = vpop.eup %10724 }
0x1205   : > { %v6790_v32 = vadd.f32 1e-05, %v6758_v40  ;;  %v6850_v35 = vmul.f32 %v10725_v59, %v16183_v3  ;;  %v6925_v27 = vadd.f32 %v16275_v56, %v6887_v2 }
0x1206   : > { %7148 = vmatmul.mubr.bf16.gmra.mxu0 %v6951_v16  ;;  %v6712_v61 = vpop.xlane.xlu1 %6711 }
0x1207   : > { %10732 = vrsqrt.f32 %v6790_v32  ;;  %v6759_v46 = vmul.f32 0.0078125, %v6712_v61  ;;  %7157 = vmatprep.mubr.bf16.mxu0 %v18266_v4  ;;  %v6888_v45 = vmul.f32 %v16262_v22, %v6850_v35 }
0x1208   : > { %v10727_v1 = vpop.eup %10726 }
0x1209   : > { %v6791_v63 = vadd.f32 1e-05, %v6759_v46  ;;  %v6926_v18 = vadd.f32 %v16275_v56, %v6888_v45  ;;  %v6851_v12 = vmul.f32 %v10727_v1, %v16193_v19 }
0x120a   : > { %v6714_v5 = vpop.xlane.xlu0 %6713 }
0x120b   : > { %10734 = vrsqrt.f32 %v6791_v63  ;;  %v6760_v3 = vmul.f32 0.0078125, %v6714_v5  ;;  %v6952_v29 = vpack.c.bf16 %v6926_v18, %v6925_v27  ;;  %v6889_v43 = vmul.f32 %v16262_v22, %v6851_v12  ;;  %v10687_v63 = vld [vmem:[%s16359_s26 + $0x38] sm:$0xff]  }
0x120c   : > { %v10729_v23 = vpop.eup %10728 }
0x120d   : > { %v6792_v14 = vadd.f32 1e-05, %v6760_v3  ;;  %v6852_v6 = vmul.f32 %v10729_v23, %v16202_v39  ;;  %v6927_v35 = vadd.f32 %v16275_v56, %v6889_v43  ;;  %v10686_v39 = vld [vmem:[%s16359_s26 + $0x78] sm:$0xff]  }
0x120e   : > { %7158 = vmatmul.mubr.bf16.gmra.mxu0 %v6952_v29  ;;  %v6716_v40 = vpop.xlane.xlu1 %6715  ;;  %9152 = vmatprep.subr.bf16.mxu1 %v10686_v39 }
0x120f   : > { %10736 = vrsqrt.f32 %v6792_v14  ;;  %v6761_v16 = vmul.f32 0.0078125, %v6716_v40  ;;  %7167 = vmatprep.mubr.bf16.mxu0 %v18266_v4  ;;  %v6890_v59 = vmul.f32 %v16262_v22, %v6852_v6  ;;  %9153 = vmatpush3.bf16.msra.mxu1 %v10687_v63 }
0x1210   : > { %v10731_v19 = vpop.eup %10730 }
0x1211   : > { %v6793_v32 = vadd.f32 1e-05, %v6761_v16  ;;  %v6928_v2 = vadd.f32 %v16275_v56, %v6890_v59  ;;  %v6853_v61 = vmul.f32 %v10731_v19, %v16208_v28 }
0x1212   : > { %v6718_v46 = vpop.xlane.xlu0 %6717 }
0x1213   : > { %10738 = vrsqrt.f32 %v6793_v32  ;;  %v6762_v45 = vmul.f32 0.0078125, %v6718_v46  ;;  %v6953_v1 = vpack.c.bf16 %v6928_v2, %v6927_v35  ;;  %v6891_v5 = vmul.f32 %v16262_v22, %v6853_v61  ;;  %v10688_v2 = vld [vmem:[%s16359_s26 + $0x70] sm:$0xff]  }
0x1214   : > { %v10733_v27 = vpop.eup %10732  ;;  %9154 = vmatprep.subr.bf16.mxu1 %v10688_v2 }
0x1215   : > { %v6794_v18 = vadd.f32 1e-05, %v6762_v45  ;;  %v6854_v12 = vmul.f32 %v10733_v27, %v16213_v42  ;;  %v6929_v29 = vadd.f32 %v16275_v56, %v6891_v5  ;;  %v10691_v27 = vld [vmem:[%s16359_s26 + $0x28] sm:$0xff]   ;;  %v10694_v5 = vld [vmem:[%s16359_s26 + $0x58] sm:$0xff]  }
0x1216   : > { %7168 = vmatmul.mubr.bf16.gmra.mxu0 %v6953_v1 }
0x1217   : > { %10740 = vrsqrt.f32 %v6794_v18  ;;  %7177 = vmatprep.mubr.bf16.mxu0 %v18266_v4  ;;  %v6892_v28 = vmul.f32 %v16262_v22, %v6854_v12  ;;  %v10692_v18 = vld [vmem:[%s16359_s26 + $0x60] sm:$0xff]  }
0x1218   : > { %v10735_v3 = vpop.eup %10734  ;;  %v10693_v12 = vld [vmem:[%s16359_s26 + $0x20] sm:$0xff]  }
0x1219   : > { %v6930_v23 = vadd.f32 %v16275_v56, %v6892_v28  ;;  %v6855_v14 = vmul.f32 %v10735_v3, %v16218_v55  ;;  %v10689_v55 = vld [vmem:[%s16359_s26 + $0x30] sm:$0xff]   ;;  %v10695_v28 = vld [vmem:[%s16359_s26 + $0x18] sm:$0xff]  }
0x121a   : > { %9155 = vmatpush3.bf16.msra.mxu1 %v10689_v55  ;;  %v10696_v3 = vld [vmem:[%s16359_s26 + $0x50] sm:$0xff]  }
0x121b   : > { %v6954_v6 = vpack.c.bf16 %v6930_v23, %v6929_v29  ;;  %v6893_v40 = vmul.f32 %v16262_v22, %v6855_v14  ;;  %v10697_v29 = vld [vmem:[%s16359_s26 + $0x10] sm:$0xff]   ;;  %v10698_v23 = vld [vmem:[%s16359_s26 + $0x48] sm:$0xff]  }
0x121c   : > { %v10737_v42 = vpop.eup %10736  ;;  %v10699_v14 = vld [vmem:[%s16359_s26 + $0x8] sm:$0xff]  }
0x121d   : > { %v6856_v43 = vmul.f32 %v10737_v42, %v16223_v50  ;;  %v6931_v19 = vadd.f32 %v16275_v56, %v6893_v40  ;;  %v10701_v42 = vld [vmem:[%s16359_s26] sm:$0xff]  }
0x121e   : > { %7178 = vmatmul.mubr.bf16.gmra.mxu0 %v6954_v6  ;;  %v10700_v6 = vld [vmem:[%s16359_s26 + $0x40] sm:$0xff]  }
0x121f   : > { %7187 = vmatprep.mubr.bf16.mxu0 %v18266_v4  ;;  %v6894_v16 = vmul.f32 %v16262_v22, %v6856_v43 }
0x1220   : > { %v10739_v59 = vpop.eup %10738 }
0x1221   : > { %v6932_v32 = vadd.f32 %v16275_v56, %v6894_v16  ;;  %v6857_v35 = vmul.f32 %v10739_v59, %v16228_v8 }
0x1223   : > { %v6955_v61 = vpack.c.bf16 %v6932_v32, %v6931_v19  ;;  %v6895_v39 = vmul.f32 %v16262_v22, %v6857_v35 }
0x1224   : > { %v10741_v50 = vpop.eup %10740 }
0x1225   : > { %v6858_v46 = vmul.f32 %v10741_v50, %v16233_v15  ;;  %v6933_v45 = vadd.f32 %v16275_v56, %v6895_v39  ;;  %v10690_v15 = vld [vmem:[%s16359_s26 + $0x68] sm:$0xff]   ;;  %s18523_s26 = sld [smem:[#allocation258_spill]] }
0x1226   : > { %7188 = vmatmul.mubr.bf16.gmra.mxu0 %v6955_v61  ;;  %9156 = vmatprep.subr.bf16.mxu1 %v10690_v15 }
0x1227   : > { %7197 = vmatprep.mubr.bf16.mxu0 %v18266_v4  ;;  %v6896_v8 = vmul.f32 %v16262_v22, %v6858_v46  ;;  %9157 = vmatpush3.bf16.msra.mxu1 %v10691_v27 }
0x1228   : > { %9158 = vmatprep.subr.bf16.mxu1 %v10692_v18 }
0x1229   : > { %v6934_v1 = vadd.f32 %v16275_v56, %v6896_v8 }
0x122b   : > { %v6956_v63 = vpack.c.bf16 %v6934_v1, %v6933_v45  ;;  %9159 = vmatpush3.bf16.msra.mxu1 %v10693_v12  ;;  %s17105_s5 = scalar_lea.hbm %s18523_s26, %s8783_s14 }
0x122c   : > { %9160 = vmatprep.subr.bf16.mxu1 %v10694_v5 }
0x122e   : > { %7198 = vmatmul.mubr.bf16.gmra.mxu0 %v6956_v63 }
0x122f   : > { %7207 = vmatprep.mubr.bf16.mxu0 %v18266_v4  ;;  %9161 = vmatpush3.bf16.msra.mxu1 %v10695_v28 }
0x1230   : > { %9162 = vmatprep.subr.bf16.mxu1 %v10696_v3 }
0x1233   : > { %9163 = vmatpush3.bf16.msra.mxu1 %v10697_v29 }
0x1234   : > { %9164 = vmatprep.subr.bf16.mxu1 %v10698_v23 }
0x1237   : > { %9165 = vmatpush3.bf16.msra.mxu1 %v10699_v14 }
0x1238   : > { %9166 = vmatprep.subr.bf16.mxu1 %v10700_v6 }
0x123b   : > { %9167 = vmatpush3.bf16.msra.mxu1 %v10701_v42 }
0x125a   : > { %v6720_v43 = vpop.xlane.xlu1 %6719 }
0x125b   : > { %v6763_v40 = vmul.f32 0.0078125, %v6720_v43 }
0x125d   : > { %v6795_v16 = vadd.f32 1e-05, %v6763_v40 }
0x125e   : > { %v6722_v59 = vpop.xlane.xlu0 %6721 }
0x125f   : > { %10742 = vrsqrt.f32 %v6795_v16  ;;  %v6764_v19 = vmul.f32 0.0078125, %v6722_v59 }
0x1261   : > { %v6796_v32 = vadd.f32 1e-05, %v6764_v19 }
0x1262   : > { %v6724_v35 = vpop.xlane.xlu1 %6723 }
0x1263   : > { %10744 = vrsqrt.f32 %v6796_v32  ;;  %v6765_v2 = vmul.f32 0.0078125, %v6724_v35 }
0x1265   : > { %v6797_v55 = vadd.f32 1e-05, %v6765_v2 }
0x1266   : > { %v6726_v61 = vpop.xlane.xlu0 %6725 }
0x1267   : > { %10746 = vrsqrt.f32 %v6797_v55  ;;  %v6766_v50 = vmul.f32 0.0078125, %v6726_v61 }
0x1269   : > { %v6798_v46 = vadd.f32 1e-05, %v6766_v50 }
0x126a   : > { %v6728_v39 = vpop.xlane.xlu1 %6727 }
0x126b   : > { %10748 = vrsqrt.f32 %v6798_v46  ;;  %v6767_v8 = vmul.f32 0.0078125, %v6728_v39 }
0x126c   : > { %v10743_v45 = vpop.eup %10742 }
0x126d   : > { %v6799_v1 = vadd.f32 1e-05, %v6767_v8  ;;  %v6859_v63 = vmul.f32 %v10743_v45, %v16238_v60 }
0x126e   : > { %v6730_v15 = vpop.xlane.xlu0 %6729 }
0x126f   : > { %10750 = vrsqrt.f32 %v6799_v1  ;;  %v6768_v27 = vmul.f32 0.0078125, %v6730_v15  ;;  %v6897_v28 = vmul.f32 %v16262_v22, %v6859_v63 }
0x1270   : > { %v10745_v18 = vpop.eup %10744 }
0x1271   : > { %v6800_v12 = vadd.f32 1e-05, %v6768_v27  ;;  %v6860_v5 = vmul.f32 %v10745_v18, %v16243_v25  ;;  %v6935_v42 = vadd.f32 %v16275_v56, %v6897_v28 }
0x1272   : > { %v6732_v3 = vpop.xlane.xlu1 %6731 }
0x1273   : > { %10752 = vrsqrt.f32 %v6800_v12  ;;  %v6769_v29 = vmul.f32 0.0078125, %v6732_v3  ;;  %v6898_v23 = vmul.f32 %v16262_v22, %v6860_v5 }
0x1274   : > { %v10747_v14 = vpop.eup %10746 }
0x1275   : > { %v6801_v6 = vadd.f32 1e-05, %v6769_v29  ;;  %v6936_v60 = vadd.f32 %v16275_v56, %v6898_v23  ;;  %v6861_v43 = vmul.f32 %v10747_v14, %v16248_v9 }
0x1276   : > { %v6734_v40 = vpop.xlane.xlu0 %6733 }
0x1277   : > { %10754 = vrsqrt.f32 %v6801_v6  ;;  %v6770_v16 = vmul.f32 0.0078125, %v6734_v40  ;;  %v6957_v59 = vpack.c.bf16 %v6936_v60, %v6935_v42  ;;  %v6899_v35 = vmul.f32 %v16262_v22, %v6861_v43 }
0x1278   : > { %v10749_v25 = vpop.eup %10748 }
0x1279   : > { %v6802_v19 = vadd.f32 1e-05, %v6770_v16  ;;  %7208 = vmatmul.mubr.bf16.gmra.mxu0 %v6957_v59  ;;  %v6862_v32 = vmul.f32 %v10749_v25, %v16257_v26  ;;  %v6937_v46 = vadd.f32 %v16275_v56, %v6899_v35 }
0x127a   : > { %v6736_v2 = vpop.xlane.xlu1 %6735  ;;  %7217 = vmatprep.mubr.bf16.mxu0 %v18266_v4 }
0x127b   : > { %10756 = vrsqrt.f32 %v6802_v19  ;;  %v6771_v55 = vmul.f32 0.0078125, %v6736_v2  ;;  %v6900_v61 = vmul.f32 %v16262_v22, %v6862_v32 }
0x127c   : > { %v10751_v50 = vpop.eup %10750 }
0x127d   : > { %v6803_v9 = vadd.f32 1e-05, %v6771_v55  ;;  %v6938_v39 = vadd.f32 %v16275_v56, %v6900_v61  ;;  %v6863_v8 = vmul.f32 %v10751_v50, %v16269_v41 }
0x127e   : > { %v6738_v45 = vpop.xlane.xlu0 %6737 }
0x127f   : > { %10758 = vrsqrt.f32 %v6803_v9  ;;  %v6772_v26 = vmul.f32 0.0078125, %v6738_v45  ;;  %v6958_v1 = vpack.c.bf16 %v6938_v39, %v6937_v46  ;;  %v6901_v18 = vmul.f32 %v16262_v22, %v6863_v8 }
0x1280   : > { %v10753_v63 = vpop.eup %10752 }
0x1281   : > { %v6804_v15 = vadd.f32 1e-05, %v6772_v26  ;;  %7218 = vmatmul.mubr.bf16.gmra.mxu0 %v6958_v1  ;;  %v6864_v27 = vmul.f32 %v10753_v63, %v16279_v33  ;;  %v6939_v29 = vadd.f32 %v16275_v56, %v6901_v18 }
0x1282   : > { %v6740_v12 = vpop.xlane.xlu1 %6739  ;;  %7227 = vmatprep.mubr.bf16.mxu0 %v18266_v4 }
0x1283   : > { %10760 = vrsqrt.f32 %v6804_v15  ;;  %v6773_v5 = vmul.f32 0.0078125, %v6740_v12  ;;  %v6902_v28 = vmul.f32 %v16262_v22, %v6864_v27  ;;  %v6983_v15 = vld [vmem:[%s6982_s22] sm:$0x3]  ;;  %v18508_v27 = vld [vmem:[#allocation57_spill] sm:$0xff]  ;;  %s11084_s22 = scalar_lea.vmem %s11083_s4, 32768 }
0x1284   : > { %v10755_v3 = vpop.eup %10754  ;;  %p11086_p8 = scmp.lt.s32.totalorder %s11084_s22, %s11078_s12 }
0x1285   : > { %v6805_v41 = vadd.f32 1e-05, %v6773_v5  ;;  %v6940_v23 = vadd.f32 %v16275_v56, %v6902_v28  ;;  %v6865_v14 = vmul.f32 %v10755_v3, %v16287_v47 }
0x1286   : > { %v6742_v6 = vpop.xlane.xlu0 %6741  ;;  %p11087_p10 = por %p11086_p8, %p11085_p7 }
0x1287   : > { %10762 = vrsqrt.f32 %v6805_v41  ;;  %v6774_v33 = vmul.f32 0.0078125, %v6742_v6  ;;  %v6959_v42 = vpack.c.bf16 %v6940_v23, %v6939_v29  ;;  %v6903_v16 = vmul.f32 %v16262_v22, %v6865_v14 }
0x1288   : > { %v10757_v60 = vpop.eup %10756  ;;  %p11088_p12 = pnand %p11087_p10, %p11081_p4 }
0x1289   : > { %v6806_v43 = vadd.f32 1e-05, %v6774_v33  ;;  %7228 = vmatmul.mubr.bf16.gmra.mxu0 %v6959_v42  ;;  %v6866_v40 = vmul.f32 %v10757_v60, %v16296_v58  ;;  %v6941_v19 = vadd.f32 %v16275_v56, %v6903_v16 }
0x128a   : > { %7237 = vmatprep.mubr.bf16.mxu0 %v18266_v4 }
0x128b   : > { %10764 = vrsqrt.f32 %v6806_v43  ;;  %v6904_v59 = vmul.f32 %v16262_v22, %v6866_v40 }
0x128c   : > { %v10759_v25 = vpop.eup %10758 }
0x128d   : > { %v6942_v47 = vadd.f32 %v16275_v56, %v6904_v59  ;;  %v6867_v32 = vmul.f32 %v10759_v25, %v16304_v21 }
0x128f   : > { %v6960_v35 = vpack.c.bf16 %v6942_v47, %v6941_v19  ;;  %v6905_v55 = vmul.f32 %v16262_v22, %v6867_v32 }
0x1290   : > { %v10761_v2 = vpop.eup %10760 }
0x1291   : > { %7238 = vmatmul.mubr.bf16.gmra.mxu0 %v6960_v35  ;;  %v6868_v58 = vmul.f32 %v10761_v2, %v16313_v20  ;;  %v6943_v9 = vadd.f32 %v16275_v56, %v6905_v55 }
0x1292   : > { %7247 = vmatprep.mubr.bf16.mxu0 %v18266_v4 }
0x1293   : > { %v6906_v61 = vmul.f32 %v16262_v22, %v6868_v58 }
0x1294   : > { %v10763_v50 = vpop.eup %10762 }
0x1295   : > { %v6944_v46 = vadd.f32 %v16275_v56, %v6906_v61  ;;  %v6869_v39 = vmul.f32 %v10763_v50, %v16321_v34 }
0x1297   : > { %v6961_v21 = vpack.c.bf16 %v6944_v46, %v6943_v9  ;;  %v6907_v20 = vmul.f32 %v16262_v22, %v6869_v39 }
0x1298   : > { %v10765_v8 = vpop.eup %10764 }
0x1299   : > { %7248 = vmatmul.mubr.bf16.gmra.mxu0 %v6961_v21  ;;  %v6870_v45 = vmul.f32 %v10765_v8, %v16330_v0  ;;  %v6945_v1 = vadd.f32 %v16275_v56, %v6907_v20  ;;  %v18509_v0 = vsub.s32 0, %v18508_v27 }
0x129a   : > { %7257 = vmatprep.mubr.bf16.mxu0 %v18266_v4  ;;  %v18510_v4 = vsub.s32 1, %v18508_v27 }
0x129b   : > { %v6908_v26 = vmul.f32 %v16262_v22, %v6870_v45  ;;  %v16445_v18 = vrot.slane %v6983_v15, %v18509_v0 }
0x129c   : > { %v16449_v12 = vrot.slane %v6983_v15, %v18510_v4 }
0x129d   : > { %v6946_v63 = vadd.f32 %v16275_v56, %v6908_v26 }
0x129f   : > { %v6962_v34 = vpack.c.bf16 %v6946_v63, %v6945_v1 }
0x12a1   : > { %7258 = vmatmul.mubr.bf16.gmra.mxu0 %v6962_v34 }
0x12a6   : > { %v7109_v22 = vpop.f32.mrf.mxu0 }
0x12a7   : > { %v16452_v5 = vadd.f32 %v7109_v22, %v16445_v18 }
0x12a8   : > { %v7111_v56 = vpop.f32.mrf.mxu0 }
0x12a9   : > { %v7268_v28 = vmul.f32 %v16452_v5, %v16452_v5  ;;  %v16457_v3 = vadd.f32 %v7111_v56, %v16449_v12 }
0x12aa   : > { %v7113_v41 = vpop.f32.mrf.mxu0 }
0x12ab   : > { %v7332_v29 = vmul.f32 %v7268_v28, %v16452_v5  ;;  %v7269_v23 = vmul.f32 %v16457_v3, %v16457_v3  ;;  %v16463_v14 = vadd.f32 %v7113_v41, %v16445_v18 }
0x12ac   : > { %v7115_v6 = vpop.f32.mrf.mxu0 }
0x12ad   : > { %v7396_v33 = vmul.f32 0.044715, %v7332_v29  ;;  %v7333_v42 = vmul.f32 %v7269_v23, %v16457_v3  ;;  %v7270_v60 = vmul.f32 %v16463_v14, %v16463_v14  ;;  %v16469_v43 = vadd.f32 %v7115_v6, %v16449_v12 }
0x12ae   : > { %v7119_v40 = vpop.f32.mrf.mxu0 }
0x12af   : > { %v7460_v16 = vadd.f32 %v7396_v33, %v16452_v5  ;;  %v7397_v59 = vmul.f32 0.044715, %v7333_v42  ;;  %v7334_v25 = vmul.f32 %v7270_v60, %v16463_v14  ;;  %v7271_v19 = vmul.f32 %v16469_v43, %v16469_v43 }
0x12b0   : > { %v16476_v47 = vadd.f32 %v7119_v40, %v16445_v18  ;;  %v7121_v32 = vpop.f32.mrf.mxu0 }
0x12b1   : > { %v7524_v35 = vmul.f32 0.7978846, %v7460_v16  ;;  %v7398_v2 = vmul.f32 0.044715, %v7334_v25  ;;  %v7335_v58 = vmul.f32 %v7271_v19, %v16469_v43  ;;  %v7461_v55 = vadd.f32 %v7397_v59, %v16457_v3 }
0x12b2   : > { %v7272_v61 = vmul.f32 %v16476_v47, %v16476_v47  ;;  %v16483_v50 = vadd.f32 %v7121_v32, %v16449_v12  ;;  %v7123_v9 = vpop.f32.mrf.mxu0 }
0x12b3   : > { %10766 = vtanh.f32 %v7524_v35  ;;  %v7462_v46 = vadd.f32 %v7398_v2, %v16463_v14  ;;  %v7399_v39 = vmul.f32 0.044715, %v7335_v58  ;;  %v16490_v45 = vadd.f32 %v7123_v9, %v16445_v18 }
0x12b4   : > { %v7336_v21 = vmul.f32 %v7272_v61, %v16476_v47  ;;  %v7273_v8 = vmul.f32 %v16483_v50, %v16483_v50  ;;  %v7125_v20 = vpop.f32.mrf.mxu0  ;;  %v7525_v34 = vmul.f32 0.7978846, %v7461_v55 }
0x12b5   : > { %v7526_v26 = vmul.f32 0.7978846, %v7462_v46  ;;  %v7463_v1 = vadd.f32 %v7399_v39, %v16469_v43  ;;  %v16494_v63 = vadd.f32 %v7125_v20, %v16449_v12  ;;  %v7274_v0 = vmul.f32 %v16490_v45, %v16490_v45 }
0x12b6   : > { %v7400_v15 = vmul.f32 0.044715, %v7336_v21  ;;  %v7337_v27 = vmul.f32 %v7273_v8, %v16483_v50  ;;  %v7129_v4 = vpop.f32.mrf.mxu0 }
0x12b7   : > { %10768 = vtanh.f32 %v7526_v26  ;;  %v7275_v22 = vmul.f32 %v16494_v63, %v16494_v63  ;;  %v16502_v56 = vadd.f32 %v7129_v4, %v16445_v18  ;;  %v7527_v28 = vmul.f32 0.7978846, %v7463_v1 }
0x12b8   : > { %v7464_v41 = vadd.f32 %v7400_v15, %v16476_v47  ;;  %v7401_v29 = vmul.f32 0.044715, %v7337_v27  ;;  %v7338_v23 = vmul.f32 %v7274_v0, %v16490_v45  ;;  %v7131_v6 = vpop.f32.mrf.mxu0  ;;  %10770 = vtanh.f32 %v7525_v34 }
0x12b9   : > { %v7339_v33 = vmul.f32 %v7275_v22, %v16494_v63  ;;  %v7276_v42 = vmul.f32 %v16502_v56, %v16502_v56  ;;  %v16510_v60 = vadd.f32 %v7131_v6, %v16449_v12  ;;  %10772 = vtanh.f32 %v7527_v28 }
0x12ba   : > { %v7528_v40 = vmul.f32 0.7978846, %v7464_v41  ;;  %v7465_v16 = vadd.f32 %v7401_v29, %v16483_v50  ;;  %v7402_v59 = vmul.f32 0.044715, %v7338_v23  ;;  %v7133_v25 = vpop.f32.mrf.mxu0 }
0x12bb   : > { %v7403_v19 = vmul.f32 0.044715, %v7339_v33  ;;  %v7340_v32 = vmul.f32 %v7276_v42, %v16502_v56  ;;  %v7277_v35 = vmul.f32 %v16510_v60, %v16510_v60  ;;  %v16517_v2 = vadd.f32 %v7133_v25, %v16445_v18 }
0x12bc   : > { %v7529_v58 = vmul.f32 0.7978846, %v7465_v16  ;;  %v7466_v55 = vadd.f32 %v7402_v59, %v16490_v45  ;;  %v7135_v61 = vpop.f32.mrf.mxu0  ;;  %10774 = vtanh.f32 %v7528_v40 }
0x12bd   : > { %v7467_v9 = vadd.f32 %v7403_v19, %v16494_v63  ;;  %v7404_v46 = vmul.f32 0.044715, %v7340_v32  ;;  %v7341_v39 = vmul.f32 %v7277_v35, %v16510_v60  ;;  %v7278_v21 = vmul.f32 %v16517_v2, %v16517_v2 }
0x12be   : > { %v7530_v8 = vmul.f32 0.7978846, %v7466_v55  ;;  %v16525_v20 = vadd.f32 %v7135_v61, %v16449_v12  ;;  %v7139_v26 = vpop.f32.mrf.mxu0  ;;  %10776 = vtanh.f32 %v7529_v58 }
0x12bf   : > { %v7531_v1 = vmul.f32 0.7978846, %v7467_v9  ;;  %v7468_v34 = vadd.f32 %v7404_v46, %v16502_v56  ;;  %v7405_v15 = vmul.f32 0.044715, %v7341_v39  ;;  %v7342_v27 = vmul.f32 %v7278_v21, %v16517_v2 }
0x12c0   : > { %v10767_v0 = vpop.eup %10766  ;;  %v7279_v4 = vmul.f32 %v16525_v20, %v16525_v20  ;;  %v16532_v22 = vadd.f32 %v7139_v26, %v16445_v18  ;;  %v7141_v28 = vpop.f32.mrf.mxu0  ;;  %10778 = vtanh.f32 %v7530_v8 }
0x12c1   : > { %v7652_v41 = vadd.f32 1.0, %v10767_v0  ;;  %v7532_v29 = vmul.f32 0.7978846, %v7468_v34  ;;  %v7469_v23 = vadd.f32 %v7405_v15, %v16510_v60  ;;  %v7406_v6 = vmul.f32 0.044715, %v7342_v27 }
0x12c2   : > { %v7343_v33 = vmul.f32 %v7279_v4, %v16525_v20  ;;  %v7280_v42 = vmul.f32 %v16532_v22, %v16532_v22  ;;  %v16539_v40 = vadd.f32 %v7141_v28, %v16449_v12  ;;  %v7143_v16 = vpop.f32.mrf.mxu0  ;;  %10780 = vtanh.f32 %v7531_v1 }
0x12c3   : > { %v7716_v59 = vmul.f32 0.5, %v7652_v41  ;;  %v7533_v25 = vmul.f32 0.7978846, %v7469_v23  ;;  %v16542_v19 = vadd.f32 %v7143_v16, %v16445_v18  ;;  %v7470_v35 = vadd.f32 %v7406_v6, %v16517_v2 }
0x12c4   : > { %v10769_v32 = vpop.eup %10768  ;;  %v7407_v58 = vmul.f32 0.044715, %v7343_v33  ;;  %v7344_v55 = vmul.f32 %v7280_v42, %v16532_v22  ;;  %v7281_v61 = vmul.f32 %v16539_v40, %v16539_v40  ;;  %v7145_v9 = vpop.f32.mrf.mxu0  ;;  %10782 = vtanh.f32 %v7532_v29 }
0x12c5   : > { %v16549_v46 = vmul.f32 %v7716_v59, %v16452_v5  ;;  %v7654_v39 = vadd.f32 1.0, %v10769_v32  ;;  %v7282_v21 = vmul.f32 %v16542_v19, %v16542_v19  ;;  %v7534_v8 = vmul.f32 0.7978846, %v7470_v35  ;;  %v10771_v27 = vpop.eup %10770 }
0x12c6   : > { %v7471_v26 = vadd.f32 %v7407_v58, %v16525_v20  ;;  %v7408_v1 = vmul.f32 0.044715, %v7344_v55  ;;  %v7345_v34 = vmul.f32 %v7281_v61, %v16539_v40  ;;  %v7149_v15 = vpop.f32.mrf.mxu0  ;;  %v16557_v28 = vadd.f32 %v7145_v9, %v16449_v12  ;;  %v10773_v33 = vpop.eup %10772 }
0x12c7   : > { %v7718_v0 = vmul.f32 0.5, %v7654_v39  ;;  %v7346_v4 = vmul.f32 %v7282_v21, %v16542_v19  ;;  %v16560_v5 = vadd.f32 %v7149_v15, %v16445_v18  ;;  %10784 = vtanh.f32 %v7533_v25 }
0x12c8   : > { %v7535_v41 = vmul.f32 0.7978846, %v7471_v26  ;;  %v7472_v29 = vadd.f32 %v7408_v1, %v16532_v22  ;;  %v7409_v23 = vmul.f32 0.044715, %v7345_v34  ;;  %v7151_v6 = vpop.f32.mrf.mxu0  ;;  %10786 = vtanh.f32 %v7534_v8 }
0x12c9   : > { %v7410_v42 = vmul.f32 0.044715, %v7346_v4  ;;  %v7283_v16 = vmul.f32 %v16557_v28, %v16557_v28  ;;  %v7284_v59 = vmul.f32 %v16560_v5, %v16560_v5  ;;  %v16568_v32 = vmul.f32 %v7718_v0, %v16463_v14  ;;  %v16574_v61 = vpop.eup %10774 }
0x12ca   : > { %v7536_v35 = vmul.f32 0.7978846, %v7472_v29  ;;  %v7473_v25 = vadd.f32 %v7409_v23, %v16539_v40  ;;  %v16572_v58 = vadd.f32 %v7151_v6, %v16449_v12  ;;  %v7153_v55 = vpop.f32.mrf.mxu0  ;;  %10788 = vtanh.f32 %v7535_v41 }
0x12cb   : > { %v7474_v9 = vadd.f32 %v7410_v42, %v16542_v19  ;;  %v7347_v39 = vmul.f32 %v7283_v16, %v16557_v28  ;;  %v7348_v21 = vmul.f32 %v7284_v59, %v16560_v5  ;;  %v16582_v26 = vadd.f32 %v7153_v55, %v16445_v18  ;;  %v16584_v34 = vpop.eup %10776 }
0x12cc   : > { %10790 = vtanh.f32 %v7536_v35  ;;  %v7537_v8 = vmul.f32 0.7978846, %v7473_v25  ;;  %v7285_v14 = vmul.f32 %v16572_v58, %v16572_v58  ;;  %v7155_v1 = vpop.f32.mrf.mxu0  ;;  %v7653_v16 = vadd.f32 1.0, %v10771_v27 }
0x12cd   : > { %v7538_v15 = vmul.f32 0.7978846, %v7474_v9  ;;  %v7411_v0 = vmul.f32 0.044715, %v7347_v39  ;;  %v7412_v4 = vmul.f32 0.044715, %v7348_v21  ;;  %v16587_v41 = vadd.f32 %v7155_v1, %v16449_v12  ;;  %v16589_v29 = vpop.eup %10778 }
0x12ce   : > { %10792 = vtanh.f32 %v7537_v8  ;;  %v7349_v23 = vmul.f32 %v7285_v14, %v16572_v58  ;;  %v7286_v6 = vmul.f32 %v16582_v26, %v16582_v26  ;;  %v7159_v42 = vpop.f32.mrf.mxu0  ;;  %v7655_v8 = vadd.f32 1.0, %v10773_v33 }
0x12cf   : > { %10794 = vtanh.f32 %v7538_v15  ;;  %v7475_v59 = vadd.f32 %v7411_v0, %v16557_v28  ;;  %v7476_v35 = vadd.f32 %v7412_v4, %v16560_v5  ;;  %v7287_v25 = vmul.f32 %v16587_v41, %v16587_v41  ;;  %v10781_v55 = vpop.eup %10780 }
0x12d0   : > { %v7413_v9 = vmul.f32 0.044715, %v7349_v23  ;;  %v7350_v39 = vmul.f32 %v7286_v6, %v16582_v26  ;;  %v16600_v21 = vadd.f32 %v7159_v42, %v16445_v18  ;;  %v7161_v14 = vpop.f32.mrf.mxu0  ;;  %v7717_v15 = vmul.f32 0.5, %v7653_v16 }
0x12d1   : > { %v7539_v1 = vmul.f32 0.7978846, %v7475_v59  ;;  %v7540_v52 = vmul.f32 0.7978846, %v7476_v35  ;;  %v7351_v27 = vmul.f32 %v7287_v25, %v16587_v41  ;;  %v16603_v0 = vpop.eup %10782  ;;  %v7719_v44 = vmul.f32 0.5, %v7655_v8 }
0x12d2   : > { %v7477_v4 = vadd.f32 %v7413_v9, %v16572_v58  ;;  %v7414_v13 = vmul.f32 0.044715, %v7350_v39  ;;  %v7288_v23 = vmul.f32 %v16600_v21, %v16600_v21  ;;  %v7163_v6 = vpop.f32.mrf.mxu0  ;;  %v7844_v42 = vpack.c.bf16 %v16568_v32, %v16549_v46 }
0x12d3   : > { %10796 = vtanh.f32 %v7539_v1  ;;  %v7415_v33 = vmul.f32 0.044715, %v7351_v27  ;;  %v16611_v59 = vadd.f32 %v7161_v14, %v16449_v12  ;;  %v7781_v9 = vmul.f32 %v7717_v15, %v16457_v3 }
0x12d4   : > { %v7541_v35 = vmul.f32 0.7978846, %v7477_v4  ;;  %v7478_v16 = vadd.f32 %v7414_v13, %v16582_v26  ;;  %v7352_v25 = vmul.f32 %v7288_v23, %v16600_v21  ;;  %v7165_v39 = vpop.f32.mrf.mxu0  ;;  %v16616_v57 = vpop.eup %10784  ;;  %v7783_v53 = vmul.f32 %v7719_v44, %v16469_v43 }
0x12d5   : > { %v7479_v8 = vadd.f32 %v7415_v33, %v16587_v41  ;;  %v7289_v46 = vmul.f32 %v16611_v59, %v16611_v59  ;;  %v16623_v32 = vadd.f32 %v7163_v6, %v16445_v18  ;;  %v16625_v14 = vpop.eup %10786  ;;  %10798 = vtanh.f32 %v7540_v52 }
0x12d6   : > { %v7542_v13 = vmul.f32 0.7978846, %v7478_v16  ;;  %v7416_v1 = vmul.f32 0.044715, %v7352_v25  ;;  %v16628_v3 = vadd.f32 %v7165_v39, %v16449_v12  ;;  %v7169_v27 = vpop.f32.mrf.mxu0  ;;  %10800 = vtanh.f32 %v7541_v35 }
0x12d7   : > { %v7845_v15 = vpack.c.bf16 %v7783_v53, %v7781_v9  ;;  %v7353_v4 = vmul.f32 %v7289_v46, %v16611_v59  ;;  %v7290_v44 = vmul.f32 %v16623_v32, %v16623_v32  ;;  %v16633_v43 = vpop.eup %10788  ;;  %v7543_v23 = vmul.f32 0.7978846, %v7479_v8 }
0x12d8   : > { %v7480_v6 = vadd.f32 %v7416_v1, %v16600_v21  ;;  %v7291_v52 = vmul.f32 %v16628_v3, %v16628_v3  ;;  %v16639_v33 = vadd.f32 %v7169_v27, %v16445_v18  ;;  %v7171_v16 = vpop.f32.mrf.mxu0  ;;  %10802 = vtanh.f32 %v7542_v13 }
0x12d9   : > { %v16641_v25 = vpop.eup %10790  ;;  %8046 = vmatprep.mubr.bf16.mxu1 %v7845_v15  ;;  %v7417_v53 = vmul.f32 0.044715, %v7353_v4  ;;  %v7354_v35 = vmul.f32 %v7290_v44, %v16623_v32  ;;  %v7657_v9 = vadd.f32 1.0, %v16584_v34  ;;  %v7659_v1 = vadd.f32 1.0, %v10781_v55 }
0x12da   : > { %v7544_v39 = vmul.f32 0.7978846, %v7480_v6  ;;  %8047 = vmatmul.mubr.bf16.vlgmr.msra.gmra.mxu1 %v7844_v42  ;;  %v7355_v8 = vmul.f32 %v7291_v52, %v16628_v3  ;;  %v7292_v46 = vmul.f32 %v16639_v33, %v16639_v33  ;;  %v7173_v27 = vpop.f32.mrf.mxu0  ;;  %v16652_v4 = vadd.f32 %v7171_v16, %v16449_v12 }
0x12db   : > { %v16648_v7 = vpop.eup %10792  ;;  %v7481_v24 = vadd.f32 %v7417_v53, %v16611_v59  ;;  %v7418_v13 = vmul.f32 0.044715, %v7354_v35  ;;  %v7721_v15 = vmul.f32 0.5, %v7657_v9  ;;  %10804 = vtanh.f32 %v7543_v23 }
0x12dc   : > { %v16654_v44 = vpop.eup %10794  ;;  %v7419_v34 = vmul.f32 0.044715, %v7355_v8  ;;  %v7356_v42 = vmul.f32 %v7292_v46, %v16639_v33  ;;  %v7723_v6 = vmul.f32 0.5, %v7659_v1  ;;  %v7175_v52 = vpop.f32.mrf.mxu0  ;;  %v7293_v53 = vmul.f32 %v16652_v4, %v16652_v4 }
0x12dd   : > { %v7545_v10 = vmul.f32 0.7978846, %v7481_v24  ;;  %v7482_v55 = vadd.f32 %v7418_v13, %v16623_v32  ;;  %v7785_v62 = vmul.f32 %v7721_v15, %v16483_v50  ;;  %v7656_v23 = vadd.f32 1.0, %v16574_v61 }
0x12de   : > { %v7483_v35 = vadd.f32 %v7419_v34, %v16628_v3  ;;  %v7420_v16 = vmul.f32 0.044715, %v7356_v42  ;;  %v7787_v9 = vmul.f32 %v7723_v6, %v16494_v63  ;;  %v7179_v8 = vpop.f32.mrf.mxu0  ;;  %10806 = vtanh.f32 %v7544_v39 }
0x12df   : > { %v7546_v46 = vmul.f32 0.7978846, %v7482_v55  ;;  %v7357_v1 = vmul.f32 %v7293_v53, %v16652_v4  ;;  %v7658_v24 = vadd.f32 1.0, %v16589_v29  ;;  %10808 = vtanh.f32 %v7545_v10 }
0x12e0   : > { %v16666_v13 = vpop.eup %10796  ;;  %v7547_v50 = vmul.f32 0.7978846, %v7483_v35  ;;  %v7847_v15 = vpack.c.bf16 %v7787_v9, %v7785_v62  ;;  %v7720_v17 = vmul.f32 0.5, %v7656_v23  ;;  %v7181_v37 = vpop.f32.mrf.mxu0  ;;  %v7484_v34 = vadd.f32 %v7420_v16, %v16639_v33 }
0x12e1   : > { %v7421_v42 = vmul.f32 0.044715, %v7357_v1  ;;  %v7722_v63 = vmul.f32 0.5, %v7658_v24  ;;  %v16670_v61 = vadd.f32 %v7173_v27, %v16445_v18  ;;  %10810 = vtanh.f32 %v7546_v46 }
0x12e2   : > { %8054 = vmatprep.mubr.bf16.mxu1 %v7847_v15  ;;  %v7784_v39 = vmul.f32 %v7720_v17, %v16476_v47  ;;  %v16674_v29 = vadd.f32 %v7175_v52, %v16449_v12  ;;  %v7183_v6 = vpop.f32.mrf.mxu0  ;;  %v16676_v10 = vpop.eup %10798  ;;  %v16683_v27 = vadd.f32 %v7179_v8, %v16445_v18  ;;  %10812 = vtanh.f32 %v7547_v50 }
0x12e3   : > { %v7485_v62 = vadd.f32 %v7421_v42, %v16652_v4  ;;  %v7786_v55 = vmul.f32 %v7722_v63, %v16490_v45  ;;  %v7294_v53 = vmul.f32 %v16670_v61, %v16670_v61  ;;  %v16685_v35 = vpop.eup %10800  ;;  %v7661_v47 = vadd.f32 1.0, %v16616_v57 }
0x12e4   : > { %v7295_v17 = vmul.f32 %v16674_v29, %v16674_v29  ;;  %v7663_v52 = vadd.f32 1.0, %v16633_v43  ;;  %v7185_v16 = vpop.f32.mrf.mxu0  ;;  %v7548_v9 = vmul.f32 0.7978846, %v7484_v34  ;;  %v7296_v46 = vmul.f32 %v16683_v27, %v16683_v27 }
0x12e5   : > { %v7846_v23 = vpack.c.bf16 %v7786_v55, %v7784_v39  ;;  %v7358_v45 = vmul.f32 %v7294_v53, %v16670_v61  ;;  %v16694_v8 = vpop.eup %10802  ;;  %v7725_v24 = vmul.f32 0.5, %v7661_v47  ;;  %v16698_v15 = vadd.f32 %v7181_v37, %v16449_v12 }
0x12e6   : > { %v7359_v1 = vmul.f32 %v7295_v17, %v16674_v29  ;;  %v7727_v50 = vmul.f32 0.5, %v7663_v52  ;;  %v7189_v57 = vpop.f32.mrf.mxu0  ;;  %v7549_v42 = vmul.f32 0.7978846, %v7485_v62  ;;  %v7360_v34 = vmul.f32 %v7296_v46, %v16683_v27 }
0x12e7   : > { %8055 = vmatmul.mubr.bf16.gmra.mxu1 %v7846_v23  ;;  %v7422_v43 = vmul.f32 0.044715, %v7358_v45  ;;  %v7660_v63 = vadd.f32 1.0, %v16603_v0  ;;  %v7789_v55 = vmul.f32 %v7725_v24, %v16510_v60  ;;  %v7297_v17 = vmul.f32 %v16698_v15, %v16698_v15 }
0x12e8   : > { %v7423_v39 = vmul.f32 0.044715, %v7359_v1  ;;  %v7791_v53 = vmul.f32 %v7727_v50, %v16525_v20  ;;  %v7191_v47 = vpop.f32.mrf.mxu0  ;;  %v16706_v52 = vpop.eup %10804  ;;  %v7424_v62 = vmul.f32 0.044715, %v7360_v34  ;;  %v7662_v23 = vadd.f32 1.0, %v16625_v14 }
0x12e9   : > { %v7486_v37 = vadd.f32 %v7422_v43, %v16670_v61  ;;  %v7724_v45 = vmul.f32 0.5, %v7660_v63  ;;  %v7361_v1 = vmul.f32 %v7297_v17, %v16698_v15  ;;  %v16713_v60 = vadd.f32 %v7183_v6, %v16445_v18 }
0x12ea   : > { %v7487_v46 = vadd.f32 %v7423_v39, %v16674_v29  ;;  %v7849_v0 = vpack.c.bf16 %v7791_v53, %v7789_v55  ;;  %10814 = vtanh.f32 %v7548_v9  ;;  %v7488_v24 = vadd.f32 %v7424_v62, %v16683_v27  ;;  %v7193_v48 = vpop.f32.mrf.mxu0 }
0x12eb   : > { %v7550_v20 = vmul.f32 0.7978846, %v7486_v37  ;;  %v7726_v50 = vmul.f32 0.5, %v7662_v23  ;;  %v16716_v38 = vpop.eup %10806  ;;  %v7425_v14 = vmul.f32 0.044715, %v7361_v1  ;;  %v7298_v34 = vmul.f32 %v16713_v60, %v16713_v60 }
0x12ec   : > { %v7551_v43 = vmul.f32 0.7978846, %v7487_v46  ;;  %8062 = vmatprep.mubr.bf16.mxu1 %v7849_v0  ;;  %v16721_v63 = vadd.f32 %v7185_v16, %v16449_v12  ;;  %v16723_v39 = vpop.eup %10808  ;;  %10816 = vtanh.f32 %v7549_v42  ;;  %v7788_v6 = vmul.f32 %v7724_v45, %v16502_v56  ;;  %v7195_v42 = vpop.f32.mrf.mxu0 }
0x12ed   : > { %v7790_v9 = vmul.f32 %v7726_v50, %v16517_v2  ;;  %v16728_v55 = vadd.f32 %v7189_v57, %v16445_v18  ;;  %10818 = vtanh.f32 %v7550_v20  ;;  %v7489_v53 = vadd.f32 %v7425_v14, %v16698_v15 }
0x12ee   : > { %v7362_v17 = vmul.f32 %v7298_v34, %v16713_v60  ;;  %v7299_v37 = vmul.f32 %v16721_v63, %v16721_v63  ;;  %v16734_v16 = vpop.eup %10810  ;;  %v7552_v62 = vmul.f32 0.7978846, %v7488_v24  ;;  %v7665_v2 = vadd.f32 1.0, %v16648_v7 }
0x12ef   : > { %v7848_v23 = vpack.c.bf16 %v7790_v9, %v7788_v6  ;;  %v7300_v56 = vmul.f32 %v16728_v55, %v16728_v55  ;;  %10820 = vtanh.f32 %v7551_v43  ;;  %v7667_v46 = vadd.f32 1.0, %v16666_v13  ;;  %v16741_v0 = vpop.eup %10812 }
0x12f0   : > { %v7426_v57 = vmul.f32 0.044715, %v7362_v17  ;;  %v7363_v45 = vmul.f32 %v7299_v37, %v16721_v63  ;;  %v7729_v20 = vmul.f32 0.5, %v7665_v2  ;;  %v16745_v24 = vadd.f32 %v7191_v47, %v16449_v12  ;;  %v7199_v17 = vpop.f32.mrf.mxu0 }
0x12f1   : > { %8063 = vmatmul.mubr.bf16.gmra.mxu1 %v7848_v23  ;;  %v7364_v1 = vmul.f32 %v7300_v56, %v16728_v55  ;;  %v7664_v50 = vadd.f32 1.0, %v16641_v25  ;;  %v7553_v14 = vmul.f32 0.7978846, %v7489_v53  ;;  %v7731_v34 = vmul.f32 0.5, %v7667_v46 }
0x12f2   : > { %v7490_v7 = vadd.f32 %v7426_v57, %v16713_v60  ;;  %v7427_v43 = vmul.f32 0.044715, %v7363_v45  ;;  %10822 = vtanh.f32 %v7552_v62  ;;  %v7301_v13 = vmul.f32 %v16745_v24, %v16745_v24 }
0x12f3   : > { %v7428_v6 = vmul.f32 0.044715, %v7364_v1  ;;  %v7666_v9 = vadd.f32 1.0, %v16654_v44  ;;  %v7793_v23 = vmul.f32 %v7729_v20, %v16539_v40  ;;  %v7795_v47 = vmul.f32 %v7731_v34, %v16557_v28  ;;  %v7201_v1 = vpop.f32.mrf.mxu0 }
0x12f4   : > { %v7554_v37 = vmul.f32 0.7978846, %v7490_v7  ;;  %v7728_v56 = vmul.f32 0.5, %v7664_v50  ;;  %v7491_v25 = vadd.f32 %v7427_v43, %v16721_v63  ;;  %v7365_v53 = vmul.f32 %v7301_v13, %v16745_v24 }
0x12f5   : > { %v7730_v2 = vmul.f32 0.5, %v7666_v9  ;;  %v16757_v62 = vadd.f32 %v7193_v48, %v16445_v18  ;;  %10824 = vtanh.f32 %v7553_v14  ;;  %v7492_v57 = vadd.f32 %v7428_v6, %v16728_v55 }
0x12f6   : > { %v7851_v45 = vpack.c.bf16 %v7795_v47, %v7793_v23  ;;  %v7429_v44 = vmul.f32 0.044715, %v7365_v53  ;;  %v7792_v46 = vmul.f32 %v7728_v56, %v16532_v22  ;;  %10826 = vtanh.f32 %v7554_v37  ;;  %v7203_v56 = vpop.f32.mrf.mxu0 }
0x12f7   : > { %v7794_v40 = vmul.f32 %v7730_v2, %v16542_v19  ;;  %v7302_v28 = vmul.f32 %v16757_v62, %v16757_v62  ;;  %v16764_v20 = vpop.eup %10814  ;;  %v16767_v48 = vadd.f32 %v7195_v42, %v16449_v12  ;;  %v16770_v50 = vadd.f32 %v7199_v17, %v16445_v18 }
0x12f8   : > { %8070 = vmatprep.mubr.bf16.mxu1 %v7851_v45  ;;  %v7669_v14 = vadd.f32 1.0, %v16685_v35  ;;  %v7555_v7 = vmul.f32 0.7978846, %v7491_v25  ;;  %v7493_v22 = vadd.f32 %v7429_v44, %v16745_v24  ;;  %v7671_v13 = vadd.f32 1.0, %v16706_v52 }
0x12f9   : > { %v7850_v19 = vpack.c.bf16 %v7794_v40, %v7792_v46  ;;  %v7366_v43 = vmul.f32 %v7302_v28, %v16757_v62  ;;  %v16775_v34 = vpop.eup %10816  ;;  %v7303_v6 = vmul.f32 %v16767_v48, %v16767_v48  ;;  %v7304_v42 = vmul.f32 %v16770_v50, %v16770_v50 }
0x12fa   : > { %v7733_v9 = vmul.f32 0.5, %v7669_v14  ;;  %v16782_v17 = vpop.eup %10818  ;;  %v7556_v35 = vmul.f32 0.7978846, %v7492_v57  ;;  %v16785_v23 = vadd.f32 %v7201_v1, %v16449_v12  ;;  %v7668_v47 = vadd.f32 1.0, %v16676_v10 }
0x12fb   : > { %8071 = vmatmul.mubr.bf16.gmra.mxu1 %v7850_v19  ;;  %v7430_v37 = vmul.f32 0.044715, %v7366_v43  ;;  %v7557_v25 = vmul.f32 0.7978846, %v7493_v22  ;;  %v7367_v53 = vmul.f32 %v7303_v6, %v16767_v48  ;;  %v7368_v2 = vmul.f32 %v7304_v42, %v16770_v50 }
0x12fc   : > { %v7735_v45 = vmul.f32 0.5, %v7671_v13  ;;  %v10821_v44 = vpop.eup %10820  ;;  %10828 = vtanh.f32 %v7555_v7  ;;  %v7797_v52 = vmul.f32 %v7733_v9, %v16572_v58  ;;  %v7305_v57 = vmul.f32 %v16785_v23, %v16785_v23  ;;  %v7205_v7 = vpop.f32.mrf.mxu0 }
0x12fd   : > { %v7670_v46 = vadd.f32 1.0, %v16694_v8  ;;  %v7494_v40 = vadd.f32 %v7430_v37, %v16757_v62  ;;  %v7431_v28 = vmul.f32 0.044715, %v7367_v53  ;;  %v7732_v1 = vmul.f32 0.5, %v7668_v47 }
0x12fe   : > { %v7799_v10 = vmul.f32 %v7735_v45, %v16587_v41  ;;  %10830 = vtanh.f32 %v7556_v35  ;;  %v7369_v14 = vmul.f32 %v7305_v57, %v16785_v23  ;;  %v16798_v19 = vadd.f32 %v7203_v56, %v16445_v18 }
0x12ff   : > { %v7734_v22 = vmul.f32 0.5, %v7670_v46  ;;  %v16800_v58 = vpop.eup %10822  ;;  %10832 = vtanh.f32 %v7557_v25  ;;  %v7495_v43 = vadd.f32 %v7431_v28, %v16767_v48  ;;  %v7432_v8 = vmul.f32 0.044715, %v7368_v2 }
0x1300   : > { %v7853_v6 = vpack.c.bf16 %v7799_v10, %v7797_v52  ;;  %v7433_v42 = vmul.f32 0.044715, %v7369_v14  ;;  %v7796_v13 = vmul.f32 %v7732_v1, %v16560_v5  ;;  %v7306_v9 = vmul.f32 %v16798_v19, %v16798_v19 }
0x1301   : > { %v7798_v41 = vmul.f32 %v7734_v22, %v16582_v26  ;;  %v7558_v35 = vmul.f32 0.7978846, %v7494_v40  ;;  %v7559_v37 = vmul.f32 0.7978846, %v7495_v43  ;;  %v16808_v47 = vadd.f32 %v7205_v7, %v16449_v12 }
0x1302   : > { %8078 = vmatprep.mubr.bf16.mxu1 %v7853_v6  ;;  %v7673_v56 = vadd.f32 1.0, %v16723_v39  ;;  %v10825_v25 = vpop.eup %10824  ;;  %v7497_v53 = vadd.f32 %v7433_v42, %v16785_v23  ;;  %v7370_v45 = vmul.f32 %v7306_v9, %v16798_v19  ;;  %v7675_v5 = vadd.f32 1.0, %v16741_v0 }
0x1303   : > { %v7852_v2 = vpack.c.bf16 %v7798_v41, %v7796_v13  ;;  %10834 = vtanh.f32 %v7559_v37  ;;  %v7307_v26 = vmul.f32 %v16808_v47, %v16808_v47  ;;  %v7672_v57 = vadd.f32 1.0, %v16716_v38  ;;  %v10827_v46 = vpop.eup %10826 }
0x1304   : > { %v7737_v52 = vmul.f32 0.5, %v7673_v56  ;;  %v7496_v40 = vadd.f32 %v7432_v8, %v16770_v50  ;;  %v7561_v28 = vmul.f32 0.7978846, %v7497_v53  ;;  %v7434_v39 = vmul.f32 0.044715, %v7370_v45 }
0x1305   : > { %8079 = vmatmul.mubr.bf16.gmra.mxu1 %v7852_v2  ;;  %v7739_v10 = vmul.f32 0.5, %v7675_v5  ;;  %10836 = vtanh.f32 %v7558_v35  ;;  %v7371_v1 = vmul.f32 %v7307_v26, %v16808_v47  ;;  %v7674_v14 = vadd.f32 1.0, %v16734_v16 }
0x1306   : > { %v7736_v0 = vmul.f32 0.5, %v7672_v57  ;;  %v7498_v22 = vadd.f32 %v7434_v39, %v16798_v19  ;;  %v7801_v7 = vmul.f32 %v7737_v52, %v16611_v59  ;;  %v7677_v38 = vadd.f32 1.0, %v16775_v34 }
0x1307   : > { %v7803_v43 = vmul.f32 %v7739_v10, %v16628_v3  ;;  %10838 = vtanh.f32 %v7561_v28  ;;  %v7435_v8 = vmul.f32 0.044715, %v7371_v1  ;;  %v7738_v6 = vmul.f32 0.5, %v7674_v14 }
0x1308   : > { %v7679_v42 = vadd.f32 1.0, %v10821_v44  ;;  %v7800_v41 = vmul.f32 %v7736_v0, %v16600_v21  ;;  %v7741_v9 = vmul.f32 0.5, %v7677_v38  ;;  %v7676_v35 = vadd.f32 1.0, %v16764_v20 }
0x1309   : > { %v7855_v13 = vpack.c.bf16 %v7803_v43, %v7801_v7  ;;  %v10829_v16 = vpop.eup %10828  ;;  %v7499_v37 = vadd.f32 %v7435_v8, %v16808_v47  ;;  %v7802_v56 = vmul.f32 %v7738_v6, %v16623_v32  ;;  %v7678_v3 = vadd.f32 1.0, %v16782_v17 }
0x130a   : > { %v7743_v59 = vmul.f32 0.5, %v7679_v42  ;;  %v7562_v53 = vmul.f32 0.7978846, %v7498_v22  ;;  %v7805_v34 = vmul.f32 %v7741_v9, %v16652_v4  ;;  %v7681_v2 = vadd.f32 1.0, %v10825_v25 }
0x130b   : > { %8086 = vmatprep.mubr.bf16.mxu1 %v7855_v13  ;;  %v10831_v44 = vpop.eup %10830  ;;  %v7563_v45 = vmul.f32 0.7978846, %v7499_v37  ;;  %v7854_v5 = vpack.c.bf16 %v7802_v56, %v7800_v41  ;;  %v7742_v26 = vmul.f32 0.5, %v7678_v3  ;;  %v7683_v52 = vadd.f32 1.0, %v10829_v16 }
0x130c   : > { %v7807_v21 = vmul.f32 %v7743_v59, %v16674_v29  ;;  %v10833_v20 = vpop.eup %10832  ;;  %v7745_v57 = vmul.f32 0.5, %v7681_v2  ;;  %v7560_v28 = vmul.f32 0.7978846, %v7496_v40  ;;  %v7740_v39 = vmul.f32 0.5, %v7676_v35 }
0x130d   : > { %10840 = vtanh.f32 %v7563_v45  ;;  %8087 = vmatmul.mubr.bf16.gmra.mxu1 %v7854_v5  ;;  %v7747_v17 = vmul.f32 0.5, %v7683_v52  ;;  %v7806_v4 = vmul.f32 %v7742_v26, %v16670_v61  ;;  %v7682_v25 = vadd.f32 1.0, %v10827_v46 }
0x130e   : > { %v7857_v32 = vpack.c.bf16 %v7807_v21, %v7805_v34  ;;  %10842 = vtanh.f32 %v7562_v53  ;;  %v7809_v1 = vmul.f32 %v7745_v57, %v16698_v15  ;;  %v7685_v14 = vadd.f32 1.0, %v10833_v20 }
0x130f   : > { %v7811_v29 = vmul.f32 %v7747_v17, %v16721_v63  ;;  %10844 = vtanh.f32 %v7560_v28  ;;  %v7804_v0 = vmul.f32 %v7740_v39, %v16639_v33  ;;  %v7680_v40 = vadd.f32 1.0, %v16800_v58 }
0x1310   : > { %8094 = vmatprep.mubr.bf16.mxu1 %v7857_v32  ;;  %v10835_v10 = vpop.eup %10834  ;;  %v7746_v8 = vmul.f32 0.5, %v7682_v25  ;;  %v7749_v61 = vmul.f32 0.5, %v7685_v14  ;;  %v7684_v9 = vadd.f32 1.0, %v10831_v44 }
0x1311   : > { %v7687_v22 = vadd.f32 1.0, %v10835_v10  ;;  %v7859_v43 = vpack.c.bf16 %v7811_v29, %v7809_v1  ;;  %v7856_v38 = vpack.c.bf16 %v7806_v4, %v7804_v0  ;;  %v7744_v46 = vmul.f32 0.5, %v7680_v40 }
0x1312   : > { %v10837_v7 = vpop.eup %10836  ;;  %v7810_v63 = vmul.f32 %v7746_v8, %v16713_v60  ;;  %v7813_v33 = vmul.f32 %v7749_v61, %v16745_v24  ;;  %v7748_v34 = vmul.f32 0.5, %v7684_v9 }
0x1313   : > { %v7751_v6 = vmul.f32 0.5, %v7687_v22  ;;  %v7686_v13 = vadd.f32 1.0, %v10837_v7  ;;  %v7808_v58 = vmul.f32 %v7744_v46, %v16683_v27 }
0x1314   : > { %v10839_v42 = vpop.eup %10838  ;;  %v7812_v44 = vmul.f32 %v7748_v34, %v16728_v55 }
0x1315   : > { %8095 = vmatmul.mubr.bf16.gmra.mxu1 %v7856_v38  ;;  %v7815_v15 = vmul.f32 %v7751_v6, %v16767_v48  ;;  %v7689_v41 = vadd.f32 1.0, %v10839_v42  ;;  %v7858_v37 = vpack.c.bf16 %v7810_v63, %v7808_v58  ;;  %v7750_v56 = vmul.f32 0.5, %v7686_v13 }
0x1316   : > { %8102 = vmatprep.mubr.bf16.mxu1 %v7859_v43 }
0x1317   : > { %v7861_v16 = vpack.c.bf16 %v7815_v15, %v7813_v33  ;;  %v7753_v53 = vmul.f32 0.5, %v7689_v41  ;;  %v7814_v60 = vmul.f32 %v7750_v56, %v16757_v62 }
0x1319   : > { %v7817_v27 = vmul.f32 %v7753_v53, %v16785_v23  ;;  %v7860_v26 = vpack.c.bf16 %v7814_v60, %v7812_v44 }
0x131a   : > { %v10841_v35 = vpop.eup %10840 }
0x131b   : > { %v7691_v59 = vadd.f32 1.0, %v10841_v35  ;;  %v10843_v3 = vpop.eup %10842 }
0x131c   : > { %v10845_v48 = vpop.eup %10844  ;;  %v7690_v45 = vadd.f32 1.0, %v10843_v3 }
0x131d   : > { %8103 = vmatmul.mubr.bf16.gmra.mxu1 %v7858_v37  ;;  %v7755_v2 = vmul.f32 0.5, %v7691_v59  ;;  %v7688_v5 = vadd.f32 1.0, %v10845_v48 }
0x131e   : > { %8110 = vmatprep.mubr.bf16.mxu1 %v7861_v16  ;;  %v7754_v20 = vmul.f32 0.5, %v7690_v45 }
0x131f   : > { %v7819_v24 = vmul.f32 %v7755_v2, %v16808_v47  ;;  %v7752_v52 = vmul.f32 0.5, %v7688_v5 }
0x1320   : > { %v7818_v57 = vmul.f32 %v7754_v20, %v16798_v19 }
0x1321   : > { %v7863_v21 = vpack.c.bf16 %v7819_v24, %v7817_v27  ;;  %v7816_v28 = vmul.f32 %v7752_v52, %v16770_v50 }
0x1323   : > { %v7862_v32 = vpack.c.bf16 %v7818_v57, %v7816_v28 }
0x1325   : > { %8111 = vmatmul.mubr.bf16.gmra.mxu1 %v7860_v26 }
0x1326   : > { %8118 = vmatprep.mubr.bf16.mxu1 %v7863_v21 }
0x132d   : > { %8119 = vmatmul.mubr.bf16.gmra.mxu1 %v7862_v32 }
0x1339   : > { %v7209_v62 = vpop.f32.mrf.mxu0 }
0x133a   : > { %v16847_v47 = vadd.f32 %v7209_v62, %v16445_v18 }
0x133b   : > { %v7211_v23 = vpop.f32.mrf.mxu0 }
0x133c   : > { %v7308_v55 = vmul.f32 %v16847_v47, %v16847_v47  ;;  %v16852_v39 = vadd.f32 %v7211_v23, %v16449_v12 }
0x133d   : > { %v7213_v17 = vpop.f32.mrf.mxu0 }
0x133e   : > { %v7309_v4 = vmul.f32 %v16852_v39, %v16852_v39  ;;  %v16857_v19 = vadd.f32 %v7213_v17, %v16445_v18  ;;  %v7372_v25 = vmul.f32 %v7308_v55, %v16847_v47 }
0x133f   : > { %v7215_v50 = vpop.f32.mrf.mxu0 }
0x1340   : > { %v7373_v10 = vmul.f32 %v7309_v4, %v16852_v39  ;;  %v7310_v1 = vmul.f32 %v16857_v19, %v16857_v19  ;;  %v16864_v29 = vadd.f32 %v7215_v50, %v16449_v12  ;;  %v7436_v38 = vmul.f32 0.044715, %v7372_v25 }
0x1341   : > { %v7219_v14 = vpop.f32.mrf.mxu0 }
0x1342   : > { %v7437_v0 = vmul.f32 0.044715, %v7373_v10  ;;  %v7311_v40 = vmul.f32 %v16864_v29, %v16864_v29  ;;  %v7374_v22 = vmul.f32 %v7310_v1, %v16857_v19  ;;  %v16870_v7 = vadd.f32 %v7219_v14, %v16445_v18 }
0x1343   : > { %v7221_v43 = vpop.f32.mrf.mxu0  ;;  %v7500_v35 = vadd.f32 %v7436_v38, %v16847_v47 }
0x1344   : > { %v7501_v8 = vadd.f32 %v7437_v0, %v16852_v39  ;;  %v7375_v6 = vmul.f32 %v7311_v40, %v16864_v29  ;;  %v7312_v42 = vmul.f32 %v16870_v7, %v16870_v7  ;;  %v16877_v61 = vadd.f32 %v7221_v43, %v16449_v12 }
0x1345   : > { %v7223_v46 = vpop.f32.mrf.mxu0  ;;  %v7438_v13 = vmul.f32 0.044715, %v7374_v22  ;;  %v7564_v26 = vmul.f32 0.7978846, %v7500_v35 }
0x1346   : > { %v7565_v15 = vmul.f32 0.7978846, %v7501_v8  ;;  %v7439_v63 = vmul.f32 0.044715, %v7375_v6  ;;  %v7376_v33 = vmul.f32 %v7312_v42, %v16870_v7  ;;  %v7313_v41 = vmul.f32 %v16877_v61, %v16877_v61 }
0x1347   : > { %v16883_v58 = vadd.f32 %v7223_v46, %v16445_v18  ;;  %v7225_v9 = vpop.f32.mrf.mxu0  ;;  %v7502_v60 = vadd.f32 %v7438_v13, %v16857_v19 }
0x1348   : > { %v7503_v16 = vadd.f32 %v7439_v63, %v16864_v29  ;;  %v16888_v37 = vadd.f32 %v7225_v9, %v16449_v12  ;;  %10846 = vtanh.f32 %v7565_v15  ;;  %v7440_v56 = vmul.f32 0.044715, %v7376_v33 }
0x1349   : > { %v7377_v59 = vmul.f32 %v7313_v41, %v16877_v61  ;;  %v7314_v3 = vmul.f32 %v16883_v58, %v16883_v58  ;;  %v7229_v53 = vpop.f32.mrf.mxu0  ;;  %v7566_v4 = vmul.f32 0.7978846, %v7502_v60 }
0x134a   : > { %v7567_v34 = vmul.f32 0.7978846, %v7503_v16  ;;  %v7315_v2 = vmul.f32 %v16888_v37, %v16888_v37  ;;  %v16896_v48 = vadd.f32 %v7229_v53, %v16445_v18  ;;  %v7504_v20 = vadd.f32 %v7440_v56, %v16870_v7 }
0x134b   : > { %v7441_v24 = vmul.f32 0.044715, %v7377_v59  ;;  %v7378_v45 = vmul.f32 %v7314_v3, %v16883_v58  ;;  %v7231_v27 = vpop.f32.mrf.mxu0 }
0x134c   : > { %10848 = vtanh.f32 %v7567_v34  ;;  %v7379_v44 = vmul.f32 %v7315_v2, %v16888_v37  ;;  %v7316_v5 = vmul.f32 %v16896_v48, %v16896_v48  ;;  %v16904_v21 = vadd.f32 %v7231_v27, %v16449_v12 }
0x134d   : > { %v7442_v52 = vmul.f32 0.044715, %v7378_v45  ;;  %v7233_v57 = vpop.f32.mrf.mxu0  ;;  %v7505_v55 = vadd.f32 %v7441_v24, %v16877_v61  ;;  %10850 = vtanh.f32 %v7564_v26  ;;  %v7568_v40 = vmul.f32 0.7978846, %v7504_v20 }
0x134e   : > { %v7443_v28 = vmul.f32 0.044715, %v7379_v44  ;;  %v7380_v32 = vmul.f32 %v7316_v5, %v16896_v48  ;;  %v7317_v62 = vmul.f32 %v16904_v21, %v16904_v21  ;;  %v16911_v23 = vadd.f32 %v7233_v57, %v16445_v18 }
0x134f   : > { %v7235_v17 = vpop.f32.mrf.mxu0  ;;  %v7506_v50 = vadd.f32 %v7442_v52, %v16883_v58  ;;  %v7569_v43 = vmul.f32 0.7978846, %v7505_v55  ;;  %10852 = vtanh.f32 %v7566_v4 }
0x1350   : > { %v7381_v25 = vmul.f32 %v7317_v62, %v16904_v21  ;;  %v7318_v10 = vmul.f32 %v16911_v23, %v16911_v23  ;;  %v7444_v1 = vmul.f32 0.044715, %v7380_v32  ;;  %v16919_v14 = vadd.f32 %v7235_v17, %v16449_v12 }
0x1351   : > { %v7239_v0 = vpop.f32.mrf.mxu0  ;;  %v7507_v22 = vadd.f32 %v7443_v28, %v16888_v37  ;;  %v7570_v46 = vmul.f32 0.7978846, %v7506_v50  ;;  %10854 = vtanh.f32 %v7568_v40 }
0x1352   : > { %v7445_v38 = vmul.f32 0.044715, %v7381_v25  ;;  %v7382_v8 = vmul.f32 %v7318_v10, %v16911_v23  ;;  %v7319_v6 = vmul.f32 %v16919_v14, %v16919_v14  ;;  %v7508_v15 = vadd.f32 %v7444_v1, %v16896_v48 }
0x1353   : > { %v7241_v42 = vpop.f32.mrf.mxu0  ;;  %v16928_v13 = vadd.f32 %v7239_v0, %v16445_v18  ;;  %v7571_v35 = vmul.f32 0.7978846, %v7507_v22  ;;  %10856 = vtanh.f32 %v7569_v43 }
0x1354   : > { %v7383_v63 = vmul.f32 %v7319_v6, %v16919_v14  ;;  %v16931_v33 = vadd.f32 %v7241_v42, %v16449_v12  ;;  %v7509_v56 = vadd.f32 %v7445_v38, %v16904_v21  ;;  %v7446_v59 = vmul.f32 0.044715, %v7382_v8 }
0x1355   : > { %v7243_v41 = vpop.f32.mrf.mxu0  ;;  %v10847_v9 = vpop.eup %10846  ;;  %10858 = vtanh.f32 %v7570_v46  ;;  %v7572_v45 = vmul.f32 0.7978846, %v7508_v15  ;;  %v7320_v27 = vmul.f32 %v16928_v13, %v16928_v13 }
0x1356   : > { %v16934_v16 = vadd.f32 %v7243_v41, %v16445_v18  ;;  %v7321_v3 = vmul.f32 %v16931_v33, %v16931_v33  ;;  %v7447_v34 = vmul.f32 0.044715, %v7383_v63  ;;  %v7693_v26 = vadd.f32 1.0, %v10847_v9 }
0x1357   : > { %v7245_v53 = vpop.f32.mrf.mxu0  ;;  %10860 = vtanh.f32 %v7571_v35  ;;  %v7573_v28 = vmul.f32 0.7978846, %v7509_v56  ;;  %v7510_v32 = vadd.f32 %v7446_v59, %v16911_v23  ;;  %v7384_v1 = vmul.f32 %v7320_v27, %v16928_v13 }
0x1358   : > { %v7322_v2 = vmul.f32 %v16934_v16, %v16934_v16  ;;  %v16942_v60 = vadd.f32 %v7245_v53, %v16449_v12  ;;  %v7385_v44 = vmul.f32 %v7321_v3, %v16931_v33  ;;  %v7511_v4 = vadd.f32 %v7447_v34, %v16919_v14 }
0x1359   : > { %v10849_v24 = vpop.eup %10848  ;;  %v7249_v5 = vpop.f32.mrf.mxu0  ;;  %10862 = vtanh.f32 %v7572_v45  ;;  %v7757_v40 = vmul.f32 0.5, %v7693_v26  ;;  %v7574_v46 = vmul.f32 0.7978846, %v7510_v32  ;;  %v7448_v45 = vmul.f32 0.044715, %v7384_v1 }
0x135a   : > { %v7386_v20 = vmul.f32 %v7322_v2, %v16934_v16  ;;  %v7323_v52 = vmul.f32 %v16942_v60, %v16942_v60  ;;  %v16951_v57 = vadd.f32 %v7249_v5, %v16445_v18  ;;  %v7449_v62 = vmul.f32 0.044715, %v7385_v44  ;;  %v10851_v42 = vpop.eup %10850 }
0x135b   : > { %v7251_v55 = vpop.f32.mrf.mxu0  ;;  %v7695_v17 = vadd.f32 1.0, %v10849_v24  ;;  %10864 = vtanh.f32 %v7573_v28  ;;  %v7575_v41 = vmul.f32 0.7978846, %v7511_v4  ;;  %v7821_v2 = vmul.f32 %v7757_v40, %v16852_v39 }
0x135c   : > { %v7387_v50 = vmul.f32 %v7323_v52, %v16942_v60  ;;  %v7324_v25 = vmul.f32 %v16951_v57, %v16951_v57  ;;  %v16959_v10 = vadd.f32 %v7251_v55, %v16449_v12  ;;  %v7513_v43 = vadd.f32 %v7449_v62, %v16931_v33  ;;  %v10853_v59 = vpop.eup %10852 }
0x135d   : > { %v7253_v0 = vpop.f32.mrf.mxu0  ;;  %v7759_v22 = vmul.f32 0.5, %v7695_v17  ;;  %v7450_v38 = vmul.f32 0.044715, %v7386_v20  ;;  %10866 = vtanh.f32 %v7574_v46  ;;  %v7692_v55 = vadd.f32 1.0, %v10851_v42 }
0x135e   : > { %v7451_v8 = vmul.f32 0.044715, %v7387_v50  ;;  %v7325_v6 = vmul.f32 %v16959_v10, %v16959_v10  ;;  %v16966_v15 = vadd.f32 %v7253_v0, %v16445_v18  ;;  %v7388_v35 = vmul.f32 %v7324_v25, %v16951_v57  ;;  %v16979_v26 = vpop.eup %10854 }
0x135f   : > { %v7255_v63 = vpop.f32.mrf.mxu0  ;;  %v7823_v24 = vmul.f32 %v7759_v22, %v16864_v29  ;;  %v7577_v27 = vmul.f32 0.7978846, %v7513_v43  ;;  %v7514_v44 = vadd.f32 %v7450_v38, %v16934_v16  ;;  %10868 = vtanh.f32 %v7575_v41 }
0x1360   : > { %v7515_v9 = vadd.f32 %v7451_v8, %v16942_v60  ;;  %v7389_v56 = vmul.f32 %v7325_v6, %v16959_v10  ;;  %v7326_v3 = vmul.f32 %v16966_v15, %v16966_v15  ;;  %v16974_v53 = vadd.f32 %v7255_v63, %v16449_v12  ;;  %v10857_v62 = vpop.eup %10856 }
0x1361   : > { %v7259_v34 = vpop.f32.mrf.mxu0  ;;  %v7865_v28 = vpack.c.bf16 %v7823_v24, %v7821_v2  ;;  %v7452_v4 = vmul.f32 0.044715, %v7388_v35  ;;  %v7512_v40 = vadd.f32 %v7448_v45, %v16928_v13  ;;  %10870 = vtanh.f32 %v7577_v27 }
0x1362   : > { %v7453_v5 = vmul.f32 0.044715, %v7389_v56  ;;  %v7390_v20 = vmul.f32 %v7326_v3, %v16966_v15  ;;  %v7327_v52 = vmul.f32 %v16974_v53, %v16974_v53  ;;  %v7579_v39 = vmul.f32 0.7978846, %v7515_v9  ;;  %v16985_v17 = vpop.eup %10858 }
0x1363   : > { %v7261_v32 = vpop.f32.mrf.mxu0  ;;  %v16989_v25 = vadd.f32 %v7259_v34, %v16445_v18  ;;  %8126 = vmatprep.mubr.bf16.mxu1 %v7865_v28  ;;  %v7578_v22 = vmul.f32 0.7978846, %v7514_v44  ;;  %v7694_v43 = vadd.f32 1.0, %v10853_v59  ;;  %v7756_v63 = vmul.f32 0.5, %v7692_v55 }
0x1364   : > { %v7517_v29 = vadd.f32 %v7453_v5, %v16959_v10  ;;  %v7391_v50 = vmul.f32 %v7327_v52, %v16974_v53  ;;  %v16992_v1 = vadd.f32 %v7261_v32, %v16449_v12  ;;  %v10861_v38 = vpop.eup %10860  ;;  %v7454_v6 = vmul.f32 0.044715, %v7390_v20 }
0x1365   : > { %v7263_v0 = vpop.f32.mrf.mxu0  ;;  %10872 = vtanh.f32 %v7579_v39  ;;  %v7516_v41 = vadd.f32 %v7452_v4, %v16951_v57  ;;  %v7328_v35 = vmul.f32 %v16989_v25, %v16989_v25  ;;  %v7576_v34 = vmul.f32 0.7978846, %v7512_v40 }
0x1366   : > { %v7581_v8 = vmul.f32 0.7978846, %v7517_v29  ;;  %v7455_v42 = vmul.f32 0.044715, %v7391_v50  ;;  %v7329_v46 = vmul.f32 %v16992_v1, %v16992_v1  ;;  %v10863_v59 = vpop.eup %10862  ;;  %10874 = vtanh.f32 %v7578_v22 }
0x1367   : > { %v7265_v3 = vpop.f32.mrf.mxu0  ;;  %v7758_v2 = vmul.f32 0.5, %v7694_v43  ;;  %v17003_v24 = vadd.f32 %v7263_v0, %v16445_v18  ;;  %v7518_v45 = vadd.f32 %v7454_v6, %v16966_v15  ;;  %v7820_v20 = vmul.f32 %v7756_v63, %v16847_v47 }
0x1368   : > { %v7519_v9 = vadd.f32 %v7455_v42, %v16974_v53  ;;  %v7393_v56 = vmul.f32 %v7329_v46, %v16992_v1  ;;  %10876 = vtanh.f32 %v7581_v8  ;;  %v10865_v5 = vpop.eup %10864  ;;  %v17011_v32 = vadd.f32 %v7265_v3, %v16449_v12 }
0x1369   : > { %v7822_v52 = vmul.f32 %v7758_v2, %v16857_v19  ;;  %v7330_v28 = vmul.f32 %v17003_v24, %v17003_v24  ;;  %v7580_v39 = vmul.f32 0.7978846, %v7516_v41  ;;  %v7392_v18 = vmul.f32 %v7328_v35, %v16989_v25 }
0x136a   : > { %v7583_v27 = vmul.f32 0.7978846, %v7519_v9  ;;  %v7457_v44 = vmul.f32 0.044715, %v7393_v56  ;;  %v7331_v47 = vmul.f32 %v17011_v32, %v17011_v32  ;;  %v7697_v50 = vadd.f32 1.0, %v10857_v62  ;;  %v10867_v0 = vpop.eup %10866 }
0x136b   : > { %v7864_v55 = vpack.c.bf16 %v7822_v52, %v7820_v20  ;;  %v7394_v4 = vmul.f32 %v7330_v28, %v17003_v24  ;;  %v7699_v19 = vadd.f32 1.0, %v10861_v38  ;;  %v7582_v40 = vmul.f32 0.7978846, %v7518_v45 }
0x136c   : > { %10878 = vtanh.f32 %v7583_v27  ;;  %v7521_v29 = vadd.f32 %v7457_v44, %v16992_v1  ;;  %v7395_v12 = vmul.f32 %v7331_v47, %v17011_v32  ;;  %v7761_v22 = vmul.f32 0.5, %v7697_v50  ;;  %v10869_v43 = vpop.eup %10868 }
0x136d   : > { %10880 = vtanh.f32 %v7576_v34  ;;  %8127 = vmatmul.mubr.bf16.gmra.mxu1 %v7864_v55  ;;  %v7458_v8 = vmul.f32 0.044715, %v7394_v4  ;;  %v7763_v6 = vmul.f32 0.5, %v7699_v19  ;;  %v7696_v42 = vadd.f32 1.0, %v16979_v26 }
0x136e   : > { %10882 = vtanh.f32 %v7580_v39  ;;  %v7456_v46 = vmul.f32 0.044715, %v7392_v18  ;;  %v7585_v63 = vmul.f32 0.7978846, %v7521_v29  ;;  %v7459_v41 = vmul.f32 0.044715, %v7395_v12  ;;  %v10871_v62 = vpop.eup %10870 }
0x136f   : > { %v7825_v9 = vmul.f32 %v7761_v22, %v16877_v61  ;;  %v7827_v38 = vmul.f32 %v7763_v6, %v16888_v37  ;;  %v7698_v35 = vadd.f32 1.0, %v16985_v17  ;;  %v7760_v56 = vmul.f32 0.5, %v7696_v42 }
0x1370   : > { %v7701_v3 = vadd.f32 1.0, %v10865_v5  ;;  %v7700_v34 = vadd.f32 1.0, %v10863_v59  ;;  %v7702_v2 = vadd.f32 1.0, %v10867_v0  ;;  %10884 = vtanh.f32 %v7582_v40 }
0x1371   : > { %v7523_v45 = vadd.f32 %v7459_v41, %v17011_v32  ;;  %v7522_v26 = vadd.f32 %v7458_v8, %v17003_v24  ;;  %v7867_v44 = vpack.c.bf16 %v7827_v38, %v7825_v9  ;;  %v7762_v20 = vmul.f32 0.5, %v7698_v35 }
0x1372   : > { %v10873_v27 = vpop.eup %10872  ;;  %v7703_v52 = vadd.f32 1.0, %v10869_v43  ;;  %v7520_v61 = vadd.f32 %v7456_v46, %v16989_v25  ;;  %10886 = vtanh.f32 %v7585_v63  ;;  %v7765_v37 = vmul.f32 0.5, %v7701_v3 }
0x1373   : > { %v7587_v28 = vmul.f32 0.7978846, %v7523_v45  ;;  %v10875_v39 = vpop.eup %10874  ;;  %8134 = vmatprep.mubr.bf16.mxu1 %v7867_v44  ;;  %v7824_v17 = vmul.f32 %v7760_v56, %v16870_v7  ;;  %v7826_v59 = vmul.f32 %v7762_v20, %v16883_v58  ;;  %v7705_v18 = vadd.f32 1.0, %v10871_v62 }
0x1374   : > { %v7767_v5 = vmul.f32 0.5, %v7703_v52  ;;  %v7766_v55 = vmul.f32 0.5, %v7702_v2  ;;  %v7707_v4 = vadd.f32 1.0, %v10873_v27  ;;  %v7586_v47 = vmul.f32 0.7978846, %v7522_v26 }
0x1375   : > { %v10877_v29 = vpop.eup %10876  ;;  %10888 = vtanh.f32 %v7587_v28  ;;  %v7866_v50 = vpack.c.bf16 %v7826_v59, %v7824_v17  ;;  %v7829_v19 = vmul.f32 %v7765_v37, %v16904_v21  ;;  %v7769_v12 = vmul.f32 0.5, %v7705_v18 }
0x1376   : > { %v7831_v0 = vmul.f32 %v7767_v5, %v16919_v14  ;;  %v7771_v22 = vmul.f32 0.5, %v7707_v4  ;;  %v7764_v43 = vmul.f32 0.5, %v7700_v34  ;;  %v7584_v8 = vmul.f32 0.7978846, %v7520_v61 }
0x1377   : > { %8135 = vmatmul.mubr.bf16.gmra.mxu1 %v7866_v50  ;;  %v7830_v46 = vmul.f32 %v7766_v55, %v16911_v23  ;;  %v7706_v63 = vadd.f32 1.0, %v10875_v39  ;;  %10890 = vtanh.f32 %v7586_v47  ;;  %v7833_v21 = vmul.f32 %v7769_v12, %v16931_v33 }
0x1378   : > { %v7869_v7 = vpack.c.bf16 %v7831_v0, %v7829_v19  ;;  %v7835_v6 = vmul.f32 %v7771_v22, %v16942_v60  ;;  %v7709_v14 = vadd.f32 1.0, %v10877_v29  ;;  %v7828_v9 = vmul.f32 %v7764_v43, %v16896_v48 }
0x1379   : > { %v10879_v40 = vpop.eup %10878  ;;  %10892 = vtanh.f32 %v7584_v8  ;;  %v7770_v3 = vmul.f32 0.5, %v7706_v63 }
0x137a   : > { %v10881_v58 = vpop.eup %10880  ;;  %v7711_v42 = vadd.f32 1.0, %v10879_v40  ;;  %8142 = vmatprep.mubr.bf16.mxu1 %v7869_v7  ;;  %v7871_v38 = vpack.c.bf16 %v7835_v6, %v7833_v21  ;;  %v7868_v34 = vpack.c.bf16 %v7830_v46, %v7828_v9  ;;  %v7773_v60 = vmul.f32 0.5, %v7709_v14 }
0x137b   : > { %v10883_v41 = vpop.eup %10882  ;;  %v7704_v62 = vadd.f32 1.0, %v10881_v58  ;;  %v7834_v33 = vmul.f32 %v7770_v3, %v16934_v16 }
0x137c   : > { %v7775_v35 = vmul.f32 0.5, %v7711_v42  ;;  %v7837_v48 = vmul.f32 %v7773_v60, %v16959_v10  ;;  %v7708_v61 = vadd.f32 1.0, %v10883_v41 }
0x137d   : > { %v10885_v56 = vpop.eup %10884  ;;  %v7768_v45 = vmul.f32 0.5, %v7704_v62 }
0x137e   : > { %v7839_v23 = vmul.f32 %v7775_v35, %v16974_v53  ;;  %v7710_v26 = vadd.f32 1.0, %v10885_v56  ;;  %v7772_v18 = vmul.f32 0.5, %v7708_v61 }
0x137f   : > { %v10887_v2 = vpop.eup %10886  ;;  %8143 = vmatmul.mubr.bf16.gmra.mxu1 %v7868_v34  ;;  %v7832_v52 = vmul.f32 %v7768_v45, %v16928_v13 }
0x1380   : > { %8150 = vmatprep.mubr.bf16.mxu1 %v7871_v38  ;;  %v7713_v44 = vadd.f32 1.0, %v10887_v2  ;;  %v7873_v28 = vpack.c.bf16 %v7839_v23, %v7837_v48  ;;  %v7774_v39 = vmul.f32 0.5, %v7710_v26  ;;  %v7836_v13 = vmul.f32 %v7772_v18, %v16951_v57  ;;  %v17048_v57 = vld [vmem:[%s7910_s21] ss:$0 sm:$0xff]  ;;  %v18513_v18 = vld [vmem:[#allocation77_spill] sm:$0xff] }
0x1381   : > { %v7870_v17 = vpack.c.bf16 %v7834_v33, %v7832_v52 }
0x1382   : > { %v10889_v27 = vpop.eup %10888  ;;  %v7777_v5 = vmul.f32 0.5, %v7713_v44  ;;  %v7838_v10 = vmul.f32 %v7774_v39, %v16966_v15 }
0x1383   : > { %v7715_v20 = vadd.f32 1.0, %v10889_v27 }
0x1384   : > { %v10891_v59 = vpop.eup %10890  ;;  %v7841_v55 = vmul.f32 %v7777_v5, %v16992_v1  ;;  %v7872_v19 = vpack.c.bf16 %v7838_v10, %v7836_v13 }
0x1385   : > { %v7779_v37 = vmul.f32 0.5, %v7715_v20  ;;  %v7714_v29 = vadd.f32 1.0, %v10891_v59 }
0x1386   : > { %v10893_v53 = vpop.eup %10892 }
0x1387   : > { %8151 = vmatmul.mubr.bf16.gmra.mxu1 %v7870_v17  ;;  %v7843_v16 = vmul.f32 %v7779_v37, %v17011_v32  ;;  %v7712_v4 = vadd.f32 1.0, %v10893_v53  ;;  %v7778_v50 = vmul.f32 0.5, %v7714_v29  ;;  %v18514_v29 = vld [vmem:[#allocation81_spill] sm:$0xff] }
0x1388   : > { %8158 = vmatprep.mubr.bf16.mxu1 %v7873_v28  ;;  %v18512_v28 = vld [vmem:[#allocation79_spill] sm:$0xff] }
0x1389   : > { %v7875_v47 = vpack.c.bf16 %v7843_v16, %v7841_v55  ;;  %v7776_v0 = vmul.f32 0.5, %v7712_v4  ;;  %v7842_v40 = vmul.f32 %v7778_v50, %v17003_v24 }
0x138b   : > { %v7840_v12 = vmul.f32 %v7776_v0, %v16989_v25  ;;  %v18515_v0 = vld [vmem:[#allocation128_spill] sm:$0xff] }
0x138d   : > { %v7874_v32 = vpack.c.bf16 %v7842_v40, %v7840_v12 }
0x138f   : > { %8159 = vmatmul.mubr.bf16.gmra.mxu1 %v7872_v19 }
0x1390   : > { %8166 = vmatprep.mubr.bf16.mxu1 %v7875_v47 }
0x1397   : > { %8167 = vmatmul.mubr.bf16.gmra.mxu1 %v7874_v32 }
0x139a   : > { %v9168_v15 = vpop.f32.mrf.mxu1 }
0x139c   : > { %v9169_v1 = vpop.f32.mrf.mxu1 }
0x139d   : > { %v9170_v22 = vadd.f32 %v9169_v1, %v9168_v15 }
0x139e   : > { %v9171_v43 = vpop.f32.mrf.mxu1 }
0x139f   : > { %v8049_v8 = vadd.f32 %v9170_v22, %v17048_v57  ;;  %v18516_v22 = vld [vmem:[#allocation71_spill] sm:$0xff] }
0x13a0   : > { %v9172_v7 = vpop.f32.mrf.mxu1 }
0x13a1   : > { %v8175_v24 = vadd.f32 %v8049_v8, %v15957_v36  ;;  %v9173_v25 = vadd.f32 %v9172_v7, %v9171_v43 }
0x13a3   : > { %8207 = vst [vmem:[%s11512_s9] sm:$0xff] %v8175_v24  ;;  %v8052_v58 = vadd.f32 %v9173_v25, %v17048_v57 }
0x13a5   : > { %v8176_v6 = vadd.f32 %v8052_v58, %v15962_v11  ;;  %v18517_v58 = vld [vmem:[#allocation75_spill] sm:$0xff] }
0x13a7   : > { %8208 = vst [vmem:[%s11512_s9 + $0x8] sm:$0xff] %v8176_v6  ;;  %v9174_v42 = vpop.f32.mrf.mxu1 }
0x13a9   : > { %v9175_v46 = vpop.f32.mrf.mxu1 }
0x13aa   : > { %v9176_v63 = vadd.f32 %v9175_v46, %v9174_v42 }
0x13ab   : > { %v9177_v41 = vpop.f32.mrf.mxu1 }
0x13ac   : > { %v8057_v21 = vadd.f32 %v9176_v63, %v17048_v57 }
0x13ad   : > { %v9178_v14 = vpop.f32.mrf.mxu1 }
0x13ae   : > { %v8177_v9 = vadd.f32 %v8057_v21, %v15967_v54  ;;  %v9179_v62 = vadd.f32 %v9178_v14, %v9177_v41  ;;  %v18518_v21 = vld [vmem:[#allocation119_spill] sm:$0xff] }
0x13b0   : > { %8209 = vst [vmem:[%s11512_s9 + $0x10] sm:$0xff] %v8177_v9  ;;  %v8060_v36 = vadd.f32 %v9179_v62, %v17048_v57 }
0x13b1   : > { %v9180_v38 = vpop.f32.mrf.mxu1 }
0x13b2   : > { %v8178_v35 = vadd.f32 %v8060_v36, %v15972_v51 }
0x13b3   : > { %v9181_v11 = vpop.f32.mrf.mxu1 }
0x13b4   : > { %8210 = vst [vmem:[%s11512_s9 + $0x18] sm:$0xff] %v8178_v35  ;;  %v9182_v56 = vadd.f32 %v9181_v11, %v9180_v38  ;;  %v18520_v35 = vld [vmem:[#allocation98_spill] sm:$0xff] }
0x13b5   : > { %v9183_v3 = vpop.f32.mrf.mxu1 }
0x13b6   : > { %v8065_v34 = vadd.f32 %v9182_v56, %v17048_v57 }
0x13b7   : > { %v9184_v60 = vpop.f32.mrf.mxu1 }
0x13b8   : > { %v8179_v2 = vadd.f32 %v8065_v34, %v15977_v30  ;;  %v9185_v45 = vadd.f32 %v9184_v60, %v9183_v3 }
0x13ba   : > { %8211 = vst [vmem:[%s11512_s9 + $0x20] sm:$0xff] %v8179_v2  ;;  %v8068_v54 = vadd.f32 %v9185_v45, %v17048_v57  ;;  %v18521_v2 = vld [vmem:[#allocation171_spill] sm:$0xff] }
0x13bb   : > { %v9186_v23 = vpop.f32.mrf.mxu1 }
0x13bc   : > { %v8180_v27 = vadd.f32 %v8068_v54, %v15982_v49 }
0x13bd   : > { %v9187_v33 = vpop.f32.mrf.mxu1 }
0x13be   : > { %8212 = vst [vmem:[%s11512_s9 + $0x28] sm:$0xff] %v8180_v27  ;;  %v9188_v51 = vadd.f32 %v9187_v33, %v9186_v23 }
0x13bf   : > { %v9189_v26 = vpop.f32.mrf.mxu1 }
0x13c0   : > { %v8073_v48 = vadd.f32 %v9188_v51, %v17048_v57  ;;  %v18522_v51 = vld [vmem:[#allocation146_spill] sm:$0xff] }
0x13c1   : > { %v9190_v44 = vpop.f32.mrf.mxu1 }
0x13c2   : > { %v8181_v20 = vadd.f32 %v8073_v48, %v15987_v31  ;;  %v9191_v52 = vadd.f32 %v9190_v44, %v9189_v26 }
0x13c4   : > { %8213 = vst [vmem:[%s11512_s9 + $0x30] sm:$0xff] %v8181_v20  ;;  %v8076_v30 = vadd.f32 %v9191_v52, %v17048_v57 }
0x13c5   : > { %v9192_v61 = vpop.f32.mrf.mxu1 }
0x13c6   : > { %v8182_v37 = vadd.f32 %v8076_v30, %v18512_v28 }
0x13c7   : > { %v9193_v39 = vpop.f32.mrf.mxu1 }
0x13c8   : > { %8214 = vst [vmem:[%s11512_s9 + $0x38] sm:$0xff] %v8182_v37  ;;  %v9194_v49 = vadd.f32 %v9193_v39, %v9192_v61 }
0x13c9   : > { %v9195_v17 = vpop.f32.mrf.mxu1 }
0x13ca   : > { %v8081_v59 = vadd.f32 %v9194_v49, %v17048_v57 }
0x13cb   : > { %v9196_v5 = vpop.f32.mrf.mxu1 }
0x13cc   : > { %v8183_v53 = vadd.f32 %v8081_v59, %v18513_v18  ;;  %v9197_v16 = vadd.f32 %v9196_v5, %v9195_v17 }
0x13cd   : > { %v9198_v10 = vpop.f32.mrf.mxu1 }
0x13ce   : > { %8215 = vst [vmem:[%s11512_s9 + $0x40] sm:$0xff] %v8183_v53  ;;  %v8084_v31 = vadd.f32 %v9197_v16, %v17048_v57 }
0x13cf   : > { %v9199_v13 = vpop.f32.mrf.mxu1 }
0x13d0   : > { %v8184_v55 = vadd.f32 %v8084_v31, %v18514_v29  ;;  %v9200_v4 = vadd.f32 %v9199_v13, %v9198_v10 }
0x13d1   : > { %v9201_v47 = vpop.f32.mrf.mxu1 }
0x13d2   : > { %8216 = vst [vmem:[%s11512_s9 + $0x48] sm:$0xff] %v8184_v55  ;;  %v8089_v50 = vadd.f32 %v9200_v4, %v17048_v57 }
0x13d3   : > { %v9202_v19 = vpop.f32.mrf.mxu1 }
0x13d4   : > { %v8185_v40 = vadd.f32 %v8089_v50, %v18515_v0  ;;  %v9203_v12 = vadd.f32 %v9202_v19, %v9201_v47 }
0x13d5   : > { %v9204_v32 = vpop.f32.mrf.mxu1 }
0x13d6   : > { %8217 = vst [vmem:[%s11512_s9 + $0x50] sm:$0xff] %v8185_v40  ;;  %v8092_v15 = vadd.f32 %v9203_v12, %v17048_v57 }
0x13d7   : > { %v9205_v1 = vpop.f32.mrf.mxu1 }
0x13d8   : > { %v8186_v43 = vadd.f32 %v8092_v15, %v18516_v22  ;;  %v9206_v8 = vadd.f32 %v9205_v1, %v9204_v32 }
0x13d9   : > { %v9207_v7 = vpop.f32.mrf.mxu1 }
0x13da   : > { %8218 = vst [vmem:[%s11512_s9 + $0x58] sm:$0xff] %v8186_v43  ;;  %v8097_v24 = vadd.f32 %v9206_v8, %v17048_v57 }
0x13db   : > { %v9208_v25 = vpop.f32.mrf.mxu1 }
0x13dc   : > { %v8187_v6 = vadd.f32 %v8097_v24, %v18517_v58  ;;  %v9209_v42 = vadd.f32 %v9208_v25, %v9207_v7 }
0x13dd   : > { %v9210_v46 = vpop.f32.mrf.mxu1 }
0x13de   : > { %8219 = vst [vmem:[%s11512_s9 + $0x60] sm:$0xff] %v8187_v6  ;;  %v8100_v63 = vadd.f32 %v9209_v42, %v17048_v57 }
0x13df   : > { %v9211_v41 = vpop.f32.mrf.mxu1 }
0x13e0   : > { %v8188_v14 = vadd.f32 %v8100_v63, %v18518_v21  ;;  %v9212_v9 = vadd.f32 %v9211_v41, %v9210_v46 }
0x13e1   : > { %v9213_v62 = vpop.f32.mrf.mxu1 }
0x13e2   : > { %8220 = vst [vmem:[%s11512_s9 + $0x68] sm:$0xff] %v8188_v14  ;;  %v8105_v36 = vadd.f32 %v9212_v9, %v17048_v57 }
0x13e3   : > { %v9214_v38 = vpop.f32.mrf.mxu1 }
0x13e4   : > { %v8189_v11 = vadd.f32 %v8105_v36, %v18520_v35  ;;  %v9215_v56 = vadd.f32 %v9214_v38, %v9213_v62 }
0x13e5   : > { %v9216_v3 = vpop.f32.mrf.mxu1 }
0x13e6   : > { %8221 = vst [vmem:[%s11512_s9 + $0x70] sm:$0xff] %v8189_v11  ;;  %v8108_v34 = vadd.f32 %v9215_v56, %v17048_v57 }
0x13e7   : > { %v9217_v60 = vpop.f32.mrf.mxu1 }
0x13e8   : > { %v8190_v45 = vadd.f32 %v8108_v34, %v18521_v2  ;;  %v9218_v54 = vadd.f32 %v9217_v60, %v9216_v3 }
0x13e9   : > { %v9219_v23 = vpop.f32.mrf.mxu1 }
0x13ea   : > { %8222 = vst [vmem:[%s11512_s9 + $0x78] sm:$0xff] %v8190_v45  ;;  %v8113_v27 = vadd.f32 %v9218_v54, %v17048_v57 }
0x13eb   : > { %v9220_v33 = vpop.f32.mrf.mxu1 }
0x13ec   : > { %v8191_v26 = vadd.f32 %v8113_v27, %v18522_v51  ;;  %v9221_v48 = vadd.f32 %v9220_v33, %v9219_v23 }
0x13ed   : > { %v9222_v44 = vpop.f32.mrf.mxu1 }
0x13ee   : > { %11091 = shalt.err (!%p11088_p12)
}
0x13ef   : > { %s11092_s27 = scalar_lea.hbm %s17105_s5, 16384  ;;  %s11096_s21 = scalar_lea.hbm %s18523_s26, 32768 }
0x13f0   : > { %p11093_p3 = scmp.ne.s32.totalorder %s17105_s5, %s11092_s27  ;;  %p11097_p9 = scmp.lt.s32.totalorder %s17105_s5, %s18523_s26 }
0x13f1   : > { %p11098_p1 = scmp.lt.s32.totalorder %s11096_s21, %s11092_s27 }
0x13f2   : > { %p11094_p5 = pnand %p11093_p3, %p11454_p11 }
0x13f3   : > { %p11099_p6 = por %p11098_p1, %p11097_p9 }
0x13f4   : > { %p11095_p13 = pneg %p11094_p5 }
0x13f6   : > { %p11100_p2 = pnand %p11099_p6, %p11095_p13 }
0x13f8   : > { %11103 = shalt.err (!%p11100_p2)
}
0x13f9   : > { %s11238_s3 = smov 128   ;;  %s11239_s12 = smov 8   ;;  %8223 = vst [vmem:[%s11512_s9 + $0x80] sm:$0xff] %v8191_v26  ;;  %v8116_v20 = vadd.f32 %v9221_v48, %v17048_v57  ;;  %v9223_v52 = vpop.f32.mrf.mxu1  ;;  %v18524_v30 = vld [vmem:[#allocation195_spill] sm:$0xff]  ;;  %v18525_v17 = vld [vmem:[#allocation173_spill] sm:$0xff]  ;;  %v18526_v53 = vld [vmem:[#allocation198_spill] sm:$0xff] }
0x13fa   : > { %9867 = dma.vmem_to_hbm [thread:$0]  (%p11454_p11), %s17107_s25, 16384, %s17105_s5, %s8245_s11, %s11238_s3, %s11238_s3, %s11239_s12   ;;  %v9224_v28 = vadd.f32 %v9223_v52, %v9222_v44  ;;  %v18527_v47 = vld [vmem:[#allocation175_spill] sm:$0xff]  ;;  %v18528_v40 = vld [vmem:[#allocation178_spill] sm:$0xff]  ;;  %v18530_v46 = vld [vmem:[#allocation180_spill] sm:$0xff] }
0x13fb   : > { %v8192_v61 = vadd.f32 %v8116_v20, %v18524_v30  ;;  %v9225_v37 = vpop.f32.mrf.mxu1  ;;  %v18529_v7 = vld [vmem:[#allocation199_spill] sm:$0xff]  ;;  %v18532_v3 = vld [vmem:[#allocation201_spill] sm:$0xff]  ;;  %v18533_v23 = vld [vmem:[#allocation156_spill] sm:$0xff]  ;;  %s8781_s25 = sshll.u32 %s18519_s16, 12  ;;  %s8259_s5 = sshll.u32 %s11512_s9, 4  ;;  %s17187_s5 = int_to_ptr.vmem [resolvable:$true] %s8259_s5 }
0x13fc   : > { %v8121_v39 = vadd.f32 %v9224_v28, %v17048_v57  ;;  %v18531_v62 = vld [vmem:[#allocation183_spill] sm:$0xff]  ;;  %v18534_v44 = vld [vmem:[#allocation152_spill] sm:$0xff]  ;;  %s18539_s4 = sld [smem:[#allocation257_spill]]  ;;  %s8240_s27 = scalar_lea.sflag [#allocation4], %s11489_s24 }
0x13fd   : > { %8224 = vst [vmem:[%s11512_s9 + $0x88] sm:$0xff] %v8192_v61  ;;  %v9226_v49 = vpop.f32.mrf.mxu1  ;;  %s11104_s7 = scalar_lea.vmem %s17187_s5, 4096  ;;  %s11240_s16 = smov [#allocation14]  }
0x13fe   : > { %v8193_v59 = vadd.f32 %v8121_v39, %v18525_v17  ;;  %v9227_v5 = vadd.f32 %v9226_v49, %v9225_v37  ;;  %v18535_v37 = vld [vmem:[#allocation176_spill] sm:$0xff]  ;;  %p11105_p4 = scmp.ne.s32.totalorder %s17187_s5, %s11104_s7  ;;  %s11108_s10 = sshll.u32 %s11240_s16, 4  ;;  %s11109_s10 = int_to_ptr.vmem [resolvable:$false] %s11108_s10 }
0x13ff   : > { %s11110_s21 = scalar_lea.vmem %s11109_s10, 8192  ;;  %p11111_p10 = scmp.lt.s32.totalorder %s17187_s5, %s11109_s10 }
0x1400   : > { %8225 = vst [vmem:[%s11512_s9 + $0x90] sm:$0xff] %v8193_v59  ;;  %v8124_v18 = vadd.f32 %v9227_v5, %v17048_v57  ;;  %p11106_p7 = pnand %p11105_p4, %p11454_p11  ;;  %p11112_p12 = scmp.lt.s32.totalorder %s11110_s21, %s11104_s7 }
0x1402   : > { %v8194_v16 = vadd.f32 %v8124_v18, %v18526_v53  ;;  %v18536_v18 = vld [vmem:[#allocation181_spill] sm:$0xff]  ;;  %s17185_s22 = scalar_lea.hbm %s18539_s4, %s8781_s25  ;;  %p11107_p8 = pneg %p11106_p7 }
0x1403   : > { %p11113_p3 = por %p11112_p12, %p11111_p10 }
0x1404   : > { %8226 = vst [vmem:[%s11512_s9 + $0x98] sm:$0xff] %v8194_v16 }
0x1405   : > { %p11114_p5 = pnand %p11113_p3, %p11107_p8 }
0x142d   : > { %v9228_v31 = vpop.f32.mrf.mxu1 }
0x142f   : > { %v9229_v10 = vpop.f32.mrf.mxu1 }
0x1430   : > { %v9230_v29 = vadd.f32 %v9229_v10, %v9228_v31 }
0x1431   : > { %v9231_v55 = vpop.f32.mrf.mxu1 }
0x1432   : > { %v8129_v13 = vadd.f32 %v9230_v29, %v17048_v57 }
0x1433   : > { %v9232_v4 = vpop.f32.mrf.mxu1 }
0x1434   : > { %v8195_v50 = vadd.f32 %v8129_v13, %v18527_v47  ;;  %v9233_v19 = vadd.f32 %v9232_v4, %v9231_v55  ;;  %v18537_v55 = vld [vmem:[#allocation197_spill] sm:$0xff] }
0x1436   : > { %8227 = vst [vmem:[%s11512_s9 + $0xa0] sm:$0xff] %v8195_v50  ;;  %v8132_v0 = vadd.f32 %v9233_v19, %v17048_v57  ;;  %v18538_v50 = vld [vmem:[#allocation200_spill] sm:$0xff] }
0x1437   : > { %v9234_v32 = vpop.f32.mrf.mxu1 }
0x1438   : > { %v8196_v12 = vadd.f32 %v8132_v0, %v18528_v40 }
0x1439   : > { %v9235_v15 = vpop.f32.mrf.mxu1 }
0x143a   : > { %8228 = vst [vmem:[%s11512_s9 + $0xa8] sm:$0xff] %v8196_v12  ;;  %v9236_v1 = vadd.f32 %v9235_v15, %v9234_v32 }
0x143b   : > { %v9237_v22 = vpop.f32.mrf.mxu1 }
0x143c   : > { %v8137_v43 = vadd.f32 %v9236_v1, %v17048_v57 }
0x143d   : > { %v9238_v8 = vpop.f32.mrf.mxu1 }
0x143e   : > { %v8197_v24 = vadd.f32 %v8137_v43, %v18529_v7  ;;  %v9239_v25 = vadd.f32 %v9238_v8, %v9237_v22 }
0x143f   : > { %v9240_v58 = vpop.f32.mrf.mxu1 }
0x1440   : > { %8229 = vst [vmem:[%s11512_s9 + $0xb0] sm:$0xff] %v8197_v24  ;;  %v8140_v6 = vadd.f32 %v9239_v25, %v17048_v57 }
0x1441   : > { %v9241_v42 = vpop.f32.mrf.mxu1 }
0x1442   : > { %v8198_v63 = vadd.f32 %v8140_v6, %v18530_v46  ;;  %v9242_v41 = vadd.f32 %v9241_v42, %v9240_v58 }
0x1443   : > { %v9243_v21 = vpop.f32.mrf.mxu1 }
0x1444   : > { %8230 = vst [vmem:[%s11512_s9 + $0xb8] sm:$0xff] %v8198_v63  ;;  %v8145_v14 = vadd.f32 %v9242_v41, %v17048_v57 }
0x1445   : > { %v9244_v9 = vpop.f32.mrf.mxu1 }
0x1446   : > { %v8199_v36 = vadd.f32 %v8145_v14, %v18531_v62  ;;  %v9245_v38 = vadd.f32 %v9244_v9, %v9243_v21 }
0x1447   : > { %v9246_v35 = vpop.f32.mrf.mxu1 }
0x1448   : > { %8231 = vst [vmem:[%s11512_s9 + $0xc0] sm:$0xff] %v8199_v36  ;;  %v8148_v11 = vadd.f32 %v9245_v38, %v17048_v57 }
0x1449   : > { %v9247_v56 = vpop.f32.mrf.mxu1 }
0x144a   : > { %v8200_v34 = vadd.f32 %v8148_v11, %v18532_v3  ;;  %v9248_v60 = vadd.f32 %v9247_v56, %v9246_v35 }
0x144b   : > { %v9249_v2 = vpop.f32.mrf.mxu1 }
0x144c   : > { %8232 = vst [vmem:[%s11512_s9 + $0xc8] sm:$0xff] %v8200_v34  ;;  %v8153_v45 = vadd.f32 %v9248_v60, %v17048_v57 }
0x144d   : > { %v9250_v54 = vpop.f32.mrf.mxu1 }
0x144e   : > { %v8201_v27 = vadd.f32 %v8153_v45, %v18533_v23  ;;  %v9251_v33 = vadd.f32 %v9250_v54, %v9249_v2 }
0x144f   : > { %v9252_v51 = vpop.f32.mrf.mxu1 }
0x1450   : > { %8233 = vst [vmem:[%s11512_s9 + $0xd0] sm:$0xff] %v8201_v27  ;;  %v8156_v26 = vadd.f32 %v9251_v33, %v17048_v57 }
0x1451   : > { %v9253_v48 = vpop.f32.mrf.mxu1 }
0x1452   : > { %v8202_v20 = vadd.f32 %v8156_v26, %v18534_v44  ;;  %v9254_v52 = vadd.f32 %v9253_v48, %v9252_v51 }
0x1453   : > { %v9255_v30 = vpop.f32.mrf.mxu1 }
0x1454   : > { %8234 = vst [vmem:[%s11512_s9 + $0xd8] sm:$0xff] %v8202_v20  ;;  %v8161_v61 = vadd.f32 %v9254_v52, %v17048_v57 }
0x1455   : > { %v9256_v28 = vpop.f32.mrf.mxu1 }
0x1456   : > { %v8203_v39 = vadd.f32 %v8161_v61, %v18535_v37  ;;  %v9257_v49 = vadd.f32 %v9256_v28, %v9255_v30 }
0x1457   : > { %v9258_v17 = vpop.f32.mrf.mxu1 }
0x1458   : > { %8235 = vst [vmem:[%s11512_s9 + $0xe0] sm:$0xff] %v8203_v39  ;;  %v8164_v59 = vadd.f32 %v9257_v49, %v17048_v57 }
0x1459   : > { %v9259_v5 = vpop.f32.mrf.mxu1 }
0x145a   : > { %v8204_v53 = vadd.f32 %v8164_v59, %v18536_v18  ;;  %v9260_v16 = vadd.f32 %v9259_v5, %v9258_v17 }
0x145b   : > { %v9261_v31 = vpop.f32.mrf.mxu1 }
0x145c   : > { %8236 = vst [vmem:[%s11512_s9 + $0xe8] sm:$0xff] %v8204_v53  ;;  %v8169_v10 = vadd.f32 %v9260_v16, %v17048_v57 }
0x145d   : > { %v9262_v29 = vpop.f32.mrf.mxu1 }
0x145e   : > { %v8205_v13 = vadd.f32 %v8169_v10, %v18537_v55  ;;  %v9263_v4 = vadd.f32 %v9262_v29, %v9261_v31 }
0x1460   : > { %8237 = vst [vmem:[%s11512_s9 + $0xf0] sm:$0xff] %v8205_v13  ;;  %v8172_v47 = vadd.f32 %v9263_v4, %v17048_v57 }
0x1462   : > { %v8206_v19 = vadd.f32 %v8172_v47, %v18538_v50 }
0x1464   : > { %8238 = vst [vmem:[%s11512_s9 + $0xf8] sm:$0xff] %v8206_v19 }
0x1465   : > { %11117 = shalt.err (!%p11114_p5)
}
0x1466   : > { %s11118_s9 = scalar_lea.hbm %s17185_s22, 4096  ;;  %s11122_s1 = scalar_lea.hbm %s18539_s4, 8192 }
0x1467   : > { %p11119_p13 = scmp.ne.s32.totalorder %s17185_s22, %s11118_s9  ;;  %p11123_p6 = scmp.lt.s32.totalorder %s17185_s22, %s18539_s4 }
0x1468   : > { %p11124_p2 = scmp.lt.s32.totalorder %s11122_s1, %s11118_s9 }
0x1469   : > { %p11120_p9 = pnand %p11119_p13, %p11454_p11 }
0x146a   : > { %p11125_p4 = por %p11124_p2, %p11123_p6 }
0x146b   : > { %p11121_p1 = pneg %p11120_p9 }
0x146d   : > { %p11126_p7 = pnand %p11125_p4, %p11121_p1 }
0x146f   : > { %11129 = shalt.err (!%p11126_p7)
}
0x1470   : > { %9866 = dma.vmem_to_hbm [thread:$0]  (%p11454_p11), %s17187_s5, 4096, %s17185_s22, %s8240_s27, %s11238_s3, %s11238_s3, %s11239_s12  }
0x1471 PF: > { %p9913_p8 = scmp.ge.s32.totalorder %s11216_s20, 2  ;;  %s8291_s23 = sand.u32 1, %s11188_s29  }
0x1472   : > { %s8292_s7 = scalar_lea.sflag [#allocation4], %s8291_s23 }
0x1473   : > { %p9894_p10 = pnand %p9913_p8, %p11461_p0 }
0x1475   : > { %p9895_p12 = pneg %p9894_p10 }
0x1477   : > { %11179 = dma.done.wait (%p9895_p12), %s8292_s7, 4096  }
0x1478   : > { %11181 = vsyncadd (%p9895_p12), %s8292_s7, 4294963200  ;;  %s8301_s16 = scalar_lea.sflag [#allocation16], %s8291_s23 }
0x1479   : > { %11183 = dma.done.wait (%p9895_p12), %s8301_s16, 16384  }
0x147a   : > { %11185 = vsyncadd (%p9895_p12), %s8301_s16, 4294950912  ;;  %s37_s20 = sadd.s32 1, %s11216_s20   ;;  %s18540_s13 = sld [smem:[#allocation24_spill]] }
0x147b   : > { %p34_p3 = scmp.ge.s32.totalorder %s37_s20, 6   ;;  %s18541_s29 = smov %s11192_s30 }
0x147c   : > { %s18542_s30 = smov %s11196_s15  ;;  %s18543_s15 = smov %s11468_s28 }
0x147d   : > { %s18544_s16 = smov %s11208_s18  ;;  %s18545_s17 = smov %s11212_s19 }
0x147e   : > { %s18546_s18 = smov %s18549_s8  ;;  %36 = sbr.rel (!%p34_p3) target bundleno = 25 (0x19), region = 193 }
0x1480   : > { %s18547_s19 = smov %s18540_s13 }
0x1483   :  { %8306 = vsyncpa [#allocation3], 1 }
0x1484   :  { %8308 = vsyncpa [#allocation3 + $0x1], 1 }
0x1485   :  { %8309 = vsyncpa [#allocation6], 1 }
0x1486   :  { %8310 = vsyncpa [#allocation9], 1 }
0x1487   :  { %8311 = vsyncpa [#allocation12], 1 }
0x1488   :  { %8312 = vsyncpa [#allocation4], 1 }
0x1489   :  { %8314 = vsyncpa [#allocation4 + $0x1], 1 }
0x148a   :  { %8315 = vsyncpa [#allocation16], 1 }
0x148b   :  { %8317 = vsyncpa [#allocation16 + $0x1], 1 }

</bundles_post_ra>
